<compile_context>
chip_gen: v7x
topology: tpu7x:2x2x1
jax: 0.10.0
libtpu: 0.0.40
codegen_flags: <defaults>
</compile_context>

<pallas_src>
import functools

import jax
import jax.numpy as jnp
from jax.experimental import pallas as pl
from jax.experimental.pallas import tpu as pltpu

DIM = 512


def _round_up(n, m):
    return (n + m - 1) // m * m


def _mlp_kernel(xt_ref, w1_ref, b1_ref, w2_ref, b2_ref, w3_ref, b3_ref,
                w4_ref, b4_ref, o_ref):
    """One batch tile.  Activations are (features, TB): batch lives on lanes."""
    xt = xt_ref[...]                                    # (2, TB)  f32
    w1 = w1_ref[...]                                    # (DIM, 2) f32

    # Layer 1: K=2 -> two VPU broadcast FMAs instead of a wasted MXU push.
    # Kept in f32 (v5e VPU/EUP have no bf16).
    h = w1[:, 0:1] * xt[0:1, :] + w1[:, 1:2] * xt[1:2, :] + b1_ref[...]
    h = jnp.maximum(h, 0.0)                             # (DIM, TB) f32

    # Layers 2/3: 512x512 MXU matmuls with bf16 operands, f32 accumulation.
    # Weights arrive pre-cast to bf16; activations are cast at the dot input
    # only, so bias adds / ReLU stay in f32.
    h = jnp.dot(w2_ref[...], h.astype(jnp.bfloat16),
                preferred_element_type=jnp.float32) + b2_ref[...]
    h = jnp.maximum(h, 0.0)
    h = jnp.dot(w3_ref[...], h.astype(jnp.bfloat16),
                preferred_element_type=jnp.float32) + b3_ref[...]
    h = jnp.maximum(h, 0.0)

    # Layer 4: skinny (1, DIM) @ (DIM, TB) -> (1, TB): already lane-dense.
    o = jnp.dot(w4_ref[...], h.astype(jnp.bfloat16),
                preferred_element_type=jnp.float32) + b4_ref[...]
    o_ref[...] = o.reshape(o_ref.shape).astype(o_ref.dtype)     # (1, 1, TB)


@functools.partial(jax.jit, static_argnames=("tile_b", "single_buffer_weights"))
def discriminator_forward(x, params, *, tile_b=1024, single_buffer_weights=True):
    """x: (B, 2) float32; params in PyTorch layout (W: (out,in), b: (out,)).

    Returns (B,) float32, matching Discriminator(x).view(-1) up to bf16 matmul
    rounding (MXU operands are bf16 with f32 accumulation).
    """
    B = x.shape[0]
    assert tile_b % 128 == 0, "tile_b must be a multiple of the 128-lane width"

    # Tile selection:
    #  * batches that pad to a single 128-wide tile -> one grid step;
    #  * anything larger -> at least two grid steps (so the "parallel" batch
    #    axis can shard across both TensorCores on v7x), each tile capped at
    #    tile_b and rounded to a 128-lane multiple.
    b128 = _round_up(B, 128)
    if b128 >= 2 * 128:
        tb = min(tile_b, _round_up(b128 // 2, 128))
    else:
        tb = min(tile_b, b128)
    B_pad = _round_up(B, tb)
    num_tiles = B_pad // tb

    # Feature-major input so the batch dim maps to lanes; zero-pad the batch
    # (padded columns give finite bias-only outputs and are sliced off below).
    x_t = jnp.pad(x.T, ((0, 0), (0, B_pad - B)))        # (2, B_pad) f32

    # Layer-1 stays f32 (VPU path); matmul weights are cast to bf16 once here.
    w1, b1 = params["w1"], params["b1"].reshape(DIM, 1)
    w2, b2 = params["w2"].astype(jnp.bfloat16), params["b2"].reshape(DIM, 1)
    w3, b3 = params["w3"].astype(jnp.bfloat16), params["b3"].reshape(DIM, 1)
    w4, b4 = params["w4"].astype(jnp.bfloat16), params["b4"].reshape(1, 1)

    # Constant index_map => fetched once, VMEM-resident for all grid steps.
    # Single-buffer them (no re-fetch ever happens) to free VMEM headroom.
    def resident(a):
        nd = a.ndim
        if single_buffer_weights:
            return pl.BlockSpec(a.shape, lambda i: (0,) * nd,
                                pipeline_mode=pl.Buffered(buffer_count=1))
        return pl.BlockSpec(a.shape, lambda i: (0,) * nd)

    flops = 2 * B_pad * (2 * DIM + DIM * DIM + DIM * DIM + DIM)
    bytes_accessed = (
        4 * int(x_t.size)
        + sum(int(p.size) * p.dtype.itemsize
              for p in (w1, b1, w2, b2, w3, b3, w4, b4))
        + 4 * B_pad)

    out = pl.pallas_call(
        _mlp_kernel,
        out_shape=jax.ShapeDtypeStruct((num_tiles, 1, tb), jnp.float32),
        grid_spec=pltpu.PrefetchScalarGridSpec(
            num_scalar_prefetch=0,
            grid=(num_tiles,),
            in_specs=[
                pl.BlockSpec((2, tb), lambda i: (0, i)),     # x^T batch tile
                resident(w1), resident(b1),
                resident(w2), resident(b2),
                resident(w3), resident(b3),
                resident(w4), resident(b4),
            ],
            out_specs=pl.BlockSpec((1, 1, tb), lambda i: (i, 0, 0)),
        ),
        compiler_params=pltpu.CompilerParams(
            dimension_semantics=("parallel",),
            vmem_limit_bytes=32 * 1024 * 1024),
        cost_estimate=pl.CostEstimate(
            flops=flops, transcendentals=0, bytes_accessed=bytes_accessed),
    )(x_t, w1, b1, w2, b2, w3, b3, w4, b4)

    return out.reshape(-1)[:B]           # == output.view(-1)


def init_params(key):
    """PyTorch-layout params: W (out_features, in_features), b (out_features,)."""
    ks = jax.random.split(key, 8)

    def lin(kw, kb, fan_in, fan_out):
        bound = float(fan_in) ** -0.5    # PyTorch default Linear init bound
        w = jax.random.uniform(kw, (fan_out, fan_in), jnp.float32, -bound, bound)
        b = jax.random.uniform(kb, (fan_out,), jnp.float32, -bound, bound)
        return w, b

    w1, b1 = lin(ks[0], ks[1], 2, DIM)
    w2, b2 = lin(ks[2], ks[3], DIM, DIM)
    w3, b3 = lin(ks[4], ks[5], DIM, DIM)
    w4, b4 = lin(ks[6], ks[7], DIM, 1)
    return dict(w1=w1, b1=b1, w2=w2, b2=b2, w3=w3, b3=b3, w4=w4, b4=b4)


def _reference(x, p):
    """Pure-JAX f32 reference matching nn.Linear semantics (x @ W.T + b)."""
    h = jnp.maximum(x @ p["w1"].T + p["b1"], 0.0)
    h = jnp.maximum(h @ p["w2"].T + p["b2"], 0.0)
    h = jnp.maximum(h @ p["w3"].T + p["b3"], 0.0)
    return (h @ p["w4"].T + p["b4"]).reshape(-1)


if __name__ == "__main__":
    key = jax.random.PRNGKey(0)
    k_x, k_p = jax.random.split(key)

    # Small, deliberately non-tile-aligned batch: exercises padding + 2-step grid.
    B = 300
    x = jax.random.normal(k_x, (B, 2), jnp.float32)
    params = init_params(k_p)

    try:
        out = jax.block_until_ready(discriminator_forward(x, params))
    except Exception:
        # Fallback if this JAX build rejects single-buffered resident specs.
        out = jax.block_until_ready(
            discriminator_forward(x, params, single_buffer_weights=False))

    ref = _reference(x, params)
    assert out.shape == (B,)
    # bf16 MXU operands over K=512 -> loosened tolerance vs the f32 reference.
    assert jnp.allclose(out, ref, atol=5e-2, rtol=5e-2), "mismatch vs reference"

    print("KERNEL_OK")
</pallas_src>

<mosaic_0001>
module attributes {stable_mosaic.version = 11 : i64} {
  func.func @_mlp_kernel(%arg0: i32, %arg1: memref<2x256xf32, #tpu.memory_space<vmem>>, %arg2: memref<512x2xf32, #tpu.memory_space<vmem>>, %arg3: memref<512x1xf32, #tpu.memory_space<vmem>>, %arg4: memref<512x512xbf16, #tpu.memory_space<vmem>>, %arg5: memref<512x1xf32, #tpu.memory_space<vmem>>, %arg6: memref<512x512xbf16, #tpu.memory_space<vmem>>, %arg7: memref<512x1xf32, #tpu.memory_space<vmem>>, %arg8: memref<1x512xbf16, #tpu.memory_space<vmem>>, %arg9: memref<1x1xf32, #tpu.memory_space<vmem>>, %arg10: memref<1x1x256xf32, #tpu.memory_space<vmem>>) attributes {dimension_semantics = [#tpu.dimension_semantics<parallel>], iteration_bounds = array<i64: 2>, scalar_prefetch = 0 : i64, scratch_operands = 0 : i64, tpu.core_type = #tpu.core_type<tc>, window_params = [{transform_indices = @transform_0, window_bounds = array<i64: 2, 256>}, {pipeline_mode = #tpu.pipeline_mode<synchronous>, transform_indices = @transform_1, window_bounds = array<i64: 512, 2>}, {pipeline_mode = #tpu.pipeline_mode<synchronous>, transform_indices = @transform_2, window_bounds = array<i64: 512, 1>}, {pipeline_mode = #tpu.pipeline_mode<synchronous>, transform_indices = @transform_3, window_bounds = array<i64: 512, 512>}, {pipeline_mode = #tpu.pipeline_mode<synchronous>, transform_indices = @transform_4, window_bounds = array<i64: 512, 1>}, {pipeline_mode = #tpu.pipeline_mode<synchronous>, transform_indices = @transform_5, window_bounds = array<i64: 512, 512>}, {pipeline_mode = #tpu.pipeline_mode<synchronous>, transform_indices = @transform_6, window_bounds = array<i64: 512, 1>}, {pipeline_mode = #tpu.pipeline_mode<synchronous>, transform_indices = @transform_7, window_bounds = array<i64: 1, 512>}, {pipeline_mode = #tpu.pipeline_mode<synchronous>, transform_indices = @transform_8, window_bounds = array<i64: 1, 1>}, {transform_indices = @transform_9, window_bounds = array<i64: 1, 1, 256>}]} {
    %c0 = arith.constant 0 : index
    %c0_0 = arith.constant 0 : index
    %0 = vector.load %arg1[%c0, %c0_0] : memref<2x256xf32, #tpu.memory_space<vmem>>, vector<2x256xf32>
    %c0_1 = arith.constant 0 : index
    %c0_2 = arith.constant 0 : index
    %1 = vector.load %arg2[%c0_1, %c0_2] : memref<512x2xf32, #tpu.memory_space<vmem>>, vector<512x2xf32>
    %2 = vector.extract_strided_slice %1 {offsets = [0, 0], sizes = [512, 1], strides = [1, 1]} : vector<512x2xf32> to vector<512x1xf32>
    %3 = vector.extract_strided_slice %0 {offsets = [0, 0], sizes = [1, 256], strides = [1, 1]} : vector<2x256xf32> to vector<1x256xf32>
    %4 = vector.broadcast %2 : vector<512x1xf32> to vector<512x256xf32>
    %5 = vector.broadcast %3 : vector<1x256xf32> to vector<512x256xf32>
    %6 = arith.mulf %4, %5 : vector<512x256xf32>
    %7 = vector.extract_strided_slice %1 {offsets = [0, 1], sizes = [512, 1], strides = [1, 1]} : vector<512x2xf32> to vector<512x1xf32>
    %8 = vector.extract_strided_slice %0 {offsets = [1, 0], sizes = [1, 256], strides = [1, 1]} : vector<2x256xf32> to vector<1x256xf32>
    %9 = vector.broadcast %7 : vector<512x1xf32> to vector<512x256xf32>
    %10 = vector.broadcast %8 : vector<1x256xf32> to vector<512x256xf32>
    %11 = arith.mulf %9, %10 : vector<512x256xf32>
    %12 = arith.addf %6, %11 : vector<512x256xf32>
    %c0_3 = arith.constant 0 : index
    %c0_4 = arith.constant 0 : index
    %13 = vector.load %arg3[%c0_3, %c0_4] : memref<512x1xf32, #tpu.memory_space<vmem>>, vector<512x1xf32>
    %14 = vector.broadcast %13 : vector<512x1xf32> to vector<512x256xf32>
    %15 = arith.addf %12, %14 : vector<512x256xf32>
    %cst = arith.constant 0.000000e+00 : f32
    %16 = vector.broadcast %cst : f32 to vector<512x256xf32>
    %17 = arith.maximumf %15, %16 : vector<512x256xf32>
    %c0_5 = arith.constant 0 : index
    %c0_6 = arith.constant 0 : index
    %18 = vector.load %arg4[%c0_5, %c0_6] : memref<512x512xbf16, #tpu.memory_space<vmem>>, vector<512x512xbf16>
    %19 = arith.truncf %17 : vector<512x256xf32> to vector<512x256xbf16>
    %cst_7 = arith.constant dense<0.000000e+00> : vector<512x256xf32>
    %20 = tpu.matmul %18, %19, %cst_7 {dimension_numbers = #tpu.dot_dimension_numbers<[1], [0], [0], [1], [0, 0, 1, 1], [], []>} : vector<512x512xbf16>, vector<512x256xbf16>, vector<512x256xf32> -> vector<512x256xf32>
    %c0_8 = arith.constant 0 : index
    %c0_9 = arith.constant 0 : index
    %21 = vector.load %arg5[%c0_8, %c0_9] : memref<512x1xf32, #tpu.memory_space<vmem>>, vector<512x1xf32>
    %22 = vector.broadcast %21 : vector<512x1xf32> to vector<512x256xf32>
    %23 = arith.addf %20, %22 : vector<512x256xf32>
    %cst_10 = arith.constant 0.000000e+00 : f32
    %24 = vector.broadcast %cst_10 : f32 to vector<512x256xf32>
    %25 = arith.maximumf %23, %24 : vector<512x256xf32>
    %c0_11 = arith.constant 0 : index
    %c0_12 = arith.constant 0 : index
    %26 = vector.load %arg6[%c0_11, %c0_12] : memref<512x512xbf16, #tpu.memory_space<vmem>>, vector<512x512xbf16>
    %27 = arith.truncf %25 : vector<512x256xf32> to vector<512x256xbf16>
    %cst_13 = arith.constant dense<0.000000e+00> : vector<512x256xf32>
    %28 = tpu.matmul %26, %27, %cst_13 {dimension_numbers = #tpu.dot_dimension_numbers<[1], [0], [0], [1], [0, 0, 1, 1], [], []>} : vector<512x512xbf16>, vector<512x256xbf16>, vector<512x256xf32> -> vector<512x256xf32>
    %c0_14 = arith.constant 0 : index
    %c0_15 = arith.constant 0 : index
    %29 = vector.load %arg7[%c0_14, %c0_15] : memref<512x1xf32, #tpu.memory_space<vmem>>, vector<512x1xf32>
    %30 = vector.broadcast %29 : vector<512x1xf32> to vector<512x256xf32>
    %31 = arith.addf %28, %30 : vector<512x256xf32>
    %cst_16 = arith.constant 0.000000e+00 : f32
    %32 = vector.broadcast %cst_16 : f32 to vector<512x256xf32>
    %33 = arith.maximumf %31, %32 : vector<512x256xf32>
    %c0_17 = arith.constant 0 : index
    %c0_18 = arith.constant 0 : index
    %34 = vector.load %arg8[%c0_17, %c0_18] : memref<1x512xbf16, #tpu.memory_space<vmem>>, vector<1x512xbf16>
    %35 = arith.truncf %33 : vector<512x256xf32> to vector<512x256xbf16>
    %cst_19 = arith.constant dense<0.000000e+00> : vector<1x256xf32>
    %36 = tpu.matmul %34, %35, %cst_19 {dimension_numbers = #tpu.dot_dimension_numbers<[1], [0], [0], [1], [0, 0, 1, 1], [], []>} : vector<1x512xbf16>, vector<512x256xbf16>, vector<1x256xf32> -> vector<1x256xf32>
    %c0_20 = arith.constant 0 : index
    %c0_21 = arith.constant 0 : index
    %37 = vector.load %arg9[%c0_20, %c0_21] : memref<1x1xf32, #tpu.memory_space<vmem>>, vector<1x1xf32>
    %38 = vector.broadcast %37 : vector<1x1xf32> to vector<1x256xf32>
    %39 = arith.addf %36, %38 : vector<1x256xf32>
    %40 = vector.shape_cast %39 : vector<1x256xf32> to vector<1x1x256xf32>
    %c0_22 = arith.constant 0 : index
    %c0_23 = arith.constant 0 : index
    %c0_24 = arith.constant 0 : index
    %41 = vector.load %arg10[%c0_22, %c0_23, %c0_24] : memref<1x1x256xf32, #tpu.memory_space<vmem>>, vector<1x1x256xf32>
    tpu.vector_store %arg10[%c0_22, %c0_23, %c0_24], %40 {strides = array<i32>} : memref<1x1x256xf32, #tpu.memory_space<vmem>>, vector<1x1x256xf32>,
    return
  }
  func.func @transform_0(%arg0: i32) -> (i32, i32) {
    %c0_i32 = arith.constant 0 : i32
    %c0_i32_0 = arith.constant 0 : i32
    return %c0_i32, %arg0 : i32, i32
  }
  func.func @transform_1(%arg0: i32) -> (i32, i32) {
    %c0_i32 = arith.constant 0 : i32
    %c0_i32_0 = arith.constant 0 : i32
    %c0_i32_1 = arith.constant 0 : i32
    return %c0_i32, %c0_i32_0 : i32, i32
  }
  func.func @transform_2(%arg0: i32) -> (i32, i32) {
    %c0_i32 = arith.constant 0 : i32
    %c0_i32_0 = arith.constant 0 : i32
    %c0_i32_1 = arith.constant 0 : i32
    return %c0_i32, %c0_i32_0 : i32, i32
  }
  func.func @transform_3(%arg0: i32) -> (i32, i32) {
    %c0_i32 = arith.constant 0 : i32
    %c0_i32_0 = arith.constant 0 : i32
    %c0_i32_1 = arith.constant 0 : i32
    return %c0_i32, %c0_i32_0 : i32, i32
  }
  func.func @transform_4(%arg0: i32) -> (i32, i32) {
    %c0_i32 = arith.constant 0 : i32
    %c0_i32_0 = arith.constant 0 : i32
    %c0_i32_1 = arith.constant 0 : i32
    return %c0_i32, %c0_i32_0 : i32, i32
  }
  func.func @transform_5(%arg0: i32) -> (i32, i32) {
    %c0_i32 = arith.constant 0 : i32
    %c0_i32_0 = arith.constant 0 : i32
    %c0_i32_1 = arith.constant 0 : i32
    return %c0_i32, %c0_i32_0 : i32, i32
  }
  func.func @transform_6(%arg0: i32) -> (i32, i32) {
    %c0_i32 = arith.constant 0 : i32
    %c0_i32_0 = arith.constant 0 : i32
    %c0_i32_1 = arith.constant 0 : i32
    return %c0_i32, %c0_i32_0 : i32, i32
  }
  func.func @transform_7(%arg0: i32) -> (i32, i32) {
    %c0_i32 = arith.constant 0 : i32
    %c0_i32_0 = arith.constant 0 : i32
    %c0_i32_1 = arith.constant 0 : i32
    return %c0_i32, %c0_i32_0 : i32, i32
  }
  func.func @transform_8(%arg0: i32) -> (i32, i32) {
    %c0_i32 = arith.constant 0 : i32
    %c0_i32_0 = arith.constant 0 : i32
    %c0_i32_1 = arith.constant 0 : i32
    return %c0_i32, %c0_i32_0 : i32, i32
  }
  func.func @transform_9(%arg0: i32) -> (i32, i32, i32) {
    %c0_i32 = arith.constant 0 : i32
    %c0_i32_0 = arith.constant 0 : i32
    %c0_i32_1 = arith.constant 0 : i32
    return %arg0, %c0_i32, %c0_i32_0 : i32, i32, i32
  }
}

module attributes {stable_mosaic.version = 11 : i64} {
  func.func @_mlp_kernel(%arg0: i32, %arg1: memref<2x256xf32, #tpu.memory_space<vmem>>, %arg2: memref<512x2xf32, #tpu.memory_space<vmem>>, %arg3: memref<512x1xf32, #tpu.memory_space<vmem>>, %arg4: memref<512x512xbf16, #tpu.memory_space<vmem>>, %arg5: memref<512x1xf32, #tpu.memory_space<vmem>>, %arg6: memref<512x512xbf16, #tpu.memory_space<vmem>>, %arg7: memref<512x1xf32, #tpu.memory_space<vmem>>, %arg8: memref<1x512xbf16, #tpu.memory_space<vmem>>, %arg9: memref<1x1xf32, #tpu.memory_space<vmem>>, %arg10: memref<1x1x256xf32, #tpu.memory_space<vmem>>) attributes {dimension_semantics = [#tpu.dimension_semantics<parallel>], iteration_bounds = array<i64: 2>, scalar_prefetch = 0 : i64, scratch_operands = 0 : i64, tpu.core_type = #tpu.core_type<tc>, window_params = [{transform_indices = @transform_0, window_bounds = array<i64: 2, 256>}, {pipeline_mode = #tpu.pipeline_mode<synchronous>, transform_indices = @transform_1, window_bounds = array<i64: 512, 2>}, {pipeline_mode = #tpu.pipeline_mode<synchronous>, transform_indices = @transform_2, window_bounds = array<i64: 512, 1>}, {pipeline_mode = #tpu.pipeline_mode<synchronous>, transform_indices = @transform_3, window_bounds = array<i64: 512, 512>}, {pipeline_mode = #tpu.pipeline_mode<synchronous>, transform_indices = @transform_4, window_bounds = array<i64: 512, 1>}, {pipeline_mode = #tpu.pipeline_mode<synchronous>, transform_indices = @transform_5, window_bounds = array<i64: 512, 512>}, {pipeline_mode = #tpu.pipeline_mode<synchronous>, transform_indices = @transform_6, window_bounds = array<i64: 512, 1>}, {pipeline_mode = #tpu.pipeline_mode<synchronous>, transform_indices = @transform_7, window_bounds = array<i64: 1, 512>}, {pipeline_mode = #tpu.pipeline_mode<synchronous>, transform_indices = @transform_8, window_bounds = array<i64: 1, 1>}, {transform_indices = @transform_9, window_bounds = array<i64: 1, 1, 256>}]} {
    %c0 = arith.constant 0 : index
    %c0_0 = arith.constant 0 : index
    %0 = vector.load %arg1[%c0, %c0_0] : memref<2x256xf32, #tpu.memory_space<vmem>>, vector<2x256xf32>
    %c0_1 = arith.constant 0 : index
    %c0_2 = arith.constant 0 : index
    %1 = vector.load %arg2[%c0_1, %c0_2] : memref<512x2xf32, #tpu.memory_space<vmem>>, vector<512x2xf32>
    %2 = vector.extract_strided_slice %1 {offsets = [0, 0], sizes = [512, 1], strides = [1, 1]} : vector<512x2xf32> to vector<512x1xf32>
    %3 = vector.extract_strided_slice %0 {offsets = [0, 0], sizes = [1, 256], strides = [1, 1]} : vector<2x256xf32> to vector<1x256xf32>
    %4 = vector.broadcast %2 : vector<512x1xf32> to vector<512x256xf32>
    %5 = vector.broadcast %3 : vector<1x256xf32> to vector<512x256xf32>
    %6 = arith.mulf %4, %5 : vector<512x256xf32>
    %7 = vector.extract_strided_slice %1 {offsets = [0, 1], sizes = [512, 1], strides = [1, 1]} : vector<512x2xf32> to vector<512x1xf32>
    %8 = vector.extract_strided_slice %0 {offsets = [1, 0], sizes = [1, 256], strides = [1, 1]} : vector<2x256xf32> to vector<1x256xf32>
    %9 = vector.broadcast %7 : vector<512x1xf32> to vector<512x256xf32>
    %10 = vector.broadcast %8 : vector<1x256xf32> to vector<512x256xf32>
    %11 = arith.mulf %9, %10 : vector<512x256xf32>
    %12 = arith.addf %6, %11 : vector<512x256xf32>
    %c0_3 = arith.constant 0 : index
    %c0_4 = arith.constant 0 : index
    %13 = vector.load %arg3[%c0_3, %c0_4] : memref<512x1xf32, #tpu.memory_space<vmem>>, vector<512x1xf32>
    %14 = vector.broadcast %13 : vector<512x1xf32> to vector<512x256xf32>
    %15 = arith.addf %12, %14 : vector<512x256xf32>
    %cst = arith.constant 0.000000e+00 : f32
    %16 = vector.broadcast %cst : f32 to vector<512x256xf32>
    %17 = arith.maximumf %15, %16 : vector<512x256xf32>
    %c0_5 = arith.constant 0 : index
    %c0_6 = arith.constant 0 : index
    %18 = vector.load %arg4[%c0_5, %c0_6] : memref<512x512xbf16, #tpu.memory_space<vmem>>, vector<512x512xbf16>
    %19 = arith.truncf %17 : vector<512x256xf32> to vector<512x256xbf16>
    %cst_7 = arith.constant dense<0.000000e+00> : vector<512x256xf32>
    %20 = tpu.matmul %18, %19, %cst_7 {dimension_numbers = #tpu.dot_dimension_numbers<[1], [0], [0], [1], [0, 0, 1, 1], [], []>} : vector<512x512xbf16>, vector<512x256xbf16>, vector<512x256xf32> -> vector<512x256xf32>
    %c0_8 = arith.constant 0 : index
    %c0_9 = arith.constant 0 : index
    %21 = vector.load %arg5[%c0_8, %c0_9] : memref<512x1xf32, #tpu.memory_space<vmem>>, vector<512x1xf32>
    %22 = vector.broadcast %21 : vector<512x1xf32> to vector<512x256xf32>
    %23 = arith.addf %20, %22 : vector<512x256xf32>
    %cst_10 = arith.constant 0.000000e+00 : f32
    %24 = vector.broadcast %cst_10 : f32 to vector<512x256xf32>
    %25 = arith.maximumf %23, %24 : vector<512x256xf32>
    %c0_11 = arith.constant 0 : index
    %c0_12 = arith.constant 0 : index
    %26 = vector.load %arg6[%c0_11, %c0_12] : memref<512x512xbf16, #tpu.memory_space<vmem>>, vector<512x512xbf16>
    %27 = arith.truncf %25 : vector<512x256xf32> to vector<512x256xbf16>
    %cst_13 = arith.constant dense<0.000000e+00> : vector<512x256xf32>
    %28 = tpu.matmul %26, %27, %cst_13 {dimension_numbers = #tpu.dot_dimension_numbers<[1], [0], [0], [1], [0, 0, 1, 1], [], []>} : vector<512x512xbf16>, vector<512x256xbf16>, vector<512x256xf32> -> vector<512x256xf32>
    %c0_14 = arith.constant 0 : index
    %c0_15 = arith.constant 0 : index
    %29 = vector.load %arg7[%c0_14, %c0_15] : memref<512x1xf32, #tpu.memory_space<vmem>>, vector<512x1xf32>
    %30 = vector.broadcast %29 : vector<512x1xf32> to vector<512x256xf32>
    %31 = arith.addf %28, %30 : vector<512x256xf32>
    %cst_16 = arith.constant 0.000000e+00 : f32
    %32 = vector.broadcast %cst_16 : f32 to vector<512x256xf32>
    %33 = arith.maximumf %31, %32 : vector<512x256xf32>
    %c0_17 = arith.constant 0 : index
    %c0_18 = arith.constant 0 : index
    %34 = vector.load %arg8[%c0_17, %c0_18] : memref<1x512xbf16, #tpu.memory_space<vmem>>, vector<1x512xbf16>
    %35 = arith.truncf %33 : vector<512x256xf32> to vector<512x256xbf16>
    %cst_19 = arith.constant dense<0.000000e+00> : vector<1x256xf32>
    %36 = tpu.matmul %34, %35, %cst_19 {dimension_numbers = #tpu.dot_dimension_numbers<[1], [0], [0], [1], [0, 0, 1, 1], [], []>} : vector<1x512xbf16>, vector<512x256xbf16>, vector<1x256xf32> -> vector<1x256xf32>
    %c0_20 = arith.constant 0 : index
    %c0_21 = arith.constant 0 : index
    %37 = vector.load %arg9[%c0_20, %c0_21] : memref<1x1xf32, #tpu.memory_space<vmem>>, vector<1x1xf32>
    %38 = vector.broadcast %37 : vector<1x1xf32> to vector<1x256xf32>
    %39 = arith.addf %36, %38 : vector<1x256xf32>
    %40 = vector.shape_cast %39 : vector<1x256xf32> to vector<1x1x256xf32>
    %c0_22 = arith.constant 0 : index
    %c0_23 = arith.constant 0 : index
    %c0_24 = arith.constant 0 : index
    %41 = vector.load %arg10[%c0_22, %c0_23, %c0_24] : memref<1x1x256xf32, #tpu.memory_space<vmem>>, vector<1x1x256xf32>
    tpu.vector_store %arg10[%c0_22, %c0_23, %c0_24], %40 {strides = array<i32>} : memref<1x1x256xf32, #tpu.memory_space<vmem>>, vector<1x1x256xf32>,
    return
  }
  func.func @transform_0(%arg0: i32) -> (i32, i32) {
    %c0_i32 = arith.constant 0 : i32
    %c0_i32_0 = arith.constant 0 : i32
    return %c0_i32, %arg0 : i32, i32
  }
  func.func @transform_1(%arg0: i32) -> (i32, i32) {
    %c0_i32 = arith.constant 0 : i32
    %c0_i32_0 = arith.constant 0 : i32
    %c0_i32_1 = arith.constant 0 : i32
    return %c0_i32, %c0_i32_0 : i32, i32
  }
  func.func @transform_2(%arg0: i32) -> (i32, i32) {
    %c0_i32 = arith.constant 0 : i32
    %c0_i32_0 = arith.constant 0 : i32
    %c0_i32_1 = arith.constant 0 : i32
    return %c0_i32, %c0_i32_0 : i32, i32
  }
  func.func @transform_3(%arg0: i32) -> (i32, i32) {
    %c0_i32 = arith.constant 0 : i32
    %c0_i32_0 = arith.constant 0 : i32
    %c0_i32_1 = arith.constant 0 : i32
    return %c0_i32, %c0_i32_0 : i32, i32
  }
  func.func @transform_4(%arg0: i32) -> (i32, i32) {
    %c0_i32 = arith.constant 0 : i32
    %c0_i32_0 = arith.constant 0 : i32
    %c0_i32_1 = arith.constant 0 : i32
    return %c0_i32, %c0_i32_0 : i32, i32
  }
  func.func @transform_5(%arg0: i32) -> (i32, i32) {
    %c0_i32 = arith.constant 0 : i32
    %c0_i32_0 = arith.constant 0 : i32
    %c0_i32_1 = arith.constant 0 : i32
    return %c0_i32, %c0_i32_0 : i32, i32
  }
  func.func @transform_6(%arg0: i32) -> (i32, i32) {
    %c0_i32 = arith.constant 0 : i32
    %c0_i32_0 = arith.constant 0 : i32
    %c0_i32_1 = arith.constant 0 : i32
    return %c0_i32, %c0_i32_0 : i32, i32
  }
  func.func @transform_7(%arg0: i32) -> (i32, i32) {
    %c0_i32 = arith.constant 0 : i32
    %c0_i32_0 = arith.constant 0 : i32
    %c0_i32_1 = arith.constant 0 : i32
    return %c0_i32, %c0_i32_0 : i32, i32
  }
  func.func @transform_8(%arg0: i32) -> (i32, i32) {
    %c0_i32 = arith.constant 0 : i32
    %c0_i32_0 = arith.constant 0 : i32
    %c0_i32_1 = arith.constant 0 : i32
    return %c0_i32, %c0_i32_0 : i32, i32
  }
  func.func @transform_9(%arg0: i32) -> (i32, i32, i32) {
    %c0_i32 = arith.constant 0 : i32
    %c0_i32_0 = arith.constant 0 : i32
    %c0_i32_1 = arith.constant 0 : i32
    return %arg0, %c0_i32, %c0_i32_0 : i32, i32, i32
  }
}

</mosaic_0001>

<bundles_post_ra>
// kernel: discriminator_forward.1
= control target key start
LH: loop header
LB: loop body
LE: loop exit
PB: predicated region body
PF: predicated region fallthrough
CT: control target
= control target key end

     0   :  { %s10671_s0 = inlined_call_operand.vmem [shape: f32[2,512], index: 0, kind: input, shape index: {}]   ;;  %s10672_s1 = inlined_call_operand.vmem [shape: f32[512,2], index: 1, kind: input, shape index: {}]   ;;  %s10673_s2 = inlined_call_operand.vmem [shape: f32[512,1], index: 2, kind: input, shape index: {}]   ;;  %s10674_s3 = inlined_call_operand.vmem [shape: bf16[512,512], index: 3, kind: input, shape index: {}]   ;;  %s10675_s4 = inlined_call_operand.vmem [shape: f32[512,1], index: 4, kind: input, shape index: {}]   ;;  %s10676_s5 = inlined_call_operand.vmem [shape: bf16[512,512], index: 5, kind: input, shape index: {}]   ;;  %s10677_s6 = inlined_call_operand.vmem [shape: f32[512,1], index: 6, kind: input, shape index: {}]   ;;  %s10678_s7 = inlined_call_operand.vmem [shape: bf16[1,512], index: 7, kind: input, shape index: {}]   ;;  %s10679_s8 = inlined_call_operand.<no memory space> [shape: f32[1,1], index: 8, kind: input, shape index: {}]   ;;  %s10680_s9 = inlined_call_operand.hbm [shape: f32[2,1,256], index: 9, kind: output, shape index: {}]  }
   0x1   :  { %v14_v0 = vstv %s10679_s8 }
   0x2   :  { %15 = vst [vmem:[#allocation2] sm:$0x1] %v14_v0 }
   0x3   :  { %16 = vsyncpa [#allocation4], 0 }
   0x4   :  { %18 = vsyncpa [#allocation4 + $0x1], 0  ;;  %s7837_s11 = smov 0   ;;  %s7839_s12 = smov 0  }
   0x5   :  { %s7841_s13 = smov 0   ;;  %s7843_s14 = smov 0  }
   0x6 LB: > { %s7858_s8 = sadd.s32 4294967295, %s7778_s14   ;;  %s6420_s15 = sadd.s32 4294967294, %s7778_s14   ;;  %s7778_s14 = sphi %s7843_s14, %s10709_s14   ;;  %s7774_s13 = sphi %s7841_s13, %s10708_s13   ;;  %s7770_s12 = sphi %s7839_s12, %s10707_s12   ;;  %s7766_s11 = sphi %s7837_s11, %s10706_s11  }
   0x7   : > { %s7862_s16 = sadd.s32 1, %s7778_s14   ;;  %s225_s17 = sadd.s32 1, %s7774_s13 }
   0x8   : > { %s222_s18 = ssub.s32 %s7778_s14, %s7862_s16  ;;  %p235_p0 = scmp.ne.s32.totalorder %s7774_s13, %s7770_s12 }
   0x9   : > { %p223_p1 = scmp.eq.s32.totalorder %s222_s18, 0  ;;  %p236_p2 = scmp.eq.s32.totalorder %s7858_s8, 1 }
   0xa   : > { %p241_p3 = scmp.ne.s32.totalorder %s7770_s12, %s7766_s11  ;;  %p242_p4 = scmp.eq.s32.totalorder %s6420_s15, 1 }
   0xb   : > { %s7873_s19 = scalar_select %p223_p1, %s7774_s13, %s225_s17  }
   0xc   : > { %p7875_p5 = por %p236_p2, %p235_p0  ;;  %p7879_p6 = por %p242_p4, %p241_p3 }
   0xd   : > { %p6423_p7 = scmp.ge.s32.totalorder %s7778_s14, 1  ;;  %p293_p8 = scmp.lt.s32.totalorder %s7778_s14, 3 }
   0xf   : > { %p294_p9 = pnand %p6423_p7, %p293_p8 }
  0x11   : > { %297 = sbr.rel (%p294_p9) target bundleno = 2036 (0x7f4), region = 56 }
  0x18   : > { %v7888_v1 = vld [vmem:[%s10672_s1 + $0x10] sm:$0xff]  ;;  %v7893_v2 = vld [vmem:[%s10672_s1] sm:$0xff]  ;;  %v10682_v3 = vmov 1   ;;  %v337_v5 = vld [vmem:[%s10672_s1 + $0x8] sm:$0xff]  ;;  %v10685_v8 = vmov 0   ;;  %s6425_s18 = sshll.u32 %s7858_s8, 1 }
  0x19   : > { %7250 = vset.pattern.permute.xlu0 %v10682_v3  ;;  %7248 = vset.pattern.permute.xlu1 %v10682_v3  ;;  %v340_v4 = vld [vmem:[%s10672_s1 + $0x20] sm:$0xff]  ;;  %v342_v6 = vld [vmem:[%s10672_s1 + $0x30] sm:$0xff]  ;;  %v339_v7 = vld [vmem:[%s10672_s1 + $0x18] sm:$0xff]  ;;  %p330_p10 = scmp.lt.s32.totalorder %s6425_s18, 3  ;;  %s326_s15 = sand.u32 1, %s7770_s12  }
  0x1a   : > { %876 = vperm.xlu0 %7250, %v7888_v1   ;;  %868 = vperm.xlu1 %7248, %v7893_v2   ;;  %v344_v9 = vld [vmem:[%s10672_s1 + $0x40] sm:$0xff]  ;;  %v346_v10 = vld [vmem:[%s10672_s1 + $0x50] sm:$0xff]  ;;  %v341_v14 = vld [vmem:[%s10672_s1 + $0x28] sm:$0xff]  ;;  %s6424_s17 = sshll.u32 %s326_s15, 1  ;;  %s6689_s22 = sshll.u32 %s7858_s8, 5 }
  0x1b   : > { %v1397_v11 = vld [vmem:[%s10673_s2] sm:$0xff]  ;;  %v7932_v13 = vld [vmem:[%s10672_s1 + $0x70] sm:$0xff]  ;;  %v343_v21 = vld [vmem:[%s10672_s1 + $0x38] sm:$0xff]  ;;  %s10711_s18 = smov (!%p330_p10, %s6425_s18), 3  ;;  %s10629_s26 = scalar_lea.hbm %s10680_s9, %s6689_s22 }
  0x1c   : > { %v7925_v12 = vld [vmem:[%s10672_s1 + $0x60] sm:$0xff]  ;;  %v7947_v16 = vld [vmem:[%s10672_s1 + $0x90] sm:$0xff]  ;;  %v345_v26 = vld [vmem:[%s10672_s1 + $0x48] sm:$0xff]  ;;  %s6426_s30 = sshll.u32 %s10711_s18, 1  ;;  %s6347_s8 = scalar_lea.sflag [#allocation4], %s326_s15 }
  0x1d   : > { %v7941_v15 = vld [vmem:[%s10672_s1 + $0x80] sm:$0xff]  ;;  %v1399_v18 = vld [vmem:[%s10673_s2 + $0x10] sm:$0xff]  ;;  %v1398_v27 = vld [vmem:[%s10673_s2 + $0x8] sm:$0xff]  ;;  %s333_s23 = scalar_lea.vmem %s10671_s0, %s6426_s30  ;;  %s7783_s28 = smov [#allocation3]  }
  0x1e   : > { %884 = vperm.xlu0 %7250, %v340_v4   ;;  %872 = vperm.xlu1 %7248, %v337_v5   ;;  %v7954_v17 = vld [vmem:[%s10672_s1 + $0xa0] sm:$0xff]  ;;  %v7964_v19 = vld [vmem:[%s10672_s1 + $0xb0] sm:$0xff]  ;;  %v1400_v29 = vld [vmem:[%s10673_s2 + $0x18] sm:$0xff]  ;;  %s7720_s29 = sshll.u32 %s7783_s28, 4  ;;  %s7721_s29 = int_to_ptr.vmem [resolvable:$false] %s7720_s29 }
  0x1f   : > { %v7970_v20 = vld [vmem:[%s10672_s1 + $0xc0] sm:$0xff]  ;;  %v362_v22 = vld [vmem:[%s10672_s1 + $0xd0] sm:$0xff]  ;;  %v1402_v30 = vld [vmem:[%s10673_s2 + $0x28] sm:$0xff]  ;;  %s7722_s30 = scalar_lea.vmem %s7721_s29, 64 }
  0x20   : > { %v364_v23 = vld [vmem:[%s10672_s1 + $0xe0] sm:$0xff]  ;;  %v366_v25 = vld [vmem:[%s10672_s1 + $0xf0] sm:$0xff]  ;;  %v347_v31 = vld [vmem:[%s10672_s1 + $0x58] sm:$0xff] }
  0x21   : > { %v1401_v24 = vld [vmem:[%s10673_s2 + $0x20] sm:$0xff]  ;;  %v1403_v28 = vld [vmem:[%s10673_s2 + $0x30] sm:$0xff]  ;;  %v1404_v32 = vld [vmem:[%s10673_s2 + $0x38] sm:$0xff] }
  0x22   : > { %892 = vperm.xlu0 %7250, %v342_v6   ;;  %7249 = vset.pattern.permute.xlu1 %v10685_v8  ;;  %v1406_v33 = vld [vmem:[%s10673_s2 + $0x48] sm:$0xff]  ;;  %v1405_v34 = vld [vmem:[%s10673_s2 + $0x40] sm:$0xff]  ;;  %v1408_v35 = vld [vmem:[%s10673_s2 + $0x58] sm:$0xff] }
  0x23   : > { %417 = vperm.xlu1 %7249, %v339_v7   ;;  %v1410_v36 = vld [vmem:[%s10673_s2 + $0x68] sm:$0xff]  ;;  %v1412_v38 = vld [vmem:[%s10673_s2 + $0x78] sm:$0xff]  ;;  %v1407_v41 = vld [vmem:[%s10673_s2 + $0x50] sm:$0xff] }
  0x24   : > { %v349_v37 = vld [vmem:[%s10672_s1 + $0x68] sm:$0xff]  ;;  %v1416_v40 = vld [vmem:[%s10673_s2 + $0x98] sm:$0xff]  ;;  %v1409_v47 = vld [vmem:[%s10673_s2 + $0x60] sm:$0xff] }
  0x25   : > { %v1414_v39 = vld [vmem:[%s10673_s2 + $0x88] sm:$0xff]  ;;  %v1420_v43 = vld [vmem:[%s10673_s2 + $0xb8] sm:$0xff]  ;;  %v8084_v53 = vld [vmem:[%s10672_s1 + $0x100] sm:$0xff] }
  0x26   : > { %900 = vperm.xlu0 %7250, %v344_v9   ;;  %v1418_v42 = vld [vmem:[%s10673_s2 + $0xa8] sm:$0xff]  ;;  %v351_v44 = vld [vmem:[%s10672_s1 + $0x78] sm:$0xff]  ;;  %v8096_v56 = vld [vmem:[%s10672_s1 + $0x120] sm:$0xff] }
  0x27   : > { %7251 = vset.pattern.permute.xlu1 %v10682_v3  ;;  %v1422_v45 = vld [vmem:[%s10673_s2 + $0xc8] sm:$0xff]  ;;  %v1424_v46 = vld [vmem:[%s10673_s2 + $0xd8] sm:$0xff]  ;;  %v374_v59 = vld [vmem:[%s10672_s1 + $0x130] sm:$0xff] }
  0x28   : > { %880 = vperm.xlu1 %7251, %v339_v7   ;;  %v1426_v48 = vld [vmem:[%s10673_s2 + $0xe8] sm:$0xff]  ;;  %v1411_v61 = vld [vmem:[%s10673_s2 + $0x70] sm:$0xff]  ;;  %v376_v63 = vld [vmem:[%s10672_s1 + $0x140] sm:$0xff] }
  0x29   : > { %v353_v54 = vld [vmem:[%s10672_s1 + $0x88] sm:$0xff]  ;;  %v380_v7 = vld [vmem:[%s10672_s1 + $0x160] sm:$0xff] }
  0x2a   : > { %908 = vperm.xlu0 %7250, %v346_v10  }
  0x2c   : > { %7252 = vset.pattern.permute.xlu1 %v10685_v8 }
  0x2d   : > { %1463 = vperm.xlu1 %7252, %v1397_v11   ;;  %v382_v11 = vld [vmem:[%s10672_s1 + $0x170] sm:$0xff] }
  0x2e   : > { %916 = vperm.xlu0 %7250, %v7925_v12  }
  0x31   : > { %422 = vperm.xlu1 %7252, %v340_v4  }
  0x32   : > { %924 = vperm.xlu0 %7250, %v7932_v13  }
  0x35   : > { %427 = vperm.xlu1 %7252, %v341_v14  }
  0x36   : > { %932 = vperm.xlu0 %7250, %v7941_v15  }
  0x39   : > { %7253 = vset.pattern.permute.xlu1 %v10682_v3 }
  0x3a   : > { %940 = vperm.xlu0 %7250, %v7947_v16   ;;  %888 = vperm.xlu1 %7253, %v341_v14   ;;  %v384_v14 = vld [vmem:[%s10672_s1 + $0x180] sm:$0xff] }
  0x3e   : > { %948 = vperm.xlu0 %7250, %v7954_v17   ;;  %7254 = vset.pattern.permute.xlu1 %v10685_v8 }
  0x3f   : > { %1473 = vperm.xlu1 %7254, %v1399_v18   ;;  %v386_v18 = vld [vmem:[%s10672_s1 + $0x190] sm:$0xff] }
  0x42   : > { %956 = vperm.xlu0 %7250, %v7964_v19  }
  0x43   : > { %432 = vperm.xlu1 %7254, %v342_v6  }
  0x46   : > { %964 = vperm.xlu0 %7250, %v7970_v20  }
  0x47   : > { %437 = vperm.xlu1 %7254, %v343_v21  }
  0x4a   : > { %972 = vperm.xlu0 %7250, %v362_v22  }
  0x4b   : > { %7255 = vset.pattern.permute.xlu1 %v10682_v3 }
  0x4c   : > { %896 = vperm.xlu1 %7255, %v343_v21  }
  0x4e   : > { %980 = vperm.xlu0 %7250, %v364_v23   ;;  %v388_v23 = vld [vmem:[%s10672_s1 + $0x1a0] sm:$0xff] }
  0x50   : > { %7256 = vset.pattern.permute.xlu1 %v10685_v8 }
  0x51   : > { %1483 = vperm.xlu1 %7256, %v1401_v24  }
  0x52   : > { %988 = vperm.xlu0 %7250, %v366_v25   ;;  %v357_v25 = vld [vmem:[%s10672_s1 + $0xa8] sm:$0xff] }
  0x55   : > { %442 = vperm.xlu1 %7256, %v344_v9  }
  0x56   : > { %7279 = vset.pattern.permute.xlu0 %v10685_v8 }
  0x57   : > { %402 = vperm.xlu0 %7279, %v7893_v2   ;;  %v378_v2 = vld [vmem:[%s10672_s1 + $0x150] sm:$0xff] }
  0x59   : > { %447 = vperm.xlu1 %7256, %v345_v26  }
  0x5b   : > { %407 = vperm.xlu0 %7279, %v337_v5   ;;  %v355_v5 = vld [vmem:[%s10672_s1 + $0x98] sm:$0xff] }
  0x5d   : > { %7257 = vset.pattern.permute.xlu1 %v10682_v3 }
  0x5e   : > { %904 = vperm.xlu1 %7257, %v345_v26   ;;  %v10681_v26 = vlaneseq }
  0x5f   : > { %412 = vperm.xlu0 %7279, %v7888_v1  }
  0x62   : > { %7258 = vset.pattern.permute.xlu1 %v10685_v8 }
  0x63   : > { %1468 = vperm.xlu0 %7279, %v1398_v27   ;;  %1493 = vperm.xlu1 %7258, %v1403_v28  }
  0x67   : > { %1478 = vperm.xlu0 %7279, %v1400_v29   ;;  %452 = vperm.xlu1 %7258, %v346_v10   ;;  %v8182_v29 = vshrl.u32 %v10681_v26, 7 }
  0x69   : > { %10693 = vst [vmem:[#allocation6_spill] sm:$0xff] %v8182_v29 }
  0x6b   : > { %1488 = vperm.xlu0 %7279, %v1402_v30   ;;  %457 = vperm.xlu1 %7258, %v347_v31  }
  0x6f   : > { %1498 = vperm.xlu0 %7279, %v1404_v32   ;;  %7259 = vset.pattern.permute.xlu1 %v10682_v3 }
  0x70   : > { %912 = vperm.xlu1 %7259, %v347_v31   ;;  %v392_v31 = vld [vmem:[%s10672_s1 + $0x1c0] sm:$0xff] }
  0x73   : > { %1508 = vperm.xlu0 %7279, %v1406_v33   ;;  %v1415_v33 = vld [vmem:[%s10673_s2 + $0x90] sm:$0xff] }
  0x74   : > { %7260 = vset.pattern.permute.xlu1 %v10685_v8 }
  0x75   : > { %1503 = vperm.xlu1 %7260, %v1405_v34   ;;  %v1125_v34 = vsub.s32 1, %v8182_v29 }
  0x77   : > { %1518 = vperm.xlu0 %7279, %v1408_v35   ;;  %v1129_v35 = vsub.s32 3, %v8182_v29 }
  0x79   : > { %462 = vperm.xlu1 %7260, %v7925_v12  }
  0x7b   : > { %1528 = vperm.xlu0 %7279, %v1410_v36  }
  0x7d   : > { %467 = vperm.xlu1 %7260, %v349_v37  }
  0x7f   : > { %1538 = vperm.xlu0 %7279, %v1412_v38   ;;  %v335_v38 = vld [vmem:[%s333_s23] sm:$0xf]  ;;  %s328_s23 = scalar_lea.vmem [#allocation3], %s6424_s17 }
  0x80   : > { %s6361_s18 = sshll.u32 %s328_s23, 4  ;;  %s10631_s18 = int_to_ptr.vmem [resolvable:$true] %s6361_s18 }
  0x81   : > { %7261 = vset.pattern.permute.xlu1 %v10682_v3  ;;  %s7716_s27 = scalar_lea.vmem %s10631_s18, 32  ;;  %p7723_p0 = scmp.lt.s32.totalorder %s10631_s18, %s7721_s29 }
  0x82   : > { %920 = vperm.xlu1 %7261, %v349_v37   ;;  %v394_v37 = vld [vmem:[%s10672_s1 + $0x1d0] sm:$0xff]  ;;  %p7717_p11 = scmp.ne.s32.totalorder %s10631_s18, %s7716_s27  ;;  %p7724_p1 = scmp.lt.s32.totalorder %s7722_s30, %s7716_s27 }
  0x83   : > { %1548 = vperm.xlu0 %7279, %v1414_v39   ;;  %v8207_v39 = vsub.s32 0, %v8182_v29 }
  0x84   : > { %p7718_p12 = pnand %p7717_p11, %p7875_p5  ;;  %p7725_p2 = por %p7724_p1, %p7723_p0 }
  0x85   : > { %10695 = vst [vmem:[#allocation8_spill] sm:$0xff] %v8207_v39 }
  0x86   : > { %7262 = vset.pattern.permute.xlu1 %v10685_v8  ;;  %p7719_p13 = pneg %p7718_p12 }
  0x87   : > { %1558 = vperm.xlu0 %7279, %v1416_v40   ;;  %1513 = vperm.xlu1 %7262, %v1407_v41   ;;  %v727_v40 = vsub.s32 2, %v8182_v29 }
  0x88   : > { %p7726_p3 = pnand %p7725_p2, %p7719_p13 }
  0x8b   : > { %1568 = vperm.xlu0 %7279, %v1418_v42   ;;  %472 = vperm.xlu1 %7262, %v7932_v13   ;;  %v1126_v42 = vrot.slane %v335_v38, %v1125_v34 }
  0x8f   : > { %1578 = vperm.xlu0 %7279, %v1420_v43   ;;  %477 = vperm.xlu1 %7262, %v351_v44   ;;  %v1130_v43 = vrot.slane %v335_v38, %v1129_v35 }
  0x93   : > { %1588 = vperm.xlu0 %7279, %v1422_v45   ;;  %7263 = vset.pattern.permute.xlu1 %v10682_v3  ;;  %v396_v45 = vld [vmem:[%s10672_s1 + $0x1e0] sm:$0xff] }
  0x94   : > { %928 = vperm.xlu1 %7263, %v351_v44  }
  0x97   : > { %1598 = vperm.xlu0 %7279, %v1424_v46   ;;  %v724_v46 = vrot.slane %v335_v38, %v8207_v39 }
  0x98   : > { %7264 = vset.pattern.permute.xlu1 %v10685_v8 }
  0x99   : > { %1523 = vperm.xlu1 %7264, %v1409_v47   ;;  %v8072_v49 = vpop.permute.xlu1 %868  ;;  %v8074_v50 = vpop.permute.xlu0 %876  ;;  %v728_v47 = vrot.slane %v335_v38, %v727_v40 }
  0x9b   : > { %1608 = vperm.xlu0 %7279, %v1426_v48  }
  0x9d   : > { %482 = vperm.xlu1 %7264, %v7941_v15   ;;  %v8077_v51 = vpop.permute.xlu1 %872  ;;  %v8079_v52 = vpop.permute.xlu0 %884  ;;  %v1413_v15 = vld [vmem:[%s10673_s2 + $0x80] sm:$0xff] }
  0x9f   : > { %7282 = vset.pattern.permute.xlu0 %v10682_v3 }
  0xa0   : > { %996 = vperm.xlu0 %7282, %v8084_v53  }
  0xa1   : > { %487 = vperm.xlu1 %7264, %v353_v54   ;;  %v8091_v55 = vpop.permute.xlu0 %892 }
  0xa2   : > { %v8098_v57 = vpop.permute.xlu1 %417 }
  0xa4   : > { %1012 = vperm.xlu0 %7282, %v8096_v56  }
  0xa5   : > { %7265 = vset.pattern.permute.xlu1 %v10682_v3  ;;  %v8102_v58 = vpop.permute.xlu0 %900 }
  0xa6   : > { %936 = vperm.xlu1 %7265, %v353_v54   ;;  %v359_v54 = vld [vmem:[%s10672_s1 + $0xb8] sm:$0xff] }
  0xa7   : > { %v8107_v60 = vpop.permute.xlu1 %880 }
  0xa8   : > { %1020 = vperm.xlu0 %7282, %v374_v59   ;;  %v8224_v59 = vrot.slane %v1126_v42, %v1125_v34 }
  0xa9   : > { %v8112_v62 = vpop.permute.xlu0 %908 }
  0xaa   : > { %7266 = vset.pattern.permute.xlu1 %v10685_v8  ;;  %v8262_v35 = vmul.f32 %v8224_v59, %v8091_v55  ;;  %v8275_v38 = vmul.f32 %v8224_v59, %v8102_v58 }
  0xab   : > { %1533 = vperm.xlu1 %7266, %v1411_v61   ;;  %v8226_v61 = vrot.slane %v1130_v43, %v1125_v34 }
  0xac   : > { %1028 = vperm.xlu0 %7282, %v376_v63   ;;  %v8118_v0 = vpop.permute.xlu1 %1463  ;;  %v398_v63 = vld [vmem:[%s10672_s1 + $0x1f0] sm:$0xff] }
  0xad   : > { %v8120_v1 = vpop.permute.xlu0 %916  ;;  %v1150_v34 = vmul.f32 %v8226_v61, %v8079_v52  ;;  %v8284_v43 = vmul.f32 %v8226_v61, %v8102_v58 }
  0xaf   : > { %492 = vperm.xlu1 %7266, %v7947_v16  }
  0xb0   : > { %1036 = vperm.xlu0 %7282, %v378_v2   ;;  %v8126_v4 = vpop.permute.xlu1 %422 }
  0xb1   : > { %v8131_v6 = vpop.permute.xlu0 %924 }
  0xb3   : > { %497 = vperm.xlu1 %7266, %v355_v5  }
  0xb4   : > { %1044 = vperm.xlu0 %7282, %v380_v7   ;;  %v8136_v9 = vpop.permute.xlu1 %427 }
  0xb5   : > { %v8138_v10 = vpop.permute.xlu0 %932 }
  0xb7   : > { %7267 = vset.pattern.permute.xlu1 %v10682_v3 }
  0xb8   : > { %1052 = vperm.xlu0 %7282, %v382_v11   ;;  %944 = vperm.xlu1 %7267, %v355_v5   ;;  %v8235_v5 = vrot.slane %v728_v47, %v8207_v39  ;;  %v1141_v11 = vmul.f32 %v8224_v59, %v8072_v49  ;;  %v8291_v47 = vld [vmem:[%s10672_s1 + $0x118] sm:$0xff] }
  0xb9   : > { %v8144_v12 = vpop.permute.xlu1 %888  ;;  %v8146_v13 = vpop.permute.xlu0 %940 }
  0xbc   : > { %1060 = vperm.xlu0 %7282, %v384_v14   ;;  %7268 = vset.pattern.permute.xlu1 %v10685_v8  ;;  %v1142_v14 = vmul.f32 %v8226_v61, %v8072_v49  ;;  %v1149_v49 = vmul.f32 %v8224_v59, %v8079_v52  ;;  %v746_v52 = vmul.f32 %v8235_v5, %v8098_v57 }
  0xbd   : > { %1543 = vperm.xlu1 %7268, %v1413_v15   ;;  %v8156_v16 = vpop.permute.xlu0 %948  ;;  %v1145_v15 = vmul.f32 %v8224_v59, %v8074_v50 }
  0xbe   : > { %v8161_v21 = vpop.permute.xlu1 %1473 }
  0xc0   : > { %1068 = vperm.xlu0 %7282, %v386_v18   ;;  %v1146_v18 = vmul.f32 %v8226_v61, %v8074_v50  ;;  %v1147_v50 = vmul.f32 %v8224_v59, %v8107_v60 }
  0xc1   : > { %502 = vperm.xlu1 %7268, %v7954_v17   ;;  %v8164_v22 = vpop.permute.xlu0 %956  ;;  %v390_v17 = vld [vmem:[%s10672_s1 + $0x1b0] sm:$0xff] }
  0xc2   : > { %v8169_v24 = vpop.permute.xlu1 %432 }
  0xc4   : > { %1076 = vperm.xlu0 %7282, %v388_v23   ;;  %v1143_v23 = vmul.f32 %v8224_v59, %v8077_v51 }
  0xc5   : > { %507 = vperm.xlu1 %7268, %v357_v25   ;;  %v8174_v27 = vpop.permute.xlu0 %964 }
  0xc6   : > { %v8179_v28 = vpop.permute.xlu1 %437 }
  0xc8   : > { %1084 = vperm.xlu0 %7282, %v390_v17  }
  0xc9   : > { %7269 = vset.pattern.permute.xlu1 %v10682_v3  ;;  %v8185_v30 = vpop.permute.xlu0 %972 }
  0xca   : > { %952 = vperm.xlu1 %7269, %v357_v25  }
  0xcb   : > { %v8193_v32 = vpop.permute.xlu1 %896 }
  0xcc   : > { %1092 = vperm.xlu0 %7282, %v392_v31  }
  0xcd   : > { %v8200_v36 = vpop.permute.xlu0 %980 }
  0xce   : > { %10694 = vst [vmem:[#allocation7_spill] sm:$0xff] %v8200_v36  ;;  %7270 = vset.pattern.permute.xlu1 %v10685_v8 }
  0xcf   : > { %1553 = vperm.xlu1 %7270, %v1415_v33   ;;  %v1144_v33 = vmul.f32 %v8226_v61, %v8077_v51 }
  0xd0   : > { %1100 = vperm.xlu0 %7282, %v394_v37   ;;  %v8210_v41 = vpop.permute.xlu1 %1483  ;;  %v8266_v37 = vmul.f32 %v8226_v61, %v8091_v55 }
  0xd1   : > { %v8212_v44 = vpop.permute.xlu0 %988 }
  0xd2   : > { %10696 = vst [vmem:[#allocation9_spill] sm:$0xff] %v8212_v44 }
  0xd3   : > { %512 = vperm.xlu1 %7270, %v7964_v19   ;;  %v8232_v19 = vrot.slane %v724_v46, %v8207_v39  ;;  %v1429_v39 = vld [vmem:[%s10673_s2 + $0x100] sm:$0xff] }
  0xd4   : > { %1108 = vperm.xlu0 %7282, %v396_v45   ;;  %v8219_v48 = vpop.permute.xlu1 %442  ;;  %v1148_v45 = vmul.f32 %v8226_v61, %v8107_v60 }
  0xd5   : > { %v745_v51 = vmul.f32 %v8232_v19, %v8098_v57 }
  0xd6   : > { %v403_v2 = vpop.permute.xlu0 %402  ;;  %v1276_v44 = vadd.f32 %v1148_v45, %v746_v52 }
  0xd7   : > { %517 = vperm.xlu1 %7270, %v359_v54   ;;  %v739_v25 = vmul.f32 %v8232_v19, %v403_v2  ;;  %v740_v17 = vmul.f32 %v8235_v5, %v403_v2  ;;  %v1275_v60 = vadd.f32 %v1147_v50, %v745_v51 }
  0xd8   : > { %1116 = vperm.xlu0 %7282, %v398_v63   ;;  %v8237_v7 = vpop.permute.xlu1 %447  ;;  %v747_v63 = vmul.f32 %v8232_v19, %v8126_v4 }
  0xd9   : > { %v1269_v57 = vadd.f32 %v1141_v11, %v739_v25  ;;  %v748_v11 = vmul.f32 %v8235_v5, %v8126_v4  ;;  %v749_v25 = vmul.f32 %v8232_v19, %v8136_v9 }
  0xda   : > { %v408_v31 = vpop.permute.xlu0 %407  ;;  %v1277_v29 = vadd.f32 %v1149_v49, %v747_v63  ;;  %v753_v63 = vmul.f32 %v8232_v19, %v8179_v28 }
  0xdb   : > { %7271 = vset.pattern.permute.xlu1 %v10682_v3  ;;  %v741_v40 = vmul.f32 %v8232_v19, %v408_v31  ;;  %v742_v42 = vmul.f32 %v8235_v5, %v408_v31  ;;  %v1151_v31 = vmul.f32 %v8224_v59, %v8144_v12 }
  0xdc   : > { %7313 = vset.pattern.permute.xlu0 %v10685_v8  ;;  %960 = vperm.xlu1 %7271, %v359_v54   ;;  %v1270_v54 = vadd.f32 %v1142_v14, %v740_v17  ;;  %v1152_v14 = vmul.f32 %v8226_v61, %v8144_v12  ;;  %v750_v17 = vmul.f32 %v8235_v5, %v8136_v9 }
  0xdd   : > { %562 = vperm.xlu0 %7313, %v8084_v53   ;;  %v8280_v55 = vpop.permute.xlu1 %904  ;;  %v1417_v53 = vld [vmem:[%s10673_s2 + $0xa0] sm:$0xff]  ;;  %v1271_v50 = vadd.f32 %v1143_v23, %v741_v40  ;;  %v1272_v51 = vadd.f32 %v1144_v33, %v742_v42  ;;  %v751_v23 = vmul.f32 %v8232_v19, %v8169_v24  ;;  %v752_v40 = vmul.f32 %v8235_v5, %v8169_v24 }
  0xde   : > { %v413_v46 = vpop.permute.xlu0 %412  ;;  %v1782_v12 = vadd.f32 %v8118_v0, %v1270_v54  ;;  %v1280_v33 = vadd.f32 %v1152_v14, %v750_v17  ;;  %v1155_v42 = vmul.f32 %v8224_v59, %v8193_v32 }
  0xdf   : > { %v743_v58 = vmul.f32 %v8232_v19, %v413_v46  ;;  %v744_v2 = vmul.f32 %v8235_v5, %v413_v46 }
  0xe0   : > { %7272 = vset.pattern.permute.xlu1 %v10685_v8  ;;  %v1781_v8 = vadd.f32 %v8118_v0, %v1269_v57  ;;  %v1283_v14 = vadd.f32 %v1155_v42, %v753_v63 }
  0xe1   : > { %577 = vperm.xlu0 %7313, %v8291_v47   ;;  %1563 = vperm.xlu1 %7272, %v1417_v53   ;;  %v1273_v4 = vadd.f32 %v1145_v15, %v743_v58  ;;  %v1274_v46 = vadd.f32 %v1146_v18, %v744_v2  ;;  %v1278_v15 = vadd.f32 %v1150_v34, %v748_v11  ;;  %v1910_v34 = vmax.f32 %v1782_v12, 0.0 }
  0xe2   : > { %v1469_v26 = vpop.permute.xlu0 %1468  ;;  %v8312_v3 = vpop.permute.xlu1 %1493  ;;  %v1279_v18 = vadd.f32 %v1151_v31, %v749_v25  ;;  %v1909_v45 = vmax.f32 %v1781_v8, 0.0  ;;  %v754_v8 = vmul.f32 %v8235_v5, %v8179_v28  ;;  %v1281_v25 = vadd.f32 %v8262_v35, %v751_v23 }
  0xe3   : > { %v1783_v9 = vadd.f32 %v1469_v26, %v1271_v50  ;;  %v1784_v36 = vadd.f32 %v1469_v26, %v1272_v51  ;;  %v361_v26 = vld [vmem:[%s10672_s1 + $0xc8] sm:$0xff]  ;;  %v1786_v53 = vadd.f32 %v8161_v21, %v1274_v46  ;;  %v1785_v24 = vadd.f32 %v8161_v21, %v1273_v4 }
  0xe4   : > { %v1790_v58 = vadd.f32 %v8210_v41, %v1278_v15  ;;  %v756_v12 = vmul.f32 %v8235_v5, %v8219_v48  ;;  %v1793_v42 = vadd.f32 %v8312_v3, %v1281_v25 }
  0xe5   : > { %1623 = vperm.xlu0 %7313, %v1429_v39   ;;  %522 = vperm.xlu1 %7272, %v7970_v20   ;;  %v1912_v0 = vmax.f32 %v1784_v36, 0.0  ;;  %v1911_v49 = vmax.f32 %v1783_v9, 0.0  ;;  %v1156_v39 = vmul.f32 %v8226_v61, %v8193_v32  ;;  %v1789_v20 = vadd.f32 %v8210_v41, %v1277_v29  ;;  %v1432_v41 = vld [vmem:[%s10673_s2 + $0x118] sm:$0xff] }
  0xe6   : > { %v1479_v57 = vpop.permute.xlu0 %1478  ;;  %v8326_v52 = vpop.permute.xlu1 %452  ;;  %v1282_v29 = vadd.f32 %v8266_v37, %v752_v40  ;;  %v1913_v28 = vmax.f32 %v1785_v24, 0.0  ;;  %v755_v37 = vmul.f32 %v8232_v19, %v8219_v48  ;;  %v10697_v40 = vmov 1   ;;  %v1434_v48 = vld [vmem:[%s10673_s2 + $0x128] sm:$0xff] }
  0xe7   : > { %v1787_v36 = vadd.f32 %v1479_v57, %v1275_v60  ;;  %v1788_v54 = vadd.f32 %v1479_v57, %v1276_v44  ;;  %v2166_v2 = vpack.c.bf16 %v1912_v0, %v1910_v34  ;;  %v2165_v11 = vpack.c.bf16 %v1911_v49, %v1909_v45 }
  0xe8   : > { %v1914_v60 = vmax.f32 %v1786_v53, 0.0  ;;  %v1917_v17 = vmax.f32 %v1789_v20, 0.0  ;;  %v1284_v51 = vadd.f32 %v1156_v39, %v754_v8  ;;  %v1794_v9 = vadd.f32 %v8312_v3, %v1282_v29  ;;  %v1419_v3 = vld [vmem:[%s10673_s2 + $0xb0] sm:$0xff] }
  0xe9   : > { %v1915_v21 = vmax.f32 %v1787_v36, 0.0  ;;  %v1916_v31 = vmax.f32 %v1788_v54, 0.0  ;;  %582 = vperm.xlu0 %7313, %v8096_v56   ;;  %527 = vperm.xlu1 %7272, %v361_v26   ;;  %v1918_v56 = vmax.f32 %v1790_v58, 0.0  ;;  %v757_v24 = vmul.f32 %v8232_v19, %v8237_v7 }
  0xea   : > { %3253 = vmatprep.subr.bf16.mxu0 %v2166_v2  ;;  %v1489_v32 = vpop.permute.xlu0 %1488  ;;  %v8344_v44 = vpop.permute.xlu1 %457  ;;  %v1921_v36 = vmax.f32 %v1793_v42, 0.0  ;;  %v10698_v2 = vmov 0   ;;  %v1286_v8 = vadd.f32 %v8284_v43, %v756_v12  ;;  %v1440_v12 = vld [vmem:[%s10673_s2 + $0x158] sm:$0xff]  ;;  %v1161_v42 = vmul.f32 %v8224_v59, %v8112_v62 }
  0xeb   : > { %v1791_v35 = vadd.f32 %v1489_v32, %v1279_v18  ;;  %v1792_v50 = vadd.f32 %v1489_v32, %v1280_v33  ;;  %3254 = vmatpush1.bf16.msra.mxu0 %v2165_v11  ;;  %v2168_v4 = vpack.c.bf16 %v1916_v31, %v1914_v60  ;;  %v2167_v46 = vpack.c.bf16 %v1915_v21, %v1913_v28  ;;  %v1436_v11 = vld [vmem:[%s10673_s2 + $0x138] sm:$0xff]  ;;  %v1438_v28 = vld [vmem:[%s10673_s2 + $0x148] sm:$0xff] }
  0xec   : > { %v1159_v18 = vmul.f32 %v8224_v59, %v8280_v55  ;;  %v1160_v33 = vmul.f32 %v8226_v61, %v8280_v55  ;;  %v758_v55 = vmul.f32 %v8235_v5, %v8237_v7  ;;  %v1285_v7 = vadd.f32 %v8275_v38, %v755_v37  ;;  %v7700_v38 = vld [vmem:[%s10672_s1 + $0xd0] sm:$0xff] }
  0xed   : > { %v1919_v23 = vmax.f32 %v1791_v35, 0.0  ;;  %v1920_v15 = vmax.f32 %v1792_v50, 0.0  ;;  %1638 = vperm.xlu0 %7313, %v1432_v41   ;;  %7273 = vset.pattern.permute.xlu1 %v10697_v40 }
  0xee   : > { %3255 = vmatprep.subr.bf16.mxu0 %v2168_v4  ;;  %v1499_v0 = vpop.permute.xlu0 %1498  ;;  %968 = vperm.xlu1 %7273, %v361_v26   ;;  %v1922_v26 = vmax.f32 %v1794_v9, 0.0  ;;  %v1287_v63 = vadd.f32 %v1159_v18, %v757_v24  ;;  %v1288_v58 = vadd.f32 %v1160_v33, %v758_v55  ;;  %v1444_v24 = vld [vmem:[%s10673_s2 + $0x178] sm:$0xff] }
  0xef   : > { %v1795_v49 = vadd.f32 %v1499_v0, %v1283_v14  ;;  %v1796_v57 = vadd.f32 %v1499_v0, %v1284_v51  ;;  %3256 = vmatpush1.bf16.msra.mxu0 %v2167_v46  ;;  %v913_v34 = vpop.permute.xlu1 %912  ;;  %v2170_v45 = vpack.c.bf16 %v1920_v15, %v1918_v56  ;;  %v2169_v53 = vpack.c.bf16 %v1919_v23, %v1917_v17  ;;  %v363_v56 = vld [vmem:[%s10672_s1 + $0xd8] sm:$0xff]  ;;  %v1442_v15 = vld [vmem:[%s10673_s2 + $0x168] sm:$0xff] }
  0xf0   : > { %v1163_v18 = vmul.f32 %v8224_v59, %v913_v34  ;;  %v1164_v33 = vmul.f32 %v8226_v61, %v913_v34  ;;  %v759_v0 = vmul.f32 %v8232_v19, %v8326_v52  ;;  %v762_v34 = vmul.f32 %v8235_v5, %v8344_v44 }
  0xf1   : > { %v1923_v39 = vmax.f32 %v1795_v49, 0.0  ;;  %v1924_v20 = vmax.f32 %v1796_v57, 0.0  ;;  %1648 = vperm.xlu0 %7313, %v1434_v48   ;;  %3257 = vmatprep.subr.bf16.mxu0 %v2170_v45  ;;  %v1162_v48 = vmul.f32 %v8226_v61, %v8112_v62  ;;  %v760_v49 = vmul.f32 %v8235_v5, %v8326_v52  ;;  %v1421_v62 = vld [vmem:[%s10673_s2 + $0xc0] sm:$0xff] }
  0xf2   : > { %v1509_v54 = vpop.permute.xlu0 %1508  ;;  %7274 = vset.pattern.permute.xlu1 %v10698_v2  ;;  %v761_v57 = vmul.f32 %v8232_v19, %v8344_v44  ;;  %v1292_v52 = vadd.f32 %v1164_v33, %v762_v34 }
  0xf3   : > { %3258 = vmatpush1.bf16.msra.mxu0 %v2169_v53  ;;  %1573 = vperm.xlu1 %7274, %v1419_v3   ;;  %v2172_v25 = vpack.c.bf16 %v1924_v20, %v1922_v26  ;;  %v1799_v21 = vadd.f32 %v1509_v54, %v1287_v63  ;;  %v1800_v31 = vadd.f32 %v1509_v54, %v1288_v58  ;;  %v1446_v54 = vld [vmem:[%s10673_s2 + $0x188] sm:$0xff] }
  0xf4   : > { %v1504_v29 = vpop.permute.xlu1 %1503  ;;  %v2171_v32 = vpack.c.bf16 %v1923_v39, %v1921_v36  ;;  %v1291_v55 = vadd.f32 %v1163_v18, %v761_v57  ;;  %v1289_v3 = vadd.f32 %v1161_v42, %v759_v0  ;;  %v1290_v44 = vadd.f32 %v1162_v48, %v760_v49  ;;  %v1454_v49 = vld [vmem:[%s10673_s2 + $0x1c8] sm:$0xff] }
  0xf5   : > { %v1797_v41 = vadd.f32 %v1504_v29, %v1285_v7  ;;  %v1798_v60 = vadd.f32 %v1504_v29, %v1286_v8  ;;  %1658 = vperm.xlu0 %7313, %v1436_v11   ;;  %3259 = vmatprep.subr.bf16.mxu0 %v2172_v25  ;;  %v1927_v43 = vmax.f32 %v1799_v21, 0.0  ;;  %v1928_v50 = vmax.f32 %v1800_v31, 0.0  ;;  %v7701_v21 = vld [vmem:[%s10672_s1 + $0xe0] sm:$0xff] }
  0xf6   : > { %v1519_v14 = vpop.permute.xlu0 %1518 }
  0xf7   : > { %v1925_v17 = vmax.f32 %v1797_v41, 0.0  ;;  %v1926_v35 = vmax.f32 %v1798_v60, 0.0  ;;  %3260 = vmatpush1.bf16.msra.mxu0 %v2171_v32  ;;  %532 = vperm.xlu1 %7274, %v7700_v38   ;;  %v1803_v26 = vadd.f32 %v1519_v14, %v1291_v55  ;;  %v1804_v39 = vadd.f32 %v1519_v14, %v1292_v52  ;;  %v1448_v32 = vld [vmem:[%s10673_s2 + $0x198] sm:$0xff]  ;;  %v365_v41 = vld [vmem:[%s10672_s1 + $0xe8] sm:$0xff] }
  0xf8   : > { %v8382_v51 = vpop.permute.xlu1 %462 }
  0xf9   : > { %1668 = vperm.xlu0 %7313, %v1438_v28   ;;  %v2174_v37 = vpack.c.bf16 %v1928_v50, %v1926_v35  ;;  %v2173_v46 = vpack.c.bf16 %v1927_v43, %v1925_v17  ;;  %v1931_v11 = vmax.f32 %v1803_v26, 0.0  ;;  %v1932_v7 = vmax.f32 %v1804_v39, 0.0  ;;  %v1450_v35 = vld [vmem:[%s10673_s2 + $0x1a8] sm:$0xff] }
  0xfa   : > { %v8387_v4 = vpop.permute.xlu0 %1528  ;;  %v763_v18 = vmul.f32 %v8232_v19, %v8382_v51 }
  0xfb   : > { %537 = vperm.xlu1 %7274, %v363_v56   ;;  %3261 = vmatprep.subr.bf16.mxu0 %v2174_v37  ;;  %v1165_v37 = vmul.f32 %v8224_v59, %v8120_v1 }
  0xfc   : > { %v468_v9 = vpop.permute.xlu1 %467  ;;  %3262 = vmatpush1.bf16.msra.mxu0 %v2173_v46  ;;  %v1166_v46 = vmul.f32 %v8226_v61, %v8120_v1  ;;  %v1423_v1 = vld [vmem:[%s10673_s2 + $0xd0] sm:$0xff] }
  0xfd   : > { %1678 = vperm.xlu0 %7313, %v1440_v12   ;;  %v765_v50 = vmul.f32 %v8232_v19, %v468_v9  ;;  %v1293_v57 = vadd.f32 %v1165_v37, %v763_v18  ;;  %v1425_v18 = vld [vmem:[%s10673_s2 + $0xe0] sm:$0xff] }
  0xfe   : > { %v8392_v23 = vpop.permute.xlu0 %1538 }
  0xff   : > { %7275 = vset.pattern.permute.xlu1 %v10697_v40 }
 0x100   : > { %976 = vperm.xlu1 %7275, %v363_v56   ;;  %v766_v56 = vmul.f32 %v8235_v5, %v468_v9  ;;  %v764_v9 = vmul.f32 %v8235_v5, %v8382_v51 }
 0x101   : > { %1688 = vperm.xlu0 %7313, %v1442_v15   ;;  %v921_v45 = vpop.permute.xlu1 %920  ;;  %v1452_v15 = vld [vmem:[%s10673_s2 + $0x1b8] sm:$0xff] }
 0x102   : > { %v8412_v53 = vpop.permute.xlu0 %1548  ;;  %v1167_v38 = vmul.f32 %v8224_v59, %v921_v45  ;;  %v1168_v43 = vmul.f32 %v8226_v61, %v921_v45  ;;  %v1294_v34 = vadd.f32 %v1166_v46, %v764_v9 }
 0x104   : > { %7276 = vset.pattern.permute.xlu1 %v10698_v2  ;;  %v1295_v33 = vadd.f32 %v1167_v38, %v765_v50  ;;  %v1296_v42 = vadd.f32 %v1168_v43, %v766_v56  ;;  %v1169_v38 = vmul.f32 %v8224_v59, %v8131_v6  ;;  %v1170_v50 = vmul.f32 %v8226_v61, %v8131_v6 }
 0x105   : > { %1698 = vperm.xlu0 %7313, %v1444_v24   ;;  %1583 = vperm.xlu1 %7276, %v1421_v62  }
 0x106   : > { %v1514_v20 = vpop.permute.xlu1 %1513  ;;  %v8421_v36 = vpop.permute.xlu0 %1558  ;;  %v1808_v51 = vadd.f32 %v8387_v4, %v1296_v42  ;;  %v1807_v45 = vadd.f32 %v8387_v4, %v1295_v33 }
 0x107   : > { %v1801_v63 = vadd.f32 %v1514_v20, %v1289_v3  ;;  %v1802_v58 = vadd.f32 %v1514_v20, %v1290_v44  ;;  %v1456_v3 = vld [vmem:[%s10673_s2 + $0x1d8] sm:$0xff]  ;;  %v7702_v44 = vld [vmem:[%s10672_s1 + $0xf0] sm:$0xff] }
 0x108   : > { %v1936_v20 = vmax.f32 %v1808_v51, 0.0 }
 0x109   : > { %v1929_v8 = vmax.f32 %v1801_v63, 0.0  ;;  %v1930_v25 = vmax.f32 %v1802_v58, 0.0  ;;  %1708 = vperm.xlu0 %7313, %v1446_v54   ;;  %542 = vperm.xlu1 %7276, %v7701_v21   ;;  %v1935_v54 = vmax.f32 %v1807_v45, 0.0  ;;  %v367_v63 = vld [vmem:[%s10672_s1 + $0xf8] sm:$0xff] }
 0x10a   : > { %v8429_v31 = vpop.permute.xlu1 %472  ;;  %v8431_v29 = vpop.permute.xlu0 %1568 }
 0x10b   : > { %v2176_v60 = vpack.c.bf16 %v1932_v7, %v1930_v25  ;;  %v2175_v14 = vpack.c.bf16 %v1931_v11, %v1929_v8  ;;  %v1458_v7 = vld [vmem:[%s10673_s2 + $0x1e8] sm:$0xff]  ;;  %v767_v43 = vmul.f32 %v8232_v19, %v8429_v31  ;;  %v768_v56 = vmul.f32 %v8235_v5, %v8429_v31 }
 0x10d   : > { %1718 = vperm.xlu0 %7313, %v1448_v32   ;;  %547 = vperm.xlu1 %7276, %v365_v41   ;;  %v1297_v6 = vadd.f32 %v1169_v38, %v767_v43  ;;  %v1298_v31 = vadd.f32 %v1170_v50, %v768_v56  ;;  %v2239_v38 = vld [vmem:[%s10675_s4 + $0x50] sm:$0xff] }
 0x10e   : > { %3263 = vmatprep.subr.bf16.mxu0 %v2176_v60  ;;  %v478_v28 = vpop.permute.xlu1 %477  ;;  %v8439_v17 = vpop.permute.xlu0 %1578 }
 0x10f   : > { %3264 = vmatpush1.bf16.msra.mxu0 %v2175_v14  ;;  %v769_v60 = vmul.f32 %v8232_v19, %v478_v28  ;;  %v770_v14 = vmul.f32 %v8235_v5, %v478_v28 }
 0x111   : > { %1728 = vperm.xlu0 %7313, %v1450_v35   ;;  %7277 = vset.pattern.permute.xlu1 %v10697_v40 }
 0x112   : > { %984 = vperm.xlu1 %7277, %v365_v41   ;;  %v8453_v12 = vpop.permute.xlu0 %1588  ;;  %v2229_v41 = vld [vmem:[%s10675_s4] sm:$0xff] }
 0x113   : > { %v929_v0 = vpop.permute.xlu1 %928 }
 0x114   : > { %v1171_v21 = vmul.f32 %v8224_v59, %v929_v0  ;;  %v1172_v32 = vmul.f32 %v8226_v61, %v929_v0 }
 0x115   : > { %1738 = vperm.xlu0 %7313, %v1452_v15   ;;  %v2231_v15 = vld [vmem:[%s10675_s4 + $0x10] sm:$0xff] }
 0x116   : > { %7278 = vset.pattern.permute.xlu1 %v10698_v2  ;;  %v8466_v48 = vpop.permute.xlu0 %1598  ;;  %v1299_v37 = vadd.f32 %v1171_v21, %v769_v60  ;;  %v1300_v46 = vadd.f32 %v1172_v32, %v770_v14  ;;  %v1173_v60 = vmul.f32 %v8224_v59, %v8138_v10  ;;  %v1174_v14 = vmul.f32 %v8226_v61, %v8138_v10  ;;  %v2241_v10 = vld [vmem:[%s10675_s4 + $0x60] sm:$0xff] }
 0x117   : > { %1593 = vperm.xlu1 %7278, %v1423_v1   ;;  %v2233_v1 = vld [vmem:[%s10675_s4 + $0x20] sm:$0xff] }
 0x118   : > { %v1524_v24 = vpop.permute.xlu1 %1523  ;;  %v1812_v33 = vadd.f32 %v8392_v23, %v1300_v46  ;;  %v1811_v42 = vadd.f32 %v8392_v23, %v1299_v37 }
 0x119   : > { %v1805_v62 = vadd.f32 %v1524_v24, %v1293_v57  ;;  %v1806_v55 = vadd.f32 %v1524_v24, %v1294_v34  ;;  %1748 = vperm.xlu0 %7313, %v1454_v49   ;;  %v1427_v49 = vld [vmem:[%s10673_s2 + $0xf0] sm:$0xff] }
 0x11a   : > { %v8473_v52 = vpop.permute.xlu0 %1608 }
 0x11b   : > { %v1933_v26 = vmax.f32 %v1805_v62, 0.0  ;;  %v1934_v39 = vmax.f32 %v1806_v55, 0.0  ;;  %552 = vperm.xlu1 %7278, %v7702_v44   ;;  %v1940_v62 = vmax.f32 %v1812_v33, 0.0  ;;  %v1939_v55 = vmax.f32 %v1811_v42, 0.0  ;;  %v370_v33 = vld [vmem:[%s10672_s1 + $0x110] sm:$0xff] }
 0x11c   : > { %v8481_v4 = vpop.permute.xlu1 %482 }
 0x11d   : > { %1758 = vperm.xlu0 %7313, %v1456_v3   ;;  %v2178_v58 = vpack.c.bf16 %v1936_v20, %v1934_v39  ;;  %v2177_v11 = vpack.c.bf16 %v1935_v54, %v1933_v26  ;;  %v2235_v3 = vld [vmem:[%s10675_s4 + $0x30] sm:$0xff]  ;;  %v1428_v26 = vld [vmem:[%s10673_s2 + $0xf8] sm:$0xff]  ;;  %v771_v43 = vmul.f32 %v8232_v19, %v8481_v4  ;;  %v772_v50 = vmul.f32 %v8235_v5, %v8481_v4 }
 0x11f   : > { %557 = vperm.xlu1 %7278, %v367_v63   ;;  %3265 = vmatprep.subr.bf16.mxu0 %v2178_v58  ;;  %v8489_v8 = vpop.permute.xlu0 %996  ;;  %v369_v58 = vld [vmem:[%s10672_s1 + $0x108] sm:$0xff] }
 0x120   : > { %v488_v25 = vpop.permute.xlu1 %487  ;;  %3266 = vmatpush1.bf16.msra.mxu0 %v2177_v11 }
 0x121   : > { %1768 = vperm.xlu0 %7313, %v1458_v7   ;;  %v773_v32 = vmul.f32 %v8232_v19, %v488_v25 }
 0x123   : > { %7280 = vset.pattern.permute.xlu1 %v10697_v40  ;;  %v8499_v35 = vpop.permute.xlu0 %1012 }
 0x124   : > { %992 = vperm.xlu1 %7280, %v367_v63   ;;  %v2237_v63 = vld [vmem:[%s10675_s4 + $0x40] sm:$0xff] }
 0x125   : > { %2295 = vperm.xlu0 %7313, %v2229_v41   ;;  %v937_v28 = vpop.permute.xlu1 %936  ;;  %v774_v41 = vmul.f32 %v8235_v5, %v488_v25 }
 0x126   : > { %v1175_v11 = vmul.f32 %v8224_v59, %v937_v28  ;;  %v1176_v7 = vmul.f32 %v8226_v61, %v937_v28 }
 0x127   : > { %v8515_v9 = vpop.permute.xlu0 %1020 }
 0x128   : > { %7281 = vset.pattern.permute.xlu1 %v10698_v2  ;;  %v1303_v56 = vadd.f32 %v1175_v11, %v773_v32  ;;  %v1304_v25 = vadd.f32 %v1176_v7, %v774_v41  ;;  %v1177_v41 = vmul.f32 %v8224_v59, %v8146_v13 }
 0x129   : > { %2305 = vperm.xlu0 %7313, %v2231_v15   ;;  %1603 = vperm.xlu1 %7281, %v1425_v18   ;;  %v1301_v15 = vadd.f32 %v1173_v60, %v771_v43  ;;  %v1302_v18 = vadd.f32 %v1174_v14, %v772_v50  ;;  %v1178_v14 = vmul.f32 %v8226_v61, %v8146_v13 }
 0x12a   : > { %v1534_v0 = vpop.permute.xlu1 %1533  ;;  %v1815_v4 = vadd.f32 %v8412_v53, %v1303_v56  ;;  %v2249_v56 = vld [vmem:[%s10675_s4 + $0xa0] sm:$0xff] }
 0x12b   : > { %v1809_v57 = vadd.f32 %v1534_v0, %v1297_v6  ;;  %v1810_v34 = vadd.f32 %v1534_v0, %v1298_v31  ;;  %v8526_v51 = vpop.permute.xlu0 %1028  ;;  %v1816_v6 = vadd.f32 %v8412_v53, %v1304_v25  ;;  %v1430_v25 = vld [vmem:[%s10673_s2 + $0x108] sm:$0xff] }
 0x12d   : > { %v1937_v45 = vmax.f32 %v1809_v57, 0.0  ;;  %v1938_v24 = vmax.f32 %v1810_v34, 0.0  ;;  %2315 = vperm.xlu0 %7313, %v2233_v1   ;;  %1613 = vperm.xlu1 %7281, %v1427_v49   ;;  %v2243_v1 = vld [vmem:[%s10675_s4 + $0x70] sm:$0xff]  ;;  %v1944_v53 = vmax.f32 %v1816_v6, 0.0  ;;  %v373_v6 = vld [vmem:[%s10672_s1 + $0x128] sm:$0xff] }
 0x12e   : > { %v8528_v23 = vpop.permute.xlu1 %492 }
 0x12f   : > { %v8536_v39 = vpop.permute.xlu0 %1036  ;;  %v2180_v44 = vpack.c.bf16 %v1940_v62, %v1938_v24  ;;  %v2179_v20 = vpack.c.bf16 %v1939_v55, %v1937_v45  ;;  %v1943_v45 = vmax.f32 %v1815_v4, 0.0  ;;  %v775_v60 = vmul.f32 %v8232_v19, %v8528_v23 }
 0x131   : > { %2325 = vperm.xlu0 %7313, %v2235_v3   ;;  %1618 = vperm.xlu1 %7281, %v1428_v26   ;;  %v2245_v3 = vld [vmem:[%s10675_s4 + $0x80] sm:$0xff]  ;;  %v1305_v13 = vadd.f32 %v1177_v41, %v775_v60 }
 0x132   : > { %3267 = vmatprep.subr.bf16.mxu0 %v2180_v44  ;;  %v498_v54 = vpop.permute.xlu1 %497 }
 0x133   : > { %3268 = vmatpush1.bf16.msra.mxu0 %v2179_v20  ;;  %v8546_v21 = vpop.permute.xlu0 %1044  ;;  %v777_v11 = vmul.f32 %v8232_v19, %v498_v54  ;;  %v778_v7 = vmul.f32 %v8235_v5, %v498_v54 }
 0x135   : > { %2335 = vperm.xlu0 %7313, %v2237_v63   ;;  %567 = vperm.xlu1 %7281, %v369_v58  }
 0x137   : > { %v945_v37 = vpop.permute.xlu1 %944  ;;  %v8561_v46 = vpop.permute.xlu0 %1052 }
 0x138   : > { %v1179_v20 = vmul.f32 %v8224_v59, %v945_v37  ;;  %v1180_v63 = vmul.f32 %v8226_v61, %v945_v37 }
 0x139   : > { %2345 = vperm.xlu0 %7313, %v2239_v38   ;;  %7283 = vset.pattern.permute.xlu1 %v10697_v40  ;;  %v776_v38 = vmul.f32 %v8235_v5, %v8528_v23 }
 0x13a   : > { %1000 = vperm.xlu1 %7283, %v369_v58   ;;  %v2247_v58 = vld [vmem:[%s10675_s4 + $0x90] sm:$0xff]  ;;  %v1307_v43 = vadd.f32 %v1179_v20, %v777_v11  ;;  %v1308_v50 = vadd.f32 %v1180_v63, %v778_v7 }
 0x13b   : > { %v8567_v28 = vpop.permute.xlu0 %1060  ;;  %v2255_v20 = vld [vmem:[%s10675_s4 + $0xd0] sm:$0xff] }
 0x13c   : > { %v1544_v31 = vpop.permute.xlu1 %1543  ;;  %v1820_v23 = vadd.f32 %v8421_v36, %v1308_v50  ;;  %v1431_v11 = vld [vmem:[%s10673_s2 + $0x110] sm:$0xff] }
 0x13d   : > { %v1813_v42 = vadd.f32 %v1544_v31, %v1301_v15  ;;  %v1814_v0 = vadd.f32 %v1544_v31, %v1302_v18  ;;  %2355 = vperm.xlu0 %7313, %v2241_v10   ;;  %v1819_v10 = vadd.f32 %v8421_v36, %v1307_v43  ;;  %v2251_v18 = vld [vmem:[%s10675_s4 + $0xb0] sm:$0xff]  ;;  %v1182_v43 = vmul.f32 %v8226_v61, %v8156_v16 }
 0x13e   : > { %7284 = vset.pattern.permute.xlu1 %v10698_v2 }
 0x13f   : > { %v1941_v49 = vmax.f32 %v1813_v42, 0.0  ;;  %v1942_v57 = vmax.f32 %v1814_v0, 0.0  ;;  %572 = vperm.xlu1 %7284, %v370_v33   ;;  %v8578_v34 = vpop.permute.xlu0 %1068 }
 0x140   : > { %v8580_v24 = vpop.permute.xlu1 %502 }
 0x141   : > { %2365 = vperm.xlu0 %7313, %v2243_v1   ;;  %v2182_v62 = vpack.c.bf16 %v1944_v53, %v1942_v57  ;;  %v2181_v55 = vpack.c.bf16 %v1943_v45, %v1941_v49  ;;  %v1948_v1 = vmax.f32 %v1820_v23, 0.0  ;;  %v1947_v49 = vmax.f32 %v1819_v10, 0.0  ;;  %v2253_v57 = vld [vmem:[%s10675_s4 + $0xc0] sm:$0xff] }
 0x142   : > { %v7318_v53 = vld [vmem:[%s10674_s3 + $0x4] ss:$16 sps:$4 sm:$0xff]   ;;  %v779_v50 = vmul.f32 %v8232_v19, %v8580_v24 }
 0x143   : > { %7285 = vset.pattern.permute.xlu1 %v10697_v40  ;;  %3269 = vmatprep.subr.bf16.mxu0 %v2182_v62  ;;  %v8586_v26 = vpop.permute.xlu0 %1076 }
 0x144   : > { %1004 = vperm.xlu1 %7285, %v370_v33   ;;  %v508_v44 = vpop.permute.xlu1 %507  ;;  %3270 = vmatpush1.bf16.msra.mxu0 %v2181_v55 }
 0x145   : > { %2375 = vperm.xlu0 %7313, %v2245_v3   ;;  %3285 = vmatprep.mubr.bf16.mxu0 %v7318_v53  ;;  %v781_v7 = vmul.f32 %v8232_v19, %v508_v44  ;;  %v782_v41 = vmul.f32 %v8235_v5, %v508_v44  ;;  %v780_v44 = vmul.f32 %v8235_v5, %v8580_v24  ;;  %v375_v24 = vld [vmem:[%s10672_s1 + $0x138] sm:$0xff] }
 0x147   : > { %v8595_v32 = vpop.permute.xlu0 %1084  ;;  %v1310_v23 = vadd.f32 %v1182_v43, %v780_v44 }
 0x148   : > { %1008 = vperm.xlu1 %7285, %v8291_v47   ;;  %v1306_v47 = vadd.f32 %v1178_v14, %v776_v38  ;;  %v2257_v14 = vld [vmem:[%s10675_s4 + $0xe0] sm:$0xff]  ;;  %v1181_v38 = vmul.f32 %v8224_v59, %v8156_v16 }
 0x149   : > { %2385 = vperm.xlu0 %7313, %v2247_v58   ;;  %v953_v54 = vpop.permute.xlu1 %952 }
 0x14a   : > { %v1183_v63 = vmul.f32 %v8224_v59, %v953_v54  ;;  %v1184_v58 = vmul.f32 %v8226_v61, %v953_v54  ;;  %v1309_v16 = vadd.f32 %v1181_v38, %v779_v50  ;;  %v2265_v38 = vld [vmem:[%s10675_s4 + $0x120] sm:$0xff] }
 0x14b   : > { %v8612_v37 = vpop.permute.xlu0 %1092 }
 0x14c   : > { %7286 = vset.pattern.permute.xlu1 %v10698_v2 }
 0x14d   : > { %2395 = vperm.xlu0 %7313, %v2249_v56   ;;  %1628 = vperm.xlu1 %7286, %v1430_v25   ;;  %v1311_v56 = vadd.f32 %v1183_v63, %v781_v7  ;;  %v1312_v25 = vadd.f32 %v1184_v58, %v782_v41  ;;  %v1433_v7 = vld [vmem:[%s10673_s2 + $0x120] sm:$0xff] }
 0x14e   : > { %v1554_v15 = vpop.permute.xlu1 %1553 }
 0x14f   : > { %v1817_v4 = vadd.f32 %v1554_v15, %v1305_v13  ;;  %v1818_v31 = vadd.f32 %v1554_v15, %v1306_v47  ;;  %v8623_v33 = vpop.permute.xlu0 %1100  ;;  %v2259_v13 = vld [vmem:[%s10675_s4 + $0xf0] sm:$0xff] }
 0x150   : > { %v7703_v47 = vld [vmem:[%s10672_s1 + $0x130] sm:$0xff] }
 0x151   : > { %v1945_v42 = vmax.f32 %v1817_v4, 0.0  ;;  %v1946_v0 = vmax.f32 %v1818_v31, 0.0  ;;  %2405 = vperm.xlu0 %7313, %v2251_v18   ;;  %587 = vperm.xlu1 %7286, %v373_v6   ;;  %v1824_v18 = vadd.f32 %v8431_v29, %v1312_v25 }
 0x152   : > { %v8625_v36 = vpop.permute.xlu1 %512 }
 0x153   : > { %v2184_v45 = vpack.c.bf16 %v1948_v1, %v1946_v0  ;;  %v2183_v62 = vpack.c.bf16 %v1947_v49, %v1945_v42  ;;  %v8633_v55 = vpop.permute.xlu0 %1108  ;;  %v2261_v42 = vld [vmem:[%s10675_s4 + $0x100] sm:$0xff]  ;;  %v783_v50 = vmul.f32 %v8232_v19, %v8625_v36  ;;  %v784_v44 = vmul.f32 %v8235_v5, %v8625_v36 }
 0x155   : > { %2415 = vperm.xlu0 %7313, %v2253_v57   ;;  %7287 = vset.pattern.permute.xlu1 %v10697_v40  ;;  %v1952_v57 = vmax.f32 %v1824_v18, 0.0 }
 0x156   : > { %3271 = vmatprep.subr.bf16.mxu0 %v2184_v45  ;;  %1016 = vperm.xlu1 %7287, %v373_v6   ;;  %v518_v3 = vpop.permute.xlu1 %517  ;;  %v1823_v6 = vadd.f32 %v8431_v29, %v1311_v56  ;;  %v2263_v29 = vld [vmem:[%s10675_s4 + $0x110] sm:$0xff] }
 0x157   : > { %3272 = vmatpush1.bf16.msra.mxu0 %v2183_v62  ;;  %v8646_v60 = vpop.permute.xlu0 %1116  ;;  %v785_v41 = vmul.f32 %v8232_v19, %v518_v3 }
 0x158   : > { %v1951_v53 = vmax.f32 %v1823_v6, 0.0 }
 0x159   : > { %2425 = vperm.xlu0 %7313, %v2255_v20  }
 0x15a   : > { %7288 = vset.pattern.permute.xlu1 %v10698_v2 }
 0x15b   : > { %1633 = vperm.xlu1 %7288, %v1431_v11   ;;  %v961_v54 = vpop.permute.xlu1 %960 }
 0x15c   : > { %v8666_v10 = vpop.permute.xlu0 %562  ;;  %v1187_v58 = vmul.f32 %v8224_v59, %v961_v54  ;;  %v1188_v11 = vmul.f32 %v8226_v61, %v961_v54 }
 0x15d   : > { %2435 = vperm.xlu0 %7313, %v2257_v14   ;;  %v786_v14 = vmul.f32 %v8235_v5, %v518_v3  ;;  %v1185_v3 = vmul.f32 %v8224_v59, %v8164_v22 }
 0x15e   : > { %v1315_v54 = vadd.f32 %v1187_v58, %v785_v41 }
 0x15f   : > { %592 = vperm.xlu1 %7288, %v7703_v47   ;;  %v1316_v56 = vadd.f32 %v1188_v11, %v786_v14  ;;  %v2267_v47 = vld [vmem:[%s10675_s4 + $0x130] sm:$0xff]  ;;  %v1313_v36 = vadd.f32 %v1185_v3, %v783_v50  ;;  %v2273_v14 = vld [vmem:[%s10675_s4 + $0x160] sm:$0xff] }
 0x160   : > { %v1564_v15 = vpop.permute.xlu1 %1563  ;;  %v8678_v45 = vpop.permute.xlu0 %577 }
 0x161   : > { %v1821_v4 = vadd.f32 %v1564_v15, %v1309_v16  ;;  %v1822_v31 = vadd.f32 %v1564_v15, %v1310_v23  ;;  %2445 = vperm.xlu0 %7313, %v2259_v13   ;;  %v1186_v13 = vmul.f32 %v8226_v61, %v8164_v22  ;;  %v7704_v16 = vld [vmem:[%s10672_s1 + $0x140] sm:$0xff]  ;;  %v1828_v15 = vadd.f32 %v8439_v17, %v1316_v56  ;;  %v377_v22 = vld [vmem:[%s10672_s1 + $0x148] sm:$0xff] }
 0x163   : > { %v1949_v0 = vmax.f32 %v1821_v4, 0.0  ;;  %v1950_v1 = vmax.f32 %v1822_v31, 0.0  ;;  %597 = vperm.xlu1 %7288, %v375_v24   ;;  %v1314_v23 = vadd.f32 %v1186_v13, %v784_v44 }
 0x164   : > { %v8676_v49 = vpop.permute.xlu1 %522  ;;  %v8694_v43 = vpop.permute.xlu0 %1623 }
 0x165   : > { %2455 = vperm.xlu0 %7313, %v2261_v42   ;;  %v2186_v62 = vpack.c.bf16 %v1952_v57, %v1950_v1  ;;  %v2185_v20 = vpack.c.bf16 %v1951_v53, %v1949_v0  ;;  %v2269_v42 = vld [vmem:[%s10675_s4 + $0x140] sm:$0xff]  ;;  %v1956_v57 = vmax.f32 %v1828_v15, 0.0  ;;  %v787_v56 = vmul.f32 %v8232_v19, %v8676_v49 }
 0x167   : > { %7289 = vset.pattern.permute.xlu1 %v10697_v40  ;;  %3273 = vmatprep.subr.bf16.mxu0 %v2186_v62  ;;  %v2271_v62 = vld [vmem:[%s10675_s4 + $0x150] sm:$0xff] }
 0x168   : > { %1024 = vperm.xlu1 %7289, %v375_v24   ;;  %v528_v63 = vpop.permute.xlu1 %527  ;;  %3274 = vmatpush1.bf16.msra.mxu0 %v2185_v20  ;;  %v1827_v24 = vadd.f32 %v8439_v17, %v1315_v54  ;;  %v8713_v18 = vpop.permute.xlu0 %582 }
 0x169   : > { %2465 = vperm.xlu0 %7313, %v2263_v29   ;;  %v789_v50 = vmul.f32 %v8232_v19, %v528_v63  ;;  %v790_v44 = vmul.f32 %v8235_v5, %v528_v63  ;;  %v1189_v63 = vmul.f32 %v8224_v59, %v8174_v27 }
 0x16a   : > { %v1955_v53 = vmax.f32 %v1827_v24, 0.0  ;;  %v2277_v24 = vld [vmem:[%s10675_s4 + $0x180] sm:$0xff] }
 0x16c   : > { %7290 = vset.pattern.permute.xlu1 %v10698_v2  ;;  %v8726_v58 = vpop.permute.xlu0 %1638 }
 0x16d   : > { %1643 = vperm.xlu1 %7290, %v1433_v7   ;;  %v969_v25 = vpop.permute.xlu1 %968  ;;  %2475 = vperm.xlu0 %7313, %v2265_v38   ;;  %v1435_v38 = vld [vmem:[%s10673_s2 + $0x130] sm:$0xff] }
 0x16e   : > { %v1191_v7 = vmul.f32 %v8224_v59, %v969_v25  ;;  %v1192_v41 = vmul.f32 %v8226_v61, %v969_v25  ;;  %v788_v25 = vmul.f32 %v8235_v5, %v8676_v49  ;;  %v1317_v49 = vadd.f32 %v1189_v63, %v787_v56  ;;  %v1437_v56 = vld [vmem:[%s10673_s2 + $0x140] sm:$0xff] }
 0x170   : > { %v8739_v54 = vpop.permute.xlu0 %1648  ;;  %v1319_v3 = vadd.f32 %v1191_v7, %v789_v50  ;;  %v1320_v13 = vadd.f32 %v1192_v41, %v790_v44 }
 0x171   : > { %602 = vperm.xlu1 %7290, %v7704_v16   ;;  %2485 = vperm.xlu0 %7313, %v2267_v47   ;;  %v2275_v16 = vld [vmem:[%s10675_s4 + $0x170] sm:$0xff] }
 0x172   : > { %v1574_v6 = vpop.permute.xlu1 %1573 }
 0x173   : > { %v1825_v4 = vadd.f32 %v1574_v6, %v1313_v36  ;;  %v1826_v31 = vadd.f32 %v1574_v6, %v1314_v23  ;;  %v1190_v36 = vmul.f32 %v8226_v61, %v8174_v27  ;;  %v7705_v23 = vld [vmem:[%s10672_s1 + $0x150] sm:$0xff]  ;;  %v1832_v6 = vadd.f32 %v8453_v12, %v1320_v13  ;;  %v379_v27 = vld [vmem:[%s10672_s1 + $0x158] sm:$0xff] }
 0x174   : > { %v2283_v13 = vld [vmem:[%s10675_s4 + $0x1b0] sm:$0xff] }
 0x175   : > { %v1953_v0 = vmax.f32 %v1825_v4, 0.0  ;;  %v1954_v1 = vmax.f32 %v1826_v31, 0.0  ;;  %607 = vperm.xlu1 %7290, %v377_v22   ;;  %2495 = vperm.xlu0 %7313, %v2269_v42   ;;  %v1318_v15 = vadd.f32 %v1190_v36, %v788_v25  ;;  %v8761_v4 = vpop.permute.xlu0 %1658 }
 0x176   : > { %v8721_v17 = vpop.permute.xlu1 %532 }
 0x177   : > { %v2188_v20 = vpack.c.bf16 %v1956_v57, %v1954_v1  ;;  %v2187_v29 = vpack.c.bf16 %v1955_v53, %v1953_v0  ;;  %v2279_v53 = vld [vmem:[%s10675_s4 + $0x190] sm:$0xff]  ;;  %v792_v63 = vmul.f32 %v8235_v5, %v8721_v17 }
 0x179   : > { %7291 = vset.pattern.permute.xlu1 %v10697_v40  ;;  %3275 = vmatprep.subr.bf16.mxu0 %v2188_v20  ;;  %v8771_v41 = vpop.permute.xlu0 %1668 }
 0x17a   : > { %2505 = vperm.xlu0 %7313, %v2271_v62   ;;  %1032 = vperm.xlu1 %7291, %v377_v22   ;;  %v538_v11 = vpop.permute.xlu1 %537  ;;  %v1831_v22 = vadd.f32 %v8453_v12, %v1319_v3  ;;  %v1960_v62 = vmax.f32 %v1832_v6, 0.0  ;;  %v7706_v6 = vld [vmem:[%s10672_s1 + $0x160] sm:$0xff] }
 0x17b   : > { %3276 = vmatpush1.bf16.msra.mxu0 %v2187_v29  ;;  %v793_v25 = vmul.f32 %v8232_v19, %v538_v11  ;;  %v794_v3 = vmul.f32 %v8235_v5, %v538_v11  ;;  %v1193_v11 = vmul.f32 %v8224_v59, %v8185_v30 }
 0x17c   : > { %v1959_v20 = vmax.f32 %v1831_v22, 0.0 }
 0x17e   : > { %2515 = vperm.xlu0 %7313, %v2273_v14   ;;  %7292 = vset.pattern.permute.xlu1 %v10698_v2  ;;  %v2281_v14 = vld [vmem:[%s10675_s4 + $0x1a0] sm:$0xff] }
 0x17f   : > { %1653 = vperm.xlu1 %7292, %v1435_v38   ;;  %v977_v47 = vpop.permute.xlu1 %976 }
 0x180   : > { %v1195_v50 = vmul.f32 %v8224_v59, %v977_v47  ;;  %v1196_v44 = vmul.f32 %v8226_v61, %v977_v47  ;;  %v791_v47 = vmul.f32 %v8232_v19, %v8721_v17 }
 0x182   : > { %2525 = vperm.xlu0 %7313, %v2275_v16   ;;  %v8787_v16 = vpop.permute.xlu0 %1678  ;;  %v1323_v36 = vadd.f32 %v1195_v50, %v793_v25  ;;  %v1321_v17 = vadd.f32 %v1193_v11, %v791_v47  ;;  %v2291_v47 = vld [vmem:[%s10675_s4 + $0x1f0] sm:$0xff] }
 0x183   : > { %612 = vperm.xlu1 %7292, %v7705_v23   ;;  %v1324_v23 = vadd.f32 %v1196_v44, %v794_v3 }
 0x184   : > { %v1584_v31 = vpop.permute.xlu1 %1583 }
 0x185   : > { %v1829_v42 = vadd.f32 %v1584_v31, %v1317_v49  ;;  %v1830_v0 = vadd.f32 %v1584_v31, %v1318_v15  ;;  %v1194_v15 = vmul.f32 %v8226_v61, %v8185_v30  ;;  %v1836_v31 = vadd.f32 %v8466_v48, %v1324_v23  ;;  %v381_v30 = vld [vmem:[%s10672_s1 + $0x168] sm:$0xff] }
 0x186   : > { %2535 = vperm.xlu0 %7313, %v2277_v24   ;;  %v2285_v24 = vld [vmem:[%s10675_s4 + $0x1c0] sm:$0xff] }
 0x187   : > { %v1957_v1 = vmax.f32 %v1829_v42, 0.0  ;;  %v1958_v57 = vmax.f32 %v1830_v0, 0.0  ;;  %617 = vperm.xlu1 %7292, %v379_v27   ;;  %v1322_v22 = vadd.f32 %v1194_v15, %v792_v63  ;;  %v8806_v42 = vpop.permute.xlu0 %1688 }
 0x188   : > { %v8769_v12 = vpop.permute.xlu1 %542 }
 0x189   : > { %v2190_v29 = vpack.c.bf16 %v1960_v62, %v1958_v57  ;;  %v2189_v7 = vpack.c.bf16 %v1959_v20, %v1957_v1 }
 0x18a   : > { %2545 = vperm.xlu0 %7313, %v2279_v53   ;;  %v2287_v53 = vld [vmem:[%s10675_s4 + $0x1d0] sm:$0xff] }
 0x18b   : > { %7293 = vset.pattern.permute.xlu1 %v10697_v40  ;;  %3277 = vmatprep.subr.bf16.mxu0 %v2190_v29  ;;  %v1964_v29 = vmax.f32 %v1836_v31, 0.0 }
 0x18c   : > { %1040 = vperm.xlu1 %7293, %v379_v27   ;;  %v548_v38 = vpop.permute.xlu1 %547  ;;  %3278 = vmatpush1.bf16.msra.mxu0 %v2189_v7  ;;  %v1835_v27 = vadd.f32 %v8466_v48, %v1323_v36  ;;  %v1439_v36 = vld [vmem:[%s10673_s2 + $0x150] sm:$0xff] }
 0x18d   : > { %v798_v63 = vmul.f32 %v8235_v5, %v548_v38  ;;  %v797_v23 = vmul.f32 %v8232_v19, %v548_v38  ;;  %v10699_v38 = vld [vmem:[#allocation7_spill] sm:$0xff] }
 0x18e   : > { %2555 = vperm.xlu0 %7313, %v2281_v14   ;;  %v1963_v7 = vmax.f32 %v1835_v27, 0.0  ;;  %v2289_v14 = vld [vmem:[%s10675_s4 + $0x1e0] sm:$0xff]  ;;  %v1197_v31 = vmul.f32 %v8224_v59, %v10699_v38  ;;  %v1198_v27 = vmul.f32 %v8226_v61, %v10699_v38 }
 0x190   : > { %7294 = vset.pattern.permute.xlu1 %v10698_v2 }
 0x191   : > { %1663 = vperm.xlu1 %7294, %v1437_v56   ;;  %v985_v49 = vpop.permute.xlu1 %984  ;;  %v8817_v56 = vpop.permute.xlu0 %1698 }
 0x192   : > { %2565 = vperm.xlu0 %7313, %v2283_v13   ;;  %v1200_v25 = vmul.f32 %v8226_v61, %v985_v49  ;;  %v1199_v13 = vmul.f32 %v8224_v59, %v985_v49  ;;  %v795_v49 = vmul.f32 %v8232_v19, %v8769_v12 }
 0x194   : > { %v1328_v15 = vadd.f32 %v1200_v25, %v798_v63  ;;  %v10700_v25 = vld [vmem:[#allocation9_spill] sm:$0xff] }
 0x195   : > { %622 = vperm.xlu1 %7294, %v7706_v6   ;;  %v8830_v11 = vpop.permute.xlu0 %1708  ;;  %v1327_v6 = vadd.f32 %v1199_v13, %v797_v23  ;;  %v1201_v13 = vmul.f32 %v8224_v59, %v10700_v25 }
 0x196   : > { %2575 = vperm.xlu0 %7313, %v2285_v24   ;;  %v1594_v0 = vpop.permute.xlu1 %1593  ;;  %v796_v24 = vmul.f32 %v8235_v5, %v8769_v12  ;;  %v7707_v12 = vld [vmem:[%s10672_s1 + $0x170] sm:$0xff] }
 0x197   : > { %v1833_v1 = vadd.f32 %v1594_v0, %v1321_v17  ;;  %v1834_v57 = vadd.f32 %v1594_v0, %v1322_v22  ;;  %v4279_v22 = vld [vmem:[%s10677_s6] sm:$0xff]  ;;  %v1840_v0 = vadd.f32 %v8473_v52, %v1328_v15 }
 0x199   : > { %v1961_v62 = vmax.f32 %v1833_v1, 0.0  ;;  %v1962_v20 = vmax.f32 %v1834_v57, 0.0  ;;  %627 = vperm.xlu1 %7294, %v381_v30   ;;  %v1326_v1 = vadd.f32 %v1198_v27, %v796_v24  ;;  %v4311_v57 = vld [vmem:[%s10677_s6 + $0x100] sm:$0xff]  ;;  %v1968_v63 = vmax.f32 %v1840_v0, 0.0 }
 0x19a   : > { %2585 = vperm.xlu0 %7313, %v2287_v53   ;;  %v553_v48 = vpop.permute.xlu1 %552  ;;  %v1839_v53 = vadd.f32 %v8473_v52, %v1327_v6 }
 0x19b   : > { %v2192_v50 = vpack.c.bf16 %v1964_v29, %v1962_v20  ;;  %v2191_v44 = vpack.c.bf16 %v1963_v7, %v1961_v62  ;;  %v8852_v62 = vpop.permute.xlu0 %1718  ;;  %v799_v20 = vmul.f32 %v8232_v19, %v553_v48  ;;  %v383_v7 = vld [vmem:[%s10672_s1 + $0x178] sm:$0xff] }
 0x19d   : > { %7295 = vset.pattern.permute.xlu1 %v10697_v40  ;;  %3279 = vmatprep.subr.bf16.mxu0 %v2192_v50 }
 0x19e   : > { %2595 = vperm.xlu0 %7313, %v2289_v14   ;;  %1048 = vperm.xlu1 %7295, %v381_v30   ;;  %v558_v3 = vpop.permute.xlu1 %557  ;;  %v1325_v30 = vadd.f32 %v1197_v31, %v795_v49  ;;  %v800_v14 = vmul.f32 %v8235_v5, %v553_v48  ;;  %v4281_v48 = vld [vmem:[%s10677_s6 + $0x10] sm:$0xff]  ;;  %v1967_v49 = vmax.f32 %v1839_v53, 0.0 }
 0x19f   : > { %3280 = vmatpush1.bf16.msra.mxu0 %v2191_v44  ;;  %v801_v24 = vmul.f32 %v8232_v19, %v558_v3  ;;  %v802_v38 = vmul.f32 %v8235_v5, %v558_v3  ;;  %v8870_v0 = vpop.permute.xlu0 %1728  ;;  %v4313_v53 = vld [vmem:[%s10677_s6 + $0x110] sm:$0xff] }
 0x1a2   : > { %2605 = vperm.xlu0 %7313, %v2291_v47   ;;  %7296 = vset.pattern.permute.xlu1 %v10698_v2  ;;  %v1202_v47 = vmul.f32 %v8226_v61, %v10700_v25 }
 0x1a3   : > { %1673 = vperm.xlu1 %7296, %v1439_v36   ;;  %v993_v17 = vpop.permute.xlu1 %992 }
 0x1a4   : > { %v1203_v52 = vmul.f32 %v8224_v59, %v993_v17  ;;  %v1204_v36 = vmul.f32 %v8226_v61, %v993_v17  ;;  %v1330_v31 = vadd.f32 %v1202_v47, %v800_v14  ;;  %v1441_v14 = vld [vmem:[%s10673_s2 + $0x160] sm:$0xff] }
 0x1a5   : > { %v4283_v47 = vld [vmem:[%s10677_s6 + $0x20] sm:$0xff] }
 0x1a6   : > { %4345 = vperm.xlu0 %7313, %v4279_v22   ;;  %v1329_v22 = vadd.f32 %v1201_v13, %v799_v20  ;;  %v1331_v17 = vadd.f32 %v1203_v52, %v801_v24  ;;  %v8882_v52 = vpop.permute.xlu0 %1738 }
 0x1a7   : > { %632 = vperm.xlu1 %7296, %v7707_v12  }
 0x1a8   : > { %v1604_v29 = vpop.permute.xlu1 %1603 }
 0x1a9   : > { %v1837_v50 = vadd.f32 %v1604_v29, %v1325_v30  ;;  %v1838_v44 = vadd.f32 %v1604_v29, %v1326_v1 }
 0x1aa   : > { %4505 = vperm.xlu0 %7313, %v4311_v57   ;;  %v1332_v57 = vadd.f32 %v1204_v36, %v802_v38  ;;  %v4285_v38 = vld [vmem:[%s10677_s6 + $0x30] sm:$0xff] }
 0x1ab   : > { %v1965_v23 = vmax.f32 %v1837_v50, 0.0  ;;  %v1966_v15 = vmax.f32 %v1838_v44, 0.0  ;;  %637 = vperm.xlu1 %7296, %v383_v7  }
 0x1ac   : > { %v1614_v6 = vpop.permute.xlu1 %1613 }
 0x1ad   : > { %v2194_v27 = vpack.c.bf16 %v1968_v63, %v1966_v15  ;;  %v2193_v12 = vpack.c.bf16 %v1967_v49, %v1965_v23  ;;  %v1841_v30 = vadd.f32 %v1614_v6, %v1329_v22  ;;  %v1842_v1 = vadd.f32 %v1614_v6, %v1330_v31  ;;  %v4315_v23 = vld [vmem:[%s10677_s6 + $0x120] sm:$0xff]  ;;  %v8897_v6 = vpop.permute.xlu0 %1748  ;;  %v385_v22 = vld [vmem:[%s10672_s1 + $0x188] sm:$0xff] }
 0x1ae   : > { %4355 = vperm.xlu0 %7313, %v4281_v48   ;;  %v7316_v15 = vld [vmem:[%s10674_s3] ss:$16 sps:$4 sm:$0xff]   ;;  %v7319_v48 = vld [vmem:[%s10674_s3 + $0x24] ss:$16 sps:$4 sm:$0xff]  }
 0x1af   : > { %7297 = vset.pattern.permute.xlu1 %v10697_v40  ;;  %3281 = vmatprep.subr.bf16.mxu0 %v2194_v27  ;;  %v1969_v50 = vmax.f32 %v1841_v30, 0.0  ;;  %v1970_v44 = vmax.f32 %v1842_v1, 0.0  ;;  %v7708_v49 = vld [vmem:[%s10672_s1 + $0x180] sm:$0xff]  ;;  %v4317_v27 = vld [vmem:[%s10677_s6 + $0x130] sm:$0xff]  ;;  %v1205_v1 = vmul.f32 %v8224_v59, %v8489_v8 }
 0x1b0   : > { %1056 = vperm.xlu1 %7297, %v383_v7   ;;  %v1619_v20 = vpop.permute.xlu1 %1618  ;;  %3282 = vmatpush1.bf16.msra.mxu0 %v2193_v12  ;;  %v7321_v12 = vld [vmem:[%s10674_s3 + $0x20] ss:$16 sps:$4 sm:$0xff]   ;;  %v7322_v30 = vld [vmem:[%s10674_s3 + $0x44] ss:$16 sps:$4 sm:$0xff]  }
 0x1b1   : > { %v1843_v3 = vadd.f32 %v1619_v20, %v1331_v17  ;;  %v1844_v29 = vadd.f32 %v1619_v20, %v1332_v57  ;;  %v8913_v17 = vpop.permute.xlu0 %1758  ;;  %v1206_v57 = vmul.f32 %v8226_v61, %v8489_v8  ;;  %v804_v20 = vmul.f32 %v8235_v5, %v8666_v10  ;;  %v1443_v8 = vld [vmem:[%s10673_s2 + $0x170] sm:$0xff] }
 0x1b2   : > { %4515 = vperm.xlu0 %7313, %v4313_v53   ;;  %v803_v53 = vmul.f32 %v8232_v19, %v8666_v10 }
 0x1b3   : > { %v1971_v25 = vmax.f32 %v1843_v3, 0.0  ;;  %v1972_v13 = vmax.f32 %v1844_v29, 0.0  ;;  %v4287_v29 = vld [vmem:[%s10677_s6 + $0x40] sm:$0xff] }
 0x1b4   : > { %7298 = vset.pattern.permute.xlu1 %v10698_v2  ;;  %v568_v7 = vpop.permute.xlu1 %567 }
 0x1b5   : > { %1683 = vperm.xlu1 %7298, %v1441_v14   ;;  %v2196_v63 = vpack.c.bf16 %v1972_v13, %v1970_v44  ;;  %v2195_v36 = vpack.c.bf16 %v1971_v25, %v1969_v50  ;;  %v1333_v14 = vadd.f32 %v1205_v1, %v803_v53  ;;  %v1334_v50 = vadd.f32 %v1206_v57, %v804_v20  ;;  %v8933_v44 = vpop.permute.xlu0 %1768 }
 0x1b6   : > { %4365 = vperm.xlu0 %7313, %v4283_v47   ;;  %v4319_v47 = vld [vmem:[%s10677_s6 + $0x140] sm:$0xff] }
 0x1b7   : > { %3283 = vmatprep.subr.bf16.mxu0 %v2196_v63  ;;  %v7324_v63 = vld [vmem:[%s10674_s3 + $0x40] ss:$16 sps:$4 sm:$0xff]  }
 0x1b8   : > { %3284 = vmatpush1.bf16.msra.mxu0 %v2195_v36  ;;  %v7325_v36 = vld [vmem:[%s10674_s3 + $0x64] ss:$16 sps:$4 sm:$0xff]  }
 0x1b9   : > { %642 = vperm.xlu1 %7298, %v7708_v49   ;;  %v1001_v24 = vpop.permute.xlu1 %1000  ;;  %v806_v49 = vmul.f32 %v8235_v5, %v568_v7 }
 0x1ba   : > { %4525 = vperm.xlu0 %7313, %v4315_v23   ;;  %v1207_v10 = vmul.f32 %v8224_v59, %v1001_v24  ;;  %v1208_v25 = vmul.f32 %v8226_v61, %v1001_v24  ;;  %v1845_v23 = vadd.f32 %v8694_v43, %v1333_v14  ;;  %v7709_v24 = vld [vmem:[%s10672_s1 + $0x190] sm:$0xff]  ;;  %v809_v14 = vmul.f32 %v8232_v19, %v8678_v45 }
 0x1bb   : > { %3286 = vmatmul.mubr.bf16.vlgmr.msra.gmra.mrb[0].mxu0 %v7316_v15  ;;  %v1846_v15 = vadd.f32 %v8694_v43, %v1334_v50  ;;  %v810_v50 = vmul.f32 %v8235_v5, %v8678_v45  ;;  %v4291_v45 = vld [vmem:[%s10677_s6 + $0x60] sm:$0xff] }
 0x1bc   : > { %3295 = vmatprep.mubr.bf16.mxu0 %v7319_v48  ;;  %v805_v48 = vmul.f32 %v8232_v19, %v568_v7  ;;  %v387_v7 = vld [vmem:[%s10672_s1 + $0x198] sm:$0xff] }
 0x1bd   : > { %647 = vperm.xlu1 %7298, %v385_v22   ;;  %v1974_v1 = vmax.f32 %v1846_v15, 0.0 }
 0x1be   : > { %4375 = vperm.xlu0 %7313, %v4285_v38   ;;  %v8905_v31 = vpop.permute.xlu1 %572  ;;  %v1336_v38 = vadd.f32 %v1208_v25, %v806_v49 }
 0x1c1   : > { %7299 = vset.pattern.permute.xlu1 %v10697_v40 }
 0x1c2   : > { %4535 = vperm.xlu0 %7313, %v4317_v27   ;;  %1064 = vperm.xlu1 %7299, %v385_v22   ;;  %v1335_v22 = vadd.f32 %v1207_v10, %v805_v48  ;;  %v4289_v27 = vld [vmem:[%s10677_s6 + $0x50] sm:$0xff] }
 0x1c3   : > { %v1005_v3 = vpop.permute.xlu1 %1004  ;;  %3296 = vmatmul.mubr.bf16.gmra.mrb[4].mxu0 %v7321_v12  ;;  %v8957_v12 = vpop.permute.xlu0 %2295  ;;  %v7328_v48 = vld [vmem:[%s10674_s3 + $0x84] ss:$16 sps:$4 sm:$0xff]  }
 0x1c4   : > { %3305 = vmatprep.mubr.bf16.mxu0 %v7322_v30  ;;  %v1973_v30 = vmax.f32 %v1845_v23, 0.0  ;;  %v7327_v23 = vld [vmem:[%s10674_s3 + $0x60] ss:$16 sps:$4 sm:$0xff]   ;;  %v1210_v49 = vmul.f32 %v8226_v61, %v1005_v3 }
 0x1c6   : > { %4385 = vperm.xlu0 %7313, %v4287_v29   ;;  %7300 = vset.pattern.permute.xlu1 %v10698_v2 }
 0x1c7   : > { %1693 = vperm.xlu1 %7300, %v1443_v8   ;;  %v1009_v13 = vpop.permute.xlu1 %1008  ;;  %v4321_v8 = vld [vmem:[%s10677_s6 + $0x150] sm:$0xff]  ;;  %v8976_v15 = vpop.permute.xlu0 %2305 }
 0x1c8   : > { %v1211_v25 = vmul.f32 %v8224_v59, %v1009_v13 }
 0x1ca   : > { %4545 = vperm.xlu0 %7313, %v4319_v47   ;;  %v1212_v47 = vmul.f32 %v8226_v61, %v1009_v13  ;;  %v1209_v13 = vmul.f32 %v8224_v59, %v1005_v3  ;;  %v4323_v3 = vld [vmem:[%s10677_s6 + $0x160] sm:$0xff] }
 0x1cb   : > { %652 = vperm.xlu1 %7300, %v7709_v24   ;;  %3306 = vmatmul.mubr.bf16.gmra.mrb[8].mxu0 %v7324_v63  ;;  %v1339_v24 = vadd.f32 %v1211_v25, %v809_v14  ;;  %v4293_v25 = vld [vmem:[%s10677_s6 + $0x70] sm:$0xff] }
 0x1cc   : > { %v1629_v43 = vpop.permute.xlu1 %1628  ;;  %3315 = vmatprep.mubr.bf16.mxu0 %v7325_v36 }
 0x1cd   : > { %v1847_v57 = vadd.f32 %v1629_v43, %v1335_v22  ;;  %v1848_v53 = vadd.f32 %v1629_v43, %v1336_v38  ;;  %v1340_v22 = vadd.f32 %v1212_v47, %v810_v50  ;;  %v807_v43 = vmul.f32 %v8232_v19, %v8905_v31 }
 0x1ce   : > { %4395 = vperm.xlu0 %7313, %v4289_v27   ;;  %v1445_v27 = vld [vmem:[%s10673_s2 + $0x180] sm:$0xff] }
 0x1cf   : > { %v1975_v20 = vmax.f32 %v1847_v57, 0.0  ;;  %v1976_v29 = vmax.f32 %v1848_v53, 0.0  ;;  %657 = vperm.xlu1 %7300, %v387_v7   ;;  %v1337_v57 = vadd.f32 %v1209_v13, %v807_v43  ;;  %v389_v13 = vld [vmem:[%s10672_s1 + $0x1a8] sm:$0xff] }
 0x1d0   : > { %v8969_v10 = vpop.permute.xlu1 %587 }
 0x1d1   : > { %v2197_v63 = vpack.c.bf16 %v1975_v20, %v1973_v30  ;;  %v2198_v36 = vpack.c.bf16 %v1976_v29, %v1974_v1  ;;  %v8997_v30 = vpop.permute.xlu0 %2315  ;;  %v1851_v1 = vadd.f32 %v8726_v58, %v1339_v24  ;;  %v1852_v20 = vadd.f32 %v8726_v58, %v1340_v22  ;;  %v7330_v29 = vld [vmem:[%s10674_s3 + $0x80] ss:$16 sps:$4 sm:$0xff]  }
 0x1d2   : > { %4555 = vperm.xlu0 %7313, %v4321_v8   ;;  %v7331_v8 = vld [vmem:[%s10674_s3 + $0xa4] ss:$16 sps:$4 sm:$0xff]  }
 0x1d3   : > { %7301 = vset.pattern.permute.xlu1 %v10697_v40  ;;  %3606 = vmatprep.subr.bf16.mxu0 %v2198_v36  ;;  %v1979_v36 = vmax.f32 %v1851_v1, 0.0  ;;  %v7710_v58 = vld [vmem:[%s10672_s1 + $0x1a0] sm:$0xff]  ;;  %v4325_v24 = vld [vmem:[%s10677_s6 + $0x170] sm:$0xff] }
 0x1d4   : > { %1072 = vperm.xlu1 %7301, %v387_v7   ;;  %3607 = vmatpush1.bf16.msra.mxu0 %v2197_v63  ;;  %v808_v7 = vmul.f32 %v8235_v5, %v8905_v31  ;;  %v4295_v1 = vld [vmem:[%s10677_s6 + $0x80] sm:$0xff] }
 0x1d5   : > { %v1017_v38 = vpop.permute.xlu1 %1016  ;;  %3316 = vmatmul.mubr.bf16.gmra.mrb[12].mxu0 %v7327_v23  ;;  %v1980_v23 = vmax.f32 %v1852_v20, 0.0  ;;  %v1214_v20 = vmul.f32 %v8226_v61, %v8499_v35 }
 0x1d6   : > { %4405 = vperm.xlu0 %7313, %v4291_v45   ;;  %3325 = vmatprep.mubr.bf16.mxu0 %v7328_v48  ;;  %v1338_v53 = vadd.f32 %v1210_v49, %v808_v7  ;;  %v9014_v48 = vpop.permute.xlu0 %2325  ;;  %v1215_v7 = vmul.f32 %v8224_v59, %v1017_v38 }
 0x1d8   : > { %7302 = vset.pattern.permute.xlu1 %v10698_v2 }
 0x1d9   : > { %1703 = vperm.xlu1 %7302, %v1445_v27   ;;  %v7333_v27 = vld [vmem:[%s10674_s3 + $0xa0] ss:$16 sps:$4 sm:$0xff]  }
 0x1da   : > { %4565 = vperm.xlu0 %7313, %v4323_v3   ;;  %v1634_v31 = vpop.permute.xlu1 %1633  ;;  %v1216_v3 = vmul.f32 %v8226_v61, %v1017_v38  ;;  %v812_v38 = vmul.f32 %v8235_v5, %v8713_v18 }
 0x1db   : > { %v1849_v14 = vadd.f32 %v1634_v31, %v1337_v57  ;;  %v1850_v50 = vadd.f32 %v1634_v31, %v1338_v53  ;;  %v7334_v57 = vld [vmem:[%s10674_s3 + $0xc4] ss:$16 sps:$4 sm:$0xff]   ;;  %v1213_v53 = vmul.f32 %v8224_v59, %v8499_v35  ;;  %v9043_v31 = vpop.permute.xlu0 %2335 }
 0x1dd   : > { %v1977_v47 = vmax.f32 %v1849_v14, 0.0  ;;  %v1978_v63 = vmax.f32 %v1850_v50, 0.0  ;;  %662 = vperm.xlu1 %7302, %v7710_v58   ;;  %3326 = vmatmul.mubr.bf16.gmra.mrb[16].mxu0 %v7330_v29  ;;  %v811_v29 = vmul.f32 %v8232_v19, %v8713_v18  ;;  %v814_v14 = vmul.f32 %v8235_v5, %v8969_v10  ;;  %v1447_v18 = vld [vmem:[%s10673_s2 + $0x190] sm:$0xff] }
 0x1de   : > { %4415 = vperm.xlu0 %7313, %v4293_v25   ;;  %v9016_v45 = vpop.permute.xlu1 %592  ;;  %3335 = vmatprep.mubr.bf16.mxu0 %v7331_v8  ;;  %v813_v8 = vmul.f32 %v8232_v19, %v8969_v10  ;;  %v7336_v10 = vld [vmem:[%s10674_s3 + $0xc0] ss:$16 sps:$4 sm:$0xff]  }
 0x1df   : > { %v2199_v49 = vpack.c.bf16 %v1979_v36, %v1977_v47  ;;  %v2200_v22 = vpack.c.bf16 %v1980_v23, %v1978_v63  ;;  %v1344_v50 = vadd.f32 %v1216_v3, %v814_v14  ;;  %v4327_v47 = vld [vmem:[%s10677_s6 + $0x180] sm:$0xff]  ;;  %v1341_v63 = vadd.f32 %v1213_v53, %v811_v29  ;;  %v9061_v58 = vpop.permute.xlu0 %2345  ;;  %v7711_v53 = vld [vmem:[%s10672_s1 + $0x1b0] sm:$0xff] }
 0x1e0   : > { %v1343_v35 = vadd.f32 %v1215_v7, %v813_v8  ;;  %v1342_v36 = vadd.f32 %v1214_v20, %v812_v38  ;;  %v7337_v23 = vld [vmem:[%s10674_s3 + $0xe4] ss:$16 sps:$4 sm:$0xff]   ;;  %v391_v8 = vld [vmem:[%s10672_s1 + $0x1b8] sm:$0xff] }
 0x1e1   : > { %667 = vperm.xlu1 %7302, %v389_v13   ;;  %3608 = vmatprep.subr.bf16.mxu0 %v2200_v22  ;;  %v4329_v20 = vld [vmem:[%s10677_s6 + $0x190] sm:$0xff] }
 0x1e2   : > { %4575 = vperm.xlu0 %7313, %v4325_v24   ;;  %v9027_v43 = vpop.permute.xlu1 %597  ;;  %3609 = vmatpush1.bf16.msra.mxu0 %v2199_v49  ;;  %v4297_v49 = vld [vmem:[%s10677_s6 + $0x90] sm:$0xff]  ;;  %v1856_v24 = vadd.f32 %v8739_v54, %v1344_v50 }
 0x1e3   : > { %v7339_v50 = vld [vmem:[%s10674_s3 + $0xe0] ss:$16 sps:$4 sm:$0xff]  }
 0x1e4   : > { %v1984_v29 = vmax.f32 %v1856_v24, 0.0  ;;  %v4331_v24 = vld [vmem:[%s10677_s6 + $0x1a0] sm:$0xff] }
 0x1e5   : > { %7303 = vset.pattern.permute.xlu1 %v10697_v40  ;;  %3336 = vmatmul.mubr.bf16.gmra.mrb[20].mxu0 %v7333_v27 }
 0x1e6   : > { %4425 = vperm.xlu0 %7313, %v4295_v1   ;;  %1080 = vperm.xlu1 %7303, %v389_v13   ;;  %v1855_v13 = vadd.f32 %v8739_v54, %v1343_v35  ;;  %v9078_v54 = vpop.permute.xlu0 %2355 }
 0x1e7   : > { %v1025_v25 = vpop.permute.xlu1 %1024  ;;  %3345 = vmatprep.mubr.bf16.mxu0 %v7334_v57 }
 0x1e8   : > { %v1983_v57 = vmax.f32 %v1855_v13, 0.0  ;;  %v817_v13 = vmul.f32 %v8232_v19, %v9027_v43 }
 0x1ea   : > { %4585 = vperm.xlu0 %7313, %v4327_v47   ;;  %7304 = vset.pattern.permute.xlu1 %v10698_v2  ;;  %v7340_v47 = vld [vmem:[%s10674_s3 + $0x104] ss:$16 sps:$4 sm:$0xff]  }
 0x1eb   : > { %1713 = vperm.xlu1 %7304, %v1447_v18   ;;  %v4299_v18 = vld [vmem:[%s10677_s6 + $0xa0] sm:$0xff] }
 0x1ec   : > { %v1644_v22 = vpop.permute.xlu1 %1643 }
 0x1ed   : > { %v1853_v27 = vadd.f32 %v1644_v22, %v1341_v63  ;;  %v1854_v7 = vadd.f32 %v1644_v22, %v1342_v36  ;;  %3346 = vmatmul.mubr.bf16.gmra.mrb[24].mxu0 %v7336_v10  ;;  %v1219_v36 = vmul.f32 %v8224_v59, %v1025_v25  ;;  %v1220_v10 = vmul.f32 %v8226_v61, %v1025_v25 }
 0x1ee   : > { %4435 = vperm.xlu0 %7313, %v4297_v49   ;;  %3355 = vmatprep.mubr.bf16.mxu0 %v7337_v23  ;;  %v9098_v23 = vpop.permute.xlu0 %2365  ;;  %v818_v49 = vmul.f32 %v8235_v5, %v9027_v43  ;;  %v1217_v25 = vmul.f32 %v8224_v59, %v8515_v9  ;;  %v815_v22 = vmul.f32 %v8232_v19, %v9016_v45 }
 0x1ef   : > { %v1981_v3 = vmax.f32 %v1853_v27, 0.0  ;;  %v1982_v1 = vmax.f32 %v1854_v7, 0.0  ;;  %672 = vperm.xlu1 %7304, %v7711_v53   ;;  %v1218_v27 = vmul.f32 %v8226_v61, %v8515_v9  ;;  %v816_v7 = vmul.f32 %v8235_v5, %v9016_v45  ;;  %v1449_v53 = vld [vmem:[%s10673_s2 + $0x1a0] sm:$0xff]  ;;  %v4301_v9 = vld [vmem:[%s10677_s6 + $0xb0] sm:$0xff] }
 0x1f0   : > { %v9080_v38 = vpop.permute.xlu1 %602  ;;  %v1347_v43 = vadd.f32 %v1219_v36, %v817_v13  ;;  %v4333_v36 = vld [vmem:[%s10677_s6 + $0x1b0] sm:$0xff] }
 0x1f1   : > { %v2201_v14 = vpack.c.bf16 %v1983_v57, %v1981_v3  ;;  %v2202_v35 = vpack.c.bf16 %v1984_v29, %v1982_v1  ;;  %v1348_v3 = vadd.f32 %v1220_v10, %v818_v49  ;;  %v7342_v57 = vld [vmem:[%s10674_s3 + $0x100] ss:$16 sps:$4 sm:$0xff]   ;;  %v1345_v29 = vadd.f32 %v1217_v25, %v815_v22 }
 0x1f2   : > { %4595 = vperm.xlu0 %7313, %v4329_v20   ;;  %v7343_v20 = vld [vmem:[%s10674_s3 + $0x124] ss:$16 sps:$4 sm:$0xff]   ;;  %v9128_v45 = vpop.permute.xlu0 %2375 }
 0x1f3   : > { %677 = vperm.xlu1 %7304, %v391_v8   ;;  %3610 = vmatprep.subr.bf16.mxu0 %v2202_v35  ;;  %v1860_v35 = vadd.f32 %v8761_v4, %v1348_v3 }
 0x1f4   : > { %v9094_v63 = vpop.permute.xlu1 %607  ;;  %3611 = vmatpush1.bf16.msra.mxu0 %v2201_v14  ;;  %v1346_v14 = vadd.f32 %v1218_v27, %v816_v7  ;;  %v393_v27 = vld [vmem:[%s10672_s1 + $0x1c8] sm:$0xff] }
 0x1f5   : > { %3356 = vmatmul.mubr.bf16.gmra.mrb[28].mxu0 %v7339_v50  ;;  %v1988_v25 = vmax.f32 %v1860_v35, 0.0  ;;  %v821_v35 = vmul.f32 %v8232_v19, %v9094_v63 }
 0x1f6   : > { %4445 = vperm.xlu0 %7313, %v4299_v18   ;;  %3365 = vmatprep.mubr.bf16.mxu0 %v7340_v47 }
 0x1f7   : > { %7305 = vset.pattern.permute.xlu1 %v10697_v40 }
 0x1f8   : > { %1088 = vperm.xlu1 %7305, %v391_v8   ;;  %v1859_v8 = vadd.f32 %v8761_v4, %v1347_v43  ;;  %v9139_v4 = vpop.permute.xlu0 %2385  ;;  %v4303_v43 = vld [vmem:[%s10677_s6 + $0xc0] sm:$0xff] }
 0x1f9   : > { %v1033_v1 = vpop.permute.xlu1 %1032 }
 0x1fa   : > { %4605 = vperm.xlu0 %7313, %v4331_v24   ;;  %v1987_v49 = vmax.f32 %v1859_v8, 0.0  ;;  %v7712_v24 = vld [vmem:[%s10672_s1 + $0x1c0] sm:$0xff] }
 0x1fb   : > { %v4335_v8 = vld [vmem:[%s10677_s6 + $0x1c0] sm:$0xff] }
 0x1fc   : > { %7306 = vset.pattern.permute.xlu1 %v10698_v2 }
 0x1fd   : > { %1723 = vperm.xlu1 %7306, %v1449_v53   ;;  %3366 = vmatmul.mubr.bf16.gmra.mrb[32].mxu0 %v7342_v57  ;;  %v7345_v57 = vld [vmem:[%s10674_s3 + $0x120] ss:$16 sps:$4 sm:$0xff]   ;;  %v7346_v53 = vld [vmem:[%s10674_s3 + $0x144] ss:$16 sps:$4 sm:$0xff]  }
 0x1fe   : > { %4455 = vperm.xlu0 %7313, %v4301_v9   ;;  %v1654_v50 = vpop.permute.xlu1 %1653  ;;  %3375 = vmatprep.mubr.bf16.mxu0 %v7343_v20  ;;  %v1223_v9 = vmul.f32 %v8224_v59, %v1033_v1 }
 0x1ff   : > { %v1857_v47 = vadd.f32 %v1654_v50, %v1345_v29  ;;  %v1858_v18 = vadd.f32 %v1654_v50, %v1346_v14  ;;  %v1224_v29 = vmul.f32 %v8226_v61, %v1033_v1  ;;  %v9162_v14 = vpop.permute.xlu0 %2395  ;;  %v822_v50 = vmul.f32 %v8235_v5, %v9094_v63  ;;  %v4305_v63 = vld [vmem:[%s10677_s6 + $0xd0] sm:$0xff] }
 0x200   : > { %v819_v1 = vmul.f32 %v8232_v19, %v9080_v38 }
 0x201   : > { %v1985_v10 = vmax.f32 %v1857_v47, 0.0  ;;  %v1986_v13 = vmax.f32 %v1858_v18, 0.0  ;;  %682 = vperm.xlu1 %7306, %v7712_v24   ;;  %v1221_v47 = vmul.f32 %v8224_v59, %v8526_v51  ;;  %v1222_v18 = vmul.f32 %v8226_v61, %v8526_v51  ;;  %v7348_v24 = vld [vmem:[%s10674_s3 + $0x140] ss:$16 sps:$4 sm:$0xff]   ;;  %v7349_v51 = vld [vmem:[%s10674_s3 + $0x164] ss:$16 sps:$4 sm:$0xff]  }
 0x202   : > { %4615 = vperm.xlu0 %7313, %v4333_v36   ;;  %v9141_v22 = vpop.permute.xlu1 %612  ;;  %v820_v36 = vmul.f32 %v8235_v5, %v9080_v38 }
 0x203   : > { %v2203_v7 = vpack.c.bf16 %v1987_v49, %v1985_v10  ;;  %v2204_v3 = vpack.c.bf16 %v1988_v25, %v1986_v13  ;;  %v1351_v10 = vadd.f32 %v1223_v9, %v821_v35  ;;  %v1352_v13 = vadd.f32 %v1224_v29, %v822_v50  ;;  %v1451_v25 = vld [vmem:[%s10673_s2 + $0x1b0] sm:$0xff]  ;;  %v9189_v38 = vpop.permute.xlu0 %2405 }
 0x205   : > { %687 = vperm.xlu1 %7306, %v393_v27   ;;  %3612 = vmatprep.subr.bf16.mxu0 %v2204_v3  ;;  %v4337_v3 = vld [vmem:[%s10677_s6 + $0x1d0] sm:$0xff] }
 0x206   : > { %4465 = vperm.xlu0 %7313, %v4303_v43   ;;  %v9155_v20 = vpop.permute.xlu1 %617  ;;  %3613 = vmatpush1.bf16.msra.mxu0 %v2203_v7  ;;  %v1863_v7 = vadd.f32 %v8771_v41, %v1351_v10  ;;  %v1350_v43 = vadd.f32 %v1222_v18, %v820_v36  ;;  %v395_v10 = vld [vmem:[%s10672_s1 + $0x1d8] sm:$0xff] }
 0x207   : > { %3376 = vmatmul.mubr.bf16.gmra.mrb[36].mxu0 %v7345_v57  ;;  %v1864_v57 = vadd.f32 %v8771_v41, %v1352_v13  ;;  %v9203_v41 = vpop.permute.xlu0 %2415 }
 0x208   : > { %3385 = vmatprep.mubr.bf16.mxu0 %v7346_v53  ;;  %v1991_v50 = vmax.f32 %v1863_v7, 0.0 }
 0x209   : > { %7307 = vset.pattern.permute.xlu1 %v10697_v40  ;;  %v1992_v18 = vmax.f32 %v1864_v57, 0.0  ;;  %v825_v57 = vmul.f32 %v8232_v19, %v9155_v20 }
 0x20a   : > { %4625 = vperm.xlu0 %7313, %v4335_v8   ;;  %1096 = vperm.xlu1 %7307, %v393_v27   ;;  %v1349_v27 = vadd.f32 %v1221_v47, %v819_v1  ;;  %v7713_v47 = vld [vmem:[%s10672_s1 + $0x1d0] sm:$0xff]  ;;  %v4307_v1 = vld [vmem:[%s10677_s6 + $0xe0] sm:$0xff] }
 0x20b   : > { %v1041_v49 = vpop.permute.xlu1 %1040 }
 0x20c   : > { %v1227_v7 = vmul.f32 %v8224_v59, %v1041_v49 }
 0x20e   : > { %4475 = vperm.xlu0 %7313, %v4305_v63   ;;  %7308 = vset.pattern.permute.xlu1 %v10698_v2 }
 0x20f   : > { %1733 = vperm.xlu1 %7308, %v1451_v25   ;;  %3386 = vmatmul.mubr.bf16.gmra.mrb[40].mxu0 %v7348_v24  ;;  %v7351_v24 = vld [vmem:[%s10674_s3 + $0x160] ss:$16 sps:$4 sm:$0xff]   ;;  %v7352_v25 = vld [vmem:[%s10674_s3 + $0x184] ss:$16 sps:$4 sm:$0xff]  }
 0x210   : > { %v1664_v53 = vpop.permute.xlu1 %1663  ;;  %3395 = vmatprep.mubr.bf16.mxu0 %v7349_v51  ;;  %v4339_v51 = vld [vmem:[%s10677_s6 + $0x1e0] sm:$0xff] }
 0x211   : > { %v1861_v9 = vadd.f32 %v1664_v53, %v1349_v27  ;;  %v1862_v29 = vadd.f32 %v1664_v53, %v1350_v43  ;;  %v1228_v43 = vmul.f32 %v8226_v61, %v1041_v49  ;;  %v826_v53 = vmul.f32 %v8235_v5, %v9155_v20 }
 0x212   : > { %4635 = vperm.xlu0 %7313, %v4337_v3   ;;  %v9221_v3 = vpop.permute.xlu0 %2425  ;;  %v1225_v49 = vmul.f32 %v8224_v59, %v8536_v39  ;;  %v1355_v20 = vadd.f32 %v1227_v7, %v825_v57  ;;  %v6202_v57 = vld [vmem:[#allocation2] sm:$0x1] }
 0x213   : > { %v1989_v8 = vmax.f32 %v1861_v9, 0.0  ;;  %v1990_v35 = vmax.f32 %v1862_v29, 0.0  ;;  %692 = vperm.xlu1 %7308, %v7713_v47   ;;  %10701 = vst [vmem:[#allocation7_spill] sm:$0xff] %v9221_v3  ;;  %v4309_v9 = vld [vmem:[%s10677_s6 + $0xf0] sm:$0xff]  ;;  %v823_v29 = vmul.f32 %v8232_v19, %v9141_v22 }
 0x214   : > { %v9205_v36 = vpop.permute.xlu1 %622 }
 0x215   : > { %v2205_v13 = vpack.c.bf16 %v1991_v50, %v1989_v8  ;;  %v2206_v63 = vpack.c.bf16 %v1992_v18, %v1990_v35  ;;  %v1226_v8 = vmul.f32 %v8226_v61, %v8536_v39  ;;  %v824_v35 = vmul.f32 %v8235_v5, %v9141_v22  ;;  %v1453_v18 = vld [vmem:[%s10673_s2 + $0x1c0] sm:$0xff]  ;;  %v4341_v39 = vld [vmem:[%s10677_s6 + $0x1f0] sm:$0xff] }
 0x216   : > { %4485 = vperm.xlu0 %7313, %v4307_v1   ;;  %v1356_v50 = vadd.f32 %v1228_v43, %v826_v53  ;;  %v7354_v1 = vld [vmem:[%s10674_s3 + $0x180] ss:$16 sps:$4 sm:$0xff]   ;;  %v9251_v22 = vpop.permute.xlu0 %2435 }
 0x217   : > { %697 = vperm.xlu1 %7308, %v395_v10   ;;  %3614 = vmatprep.subr.bf16.mxu0 %v2206_v63  ;;  %v1867_v63 = vadd.f32 %v8787_v16, %v1355_v20 }
 0x218   : > { %v628_v27 = vpop.permute.xlu1 %627  ;;  %3615 = vmatpush1.bf16.msra.mxu0 %v2205_v13  ;;  %v1353_v13 = vadd.f32 %v1225_v49, %v823_v29  ;;  %v7714_v49 = vld [vmem:[%s10672_s1 + $0x1e0] sm:$0xff] }
 0x219   : > { %3396 = vmatmul.mubr.bf16.gmra.mrb[44].mxu0 %v7351_v24  ;;  %v1354_v24 = vadd.f32 %v1226_v8, %v824_v35  ;;  %v1995_v3 = vmax.f32 %v1867_v63, 0.0  ;;  %v397_v8 = vld [vmem:[%s10672_s1 + $0x1e8] sm:$0xff]  ;;  %v830_v63 = vmul.f32 %v8235_v5, %v628_v27 }
 0x21a   : > { %4645 = vperm.xlu0 %7313, %v4339_v51   ;;  %3405 = vmatprep.mubr.bf16.mxu0 %v7352_v25  ;;  %v1868_v25 = vadd.f32 %v8787_v16, %v1356_v50  ;;  %v9259_v20 = vpop.permute.xlu0 %2445 }
 0x21b   : > { %7309 = vset.pattern.permute.xlu1 %v10697_v40 }
 0x21c   : > { %1104 = vperm.xlu1 %7309, %v395_v10   ;;  %v7355_v10 = vld [vmem:[%s10674_s3 + $0x1a4] ss:$16 sps:$4 sm:$0xff]   ;;  %v1996_v29 = vmax.f32 %v1868_v25, 0.0  ;;  %v827_v25 = vmul.f32 %v8232_v19, %v9205_v36 }
 0x21d   : > { %v1049_v47 = vpop.permute.xlu1 %1048 }
 0x21e   : > { %4495 = vperm.xlu0 %7313, %v4309_v9  }
 0x220   : > { %7310 = vset.pattern.permute.xlu1 %v10698_v2 }
 0x221   : > { %1743 = vperm.xlu1 %7310, %v1453_v18   ;;  %3406 = vmatmul.mubr.bf16.gmra.mrb[48].mxu0 %v7354_v1  ;;  %v7357_v1 = vld [vmem:[%s10674_s3 + $0x1a0] ss:$16 sps:$4 sm:$0xff]   ;;  %v7358_v18 = vld [vmem:[%s10674_s3 + $0x1c4] ss:$16 sps:$4 sm:$0xff]  }
 0x222   : > { %4655 = vperm.xlu0 %7313, %v4341_v39   ;;  %v1674_v51 = vpop.permute.xlu1 %1673  ;;  %3415 = vmatprep.mubr.bf16.mxu0 %v7355_v10  ;;  %v1231_v39 = vmul.f32 %v8224_v59, %v1049_v47 }
 0x223   : > { %v1865_v7 = vadd.f32 %v1674_v51, %v1353_v13  ;;  %v1866_v43 = vadd.f32 %v1674_v51, %v1354_v24  ;;  %v1232_v13 = vmul.f32 %v8226_v61, %v1049_v47  ;;  %v1229_v24 = vmul.f32 %v8224_v59, %v8546_v21 }
 0x224   : > { %v1230_v51 = vmul.f32 %v8226_v61, %v8546_v21  ;;  %v828_v47 = vmul.f32 %v8235_v5, %v9205_v36 }
 0x225   : > { %v1993_v53 = vmax.f32 %v1865_v7, 0.0  ;;  %v1994_v9 = vmax.f32 %v1866_v43, 0.0  ;;  %702 = vperm.xlu1 %7310, %v7714_v49   ;;  %v1360_v43 = vadd.f32 %v1232_v13, %v830_v63  ;;  %v1357_v21 = vadd.f32 %v1229_v24, %v827_v25  ;;  %v7715_v13 = vld [vmem:[%s10672_s1 + $0x1f0] sm:$0xff] }
 0x226   : > { %6205 = vperm.xlu0 %7313, %v6202_v57   ;;  %v9261_v16 = vpop.permute.xlu1 %632  ;;  %v1358_v49 = vadd.f32 %v1230_v51, %v828_v47  ;;  %v7363_v51 = vld [vmem:[%s10674_s3 + $0x1e0] ss:$16 sps:$4 sm:$0xff]   ;;  %v7364_v47 = vld [vmem:[%s10674_s3 + $0x204] ss:$16 sps:$4 sm:$0xff]  }
 0x227   : > { %v2207_v35 = vpack.c.bf16 %v1995_v3, %v1993_v53  ;;  %v2208_v50 = vpack.c.bf16 %v1996_v29, %v1994_v9  ;;  %v829_v3 = vmul.f32 %v8232_v19, %v628_v27  ;;  %v7360_v27 = vld [vmem:[%s10674_s3 + $0x1c0] ss:$16 sps:$4 sm:$0xff]   ;;  %v7361_v9 = vld [vmem:[%s10674_s3 + $0x1e4] ss:$16 sps:$4 sm:$0xff]   ;;  %v1872_v29 = vadd.f32 %v8806_v42, %v1360_v43 }
 0x228   : > { %v1455_v53 = vld [vmem:[%s10673_s2 + $0x1d0] sm:$0xff] }
 0x229   : > { %707 = vperm.xlu1 %7310, %v397_v8   ;;  %3616 = vmatprep.subr.bf16.mxu0 %v2208_v50  ;;  %v1359_v7 = vadd.f32 %v1231_v39, %v829_v3  ;;  %v2000_v3 = vmax.f32 %v1872_v29, 0.0 }
 0x22a   : > { %v638_v10 = vpop.permute.xlu1 %637  ;;  %3617 = vmatpush1.bf16.msra.mxu0 %v2207_v35 }
 0x22b   : > { %3416 = vmatmul.mubr.bf16.gmra.mrb[52].mxu0 %v7357_v1  ;;  %v1871_v36 = vadd.f32 %v8806_v42, %v1359_v7  ;;  %v399_v42 = vld [vmem:[%s10672_s1 + $0x1f8] sm:$0xff] }
 0x22c   : > { %3425 = vmatprep.mubr.bf16.mxu0 %v7358_v18 }
 0x22d   : > { %7311 = vset.pattern.permute.xlu1 %v10697_v40  ;;  %v1999_v39 = vmax.f32 %v1871_v36, 0.0  ;;  %v831_v36 = vmul.f32 %v8232_v19, %v9261_v16 }
 0x22e   : > { %1112 = vperm.xlu1 %7311, %v397_v8  }
 0x22f   : > { %v1057_v57 = vpop.permute.xlu1 %1056 }
 0x230   : > { %v1235_v43 = vmul.f32 %v8224_v59, %v1057_v57 }
 0x232   : > { %7312 = vset.pattern.permute.xlu1 %v10698_v2 }
 0x233   : > { %1753 = vperm.xlu1 %7312, %v1455_v53   ;;  %3426 = vmatmul.mubr.bf16.gmra.mrb[56].mxu0 %v7360_v27  ;;  %v1236_v27 = vmul.f32 %v8226_v61, %v1057_v57  ;;  %v833_v53 = vmul.f32 %v8232_v19, %v638_v10  ;;  %v832_v57 = vmul.f32 %v8235_v5, %v9261_v16 }
 0x234   : > { %v1684_v8 = vpop.permute.xlu1 %1683  ;;  %3435 = vmatprep.mubr.bf16.mxu0 %v7361_v9  ;;  %v834_v9 = vmul.f32 %v8235_v5, %v638_v10  ;;  %v1457_v10 = vld [vmem:[%s10673_s2 + $0x1e0] sm:$0xff] }
 0x235   : > { %v1869_v35 = vadd.f32 %v1684_v8, %v1357_v21  ;;  %v1870_v50 = vadd.f32 %v1684_v8, %v1358_v49  ;;  %v1233_v21 = vmul.f32 %v8224_v59, %v8561_v46  ;;  %v1234_v49 = vmul.f32 %v8226_v61, %v8561_v46 }
 0x236   : > { %v1363_v29 = vadd.f32 %v1235_v43, %v833_v53  ;;  %v1364_v8 = vadd.f32 %v1236_v27, %v834_v9  ;;  %v7369_v53 = vld [vmem:[%s10674_s3 + $0x220] ss:$16 sps:$4 sm:$0xff]   ;;  %v7370_v9 = vld [vmem:[%s10674_s3 + $0x244] ss:$16 sps:$4 sm:$0xff]  }
 0x237   : > { %v1997_v1 = vmax.f32 %v1869_v35, 0.0  ;;  %v1998_v18 = vmax.f32 %v1870_v50, 0.0  ;;  %712 = vperm.xlu1 %7312, %v7715_v13   ;;  %v7367_v50 = vld [vmem:[%s10674_s3 + $0x224] ss:$16 sps:$4 sm:$0xff]   ;;  %v1361_v46 = vadd.f32 %v1233_v21, %v831_v36  ;;  %v2230_v36 = vld [vmem:[%s10675_s4 + $0x8] sm:$0xff] }
 0x238   : > { %v9300_v63 = vpop.permute.xlu1 %642  ;;  %v1875_v16 = vadd.f32 %v8817_v56, %v1363_v29  ;;  %v1459_v13 = vld [vmem:[%s10673_s2 + $0x1f0] sm:$0xff] }
 0x239   : > { %v2209_v24 = vpack.c.bf16 %v1999_v39, %v1997_v1  ;;  %v2210_v25 = vpack.c.bf16 %v2000_v3, %v1998_v18  ;;  %v1362_v1 = vadd.f32 %v1234_v49, %v832_v57  ;;  %v1876_v18 = vadd.f32 %v8817_v56, %v1364_v8  ;;  %v1460_v56 = vld [vmem:[%s10673_s2 + $0x1f8] sm:$0xff] }
 0x23b   : > { %717 = vperm.xlu1 %7312, %v399_v42   ;;  %3618 = vmatprep.subr.bf16.mxu0 %v2210_v25 }
 0x23c   : > { %v648_v7 = vpop.permute.xlu1 %647  ;;  %3619 = vmatpush1.bf16.msra.mxu0 %v2209_v24 }
 0x23d   : > { %3436 = vmatmul.mubr.bf16.gmra.mrb[60].mxu0 %v7363_v51  ;;  %v2003_v51 = vmax.f32 %v1875_v16, 0.0  ;;  %v837_v29 = vmul.f32 %v8232_v19, %v648_v7  ;;  %v838_v8 = vmul.f32 %v8235_v5, %v648_v7 }
 0x23e   : > { %3445 = vmatprep.mubr.bf16.mxu0 %v7364_v47 }
 0x23f   : > { %7314 = vset.pattern.permute.xlu1 %v10697_v40  ;;  %v7366_v40 = vld [vmem:[%s10674_s3 + $0x200] ss:$16 sps:$4 sm:$0xff]  }
 0x240   : > { %1120 = vperm.xlu1 %7314, %v399_v42  }
 0x241   : > { %v1065_v35 = vpop.permute.xlu1 %1064 }
 0x242   : > { %v1239_v49 = vmul.f32 %v8224_v59, %v1065_v35  ;;  %v1240_v57 = vmul.f32 %v8226_v61, %v1065_v35  ;;  %v835_v35 = vmul.f32 %v8232_v19, %v9300_v63 }
 0x244   : > { %7315 = vset.pattern.permute.xlu1 %v10698_v2  ;;  %v2004_v2 = vmax.f32 %v1876_v18, 0.0  ;;  %v1367_v16 = vadd.f32 %v1239_v49, %v837_v29  ;;  %v7372_v18 = vld [vmem:[%s10674_s3 + $0x240] ss:$16 sps:$4 sm:$0xff]   ;;  %v2238_v29 = vld [vmem:[%s10675_s4 + $0x48] sm:$0xff] }
 0x245   : > { %1763 = vperm.xlu1 %7315, %v1457_v10   ;;  %3446 = vmatmul.mubr.bf16.gmra.mrb[64].mxu0 %v7366_v40  ;;  %v1237_v40 = vmul.f32 %v8224_v59, %v8567_v28  ;;  %v1238_v10 = vmul.f32 %v8226_v61, %v8567_v28  ;;  %v7373_v28 = vld [vmem:[%s10674_s3 + $0x264] ss:$16 sps:$4 sm:$0xff]  }
 0x246   : > { %v1694_v39 = vpop.permute.xlu1 %1693  ;;  %3455 = vmatprep.mubr.bf16.mxu0 %v7367_v50  ;;  %v2232_v50 = vld [vmem:[%s10675_s4 + $0x18] sm:$0xff] }
 0x247   : > { %v1873_v3 = vadd.f32 %v1694_v39, %v1361_v46  ;;  %v1874_v42 = vadd.f32 %v1694_v39, %v1362_v1  ;;  %v836_v46 = vmul.f32 %v8235_v5, %v9300_v63  ;;  %v1368_v1 = vadd.f32 %v1240_v57, %v838_v8  ;;  %v2234_v39 = vld [vmem:[%s10675_s4 + $0x28] sm:$0xff] }
 0x249   : > { %v2001_v24 = vmax.f32 %v1873_v3, 0.0  ;;  %v2002_v25 = vmax.f32 %v1874_v42, 0.0  ;;  %1773 = vperm.xlu1 %7315, %v1459_v13   ;;  %v1879_v13 = vadd.f32 %v8830_v11, %v1367_v16  ;;  %v1365_v3 = vadd.f32 %v1237_v40, %v835_v35  ;;  %v7378_v16 = vld [vmem:[%s10674_s3 + $0x280] ss:$16 sps:$4 sm:$0xff]  }
 0x24a   : > { %v9339_v47 = vpop.permute.xlu1 %652  ;;  %v1366_v63 = vadd.f32 %v1238_v10, %v836_v46  ;;  %v1880_v42 = vadd.f32 %v8830_v11, %v1368_v1  ;;  %v7376_v11 = vld [vmem:[%s10674_s3 + $0x284] ss:$16 sps:$4 sm:$0xff]  }
 0x24b   : > { %v2211_v43 = vpack.c.bf16 %v2003_v51, %v2001_v24  ;;  %v2212_v27 = vpack.c.bf16 %v2004_v2, %v2002_v25  ;;  %v2236_v2 = vld [vmem:[%s10675_s4 + $0x38] sm:$0xff]  ;;  %v7379_v1 = vld [vmem:[%s10674_s3 + $0x2a4] ss:$16 sps:$4 sm:$0xff]  }
 0x24d   : > { %1778 = vperm.xlu1 %7315, %v1460_v56   ;;  %3620 = vmatprep.subr.bf16.mxu0 %v2212_v27  ;;  %v2007_v27 = vmax.f32 %v1879_v13, 0.0 }
 0x24e   : > { %v658_v21 = vpop.permute.xlu1 %657  ;;  %3621 = vmatpush1.bf16.msra.mxu0 %v2211_v43 }
 0x24f   : > { %3456 = vmatmul.mubr.bf16.gmra.mrb[68].mxu0 %v7369_v53  ;;  %v2008_v53 = vmax.f32 %v1880_v42, 0.0  ;;  %v841_v35 = vmul.f32 %v8232_v19, %v658_v21  ;;  %v842_v46 = vmul.f32 %v8235_v5, %v658_v21  ;;  %v2242_v21 = vld [vmem:[%s10675_s4 + $0x68] sm:$0xff] }
 0x250   : > { %3465 = vmatprep.mubr.bf16.mxu0 %v7370_v9  ;;  %v7375_v9 = vld [vmem:[%s10674_s3 + $0x260] ss:$16 sps:$4 sm:$0xff]  }
 0x251   : > { %2300 = vperm.xlu1 %7315, %v2230_v36  }
 0x253   : > { %v1073_v7 = vpop.permute.xlu1 %1072 }
 0x254   : > { %v1243_v40 = vmul.f32 %v8224_v59, %v1073_v7  ;;  %v1244_v10 = vmul.f32 %v8226_v61, %v1073_v7  ;;  %v839_v7 = vmul.f32 %v8232_v19, %v9339_v47 }
 0x255   : > { %2310 = vperm.xlu1 %7315, %v2232_v50   ;;  %v2240_v50 = vld [vmem:[%s10675_s4 + $0x58] sm:$0xff] }
 0x257   : > { %3466 = vmatmul.mubr.bf16.gmra.mrb[72].mxu0 %v7372_v18  ;;  %v840_v18 = vmul.f32 %v8235_v5, %v9339_v47 }
 0x258   : > { %v1704_v24 = vpop.permute.xlu1 %1703  ;;  %3475 = vmatprep.mubr.bf16.mxu0 %v7373_v28  ;;  %v1371_v28 = vadd.f32 %v1243_v40, %v841_v35 }
 0x259   : > { %v1877_v25 = vadd.f32 %v1704_v24, %v1365_v3  ;;  %v1878_v51 = vadd.f32 %v1704_v24, %v1366_v63  ;;  %2320 = vperm.xlu1 %7315, %v2234_v39   ;;  %v1372_v39 = vadd.f32 %v1244_v10, %v842_v46  ;;  %v1241_v3 = vmul.f32 %v8224_v59, %v8578_v34 }
 0x25a   : > { %v1242_v63 = vmul.f32 %v8226_v61, %v8578_v34  ;;  %v1883_v42 = vadd.f32 %v8852_v62, %v1371_v28  ;;  %v7381_v34 = vld [vmem:[%s10674_s3 + $0x2a0] ss:$16 sps:$4 sm:$0xff]   ;;  %v2250_v28 = vld [vmem:[%s10675_s4 + $0xa8] sm:$0xff] }
 0x25b   : > { %v2005_v56 = vmax.f32 %v1877_v25, 0.0  ;;  %v2006_v43 = vmax.f32 %v1878_v51, 0.0  ;;  %v1369_v47 = vadd.f32 %v1241_v3, %v839_v7  ;;  %v1884_v25 = vadd.f32 %v8852_v62, %v1372_v39 }
 0x25c   : > { %v9385_v36 = vpop.permute.xlu1 %662  ;;  %v1370_v24 = vadd.f32 %v1242_v63, %v840_v18 }
 0x25d   : > { %v2213_v49 = vpack.c.bf16 %v2007_v27, %v2005_v56  ;;  %2330 = vperm.xlu1 %7315, %v2236_v2   ;;  %v2214_v57 = vpack.c.bf16 %v2008_v53, %v2006_v43  ;;  %v2244_v2 = vld [vmem:[%s10675_s4 + $0x78] sm:$0xff]  ;;  %v7382_v27 = vld [vmem:[%s10674_s3 + $0x2c4] ss:$16 sps:$4 sm:$0xff]   ;;  %v2012_v62 = vmax.f32 %v1884_v25, 0.0  ;;  %v843_v39 = vmul.f32 %v8232_v19, %v9385_v36 }
 0x25f   : > { %3622 = vmatprep.subr.bf16.mxu0 %v2214_v57  ;;  %3476 = vmatmul.mubr.bf16.gmra.mrb[76].mxu0 %v7375_v9  ;;  %v2246_v57 = vld [vmem:[%s10675_s4 + $0x88] sm:$0xff] }
 0x260   : > { %v668_v8 = vpop.permute.xlu1 %667  ;;  %3623 = vmatpush1.bf16.msra.mxu0 %v2213_v49  ;;  %3485 = vmatprep.mubr.bf16.mxu0 %v7376_v11  ;;  %v2011_v11 = vmax.f32 %v1883_v42, 0.0  ;;  %v1245_v42 = vmul.f32 %v8224_v59, %v8586_v26 }
 0x261   : > { %2340 = vperm.xlu1 %7315, %v2238_v29   ;;  %v845_v7 = vmul.f32 %v8232_v19, %v668_v8  ;;  %v846_v18 = vmul.f32 %v8235_v5, %v668_v8  ;;  %v1246_v8 = vmul.f32 %v8226_v61, %v8586_v26  ;;  %v7388_v26 = vld [vmem:[%s10674_s3 + $0x304] ss:$16 sps:$4 sm:$0xff]  }
 0x262   : > { %v1373_v25 = vadd.f32 %v1245_v42, %v843_v39  ;;  %v2260_v42 = vld [vmem:[%s10675_s4 + $0xf8] sm:$0xff] }
 0x265   : > { %2350 = vperm.xlu1 %7315, %v2240_v50   ;;  %v1081_v13 = vpop.permute.xlu1 %1080  ;;  %v2248_v50 = vld [vmem:[%s10675_s4 + $0x98] sm:$0xff] }
 0x266   : > { %v1247_v35 = vmul.f32 %v8224_v59, %v1081_v13  ;;  %v1248_v46 = vmul.f32 %v8226_v61, %v1081_v13  ;;  %v844_v13 = vmul.f32 %v8235_v5, %v9385_v36 }
 0x267   : > { %3486 = vmatmul.mubr.bf16.gmra.mrb[80].mxu0 %v7378_v16  ;;  %v7384_v16 = vld [vmem:[%s10674_s3 + $0x2c0] ss:$16 sps:$4 sm:$0xff]  }
 0x268   : > { %3495 = vmatprep.mubr.bf16.mxu0 %v7379_v1  ;;  %v7385_v1 = vld [vmem:[%s10674_s3 + $0x2e4] ss:$16 sps:$4 sm:$0xff]   ;;  %v1376_v3 = vadd.f32 %v1248_v46, %v846_v18  ;;  %v1374_v36 = vadd.f32 %v1246_v8, %v844_v13  ;;  %v1249_v8 = vmul.f32 %v8224_v59, %v8595_v32 }
 0x269   : > { %2360 = vperm.xlu1 %7315, %v2242_v21   ;;  %v1375_v21 = vadd.f32 %v1247_v35, %v845_v7  ;;  %v7391_v46 = vld [vmem:[%s10674_s3 + $0x324] ss:$16 sps:$4 sm:$0xff]   ;;  %v2258_v7 = vld [vmem:[%s10675_s4 + $0xe8] sm:$0xff] }
 0x26a   : > { %v1714_v51 = vpop.permute.xlu1 %1713 }
 0x26b   : > { %v1881_v56 = vadd.f32 %v1714_v51, %v1369_v47  ;;  %v1882_v43 = vadd.f32 %v1714_v51, %v1370_v24  ;;  %v2252_v47 = vld [vmem:[%s10675_s4 + $0xb8] sm:$0xff]  ;;  %v1887_v24 = vadd.f32 %v8870_v0, %v1375_v21  ;;  %v1888_v51 = vadd.f32 %v8870_v0, %v1376_v3 }
 0x26d   : > { %v2009_v53 = vmax.f32 %v1881_v56, 0.0  ;;  %v2010_v9 = vmax.f32 %v1882_v43, 0.0  ;;  %2370 = vperm.xlu1 %7315, %v2244_v2   ;;  %v7387_v2 = vld [vmem:[%s10674_s3 + $0x2e0] ss:$16 sps:$4 sm:$0xff]   ;;  %v2016_v0 = vmax.f32 %v1888_v51, 0.0 }
 0x26e   : > { %v9428_v49 = vpop.permute.xlu1 %672 }
 0x26f   : > { %v2215_v29 = vpack.c.bf16 %v2011_v11, %v2009_v53  ;;  %v2216_v40 = vpack.c.bf16 %v2012_v62, %v2010_v9  ;;  %3496 = vmatmul.mubr.bf16.gmra.mrb[84].mxu0 %v7381_v34  ;;  %v2015_v11 = vmax.f32 %v1887_v24, 0.0  ;;  %v847_v39 = vmul.f32 %v8232_v19, %v9428_v49 }
 0x270   : > { %3505 = vmatprep.mubr.bf16.mxu0 %v7382_v27  ;;  %v2254_v27 = vld [vmem:[%s10675_s4 + $0xc8] sm:$0xff]  ;;  %v848_v13 = vmul.f32 %v8235_v5, %v9428_v49  ;;  %v7394_v49 = vld [vmem:[%s10674_s3 + $0x344] ss:$16 sps:$4 sm:$0xff]  }
 0x271   : > { %2380 = vperm.xlu1 %7315, %v2246_v57   ;;  %3624 = vmatprep.subr.bf16.mxu0 %v2216_v40  ;;  %v2256_v40 = vld [vmem:[%s10675_s4 + $0xd8] sm:$0xff] }
 0x272   : > { %v678_v10 = vpop.permute.xlu1 %677  ;;  %3625 = vmatpush1.bf16.msra.mxu0 %v2215_v29 }
 0x273   : > { %v849_v18 = vmul.f32 %v8232_v19, %v678_v10 }
 0x275   : > { %2390 = vperm.xlu1 %7315, %v2248_v50   ;;  %v7390_v50 = vld [vmem:[%s10674_s3 + $0x300] ss:$16 sps:$4 sm:$0xff]  }
 0x277   : > { %v1089_v63 = vpop.permute.xlu1 %1088  ;;  %3506 = vmatmul.mubr.bf16.gmra.mrb[88].mxu0 %v7384_v16 }
 0x278   : > { %3515 = vmatprep.mubr.bf16.mxu0 %v7385_v1  ;;  %v1251_v16 = vmul.f32 %v8224_v59, %v1089_v63  ;;  %v1252_v1 = vmul.f32 %v8226_v61, %v1089_v63 }
 0x279   : > { %2400 = vperm.xlu1 %7315, %v2250_v28   ;;  %v850_v28 = vmul.f32 %v8235_v5, %v678_v10  ;;  %v1250_v10 = vmul.f32 %v8226_v61, %v8595_v32  ;;  %v2262_v32 = vld [vmem:[%s10675_s4 + $0x108] sm:$0xff] }
 0x27a   : > { %v1379_v21 = vadd.f32 %v1251_v16, %v849_v18  ;;  %v2268_v18 = vld [vmem:[%s10675_s4 + $0x138] sm:$0xff] }
 0x27b   : > { %v1380_v3 = vadd.f32 %v1252_v1, %v850_v28 }
 0x27c   : > { %v1724_v56 = vpop.permute.xlu1 %1723  ;;  %v1891_v24 = vadd.f32 %v8882_v52, %v1379_v21 }
 0x27d   : > { %v1885_v43 = vadd.f32 %v1724_v56, %v1373_v25  ;;  %v1886_v34 = vadd.f32 %v1724_v56, %v1374_v36  ;;  %2410 = vperm.xlu1 %7315, %v2252_v47   ;;  %v7393_v47 = vld [vmem:[%s10674_s3 + $0x320] ss:$16 sps:$4 sm:$0xff]   ;;  %v1377_v25 = vadd.f32 %v1249_v8, %v847_v39  ;;  %v1378_v36 = vadd.f32 %v1250_v10, %v848_v13 }
 0x27e   : > { %v1892_v51 = vadd.f32 %v8882_v52, %v1380_v3  ;;  %v2264_v52 = vld [vmem:[%s10675_s4 + $0x118] sm:$0xff]  ;;  %v1254_v8 = vmul.f32 %v8226_v61, %v8612_v37 }
 0x27f   : > { %v2013_v53 = vmax.f32 %v1885_v43, 0.0  ;;  %v2014_v9 = vmax.f32 %v1886_v34, 0.0  ;;  %3516 = vmatmul.mubr.bf16.gmra.mrb[92].mxu0 %v7387_v2 }
 0x280   : > { %v9471_v62 = vpop.permute.xlu1 %682  ;;  %3525 = vmatprep.mubr.bf16.mxu0 %v7388_v26 }
 0x281   : > { %v2217_v57 = vpack.c.bf16 %v2015_v11, %v2013_v53  ;;  %2420 = vperm.xlu1 %7315, %v2254_v27   ;;  %v2218_v29 = vpack.c.bf16 %v2016_v0, %v2014_v9  ;;  %v2019_v27 = vmax.f32 %v1891_v24, 0.0  ;;  %v2020_v53 = vmax.f32 %v1892_v51, 0.0 }
 0x282   : > { %v851_v28 = vmul.f32 %v8232_v19, %v9471_v62  ;;  %v852_v39 = vmul.f32 %v8235_v5, %v9471_v62  ;;  %v2270_v62 = vld [vmem:[%s10675_s4 + $0x148] sm:$0xff] }
 0x283   : > { %3626 = vmatprep.subr.bf16.mxu0 %v2218_v29  ;;  %v7397_v29 = vld [vmem:[%s10674_s3 + $0x364] ss:$16 sps:$4 sm:$0xff]  }
 0x284   : > { %v688_v35 = vpop.permute.xlu1 %687  ;;  %3627 = vmatpush1.bf16.msra.mxu0 %v2217_v57  ;;  %v7396_v57 = vld [vmem:[%s10674_s3 + $0x340] ss:$16 sps:$4 sm:$0xff]  }
 0x285   : > { %2430 = vperm.xlu1 %7315, %v2256_v40   ;;  %v853_v1 = vmul.f32 %v8232_v19, %v688_v35 }
 0x287   : > { %3526 = vmatmul.mubr.bf16.gmra.mrb[96].mxu0 %v7390_v50  ;;  %v2266_v50 = vld [vmem:[%s10675_s4 + $0x128] sm:$0xff] }
 0x288   : > { %3535 = vmatprep.mubr.bf16.mxu0 %v7391_v46 }
 0x289   : > { %2440 = vperm.xlu1 %7315, %v2258_v7   ;;  %v1097_v63 = vpop.permute.xlu1 %1096  ;;  %v854_v7 = vmul.f32 %v8235_v5, %v688_v35  ;;  %v7400_v35 = vld [vmem:[%s10674_s3 + $0x384] ss:$16 sps:$4 sm:$0xff]  }
 0x28a   : > { %v1255_v46 = vmul.f32 %v8224_v59, %v1097_v63  ;;  %v1256_v16 = vmul.f32 %v8226_v61, %v1097_v63  ;;  %v7399_v63 = vld [vmem:[%s10674_s3 + $0x360] ss:$16 sps:$4 sm:$0xff]  }
 0x28c   : > { %v1383_v13 = vadd.f32 %v1255_v46, %v853_v1  ;;  %v1384_v21 = vadd.f32 %v1256_v16, %v854_v7  ;;  %v7405_v16 = vld [vmem:[%s10674_s3 + $0x3a0] ss:$16 sps:$4 sm:$0xff]   ;;  %v7406_v1 = vld [vmem:[%s10674_s3 + $0x3c4] ss:$16 sps:$4 sm:$0xff]  }
 0x28d   : > { %2450 = vperm.xlu1 %7315, %v2260_v42   ;;  %v1253_v42 = vmul.f32 %v8224_v59, %v8612_v37  ;;  %v2272_v37 = vld [vmem:[%s10675_s4 + $0x158] sm:$0xff] }
 0x28e   : > { %v1734_v2 = vpop.permute.xlu1 %1733  ;;  %v1895_v10 = vadd.f32 %v8897_v6, %v1383_v13  ;;  %v1896_v24 = vadd.f32 %v8897_v6, %v1384_v21  ;;  %v7403_v6 = vld [vmem:[%s10674_s3 + $0x3a4] ss:$16 sps:$4 sm:$0xff]   ;;  %v1257_v21 = vmul.f32 %v8224_v59, %v8623_v33 }
 0x28f   : > { %v1889_v56 = vadd.f32 %v1734_v2, %v1377_v25  ;;  %v1890_v26 = vadd.f32 %v1734_v2, %v1378_v36  ;;  %3536 = vmatmul.mubr.bf16.gmra.mrb[100].mxu0 %v7393_v47  ;;  %v1381_v47 = vadd.f32 %v1253_v42, %v851_v28 }
 0x290   : > { %3545 = vmatprep.mubr.bf16.mxu0 %v7394_v49  ;;  %v1382_v49 = vadd.f32 %v1254_v8, %v852_v39 }
 0x291   : > { %v2017_v43 = vmax.f32 %v1889_v56, 0.0  ;;  %v2018_v34 = vmax.f32 %v1890_v26, 0.0  ;;  %2460 = vperm.xlu1 %7315, %v2262_v32   ;;  %v2023_v56 = vmax.f32 %v1895_v10, 0.0  ;;  %v2024_v26 = vmax.f32 %v1896_v24, 0.0 }
 0x292   : > { %v9511_v9 = vpop.permute.xlu1 %692 }
 0x293   : > { %v2219_v11 = vpack.c.bf16 %v2019_v27, %v2017_v43  ;;  %v2220_v0 = vpack.c.bf16 %v2020_v53, %v2018_v34  ;;  %v7402_v43 = vld [vmem:[%s10674_s3 + $0x380] ss:$16 sps:$4 sm:$0xff]   ;;  %v855_v7 = vmul.f32 %v8232_v19, %v9511_v9 }
 0x295   : > { %2470 = vperm.xlu1 %7315, %v2264_v52   ;;  %3628 = vmatprep.subr.bf16.mxu0 %v2220_v0  ;;  %v2274_v52 = vld [vmem:[%s10675_s4 + $0x168] sm:$0xff] }
 0x296   : > { %v698_v40 = vpop.permute.xlu1 %697  ;;  %3629 = vmatpush1.bf16.msra.mxu0 %v2219_v11 }
 0x297   : > { %3546 = vmatmul.mubr.bf16.gmra.mrb[104].mxu0 %v7396_v57  ;;  %v858_v46 = vmul.f32 %v8235_v5, %v698_v40 }
 0x298   : > { %3555 = vmatprep.mubr.bf16.mxu0 %v7397_v29  ;;  %v2276_v29 = vld [vmem:[%s10675_s4 + $0x178] sm:$0xff] }
 0x299   : > { %2480 = vperm.xlu1 %7315, %v2266_v50   ;;  %v857_v50 = vmul.f32 %v8232_v19, %v698_v40  ;;  %v2278_v40 = vld [vmem:[%s10675_s4 + $0x188] sm:$0xff] }
 0x29b   : > { %v1105_v3 = vpop.permute.xlu1 %1104 }
 0x29c   : > { %v1259_v0 = vmul.f32 %v8224_v59, %v1105_v3  ;;  %v1260_v57 = vmul.f32 %v8226_v61, %v1105_v3  ;;  %v1258_v3 = vmul.f32 %v8226_v61, %v8623_v33  ;;  %v7408_v33 = vld [vmem:[%s10674_s3 + $0x3c0] ss:$16 sps:$4 sm:$0xff]  }
 0x29d   : > { %2490 = vperm.xlu1 %7315, %v2268_v18   ;;  %v856_v18 = vmul.f32 %v8235_v5, %v9511_v9  ;;  %v1385_v9 = vadd.f32 %v1257_v21, %v855_v7  ;;  %v1262_v7 = vmul.f32 %v8226_v61, %v8633_v55 }
 0x29e   : > { %v1387_v28 = vadd.f32 %v1259_v0, %v857_v50  ;;  %v1388_v39 = vadd.f32 %v1260_v57, %v858_v46  ;;  %v7414_v0 = vld [vmem:[%s10674_s3 + $0xc] ss:$16 sps:$4 sm:$0xff]  }
 0x29f   : > { %3556 = vmatmul.mubr.bf16.gmra.mrb[108].mxu0 %v7399_v63  ;;  %v2286_v50 = vld [vmem:[%s10675_s4 + $0x1c8] sm:$0xff] }
 0x2a0   : > { %v1744_v25 = vpop.permute.xlu1 %1743  ;;  %3565 = vmatprep.mubr.bf16.mxu0 %v7400_v35  ;;  %v1899_v63 = vadd.f32 %v8913_v17, %v1387_v28  ;;  %v1386_v35 = vadd.f32 %v1258_v3, %v856_v18  ;;  %v1900_v42 = vadd.f32 %v8913_v17, %v1388_v39  ;;  %v2288_v28 = vld [vmem:[%s10675_s4 + $0x1d8] sm:$0xff] }
 0x2a1   : > { %v1893_v36 = vadd.f32 %v1744_v25, %v1381_v47  ;;  %v1894_v51 = vadd.f32 %v1744_v25, %v1382_v49  ;;  %2500 = vperm.xlu1 %7315, %v2270_v62   ;;  %v2280_v62 = vld [vmem:[%s10675_s4 + $0x198] sm:$0xff]  ;;  %v7409_v49 = vld [vmem:[%s10674_s3 + $0x3e4] ss:$16 sps:$4 sm:$0xff]  }
 0x2a2   : > { %v2028_v17 = vmax.f32 %v1900_v42, 0.0 }
 0x2a3   : > { %v2021_v2 = vmax.f32 %v1893_v36, 0.0  ;;  %v2022_v32 = vmax.f32 %v1894_v51, 0.0  ;;  %v2027_v36 = vmax.f32 %v1899_v63, 0.0 }
 0x2a4   : > { %v9557_v34 = vpop.permute.xlu1 %702 }
 0x2a5   : > { %v2221_v27 = vpack.c.bf16 %v2023_v56, %v2021_v2  ;;  %2510 = vperm.xlu1 %7315, %v2272_v37   ;;  %v2222_v53 = vpack.c.bf16 %v2024_v26, %v2022_v32  ;;  %v2282_v37 = vld [vmem:[%s10675_s4 + $0x1a8] sm:$0xff]  ;;  %v859_v46 = vmul.f32 %v8232_v19, %v9557_v34 }
 0x2a7   : > { %3630 = vmatprep.subr.bf16.mxu0 %v2222_v53  ;;  %3566 = vmatmul.mubr.bf16.gmra.mrb[112].mxu0 %v7402_v43 }
 0x2a8   : > { %v708_v11 = vpop.permute.xlu1 %707  ;;  %3631 = vmatpush1.bf16.msra.mxu0 %v2221_v27  ;;  %3575 = vmatprep.mubr.bf16.mxu0 %v7403_v6  ;;  %v2284_v6 = vld [vmem:[%s10675_s4 + $0x1b8] sm:$0xff]  ;;  %v7411_v27 = vld [vmem:[%s10674_s3 + $0x3e0] ss:$16 sps:$4 sm:$0xff]  }
 0x2a9   : > { %2520 = vperm.xlu1 %7315, %v2274_v52   ;;  %v861_v53 = vmul.f32 %v8232_v19, %v708_v11  ;;  %v862_v52 = vmul.f32 %v8235_v5, %v708_v11  ;;  %v1261_v11 = vmul.f32 %v8224_v59, %v8633_v55  ;;  %v1265_v55 = vmul.f32 %v8224_v59, %v8646_v60 }
 0x2ad   : > { %2530 = vperm.xlu1 %7315, %v2276_v29   ;;  %v1113_v13 = vpop.permute.xlu1 %1112 }
 0x2ae   : > { %v1263_v56 = vmul.f32 %v8224_v59, %v1113_v13  ;;  %v1264_v26 = vmul.f32 %v8226_v61, %v1113_v13  ;;  %v1389_v13 = vadd.f32 %v1261_v11, %v859_v46  ;;  %v4282_v46 = vld [vmem:[%s10677_s6 + $0x18] sm:$0xff] }
 0x2af   : > { %3576 = vmatmul.mubr.bf16.gmra.mrb[116].mxu0 %v7405_v16  ;;  %v860_v16 = vmul.f32 %v8235_v5, %v9557_v34  ;;  %v7418_v11 = vld [vmem:[%s10674_s3 + $0x4c] ss:$16 sps:$4 sm:$0xff]  }
 0x2b0   : > { %3585 = vmatprep.mubr.bf16.mxu0 %v7406_v1  ;;  %v1391_v57 = vadd.f32 %v1263_v56, %v861_v53  ;;  %v1392_v29 = vadd.f32 %v1264_v26, %v862_v52 }
 0x2b1   : > { %2540 = vperm.xlu1 %7315, %v2278_v40   ;;  %v1390_v34 = vadd.f32 %v1262_v7, %v860_v16  ;;  %v4314_v16 = vld [vmem:[%s10677_s6 + $0x118] sm:$0xff]  ;;  %v4284_v7 = vld [vmem:[%s10677_s6 + $0x28] sm:$0xff] }
 0x2b2   : > { %v1754_v8 = vpop.permute.xlu1 %1753  ;;  %v1903_v18 = vadd.f32 %v8933_v44, %v1391_v57  ;;  %v1904_v39 = vadd.f32 %v8933_v44, %v1392_v29  ;;  %v2290_v44 = vld [vmem:[%s10675_s4 + $0x1e8] sm:$0xff] }
 0x2b3   : > { %v1897_v10 = vadd.f32 %v1754_v8, %v1385_v9  ;;  %v1898_v47 = vadd.f32 %v1754_v8, %v1386_v35  ;;  %v1266_v35 = vmul.f32 %v8226_v61, %v8646_v60  ;;  %v4312_v57 = vld [vmem:[%s10677_s6 + $0x108] sm:$0xff] }
 0x2b4   : > { %v2031_v42 = vmax.f32 %v1903_v18, 0.0  ;;  %v2032_v8 = vmax.f32 %v1904_v39, 0.0  ;;  %v7412_v29 = vld [vmem:[%s10674_s3 + $0x8] ss:$16 sps:$4 sm:$0xff]   ;;  %v7421_v39 = vld [vmem:[%s10674_s3 + $0x6c] ss:$16 sps:$4 sm:$0xff]  }
 0x2b5   : > { %v2025_v24 = vmax.f32 %v1897_v10, 0.0  ;;  %v2026_v25 = vmax.f32 %v1898_v47, 0.0  ;;  %2550 = vperm.xlu1 %7315, %v2280_v62   ;;  %v4316_v18 = vld [vmem:[%s10677_s6 + $0x128] sm:$0xff] }
 0x2b6   : > { %v713_v51 = vpop.permute.xlu1 %712 }
 0x2b7   : > { %v2223_v2 = vpack.c.bf16 %v2027_v36, %v2025_v24  ;;  %v2224_v32 = vpack.c.bf16 %v2028_v17, %v2026_v25  ;;  %3586 = vmatmul.mubr.bf16.gmra.mrb[120].mxu0 %v7408_v33  ;;  %v863_v40 = vmul.f32 %v8232_v19, %v713_v51  ;;  %v864_v21 = vmul.f32 %v8235_v5, %v713_v51 }
 0x2b8   : > { %3595 = vmatprep.mubr.bf16.mxu0 %v7409_v49 }
 0x2b9   : > { %2560 = vperm.xlu1 %7315, %v2282_v37   ;;  %3632 = vmatprep.subr.bf16.mxu0 %v2224_v32  ;;  %v1393_v24 = vadd.f32 %v1265_v55, %v863_v40  ;;  %v1394_v25 = vadd.f32 %v1266_v35, %v864_v21  ;;  %v2292_v37 = vld [vmem:[%s10675_s4 + $0x1f8] sm:$0xff] }
 0x2ba   : > { %v718_v43 = vpop.permute.xlu1 %717  ;;  %3633 = vmatpush1.bf16.msra.mxu0 %v2223_v2  ;;  %v7423_v40 = vld [vmem:[%s10674_s3 + $0x68] ss:$16 sps:$4 sm:$0xff]   ;;  %v7424_v21 = vld [vmem:[%s10674_s3 + $0x8c] ss:$16 sps:$4 sm:$0xff]  }
 0x2bb   : > { %v865_v36 = vmul.f32 %v8232_v19, %v718_v43  ;;  %v866_v17 = vmul.f32 %v8235_v5, %v718_v43  ;;  %v4280_v19 = vld [vmem:[%s10677_s6 + $0x8] sm:$0xff]  ;;  %v4290_v35 = vld [vmem:[%s10677_s6 + $0x58] sm:$0xff] }
 0x2bc   : > { %v7427_v55 = vld [vmem:[%s10674_s3 + $0xac] ss:$16 sps:$4 sm:$0xff]  }
 0x2bd   : > { %2570 = vperm.xlu1 %7315, %v2284_v6  }
 0x2bf   : > { %v1121_v1 = vpop.permute.xlu1 %1120  ;;  %3596 = vmatmul.mubr.bf16.gmra.mrb[124].mxu0 %v7411_v27 }
 0x2c0   : > { %3638 = vmatprep.mubr.bf16.mxu0 %v7414_v0  ;;  %v1267_v62 = vmul.f32 %v8224_v59, %v1121_v1  ;;  %v1268_v10 = vmul.f32 %v8226_v61, %v1121_v1  ;;  %v7417_v1 = vld [vmem:[%s10674_s3 + $0x28] ss:$16 sps:$4 sm:$0xff]  }
 0x2c1   : > { %2580 = vperm.xlu1 %7315, %v2286_v50   ;;  %v7415_v50 = vld [vmem:[%s10674_s3 + $0x2c] ss:$16 sps:$4 sm:$0xff]  }
 0x2c2   : > { %v1395_v61 = vadd.f32 %v1267_v62, %v865_v36  ;;  %v1396_v32 = vadd.f32 %v1268_v10, %v866_v17  ;;  %v7430_v62 = vld [vmem:[%s10674_s3 + $0xcc] ss:$16 sps:$4 sm:$0xff]  }
 0x2c3   : > { %v4292_v10 = vld [vmem:[%s10677_s6 + $0x68] sm:$0xff]  ;;  %v4294_v36 = vld [vmem:[%s10677_s6 + $0x78] sm:$0xff] }
 0x2c4   : > { %v1764_v3 = vpop.permute.xlu1 %1763  ;;  %v4326_v17 = vld [vmem:[%s10677_s6 + $0x178] sm:$0xff] }
 0x2c5   : > { %v1901_v63 = vadd.f32 %v1764_v3, %v1389_v13  ;;  %v1902_v9 = vadd.f32 %v1764_v3, %v1390_v34  ;;  %2590 = vperm.xlu1 %7315, %v2288_v28   ;;  %v7420_v28 = vld [vmem:[%s10674_s3 + $0x48] ss:$16 sps:$4 sm:$0xff]  }
 0x2c6   : > { %v4286_v13 = vld [vmem:[%s10677_s6 + $0x38] sm:$0xff]  ;;  %v4288_v3 = vld [vmem:[%s10677_s6 + $0x48] sm:$0xff] }
 0x2c7   : > { %v2029_v47 = vmax.f32 %v1901_v63, 0.0  ;;  %v2030_v33 = vmax.f32 %v1902_v9, 0.0  ;;  %v4318_v34 = vld [vmem:[%s10677_s6 + $0x138] sm:$0xff]  ;;  %v4320_v63 = vld [vmem:[%s10677_s6 + $0x148] sm:$0xff] }
 0x2c8   : > { %v1774_v49 = vpop.permute.xlu1 %1773  ;;  %v7426_v9 = vld [vmem:[%s10674_s3 + $0x88] ss:$16 sps:$4 sm:$0xff]  }
 0x2c9   : > { %v2225_v60 = vpack.c.bf16 %v2031_v42, %v2029_v47  ;;  %2600 = vperm.xlu1 %7315, %v2290_v44   ;;  %v2226_v51 = vpack.c.bf16 %v2032_v8, %v2030_v33  ;;  %v1905_v2 = vadd.f32 %v1774_v49, %v1393_v24  ;;  %v1906_v59 = vadd.f32 %v1774_v49, %v1394_v25  ;;  %v4322_v44 = vld [vmem:[%s10677_s6 + $0x158] sm:$0xff]  ;;  %v4324_v33 = vld [vmem:[%s10677_s6 + $0x168] sm:$0xff] }
 0x2ca   : > { %v7429_v8 = vld [vmem:[%s10674_s3 + $0xa8] ss:$16 sps:$4 sm:$0xff]   ;;  %v7433_v24 = vld [vmem:[%s10674_s3 + $0xec] ss:$16 sps:$4 sm:$0xff]  }
 0x2cb   : > { %3634 = vmatprep.subr.bf16.mxu0 %v2226_v51  ;;  %v2033_v5 = vmax.f32 %v1905_v2, 0.0  ;;  %v2034_v43 = vmax.f32 %v1906_v59, 0.0  ;;  %v7432_v49 = vld [vmem:[%s10674_s3 + $0xc8] ss:$16 sps:$4 sm:$0xff]  }
 0x2cc   : > { %v1779_v56 = vpop.permute.xlu1 %1778  ;;  %3635 = vmatpush1.bf16.msra.mxu0 %v2225_v60  ;;  %v7435_v51 = vld [vmem:[%s10674_s3 + $0xe8] ss:$16 sps:$4 sm:$0xff]  }
 0x2cd   : > { %v1907_v26 = vadd.f32 %v1779_v56, %v1395_v61  ;;  %v1908_v6 = vadd.f32 %v1779_v56, %v1396_v32  ;;  %2610 = vperm.xlu1 %7315, %v2292_v37   ;;  %v7436_v37 = vld [vmem:[%s10674_s3 + $0x10c] ss:$16 sps:$4 sm:$0xff]   ;;  %v7438_v32 = vld [vmem:[%s10674_s3 + $0x108] ss:$16 sps:$4 sm:$0xff]  }
 0x2ce   : > { %v4296_v2 = vld [vmem:[%s10677_s6 + $0x88] sm:$0xff] }
 0x2cf   : > { %v2035_v27 = vmax.f32 %v1907_v26, 0.0  ;;  %v2036_v53 = vmax.f32 %v1908_v6, 0.0  ;;  %v4328_v61 = vld [vmem:[%s10677_s6 + $0x188] sm:$0xff]  ;;  %v4298_v26 = vld [vmem:[%s10677_s6 + $0x98] sm:$0xff] }
 0x2d0   : > { %v9711_v42 = vpop.permute.xlu1 %2300  ;;  %v7439_v56 = vld [vmem:[%s10674_s3 + $0x12c] ss:$16 sps:$4 sm:$0xff]  }
 0x2d1   : > { %v2227_v52 = vpack.c.bf16 %v2035_v27, %v2033_v5  ;;  %4350 = vperm.xlu1 %7315, %v4280_v19   ;;  %v2228_v0 = vpack.c.bf16 %v2036_v53, %v2034_v43  ;;  %v4330_v19 = vld [vmem:[%s10677_s6 + $0x198] sm:$0xff]  ;;  %v4300_v53 = vld [vmem:[%s10677_s6 + $0xa8] sm:$0xff] }
 0x2d2   : > { %v7441_v5 = vld [vmem:[%s10674_s3 + $0x128] ss:$16 sps:$4 sm:$0xff]   ;;  %v7442_v43 = vld [vmem:[%s10674_s3 + $0x14c] ss:$16 sps:$4 sm:$0xff]  }
 0x2d3   : > { %3636 = vmatprep.subr.bf16.mxu0 %v2228_v0 }
 0x2d4   : > { %3637 = vmatpush1.bf16.msra.mxu0 %v2227_v52  ;;  %v9725_v47 = vpop.permute.xlu1 %2310  ;;  %v4332_v52 = vld [vmem:[%s10677_s6 + $0x1a8] sm:$0xff] }
 0x2d5   : > { %4510 = vperm.xlu1 %7315, %v4312_v57   ;;  %v7444_v57 = vld [vmem:[%s10674_s3 + $0x148] ss:$16 sps:$4 sm:$0xff]  }
 0x2d7   : > { %3639 = vmatmul.mubr.bf16.vlgmr.msra.gmra.mrb[0].mxu0 %v7412_v29  ;;  %v7445_v29 = vld [vmem:[%s10674_s3 + $0x16c] ss:$16 sps:$4 sm:$0xff]  }
 0x2d8   : > { %3648 = vmatprep.mubr.bf16.mxu0 %v7415_v50  ;;  %v9736_v25 = vpop.permute.xlu1 %2320  ;;  %v4302_v50 = vld [vmem:[%s10677_s6 + $0xb8] sm:$0xff] }
 0x2d9   : > { %4360 = vperm.xlu1 %7315, %v4282_v46  }
 0x2dc   : > { %v9744_v60 = vpop.permute.xlu1 %2330 }
 0x2dd   : > { %4520 = vperm.xlu1 %7315, %v4314_v16   ;;  %v4334_v16 = vld [vmem:[%s10677_s6 + $0x1b8] sm:$0xff] }
 0x2df   : > { %3649 = vmatmul.mubr.bf16.gmra.mrb[4].mxu0 %v7417_v1  ;;  %v7447_v1 = vld [vmem:[%s10674_s3 + $0x168] ss:$16 sps:$4 sm:$0xff]  }
 0x2e0   : > { %3658 = vmatprep.mubr.bf16.mxu0 %v7418_v11  ;;  %v9755_v59 = vpop.permute.xlu1 %2340  ;;  %v7448_v11 = vld [vmem:[%s10674_s3 + $0x18c] ss:$16 sps:$4 sm:$0xff]  }
 0x2e1   : > { %4370 = vperm.xlu1 %7315, %v4284_v7   ;;  %v4304_v7 = vld [vmem:[%s10677_s6 + $0xc8] sm:$0xff] }
 0x2e4   : > { %v9769_v6 = vpop.permute.xlu1 %2350 }
 0x2e5   : > { %4530 = vperm.xlu1 %7315, %v4316_v18  }
 0x2e7   : > { %3659 = vmatmul.mubr.bf16.gmra.mrb[8].mxu0 %v7420_v28  ;;  %v4336_v28 = vld [vmem:[%s10677_s6 + $0x1c8] sm:$0xff] }
 0x2e8   : > { %3668 = vmatprep.mubr.bf16.mxu0 %v7421_v39  ;;  %v9780_v27 = vpop.permute.xlu1 %2360  ;;  %v7450_v39 = vld [vmem:[%s10674_s3 + $0x188] ss:$16 sps:$4 sm:$0xff]  }
 0x2e9   : > { %4380 = vperm.xlu1 %7315, %v4286_v13   ;;  %v7451_v13 = vld [vmem:[%s10674_s3 + $0x1ac] ss:$16 sps:$4 sm:$0xff]  }
 0x2ec   : > { %v9788_v0 = vpop.permute.xlu1 %2370 }
 0x2ed   : > { %4540 = vperm.xlu1 %7315, %v4318_v34  }
 0x2ef   : > { %3669 = vmatmul.mubr.bf16.gmra.mrb[12].mxu0 %v7423_v40  ;;  %v4306_v40 = vld [vmem:[%s10677_s6 + $0xd8] sm:$0xff] }
 0x2f0   : > { %3678 = vmatprep.mubr.bf16.mxu0 %v7424_v21  ;;  %v9799_v46 = vpop.permute.xlu1 %2380  ;;  %v4338_v21 = vld [vmem:[%s10677_s6 + $0x1d8] sm:$0xff] }
 0x2f1   : > { %4390 = vperm.xlu1 %7315, %v4288_v3  }
 0x2f4   : > { %v9813_v18 = vpop.permute.xlu1 %2390 }
 0x2f5   : > { %4550 = vperm.xlu1 %7315, %v4320_v63   ;;  %v7453_v63 = vld [vmem:[%s10674_s3 + $0x1a8] ss:$16 sps:$4 sm:$0xff]  }
 0x2f7   : > { %3679 = vmatmul.mubr.bf16.gmra.mrb[16].mxu0 %v7426_v9  ;;  %v7454_v9 = vld [vmem:[%s10674_s3 + $0x1cc] ss:$16 sps:$4 sm:$0xff]  }
 0x2f8   : > { %3688 = vmatprep.mubr.bf16.mxu0 %v7427_v55  ;;  %v9824_v34 = vpop.permute.xlu1 %2400  ;;  %v4308_v55 = vld [vmem:[%s10677_s6 + $0xe8] sm:$0xff] }
 0x2f9   : > { %4400 = vperm.xlu1 %7315, %v4290_v35  }
 0x2fc   : > { %v9832_v3 = vpop.permute.xlu1 %2410 }
 0x2fd   : > { %4560 = vperm.xlu1 %7315, %v4322_v44   ;;  %v4340_v44 = vld [vmem:[%s10677_s6 + $0x1e8] sm:$0xff] }
 0x2ff   : > { %3689 = vmatmul.mubr.bf16.gmra.mrb[20].mxu0 %v7429_v8  ;;  %v7456_v8 = vld [vmem:[%s10674_s3 + $0x1c8] ss:$16 sps:$4 sm:$0xff]  }
 0x300   : > { %3698 = vmatprep.mubr.bf16.mxu0 %v7430_v62  ;;  %v9843_v35 = vpop.permute.xlu1 %2420  ;;  %v7457_v62 = vld [vmem:[%s10674_s3 + $0x1ec] ss:$16 sps:$4 sm:$0xff]  }
 0x301   : > { %4410 = vperm.xlu1 %7315, %v4292_v10   ;;  %v4310_v10 = vld [vmem:[%s10677_s6 + $0xf8] sm:$0xff] }
 0x305   : > { %4570 = vperm.xlu1 %7315, %v4324_v33   ;;  %v9857_v33 = vpop.permute.xlu1 %2430 }
 0x307   : > { %3699 = vmatmul.mubr.bf16.gmra.mrb[24].mxu0 %v7432_v49  ;;  %v4342_v49 = vld [vmem:[%s10677_s6 + $0x1f8] sm:$0xff] }
 0x308   : > { %3708 = vmatprep.mubr.bf16.mxu0 %v7433_v24  ;;  %v7459_v24 = vld [vmem:[%s10674_s3 + $0x1e8] ss:$16 sps:$4 sm:$0xff]  }
 0x309   : > { %4420 = vperm.xlu1 %7315, %v4294_v36   ;;  %v7460_v36 = vld [vmem:[%s10674_s3 + $0x20c] ss:$16 sps:$4 sm:$0xff]  }
 0x30d   : > { %4580 = vperm.xlu1 %7315, %v4326_v17   ;;  %v9868_v17 = vpop.permute.xlu1 %2440 }
 0x30f   : > { %3709 = vmatmul.mubr.bf16.gmra.mrb[28].mxu0 %v7435_v51  ;;  %v7462_v51 = vld [vmem:[%s10674_s3 + $0x208] ss:$16 sps:$4 sm:$0xff]  }
 0x310   : > { %3718 = vmatprep.mubr.bf16.mxu0 %v7436_v37  ;;  %v7463_v37 = vld [vmem:[%s10674_s3 + $0x22c] ss:$16 sps:$4 sm:$0xff]  }
 0x311   : > { %4430 = vperm.xlu1 %7315, %v4296_v2   ;;  %v7465_v2 = vld [vmem:[%s10674_s3 + $0x228] ss:$16 sps:$4 sm:$0xff]  }
 0x315   : > { %4590 = vperm.xlu1 %7315, %v4328_v61   ;;  %v7466_v61 = vld [vmem:[%s10674_s3 + $0x24c] ss:$16 sps:$4 sm:$0xff]  }
 0x317   : > { %3719 = vmatmul.mubr.bf16.gmra.mrb[32].mxu0 %v7438_v32  ;;  %v7468_v32 = vld [vmem:[%s10674_s3 + $0x248] ss:$16 sps:$4 sm:$0xff]  }
 0x318   : > { %3728 = vmatprep.mubr.bf16.mxu0 %v7439_v56  ;;  %v7469_v56 = vld [vmem:[%s10674_s3 + $0x26c] ss:$16 sps:$4 sm:$0xff]  }
 0x319   : > { %4440 = vperm.xlu1 %7315, %v4298_v26   ;;  %v7471_v26 = vld [vmem:[%s10674_s3 + $0x268] ss:$16 sps:$4 sm:$0xff]  }
 0x31d   : > { %4600 = vperm.xlu1 %7315, %v4330_v19   ;;  %v7472_v19 = vld [vmem:[%s10674_s3 + $0x28c] ss:$16 sps:$4 sm:$0xff]  }
 0x31f   : > { %3729 = vmatmul.mubr.bf16.gmra.mrb[36].mxu0 %v7441_v5  ;;  %v7474_v5 = vld [vmem:[%s10674_s3 + $0x288] ss:$16 sps:$4 sm:$0xff]  }
 0x320   : > { %3738 = vmatprep.mubr.bf16.mxu0 %v7442_v43  ;;  %v7475_v43 = vld [vmem:[%s10674_s3 + $0x2ac] ss:$16 sps:$4 sm:$0xff]  }
 0x321   : > { %4450 = vperm.xlu1 %7315, %v4300_v53   ;;  %v7477_v53 = vld [vmem:[%s10674_s3 + $0x2a8] ss:$16 sps:$4 sm:$0xff]  }
 0x325   : > { %4610 = vperm.xlu1 %7315, %v4332_v52   ;;  %v7478_v52 = vld [vmem:[%s10674_s3 + $0x2cc] ss:$16 sps:$4 sm:$0xff]  }
 0x327   : > { %3739 = vmatmul.mubr.bf16.gmra.mrb[40].mxu0 %v7444_v57  ;;  %v7480_v57 = vld [vmem:[%s10674_s3 + $0x2c8] ss:$16 sps:$4 sm:$0xff]  }
 0x328   : > { %3748 = vmatprep.mubr.bf16.mxu0 %v7445_v29  ;;  %v7481_v29 = vld [vmem:[%s10674_s3 + $0x2ec] ss:$16 sps:$4 sm:$0xff]  }
 0x329   : > { %4460 = vperm.xlu1 %7315, %v4302_v50   ;;  %v7483_v50 = vld [vmem:[%s10674_s3 + $0x2e8] ss:$16 sps:$4 sm:$0xff]  }
 0x32d   : > { %4620 = vperm.xlu1 %7315, %v4334_v16   ;;  %v7484_v16 = vld [vmem:[%s10674_s3 + $0x30c] ss:$16 sps:$4 sm:$0xff]  }
 0x32f   : > { %3749 = vmatmul.mubr.bf16.gmra.mrb[44].mxu0 %v7447_v1  ;;  %v7486_v1 = vld [vmem:[%s10674_s3 + $0x308] ss:$16 sps:$4 sm:$0xff]  }
 0x330   : > { %3758 = vmatprep.mubr.bf16.mxu0 %v7448_v11  ;;  %v7487_v11 = vld [vmem:[%s10674_s3 + $0x32c] ss:$16 sps:$4 sm:$0xff]  }
 0x331   : > { %4470 = vperm.xlu1 %7315, %v4304_v7   ;;  %v7489_v7 = vld [vmem:[%s10674_s3 + $0x328] ss:$16 sps:$4 sm:$0xff]  }
 0x335   : > { %4630 = vperm.xlu1 %7315, %v4336_v28   ;;  %v7490_v28 = vld [vmem:[%s10674_s3 + $0x34c] ss:$16 sps:$4 sm:$0xff]  }
 0x337   : > { %3759 = vmatmul.mubr.bf16.gmra.mrb[48].mxu0 %v7450_v39  ;;  %v7492_v39 = vld [vmem:[%s10674_s3 + $0x348] ss:$16 sps:$4 sm:$0xff]  }
 0x338   : > { %3768 = vmatprep.mubr.bf16.mxu0 %v7451_v13  ;;  %v7493_v13 = vld [vmem:[%s10674_s3 + $0x36c] ss:$16 sps:$4 sm:$0xff]  }
 0x339   : > { %4480 = vperm.xlu1 %7315, %v4306_v40  }
 0x33d   : > { %4640 = vperm.xlu1 %7315, %v4338_v21  }
 0x33f   : > { %3769 = vmatmul.mubr.bf16.gmra.mrb[52].mxu0 %v7453_v63 }
 0x340   : > { %3778 = vmatprep.mubr.bf16.mxu0 %v7454_v9  ;;  %v7495_v9 = vld [vmem:[%s10674_s3 + $0x368] ss:$16 sps:$4 sm:$0xff]  }
 0x341   : > { %4490 = vperm.xlu1 %7315, %v4308_v55  }
 0x345   : > { %4650 = vperm.xlu1 %7315, %v4340_v44  }
 0x347   : > { %3779 = vmatmul.mubr.bf16.gmra.mrb[56].mxu0 %v7456_v8  ;;  %v7496_v8 = vld [vmem:[%s10674_s3 + $0x38c] ss:$16 sps:$4 sm:$0xff]  }
 0x348   : > { %3788 = vmatprep.mubr.bf16.mxu0 %v7457_v62 }
 0x349   : > { %4500 = vperm.xlu1 %7315, %v4310_v10  }
 0x34d   : > { %4660 = vperm.xlu1 %7315, %v4342_v49  }
 0x34f   : > { %3789 = vmatmul.mubr.bf16.gmra.mrb[60].mxu0 %v7459_v24  ;;  %v7510_v24 = vld [vmem:[%s10676_s5 + $0x4] ss:$16 sps:$4 sm:$0xff]  }
 0x350   : > { %3798 = vmatprep.mubr.bf16.mxu0 %v7460_v36  ;;  %5335 = vmatprep.mubr.bf16.mxu1 %v7510_v24 }
 0x357   : > { %3799 = vmatmul.mubr.bf16.gmra.mrb[64].mxu0 %v7462_v51 }
 0x358   : > { %3808 = vmatprep.mubr.bf16.mxu0 %v7463_v37 }
 0x35f   : > { %3809 = vmatmul.mubr.bf16.gmra.mrb[68].mxu0 %v7465_v2 }
 0x360   : > { %3818 = vmatprep.mubr.bf16.mxu0 %v7466_v61 }
 0x367   : > { %3819 = vmatmul.mubr.bf16.gmra.mrb[72].mxu0 %v7468_v32 }
 0x368   : > { %3828 = vmatprep.mubr.bf16.mxu0 %v7469_v56 }
 0x36f   : > { %3829 = vmatmul.mubr.bf16.gmra.mrb[76].mxu0 %v7471_v26 }
 0x370   : > { %3838 = vmatprep.mubr.bf16.mxu0 %v7472_v19 }
 0x377   : > { %3839 = vmatmul.mubr.bf16.gmra.mrb[80].mxu0 %v7474_v5 }
 0x378   : > { %3848 = vmatprep.mubr.bf16.mxu0 %v7475_v43  ;;  %v7499_v43 = vld [vmem:[%s10674_s3 + $0x3ac] ss:$16 sps:$4 sm:$0xff]  }
 0x37f   : > { %3849 = vmatmul.mubr.bf16.gmra.mrb[84].mxu0 %v7477_v53 }
 0x380   : > { %3858 = vmatprep.mubr.bf16.mxu0 %v7478_v52 }
 0x387   : > { %3859 = vmatmul.mubr.bf16.gmra.mrb[88].mxu0 %v7480_v57 }
 0x388   : > { %3868 = vmatprep.mubr.bf16.mxu0 %v7481_v29 }
 0x38f   : > { %3869 = vmatmul.mubr.bf16.gmra.mrb[92].mxu0 %v7483_v50 }
 0x390   : > { %3878 = vmatprep.mubr.bf16.mxu0 %v7484_v16 }
 0x397   : > { %3879 = vmatmul.mubr.bf16.gmra.mrb[96].mxu0 %v7486_v1 }
 0x398   : > { %3888 = vmatprep.mubr.bf16.mxu0 %v7487_v11 }
 0x39f   : > { %3889 = vmatmul.mubr.bf16.gmra.mrb[100].mxu0 %v7489_v7 }
 0x3a0   : > { %3898 = vmatprep.mubr.bf16.mxu0 %v7490_v28 }
 0x3a7   : > { %3899 = vmatmul.mubr.bf16.gmra.mrb[104].mxu0 %v7492_v39 }
 0x3a8   : > { %3908 = vmatprep.mubr.bf16.mxu0 %v7493_v13  ;;  %v7501_v13 = vld [vmem:[%s10674_s3 + $0x3a8] ss:$16 sps:$4 sm:$0xff]  }
 0x3aa   : > { %v3640_v40 = vpop.f32.mrb[0].mxu0 }
 0x3ab   : > { %v6690_v21 = vadd.f32 %v3640_v40, %v8957_v12  ;;  %v3642_v63 = vpop.f32.mrb[1].mxu0 }
 0x3ac   : > { %v6691_v55 = vadd.f32 %v3642_v63, %v8957_v12  ;;  %v3644_v44 = vpop.f32.mrb[2].mxu0 }
 0x3ad   : > { %v6692_v62 = vadd.f32 %v3644_v44, %v9711_v42  ;;  %v3646_v10 = vpop.f32.mrb[3].mxu0  ;;  %v3959_v36 = vmax.f32 %v6690_v21, 0.0 }
 0x3ae   : > { %v6693_v49 = vadd.f32 %v3646_v10, %v9711_v42  ;;  %v3960_v37 = vmax.f32 %v6691_v55, 0.0  ;;  %v7498_v42 = vld [vmem:[%s10674_s3 + $0x388] ss:$16 sps:$4 sm:$0xff]  }
 0x3af   : > { %v3961_v51 = vmax.f32 %v6692_v62, 0.0  ;;  %3909 = vmatmul.mubr.bf16.gmra.mrb[108].mxu0 %v7495_v9 }
 0x3b0   : > { %v3962_v2 = vmax.f32 %v6693_v49, 0.0  ;;  %3918 = vmatprep.mubr.bf16.mxu0 %v7496_v8 }
 0x3b1   : > { %v4215_v12 = vpack.c.bf16 %v3961_v51, %v3959_v36 }
 0x3b2   : > { %v3650_v61 = vpop.f32.mrb[4].mxu0  ;;  %v4216_v32 = vpack.c.bf16 %v3962_v2, %v3960_v37  ;;  %v7504_v37 = vld [vmem:[%s10674_s3 + $0x3c8] ss:$16 sps:$4 sm:$0xff]  }
 0x3b3   : > { %v6694_v56 = vadd.f32 %v3650_v61, %v8976_v15  ;;  %v3652_v26 = vpop.f32.mrb[5].mxu0 }
 0x3b4   : > { %v6695_v19 = vadd.f32 %v3652_v26, %v8976_v15  ;;  %v3654_v5 = vpop.f32.mrb[6].mxu0  ;;  %5303 = vmatprep.subr.bf16.mxu1 %v4216_v32 }
 0x3b5   : > { %v6696_v53 = vadd.f32 %v3654_v5, %v9725_v47  ;;  %v3656_v52 = vpop.f32.mrb[7].mxu0  ;;  %5304 = vmatpush1.bf16.msra.mxu1 %v4215_v12  ;;  %v3963_v29 = vmax.f32 %v6694_v56, 0.0 }
 0x3b6   : > { %v6697_v57 = vadd.f32 %v3656_v52, %v9725_v47  ;;  %v3964_v16 = vmax.f32 %v6695_v19, 0.0  ;;  %v7502_v47 = vld [vmem:[%s10674_s3 + $0x3cc] ss:$16 sps:$4 sm:$0xff]  }
 0x3b7   : > { %v3965_v50 = vmax.f32 %v6696_v53, 0.0  ;;  %3919 = vmatmul.mubr.bf16.gmra.mrb[112].mxu0 %v7498_v42 }
 0x3b8   : > { %v3966_v1 = vmax.f32 %v6697_v57, 0.0  ;;  %3928 = vmatprep.mubr.bf16.mxu0 %v7499_v43 }
 0x3b9   : > { %v4217_v11 = vpack.c.bf16 %v3965_v50, %v3963_v29  ;;  %v7507_v29 = vld [vmem:[%s10674_s3 + $0x3e8] ss:$16 sps:$4 sm:$0xff]  }
 0x3ba   : > { %v4218_v15 = vpack.c.bf16 %v3966_v1, %v3964_v16  ;;  %v3660_v7 = vpop.f32.mrb[8].mxu0 }
 0x3bb   : > { %v6698_v28 = vadd.f32 %v3660_v7, %v8997_v30  ;;  %v3662_v39 = vpop.f32.mrb[9].mxu0 }
 0x3bc   : > { %v6699_v40 = vadd.f32 %v3662_v39, %v8997_v30  ;;  %v3664_v21 = vpop.f32.mrb[10].mxu0  ;;  %5305 = vmatprep.subr.bf16.mxu1 %v4218_v15 }
 0x3bd   : > { %v6700_v63 = vadd.f32 %v3664_v21, %v9736_v25  ;;  %v3666_v9 = vpop.f32.mrb[11].mxu0  ;;  %5306 = vmatpush1.bf16.msra.mxu1 %v4217_v11  ;;  %v3967_v44 = vmax.f32 %v6698_v28, 0.0 }
 0x3be   : > { %v6701_v55 = vadd.f32 %v3666_v9, %v9736_v25  ;;  %v3968_v62 = vmax.f32 %v6699_v40, 0.0  ;;  %v7505_v25 = vld [vmem:[%s10674_s3 + $0x3ec] ss:$16 sps:$4 sm:$0xff]  }
 0x3bf   : > { %v3969_v8 = vmax.f32 %v6700_v63, 0.0  ;;  %3929 = vmatmul.mubr.bf16.gmra.mrb[116].mxu0 %v7501_v13 }
 0x3c0   : > { %v3970_v10 = vmax.f32 %v6701_v55, 0.0  ;;  %3938 = vmatprep.mubr.bf16.mxu0 %v7502_v47 }
 0x3c1   : > { %v4219_v49 = vpack.c.bf16 %v3969_v8, %v3967_v44 }
 0x3c2   : > { %v4220_v30 = vpack.c.bf16 %v3970_v10, %v3968_v62  ;;  %v3670_v24 = vpop.f32.mrb[12].mxu0 }
 0x3c3   : > { %v6702_v36 = vadd.f32 %v3670_v24, %v9014_v48  ;;  %v3672_v51 = vpop.f32.mrb[13].mxu0 }
 0x3c4   : > { %v6703_v2 = vadd.f32 %v3672_v51, %v9014_v48  ;;  %v3674_v12 = vpop.f32.mrb[14].mxu0  ;;  %5307 = vmatprep.subr.bf16.mxu1 %v4220_v30 }
 0x3c5   : > { %v6704_v61 = vadd.f32 %v3674_v12, %v9744_v60  ;;  %v3676_v32 = vpop.f32.mrb[15].mxu0  ;;  %5308 = vmatpush1.bf16.msra.mxu1 %v4219_v49  ;;  %v3971_v26 = vmax.f32 %v6702_v36, 0.0 }
 0x3c6   : > { %v6705_v56 = vadd.f32 %v3676_v32, %v9744_v60  ;;  %v3972_v19 = vmax.f32 %v6703_v2, 0.0 }
 0x3c7   : > { %v3973_v42 = vmax.f32 %v6704_v61, 0.0  ;;  %3939 = vmatmul.mubr.bf16.gmra.mrb[120].mxu0 %v7504_v37 }
 0x3c8   : > { %v3974_v5 = vmax.f32 %v6705_v56, 0.0  ;;  %3948 = vmatprep.mubr.bf16.mxu0 %v7505_v25 }
 0x3c9   : > { %v4221_v43 = vpack.c.bf16 %v3973_v42, %v3971_v26 }
 0x3ca   : > { %v4222_v48 = vpack.c.bf16 %v3974_v5, %v3972_v19  ;;  %v3680_v53 = vpop.f32.mrb[16].mxu0 }
 0x3cb   : > { %v6706_v52 = vadd.f32 %v3680_v53, %v9043_v31  ;;  %v3682_v57 = vpop.f32.mrb[17].mxu0 }
 0x3cc   : > { %v6707_v50 = vadd.f32 %v3682_v57, %v9043_v31  ;;  %v3684_v16 = vpop.f32.mrb[18].mxu0  ;;  %5309 = vmatprep.subr.bf16.mxu1 %v4222_v48 }
 0x3cd   : > { %v6708_v60 = vadd.f32 %v3684_v16, %v9755_v59  ;;  %v3686_v1 = vpop.f32.mrb[19].mxu0  ;;  %5310 = vmatpush1.bf16.msra.mxu1 %v4221_v43  ;;  %v3975_v15 = vmax.f32 %v6706_v52, 0.0 }
 0x3ce   : > { %v6709_v11 = vadd.f32 %v3686_v1, %v9755_v59  ;;  %v3976_v28 = vmax.f32 %v6707_v50, 0.0 }
 0x3cf   : > { %v3977_v7 = vmax.f32 %v6708_v60, 0.0  ;;  %3949 = vmatmul.mubr.bf16.gmra.mrb[124].mxu0 %v7507_v29 }
 0x3d0   : > { %v3978_v39 = vmax.f32 %v6709_v11, 0.0 }
 0x3d1   : > { %v4223_v13 = vpack.c.bf16 %v3977_v7, %v3975_v15 }
 0x3d2   : > { %v4224_v40 = vpack.c.bf16 %v3978_v39, %v3976_v28  ;;  %v3690_v21 = vpop.f32.mrb[20].mxu0 }
 0x3d3   : > { %v6710_v47 = vadd.f32 %v3690_v21, %v9061_v58  ;;  %v3692_v63 = vpop.f32.mrb[21].mxu0 }
 0x3d4   : > { %v6711_v31 = vadd.f32 %v3692_v63, %v9061_v58  ;;  %v3694_v9 = vpop.f32.mrb[22].mxu0  ;;  %5311 = vmatprep.subr.bf16.mxu1 %v4224_v40 }
 0x3d5   : > { %v6712_v55 = vadd.f32 %v3694_v9, %v9769_v6  ;;  %v3696_v44 = vpop.f32.mrb[23].mxu0  ;;  %5312 = vmatpush1.bf16.msra.mxu1 %v4223_v13  ;;  %v3979_v8 = vmax.f32 %v6710_v47, 0.0 }
 0x3d6   : > { %v6713_v59 = vadd.f32 %v3696_v44, %v9769_v6  ;;  %v3980_v10 = vmax.f32 %v6711_v31, 0.0 }
 0x3d7   : > { %v3981_v62 = vmax.f32 %v6712_v55, 0.0 }
 0x3d8   : > { %v3982_v49 = vmax.f32 %v6713_v59, 0.0 }
 0x3d9   : > { %v4225_v30 = vpack.c.bf16 %v3981_v62, %v3979_v8 }
 0x3da   : > { %v4226_v24 = vpack.c.bf16 %v3982_v49, %v3980_v10  ;;  %v3700_v36 = vpop.f32.mrb[24].mxu0 }
 0x3db   : > { %v6714_v51 = vadd.f32 %v3700_v36, %v9078_v54  ;;  %v3702_v37 = vpop.f32.mrb[25].mxu0 }
 0x3dc   : > { %v6715_v58 = vadd.f32 %v3702_v37, %v9078_v54  ;;  %v3704_v2 = vpop.f32.mrb[26].mxu0  ;;  %5313 = vmatprep.subr.bf16.mxu1 %v4226_v24 }
 0x3dd   : > { %v6716_v12 = vadd.f32 %v3704_v2, %v9780_v27  ;;  %v3706_v25 = vpop.f32.mrb[27].mxu0  ;;  %5314 = vmatpush1.bf16.msra.mxu1 %v4225_v30  ;;  %v3983_v61 = vmax.f32 %v6714_v51, 0.0 }
 0x3de   : > { %v6717_v6 = vadd.f32 %v3706_v25, %v9780_v27  ;;  %v3984_v56 = vmax.f32 %v6715_v58, 0.0 }
 0x3df   : > { %v3985_v32 = vmax.f32 %v6716_v12, 0.0 }
 0x3e0   : > { %v3986_v26 = vmax.f32 %v6717_v6, 0.0 }
 0x3e1   : > { %v4227_v42 = vpack.c.bf16 %v3985_v32, %v3983_v61 }
 0x3e2   : > { %v4228_v19 = vpack.c.bf16 %v3986_v26, %v3984_v56  ;;  %v3710_v5 = vpop.f32.mrb[28].mxu0 }
 0x3e3   : > { %v6718_v43 = vadd.f32 %v3710_v5, %v9098_v23  ;;  %v3712_v48 = vpop.f32.mrb[29].mxu0 }
 0x3e4   : > { %v6719_v54 = vadd.f32 %v3712_v48, %v9098_v23  ;;  %v3714_v53 = vpop.f32.mrb[30].mxu0  ;;  %5315 = vmatprep.subr.bf16.mxu1 %v4228_v19 }
 0x3e5   : > { %v6720_v52 = vadd.f32 %v3714_v53, %v9788_v0  ;;  %v3716_v57 = vpop.f32.mrb[31].mxu0  ;;  %5316 = vmatpush1.bf16.msra.mxu1 %v4227_v42  ;;  %v3987_v29 = vmax.f32 %v6718_v43, 0.0 }
 0x3e6   : > { %v6721_v27 = vadd.f32 %v3716_v57, %v9788_v0  ;;  %v3988_v16 = vmax.f32 %v6719_v54, 0.0 }
 0x3e7   : > { %v3989_v50 = vmax.f32 %v6720_v52, 0.0 }
 0x3e8   : > { %v3990_v60 = vmax.f32 %v6721_v27, 0.0 }
 0x3e9   : > { %v4229_v1 = vpack.c.bf16 %v3989_v50, %v3987_v29 }
 0x3ea   : > { %v4230_v11 = vpack.c.bf16 %v3990_v60, %v3988_v16  ;;  %v3720_v15 = vpop.f32.mrb[32].mxu0 }
 0x3eb   : > { %v6722_v7 = vadd.f32 %v3720_v15, %v9128_v45  ;;  %v3722_v28 = vpop.f32.mrb[33].mxu0 }
 0x3ec   : > { %v6723_v23 = vadd.f32 %v3722_v28, %v9128_v45  ;;  %v3724_v39 = vpop.f32.mrb[34].mxu0  ;;  %5317 = vmatprep.subr.bf16.mxu1 %v4230_v11 }
 0x3ed   : > { %v6724_v13 = vadd.f32 %v3724_v39, %v9799_v46  ;;  %v3726_v40 = vpop.f32.mrb[35].mxu0  ;;  %5318 = vmatpush1.bf16.msra.mxu1 %v4229_v1  ;;  %v3991_v21 = vmax.f32 %v6722_v7, 0.0 }
 0x3ee   : > { %v6725_v0 = vadd.f32 %v3726_v40, %v9799_v46  ;;  %v3992_v63 = vmax.f32 %v6723_v23, 0.0 }
 0x3ef   : > { %v3993_v47 = vmax.f32 %v6724_v13, 0.0 }
 0x3f0   : > { %v3994_v31 = vmax.f32 %v6725_v0, 0.0 }
 0x3f1   : > { %v4231_v9 = vpack.c.bf16 %v3993_v47, %v3991_v21 }
 0x3f2   : > { %v4232_v55 = vpack.c.bf16 %v3994_v31, %v3992_v63  ;;  %v3730_v44 = vpop.f32.mrb[36].mxu0 }
 0x3f3   : > { %v6726_v59 = vadd.f32 %v3730_v44, %v9139_v4  ;;  %v3732_v8 = vpop.f32.mrb[37].mxu0 }
 0x3f4   : > { %v6727_v45 = vadd.f32 %v3732_v8, %v9139_v4  ;;  %v3734_v62 = vpop.f32.mrb[38].mxu0  ;;  %5319 = vmatprep.subr.bf16.mxu1 %v4232_v55  ;;  %v10702_v55 = vld [vmem:[#allocation7_spill] sm:$0xff] }
 0x3f5   : > { %v6728_v10 = vadd.f32 %v3734_v62, %v9813_v18  ;;  %v3736_v49 = vpop.f32.mrb[39].mxu0  ;;  %5320 = vmatpush1.bf16.msra.mxu1 %v4231_v9  ;;  %v3995_v30 = vmax.f32 %v6726_v59, 0.0 }
 0x3f6   : > { %v6729_v46 = vadd.f32 %v3736_v49, %v9813_v18  ;;  %v3996_v36 = vmax.f32 %v6727_v45, 0.0 }
 0x3f7   : > { %v3997_v24 = vmax.f32 %v6728_v10, 0.0 }
 0x3f8   : > { %v3998_v51 = vmax.f32 %v6729_v46, 0.0 }
 0x3f9   : > { %v4233_v37 = vpack.c.bf16 %v3997_v24, %v3995_v30 }
 0x3fa   : > { %v4234_v58 = vpack.c.bf16 %v3998_v51, %v3996_v36  ;;  %v3740_v2 = vpop.f32.mrb[40].mxu0 }
 0x3fb   : > { %v6730_v12 = vadd.f32 %v3740_v2, %v9162_v14  ;;  %v3742_v25 = vpop.f32.mrb[41].mxu0 }
 0x3fc   : > { %v6731_v4 = vadd.f32 %v3742_v25, %v9162_v14  ;;  %v3744_v6 = vpop.f32.mrb[42].mxu0  ;;  %5321 = vmatprep.subr.bf16.mxu1 %v4234_v58 }
 0x3fd   : > { %v6732_v61 = vadd.f32 %v3744_v6, %v9824_v34  ;;  %v3746_v32 = vpop.f32.mrb[43].mxu0  ;;  %5322 = vmatpush1.bf16.msra.mxu1 %v4233_v37  ;;  %v3999_v56 = vmax.f32 %v6730_v12, 0.0 }
 0x3fe   : > { %v6733_v18 = vadd.f32 %v3746_v32, %v9824_v34  ;;  %v4000_v42 = vmax.f32 %v6731_v4, 0.0 }
 0x3ff   : > { %v4001_v26 = vmax.f32 %v6732_v61, 0.0 }
 0x400   : > { %v4002_v19 = vmax.f32 %v6733_v18, 0.0 }
 0x401   : > { %v4235_v5 = vpack.c.bf16 %v4001_v26, %v3999_v56 }
 0x402   : > { %v4236_v43 = vpack.c.bf16 %v4002_v19, %v4000_v42  ;;  %v3750_v48 = vpop.f32.mrb[44].mxu0 }
 0x403   : > { %v6734_v54 = vadd.f32 %v3750_v48, %v9189_v38  ;;  %v3752_v53 = vpop.f32.mrb[45].mxu0 }
 0x404   : > { %v6735_v14 = vadd.f32 %v3752_v53, %v9189_v38  ;;  %v3754_v52 = vpop.f32.mrb[46].mxu0  ;;  %5323 = vmatprep.subr.bf16.mxu1 %v4236_v43  ;;  %v2451_v43 = vpop.permute.xlu1 %2450 }
 0x405   : > { %v6736_v57 = vadd.f32 %v3754_v52, %v9832_v3  ;;  %v3756_v27 = vpop.f32.mrb[47].mxu0  ;;  %5324 = vmatpush1.bf16.msra.mxu1 %v4235_v5  ;;  %v4003_v29 = vmax.f32 %v6734_v54, 0.0 }
 0x406   : > { %v6737_v34 = vadd.f32 %v3756_v27, %v9832_v3  ;;  %v4004_v16 = vmax.f32 %v6735_v14, 0.0 }
 0x407   : > { %v4005_v50 = vmax.f32 %v6736_v57, 0.0 }
 0x408   : > { %v4006_v60 = vmax.f32 %v6737_v34, 0.0 }
 0x409   : > { %v4237_v1 = vpack.c.bf16 %v4005_v50, %v4003_v29  ;;  %v2456_v29 = vpop.permute.xlu0 %2455 }
 0x40a   : > { %v4238_v11 = vpack.c.bf16 %v4006_v60, %v4004_v16  ;;  %v3760_v15 = vpop.f32.mrb[48].mxu0 }
 0x40b   : > { %v6738_v7 = vadd.f32 %v3760_v15, %v9203_v41  ;;  %v3762_v28 = vpop.f32.mrb[49].mxu0 }
 0x40c   : > { %v6739_v38 = vadd.f32 %v3762_v28, %v9203_v41  ;;  %v3764_v23 = vpop.f32.mrb[50].mxu0  ;;  %5325 = vmatprep.subr.bf16.mxu1 %v4238_v11  ;;  %v2461_v11 = vpop.permute.xlu1 %2460 }
 0x40d   : > { %v6740_v39 = vadd.f32 %v3764_v23, %v9843_v35  ;;  %v3766_v13 = vpop.f32.mrb[51].mxu0  ;;  %5326 = vmatpush1.bf16.msra.mxu1 %v4237_v1  ;;  %v4007_v40 = vmax.f32 %v6738_v7, 0.0  ;;  %v7511_v23 = vld [vmem:[%s10676_s5 + $0x24] ss:$16 sps:$4 sm:$0xff]  }
 0x40e   : > { %v6741_v3 = vadd.f32 %v3766_v13, %v9843_v35  ;;  %v4008_v21 = vmax.f32 %v6739_v38, 0.0 }
 0x40f   : > { %v4009_v0 = vmax.f32 %v6740_v39, 0.0 }
 0x410   : > { %v4010_v47 = vmax.f32 %v6741_v3, 0.0 }
 0x411   : > { %v4239_v63 = vpack.c.bf16 %v4009_v0, %v4007_v40 }
 0x412   : > { %v4240_v31 = vpack.c.bf16 %v4010_v47, %v4008_v21  ;;  %v3770_v9 = vpop.f32.mrb[52].mxu0  ;;  %v2466_v47 = vpop.permute.xlu0 %2465 }
 0x413   : > { %v6742_v44 = vadd.f32 %v3770_v9, %v10702_v55  ;;  %v3772_v59 = vpop.f32.mrb[53].mxu0 }
 0x414   : > { %v6743_v41 = vadd.f32 %v3772_v59, %v10702_v55  ;;  %v3774_v8 = vpop.f32.mrb[54].mxu0  ;;  %5327 = vmatprep.subr.bf16.mxu1 %v4240_v31 }
 0x415   : > { %v6744_v45 = vadd.f32 %v3774_v8, %v9857_v33  ;;  %v3776_v62 = vpop.f32.mrb[55].mxu0  ;;  %5328 = vmatpush1.bf16.msra.mxu1 %v4239_v63  ;;  %v4011_v10 = vmax.f32 %v6742_v44, 0.0  ;;  %v2471_v44 = vpop.permute.xlu1 %2470  ;;  %v7513_v8 = vld [vmem:[%s10676_s5 + $0x20] ss:$16 sps:$4 sm:$0xff]  }
 0x416   : > { %v6745_v35 = vadd.f32 %v3776_v62, %v9857_v33  ;;  %v4012_v46 = vmax.f32 %v6743_v41, 0.0 }
 0x417   : > { %v4013_v49 = vmax.f32 %v6744_v45, 0.0 }
 0x418   : > { %v4014_v30 = vmax.f32 %v6745_v35, 0.0  ;;  %v7514_v35 = vld [vmem:[%s10676_s5 + $0x44] ss:$16 sps:$4 sm:$0xff]  }
 0x419   : > { %v4241_v24 = vpack.c.bf16 %v4013_v49, %v4011_v10 }
 0x41a   : > { %v4242_v36 = vpack.c.bf16 %v4014_v30, %v4012_v46  ;;  %v3780_v51 = vpop.f32.mrb[56].mxu0 }
 0x41b   : > { %v6746_v37 = vadd.f32 %v3780_v51, %v9251_v22  ;;  %v3782_v58 = vpop.f32.mrb[57].mxu0  ;;  %v2476_v51 = vpop.permute.xlu0 %2475 }
 0x41c   : > { %v6747_v2 = vadd.f32 %v3782_v58, %v9251_v22  ;;  %v3784_v12 = vpop.f32.mrb[58].mxu0  ;;  %5329 = vmatprep.subr.bf16.mxu1 %v4242_v36 }
 0x41d   : > { %v6748_v25 = vadd.f32 %v3784_v12, %v9868_v17  ;;  %v3786_v4 = vpop.f32.mrb[59].mxu0  ;;  %5330 = vmatpush1.bf16.msra.mxu1 %v4241_v24  ;;  %v4015_v6 = vmax.f32 %v6746_v37, 0.0 }
 0x41e   : > { %v6749_v33 = vadd.f32 %v3786_v4, %v9868_v17  ;;  %v4016_v32 = vmax.f32 %v6747_v2, 0.0 }
 0x41f   : > { %v4017_v61 = vmax.f32 %v6748_v25, 0.0  ;;  %v2481_v25 = vpop.permute.xlu1 %2480 }
 0x420   : > { %v4018_v18 = vmax.f32 %v6749_v33, 0.0 }
 0x421   : > { %v4243_v56 = vpack.c.bf16 %v4017_v61, %v4015_v6  ;;  %v7516_v6 = vld [vmem:[%s10676_s5 + $0x40] ss:$16 sps:$4 sm:$0xff]  }
 0x422   : > { %v4244_v26 = vpack.c.bf16 %v4018_v18, %v4016_v32  ;;  %v3790_v42 = vpop.f32.mrb[60].mxu0  ;;  %v7517_v18 = vld [vmem:[%s10676_s5 + $0x64] ss:$16 sps:$4 sm:$0xff]  }
 0x423   : > { %v6750_v19 = vadd.f32 %v3790_v42, %v9259_v20  ;;  %v3792_v5 = vpop.f32.mrb[61].mxu0 }
 0x424   : > { %v6751_v22 = vadd.f32 %v3792_v5, %v9259_v20  ;;  %v3794_v48 = vpop.f32.mrb[62].mxu0  ;;  %5331 = vmatprep.subr.bf16.mxu1 %v4244_v26  ;;  %v7508_v20 = vld [vmem:[%s10676_s5] ss:$16 sps:$4 sm:$0xff]  }
 0x425   : > { %v6752_v54 = vadd.f32 %v3794_v48, %v2451_v43  ;;  %v3796_v53 = vpop.f32.mrb[63].mxu0  ;;  %5332 = vmatpush1.bf16.msra.mxu1 %v4243_v56  ;;  %v4019_v17 = vmax.f32 %v6750_v19, 0.0 }
 0x426   : > { %v6753_v14 = vadd.f32 %v3796_v53, %v2451_v43  ;;  %v4020_v57 = vmax.f32 %v6751_v22, 0.0  ;;  %v2486_v22 = vpop.permute.xlu0 %2485 }
 0x427   : > { %v4021_v52 = vmax.f32 %v6752_v54, 0.0 }
 0x428   : > { %v4022_v27 = vmax.f32 %v6753_v14, 0.0 }
 0x429   : > { %v4245_v34 = vpack.c.bf16 %v4021_v52, %v4019_v17  ;;  %v2491_v17 = vpop.permute.xlu1 %2490 }
 0x42a   : > { %v4246_v50 = vpack.c.bf16 %v4022_v27, %v4020_v57  ;;  %v3800_v16 = vpop.f32.mrb[64].mxu0  ;;  %v7519_v27 = vld [vmem:[%s10676_s5 + $0x60] ss:$16 sps:$4 sm:$0xff]  }
 0x42b   : > { %v6754_v60 = vadd.f32 %v3800_v16, %v2456_v29  ;;  %v3802_v1 = vpop.f32.mrb[65].mxu0 }
 0x42c   : > { %v6755_v15 = vadd.f32 %v3802_v1, %v2456_v29  ;;  %v3804_v7 = vpop.f32.mrb[66].mxu0  ;;  %5333 = vmatprep.subr.bf16.mxu1 %v4246_v50  ;;  %v7520_v50 = vld [vmem:[%s10676_s5 + $0x84] ss:$16 sps:$4 sm:$0xff]  }
 0x42d   : > { %v6756_v28 = vadd.f32 %v3804_v7, %v2461_v11  ;;  %v3806_v38 = vpop.f32.mrb[67].mxu0  ;;  %5334 = vmatpush1.bf16.msra.mxu1 %v4245_v34  ;;  %v4023_v13 = vmax.f32 %v6754_v60, 0.0 }
 0x42e   : > { %v6757_v39 = vadd.f32 %v3806_v38, %v2461_v11  ;;  %v4024_v40 = vmax.f32 %v6755_v15, 0.0 }
 0x42f   : > { %v4025_v3 = vmax.f32 %v6756_v28, 0.0 }
 0x430   : > { %v4026_v0 = vmax.f32 %v6757_v39, 0.0  ;;  %5336 = vmatmul.mubr.bf16.vlgmr.msra.gmra.mrb[0].mxu1 %v7508_v20  ;;  %v2496_v20 = vpop.permute.xlu0 %2495 }
 0x431   : > { %v4247_v21 = vpack.c.bf16 %v4025_v3, %v4023_v13  ;;  %5345 = vmatprep.mubr.bf16.mxu1 %v7511_v23  ;;  %v2501_v13 = vpop.permute.xlu1 %2500 }
 0x432   : > { %v4248_v63 = vpack.c.bf16 %v4026_v0, %v4024_v40  ;;  %v3810_v31 = vpop.f32.mrb[68].mxu0  ;;  %v7522_v0 = vld [vmem:[%s10676_s5 + $0x80] ss:$16 sps:$4 sm:$0xff]  }
 0x433   : > { %v6758_v9 = vadd.f32 %v3810_v31, %v2466_v47  ;;  %v3812_v55 = vpop.f32.mrb[69].mxu0 }
 0x434   : > { %v6759_v59 = vadd.f32 %v3812_v55, %v2466_v47  ;;  %v3814_v41 = vpop.f32.mrb[70].mxu0  ;;  %5656 = vmatprep.subr.bf16.mxu1 %v4248_v63  ;;  %v7523_v63 = vld [vmem:[%s10676_s5 + $0xa4] ss:$16 sps:$4 sm:$0xff]  }
 0x435   : > { %v6760_v45 = vadd.f32 %v3814_v41, %v2471_v44  ;;  %v3816_v62 = vpop.f32.mrb[71].mxu0  ;;  %5657 = vmatpush1.bf16.msra.mxu1 %v4247_v21  ;;  %v4027_v49 = vmax.f32 %v6758_v9, 0.0 }
 0x436   : > { %v6761_v10 = vadd.f32 %v3816_v62, %v2471_v44  ;;  %v4028_v30 = vmax.f32 %v6759_v59, 0.0 }
 0x437   : > { %v4029_v46 = vmax.f32 %v6760_v45, 0.0 }
 0x438   : > { %v4030_v24 = vmax.f32 %v6761_v10, 0.0  ;;  %5346 = vmatmul.mubr.bf16.gmra.mrb[4].mxu1 %v7513_v8  ;;  %v2506_v8 = vpop.permute.xlu0 %2505 }
 0x439   : > { %v4249_v36 = vpack.c.bf16 %v4029_v46, %v4027_v49  ;;  %5355 = vmatprep.mubr.bf16.mxu1 %v7514_v35  ;;  %v2511_v49 = vpop.permute.xlu1 %2510 }
 0x43a   : > { %v4250_v37 = vpack.c.bf16 %v4030_v24, %v4028_v30  ;;  %v3820_v58 = vpop.f32.mrb[72].mxu0  ;;  %v7525_v24 = vld [vmem:[%s10676_s5 + $0xa0] ss:$16 sps:$4 sm:$0xff]  }
 0x43b   : > { %v6762_v2 = vadd.f32 %v3820_v58, %v2476_v51  ;;  %v3822_v12 = vpop.f32.mrb[73].mxu0 }
 0x43c   : > { %v6763_v4 = vadd.f32 %v3822_v12, %v2476_v51  ;;  %v3824_v33 = vpop.f32.mrb[74].mxu0  ;;  %5658 = vmatprep.subr.bf16.mxu1 %v4250_v37  ;;  %v7526_v37 = vld [vmem:[%s10676_s5 + $0xc4] ss:$16 sps:$4 sm:$0xff]  }
 0x43d   : > { %v6764_v61 = vadd.f32 %v3824_v33, %v2481_v25  ;;  %v3826_v32 = vpop.f32.mrb[75].mxu0  ;;  %5659 = vmatpush1.bf16.msra.mxu1 %v4249_v36  ;;  %v4031_v26 = vmax.f32 %v6762_v2, 0.0 }
 0x43e   : > { %v6765_v56 = vadd.f32 %v3826_v32, %v2481_v25  ;;  %v4032_v19 = vmax.f32 %v6763_v4, 0.0 }
 0x43f   : > { %v4033_v42 = vmax.f32 %v6764_v61, 0.0 }
 0x440   : > { %v4034_v5 = vmax.f32 %v6765_v56, 0.0  ;;  %5356 = vmatmul.mubr.bf16.gmra.mrb[8].mxu1 %v7516_v6  ;;  %v2516_v6 = vpop.permute.xlu0 %2515 }
 0x441   : > { %v4251_v43 = vpack.c.bf16 %v4033_v42, %v4031_v26  ;;  %5365 = vmatprep.mubr.bf16.mxu1 %v7517_v18  ;;  %v2521_v26 = vpop.permute.xlu1 %2520 }
 0x442   : > { %v4252_v48 = vpack.c.bf16 %v4034_v5, %v4032_v19  ;;  %v3830_v54 = vpop.f32.mrb[76].mxu0  ;;  %v7528_v5 = vld [vmem:[%s10676_s5 + $0xc0] ss:$16 sps:$4 sm:$0xff]  }
 0x443   : > { %v6766_v53 = vadd.f32 %v3830_v54, %v2486_v22  ;;  %v3832_v14 = vpop.f32.mrb[77].mxu0 }
 0x444   : > { %v6767_v52 = vadd.f32 %v3832_v14, %v2486_v22  ;;  %v3834_v57 = vpop.f32.mrb[78].mxu0  ;;  %5660 = vmatprep.subr.bf16.mxu1 %v4252_v48  ;;  %v7529_v48 = vld [vmem:[%s10676_s5 + $0xe4] ss:$16 sps:$4 sm:$0xff]  }
 0x445   : > { %v6768_v34 = vadd.f32 %v3834_v57, %v2491_v17  ;;  %v3836_v29 = vpop.f32.mrb[79].mxu0  ;;  %5661 = vmatpush1.bf16.msra.mxu1 %v4251_v43  ;;  %v4035_v60 = vmax.f32 %v6766_v53, 0.0 }
 0x446   : > { %v6769_v16 = vadd.f32 %v3836_v29, %v2491_v17  ;;  %v4036_v11 = vmax.f32 %v6767_v52, 0.0 }
 0x447   : > { %v4037_v1 = vmax.f32 %v6768_v34, 0.0 }
 0x448   : > { %v4038_v15 = vmax.f32 %v6769_v16, 0.0  ;;  %5366 = vmatmul.mubr.bf16.gmra.mrb[12].mxu1 %v7519_v27  ;;  %v2526_v27 = vpop.permute.xlu0 %2525 }
 0x449   : > { %v4253_v7 = vpack.c.bf16 %v4037_v1, %v4035_v60  ;;  %5375 = vmatprep.mubr.bf16.mxu1 %v7520_v50  ;;  %v2531_v60 = vpop.permute.xlu1 %2530 }
 0x44a   : > { %v4254_v28 = vpack.c.bf16 %v4038_v15, %v4036_v11  ;;  %v3840_v38 = vpop.f32.mrb[80].mxu0  ;;  %v7531_v15 = vld [vmem:[%s10676_s5 + $0xe0] ss:$16 sps:$4 sm:$0xff]  }
 0x44b   : > { %v6770_v23 = vadd.f32 %v3840_v38, %v2496_v20  ;;  %v3842_v39 = vpop.f32.mrb[81].mxu0 }
 0x44c   : > { %v6771_v3 = vadd.f32 %v3842_v39, %v2496_v20  ;;  %v3844_v40 = vpop.f32.mrb[82].mxu0  ;;  %5662 = vmatprep.subr.bf16.mxu1 %v4254_v28  ;;  %v7532_v28 = vld [vmem:[%s10676_s5 + $0x104] ss:$16 sps:$4 sm:$0xff]  }
 0x44d   : > { %v6772_v21 = vadd.f32 %v3844_v40, %v2501_v13  ;;  %v3846_v47 = vpop.f32.mrb[83].mxu0  ;;  %5663 = vmatpush1.bf16.msra.mxu1 %v4253_v7  ;;  %v4039_v9 = vmax.f32 %v6770_v23, 0.0 }
 0x44e   : > { %v6773_v31 = vadd.f32 %v3846_v47, %v2501_v13  ;;  %v4040_v44 = vmax.f32 %v6771_v3, 0.0 }
 0x44f   : > { %v4041_v55 = vmax.f32 %v6772_v21, 0.0 }
 0x450   : > { %v4042_v59 = vmax.f32 %v6773_v31, 0.0  ;;  %5376 = vmatmul.mubr.bf16.gmra.mrb[16].mxu1 %v7522_v0  ;;  %v2536_v0 = vpop.permute.xlu0 %2535 }
 0x451   : > { %v4255_v41 = vpack.c.bf16 %v4041_v55, %v4039_v9  ;;  %5385 = vmatprep.mubr.bf16.mxu1 %v7523_v63  ;;  %v2541_v9 = vpop.permute.xlu1 %2540 }
 0x452   : > { %v4256_v45 = vpack.c.bf16 %v4042_v59, %v4040_v44  ;;  %v3850_v62 = vpop.f32.mrb[84].mxu0  ;;  %v7534_v59 = vld [vmem:[%s10676_s5 + $0x100] ss:$16 sps:$4 sm:$0xff]  }
 0x453   : > { %v6774_v35 = vadd.f32 %v3850_v62, %v2506_v8  ;;  %v3852_v10 = vpop.f32.mrb[85].mxu0 }
 0x454   : > { %v6775_v46 = vadd.f32 %v3852_v10, %v2506_v8  ;;  %v3854_v30 = vpop.f32.mrb[86].mxu0  ;;  %5664 = vmatprep.subr.bf16.mxu1 %v4256_v45  ;;  %v7535_v45 = vld [vmem:[%s10676_s5 + $0x124] ss:$16 sps:$4 sm:$0xff]  }
 0x455   : > { %v6776_v36 = vadd.f32 %v3854_v30, %v2511_v49  ;;  %v3856_v51 = vpop.f32.mrb[87].mxu0  ;;  %5665 = vmatpush1.bf16.msra.mxu1 %v4255_v41  ;;  %v4043_v2 = vmax.f32 %v6774_v35, 0.0 }
 0x456   : > { %v6777_v58 = vadd.f32 %v3856_v51, %v2511_v49  ;;  %v4044_v25 = vmax.f32 %v6775_v46, 0.0 }
 0x457   : > { %v4045_v12 = vmax.f32 %v6776_v36, 0.0 }
 0x458   : > { %v4046_v4 = vmax.f32 %v6777_v58, 0.0  ;;  %5386 = vmatmul.mubr.bf16.gmra.mrb[20].mxu1 %v7525_v24  ;;  %v2546_v24 = vpop.permute.xlu0 %2545 }
 0x459   : > { %v4257_v33 = vpack.c.bf16 %v4045_v12, %v4043_v2  ;;  %5395 = vmatprep.mubr.bf16.mxu1 %v7526_v37  ;;  %v2551_v2 = vpop.permute.xlu1 %2550 }
 0x45a   : > { %v4258_v61 = vpack.c.bf16 %v4046_v4, %v4044_v25  ;;  %v3860_v32 = vpop.f32.mrb[88].mxu0  ;;  %v7537_v4 = vld [vmem:[%s10676_s5 + $0x120] ss:$16 sps:$4 sm:$0xff]  }
 0x45b   : > { %v6778_v18 = vadd.f32 %v3860_v32, %v2516_v6  ;;  %v3862_v56 = vpop.f32.mrb[89].mxu0 }
 0x45c   : > { %v6779_v42 = vadd.f32 %v3862_v56, %v2516_v6  ;;  %v3864_v19 = vpop.f32.mrb[90].mxu0  ;;  %5666 = vmatprep.subr.bf16.mxu1 %v4258_v61  ;;  %v7538_v61 = vld [vmem:[%s10676_s5 + $0x144] ss:$16 sps:$4 sm:$0xff]  }
 0x45d   : > { %v6780_v43 = vadd.f32 %v3864_v19, %v2521_v26  ;;  %v3866_v22 = vpop.f32.mrb[91].mxu0  ;;  %5667 = vmatpush1.bf16.msra.mxu1 %v4257_v33  ;;  %v4047_v53 = vmax.f32 %v6778_v18, 0.0 }
 0x45e   : > { %v6781_v54 = vadd.f32 %v3866_v22, %v2521_v26  ;;  %v4048_v17 = vmax.f32 %v6779_v42, 0.0 }
 0x45f   : > { %v4049_v14 = vmax.f32 %v6780_v43, 0.0 }
 0x460   : > { %v4050_v52 = vmax.f32 %v6781_v54, 0.0  ;;  %5396 = vmatmul.mubr.bf16.gmra.mrb[24].mxu1 %v7528_v5  ;;  %v2556_v5 = vpop.permute.xlu0 %2555 }
 0x461   : > { %v4259_v57 = vpack.c.bf16 %v4049_v14, %v4047_v53  ;;  %5405 = vmatprep.mubr.bf16.mxu1 %v7529_v48  ;;  %v2561_v53 = vpop.permute.xlu1 %2560 }
 0x462   : > { %v4260_v34 = vpack.c.bf16 %v4050_v52, %v4048_v17  ;;  %v3870_v29 = vpop.f32.mrb[92].mxu0  ;;  %v7540_v52 = vld [vmem:[%s10676_s5 + $0x140] ss:$16 sps:$4 sm:$0xff]  }
 0x463   : > { %v6782_v50 = vadd.f32 %v3870_v29, %v2526_v27  ;;  %v3872_v16 = vpop.f32.mrb[93].mxu0 }
 0x464   : > { %v6783_v1 = vadd.f32 %v3872_v16, %v2526_v27  ;;  %v3874_v11 = vpop.f32.mrb[94].mxu0  ;;  %5668 = vmatprep.subr.bf16.mxu1 %v4260_v34  ;;  %v7541_v34 = vld [vmem:[%s10676_s5 + $0x164] ss:$16 sps:$4 sm:$0xff]  }
 0x465   : > { %v6784_v7 = vadd.f32 %v3874_v11, %v2531_v60  ;;  %v3876_v20 = vpop.f32.mrb[95].mxu0  ;;  %5669 = vmatpush1.bf16.msra.mxu1 %v4259_v57  ;;  %v4051_v23 = vmax.f32 %v6782_v50, 0.0 }
 0x466   : > { %v6785_v38 = vadd.f32 %v3876_v20, %v2531_v60  ;;  %v4052_v13 = vmax.f32 %v6783_v1, 0.0 }
 0x467   : > { %v4053_v39 = vmax.f32 %v6784_v7, 0.0 }
 0x468   : > { %v4054_v3 = vmax.f32 %v6785_v38, 0.0  ;;  %5406 = vmatmul.mubr.bf16.gmra.mrb[28].mxu1 %v7531_v15  ;;  %v2566_v15 = vpop.permute.xlu0 %2565 }
 0x469   : > { %v4261_v40 = vpack.c.bf16 %v4053_v39, %v4051_v23  ;;  %5415 = vmatprep.mubr.bf16.mxu1 %v7532_v28  ;;  %v2571_v23 = vpop.permute.xlu1 %2570 }
 0x46a   : > { %v4262_v21 = vpack.c.bf16 %v4054_v3, %v4052_v13  ;;  %v3880_v47 = vpop.f32.mrb[96].mxu0  ;;  %v7543_v3 = vld [vmem:[%s10676_s5 + $0x160] ss:$16 sps:$4 sm:$0xff]  }
 0x46b   : > { %v6786_v63 = vadd.f32 %v3880_v47, %v2536_v0  ;;  %v3882_v31 = vpop.f32.mrb[97].mxu0 }
 0x46c   : > { %v6787_v55 = vadd.f32 %v3882_v31, %v2536_v0  ;;  %v3884_v44 = vpop.f32.mrb[98].mxu0  ;;  %5670 = vmatprep.subr.bf16.mxu1 %v4262_v21  ;;  %v7544_v21 = vld [vmem:[%s10676_s5 + $0x184] ss:$16 sps:$4 sm:$0xff]  }
 0x46d   : > { %v6788_v41 = vadd.f32 %v3884_v44, %v2541_v9  ;;  %v3886_v8 = vpop.f32.mrb[99].mxu0  ;;  %5671 = vmatpush1.bf16.msra.mxu1 %v4261_v40  ;;  %v4055_v35 = vmax.f32 %v6786_v63, 0.0 }
 0x46e   : > { %v6789_v62 = vadd.f32 %v3886_v8, %v2541_v9  ;;  %v4056_v49 = vmax.f32 %v6787_v55, 0.0 }
 0x46f   : > { %v4057_v10 = vmax.f32 %v6788_v41, 0.0 }
 0x470   : > { %v4058_v46 = vmax.f32 %v6789_v62, 0.0  ;;  %5416 = vmatmul.mubr.bf16.gmra.mrb[32].mxu1 %v7534_v59  ;;  %v2576_v59 = vpop.permute.xlu0 %2575 }
 0x471   : > { %v4263_v30 = vpack.c.bf16 %v4057_v10, %v4055_v35  ;;  %5425 = vmatprep.mubr.bf16.mxu1 %v7535_v45  ;;  %v2581_v35 = vpop.permute.xlu1 %2580 }
 0x472   : > { %v4264_v36 = vpack.c.bf16 %v4058_v46, %v4056_v49  ;;  %v3890_v51 = vpop.f32.mrb[100].mxu0  ;;  %v7546_v46 = vld [vmem:[%s10676_s5 + $0x180] ss:$16 sps:$4 sm:$0xff]  }
 0x473   : > { %v6790_v37 = vadd.f32 %v3890_v51, %v2546_v24  ;;  %v3892_v58 = vpop.f32.mrb[101].mxu0 }
 0x474   : > { %v6791_v12 = vadd.f32 %v3892_v58, %v2546_v24  ;;  %v3894_v25 = vpop.f32.mrb[102].mxu0  ;;  %5672 = vmatprep.subr.bf16.mxu1 %v4264_v36  ;;  %v7547_v36 = vld [vmem:[%s10676_s5 + $0x1a4] ss:$16 sps:$4 sm:$0xff]  }
 0x475   : > { %v6792_v33 = vadd.f32 %v3894_v25, %v2551_v2  ;;  %v3896_v6 = vpop.f32.mrb[103].mxu0  ;;  %5673 = vmatpush1.bf16.msra.mxu1 %v4263_v30  ;;  %v4059_v18 = vmax.f32 %v6790_v37, 0.0 }
 0x476   : > { %v6793_v32 = vadd.f32 %v3896_v6, %v2551_v2  ;;  %v4060_v26 = vmax.f32 %v6791_v12, 0.0 }
 0x477   : > { %v4061_v56 = vmax.f32 %v6792_v33, 0.0 }
 0x478   : > { %v4062_v42 = vmax.f32 %v6793_v32, 0.0  ;;  %5426 = vmatmul.mubr.bf16.gmra.mrb[36].mxu1 %v7537_v4  ;;  %v2586_v4 = vpop.permute.xlu0 %2585 }
 0x479   : > { %v4265_v19 = vpack.c.bf16 %v4061_v56, %v4059_v18  ;;  %5435 = vmatprep.mubr.bf16.mxu1 %v7538_v61  ;;  %v2591_v18 = vpop.permute.xlu1 %2590 }
 0x47a   : > { %v4266_v43 = vpack.c.bf16 %v4062_v42, %v4060_v26  ;;  %v3900_v22 = vpop.f32.mrb[104].mxu0  ;;  %v7549_v42 = vld [vmem:[%s10676_s5 + $0x1a0] ss:$16 sps:$4 sm:$0xff]  }
 0x47b   : > { %v6794_v48 = vadd.f32 %v3900_v22, %v2556_v5  ;;  %v3902_v54 = vpop.f32.mrb[105].mxu0 }
 0x47c   : > { %v6795_v14 = vadd.f32 %v3902_v54, %v2556_v5  ;;  %v3904_v17 = vpop.f32.mrb[106].mxu0  ;;  %5674 = vmatprep.subr.bf16.mxu1 %v4266_v43  ;;  %v7550_v43 = vld [vmem:[%s10676_s5 + $0x1c4] ss:$16 sps:$4 sm:$0xff]  }
 0x47d   : > { %v6796_v57 = vadd.f32 %v3904_v17, %v2561_v53  ;;  %v3906_v27 = vpop.f32.mrb[107].mxu0  ;;  %5675 = vmatpush1.bf16.msra.mxu1 %v4265_v19  ;;  %v4063_v50 = vmax.f32 %v6794_v48, 0.0 }
 0x47e   : > { %v6797_v29 = vadd.f32 %v3906_v27, %v2561_v53  ;;  %v4064_v60 = vmax.f32 %v6795_v14, 0.0 }
 0x47f   : > { %v4065_v16 = vmax.f32 %v6796_v57, 0.0 }
 0x480   : > { %v4066_v1 = vmax.f32 %v6797_v29, 0.0  ;;  %5436 = vmatmul.mubr.bf16.gmra.mrb[40].mxu1 %v7540_v52  ;;  %v2596_v52 = vpop.permute.xlu0 %2595 }
 0x481   : > { %v4267_v11 = vpack.c.bf16 %v4065_v16, %v4063_v50  ;;  %5445 = vmatprep.mubr.bf16.mxu1 %v7541_v34  ;;  %v2601_v50 = vpop.permute.xlu1 %2600 }
 0x482   : > { %v4268_v7 = vpack.c.bf16 %v4066_v1, %v4064_v60  ;;  %v3910_v20 = vpop.f32.mrb[108].mxu0  ;;  %v7552_v1 = vld [vmem:[%s10676_s5 + $0x1c0] ss:$16 sps:$4 sm:$0xff]  }
 0x483   : > { %v6798_v28 = vadd.f32 %v3910_v20, %v2566_v15  ;;  %v3912_v38 = vpop.f32.mrb[109].mxu0 }
 0x484   : > { %v6799_v39 = vadd.f32 %v3912_v38, %v2566_v15  ;;  %v3914_v13 = vpop.f32.mrb[110].mxu0  ;;  %5676 = vmatprep.subr.bf16.mxu1 %v4268_v7  ;;  %v7553_v7 = vld [vmem:[%s10676_s5 + $0x1e4] ss:$16 sps:$4 sm:$0xff]  }
 0x485   : > { %v6800_v40 = vadd.f32 %v3914_v13, %v2571_v23  ;;  %v3916_v0 = vpop.f32.mrb[111].mxu0  ;;  %5677 = vmatpush1.bf16.msra.mxu1 %v4267_v11  ;;  %v4067_v63 = vmax.f32 %v6798_v28, 0.0 }
 0x486   : > { %v6801_v47 = vadd.f32 %v3916_v0, %v2571_v23  ;;  %v4068_v9 = vmax.f32 %v6799_v39, 0.0 }
 0x487   : > { %v4069_v31 = vmax.f32 %v6800_v40, 0.0 }
 0x488   : > { %v4070_v55 = vmax.f32 %v6801_v47, 0.0  ;;  %5446 = vmatmul.mubr.bf16.gmra.mrb[44].mxu1 %v7543_v3  ;;  %v2606_v3 = vpop.permute.xlu0 %2605 }
 0x489   : > { %v4269_v44 = vpack.c.bf16 %v4069_v31, %v4067_v63  ;;  %5455 = vmatprep.mubr.bf16.mxu1 %v7544_v21  ;;  %v2611_v63 = vpop.permute.xlu1 %2610 }
 0x48a   : > { %v4270_v41 = vpack.c.bf16 %v4070_v55, %v4068_v9  ;;  %v3920_v8 = vpop.f32.mrb[112].mxu0  ;;  %v7555_v55 = vld [vmem:[%s10676_s5 + $0x1e0] ss:$16 sps:$4 sm:$0xff]  }
 0x48b   : > { %v6802_v45 = vadd.f32 %v3920_v8, %v2576_v59  ;;  %v3922_v62 = vpop.f32.mrb[113].mxu0 }
 0x48c   : > { %v6803_v10 = vadd.f32 %v3922_v62, %v2576_v59  ;;  %v3924_v49 = vpop.f32.mrb[114].mxu0  ;;  %5678 = vmatprep.subr.bf16.mxu1 %v4270_v41  ;;  %v7556_v41 = vld [vmem:[%s10676_s5 + $0x204] ss:$16 sps:$4 sm:$0xff]  }
 0x48d   : > { %v6804_v30 = vadd.f32 %v3924_v49, %v2581_v35  ;;  %v3926_v24 = vpop.f32.mrb[115].mxu0  ;;  %5679 = vmatpush1.bf16.msra.mxu1 %v4269_v44  ;;  %v4071_v37 = vmax.f32 %v6802_v45, 0.0 }
 0x48e   : > { %v6805_v51 = vadd.f32 %v3926_v24, %v2581_v35  ;;  %v4072_v2 = vmax.f32 %v6803_v10, 0.0  ;;  %v7559_v24 = vld [vmem:[%s10676_s5 + $0x224] ss:$16 sps:$4 sm:$0xff]  }
 0x48f   : > { %v4073_v58 = vmax.f32 %v6804_v30, 0.0  ;;  %v7558_v30 = vld [vmem:[%s10676_s5 + $0x200] ss:$16 sps:$4 sm:$0xff]  }
 0x490   : > { %v4074_v12 = vmax.f32 %v6805_v51, 0.0  ;;  %5456 = vmatmul.mubr.bf16.gmra.mrb[48].mxu1 %v7546_v46  ;;  %v7562_v51 = vld [vmem:[%s10676_s5 + $0x244] ss:$16 sps:$4 sm:$0xff]  }
 0x491   : > { %v4271_v25 = vpack.c.bf16 %v4073_v58, %v4071_v37  ;;  %5465 = vmatprep.mubr.bf16.mxu1 %v7547_v36  ;;  %v7561_v36 = vld [vmem:[%s10676_s5 + $0x220] ss:$16 sps:$4 sm:$0xff]   ;;  %v7565_v58 = vld [vmem:[%s10676_s5 + $0x264] ss:$16 sps:$4 sm:$0xff]  }
 0x492   : > { %v4272_v33 = vpack.c.bf16 %v4074_v12, %v4072_v2  ;;  %v3930_v6 = vpop.f32.mrb[116].mxu0  ;;  %v7564_v37 = vld [vmem:[%s10676_s5 + $0x240] ss:$16 sps:$4 sm:$0xff]   ;;  %v7568_v12 = vld [vmem:[%s10676_s5 + $0x284] ss:$16 sps:$4 sm:$0xff]  }
 0x493   : > { %v6806_v61 = vadd.f32 %v3930_v6, %v2586_v4  ;;  %v3932_v32 = vpop.f32.mrb[117].mxu0  ;;  %v7567_v2 = vld [vmem:[%s10676_s5 + $0x260] ss:$16 sps:$4 sm:$0xff]   ;;  %v7574_v6 = vld [vmem:[%s10676_s5 + $0x2c4] ss:$16 sps:$4 sm:$0xff]  }
 0x494   : > { %v6807_v56 = vadd.f32 %v3932_v32, %v2586_v4  ;;  %v3934_v26 = vpop.f32.mrb[118].mxu0  ;;  %5680 = vmatprep.subr.bf16.mxu1 %v4272_v33  ;;  %v7571_v4 = vld [vmem:[%s10676_s5 + $0x2a4] ss:$16 sps:$4 sm:$0xff]   ;;  %v7573_v33 = vld [vmem:[%s10676_s5 + $0x2a0] ss:$16 sps:$4 sm:$0xff]  }
 0x495   : > { %v6808_v19 = vadd.f32 %v3934_v26, %v2591_v18  ;;  %v3936_v5 = vpop.f32.mrb[119].mxu0  ;;  %5681 = vmatpush1.bf16.msra.mxu1 %v4271_v25  ;;  %v4075_v48 = vmax.f32 %v6806_v61, 0.0  ;;  %v7570_v25 = vld [vmem:[%s10676_s5 + $0x280] ss:$16 sps:$4 sm:$0xff]   ;;  %v7577_v32 = vld [vmem:[%s10676_s5 + $0x2e4] ss:$16 sps:$4 sm:$0xff]  }
 0x496   : > { %v6809_v22 = vadd.f32 %v3936_v5, %v2591_v18  ;;  %v4076_v53 = vmax.f32 %v6807_v56, 0.0  ;;  %v7576_v61 = vld [vmem:[%s10676_s5 + $0x2c0] ss:$16 sps:$4 sm:$0xff]   ;;  %v7580_v56 = vld [vmem:[%s10676_s5 + $0x304] ss:$16 sps:$4 sm:$0xff]  }
 0x497   : > { %v4077_v54 = vmax.f32 %v6808_v19, 0.0  ;;  %v7579_v18 = vld [vmem:[%s10676_s5 + $0x2e0] ss:$16 sps:$4 sm:$0xff]   ;;  %v7586_v5 = vld [vmem:[%s10676_s5 + $0x344] ss:$16 sps:$4 sm:$0xff]  }
 0x498   : > { %v4078_v14 = vmax.f32 %v6809_v22, 0.0  ;;  %5466 = vmatmul.mubr.bf16.gmra.mrb[52].mxu1 %v7549_v42  ;;  %v7582_v26 = vld [vmem:[%s10676_s5 + $0x300] ss:$16 sps:$4 sm:$0xff]   ;;  %v7583_v42 = vld [vmem:[%s10676_s5 + $0x324] ss:$16 sps:$4 sm:$0xff]  }
 0x499   : > { %v4273_v17 = vpack.c.bf16 %v4077_v54, %v4075_v48  ;;  %5475 = vmatprep.mubr.bf16.mxu1 %v7550_v43  ;;  %v7585_v19 = vld [vmem:[%s10676_s5 + $0x320] ss:$16 sps:$4 sm:$0xff]   ;;  %v7589_v22 = vld [vmem:[%s10676_s5 + $0x364] ss:$16 sps:$4 sm:$0xff]  }
 0x49a   : > { %v4274_v57 = vpack.c.bf16 %v4078_v14, %v4076_v53  ;;  %v3940_v27 = vpop.f32.mrb[120].mxu0  ;;  %v7588_v43 = vld [vmem:[%s10676_s5 + $0x340] ss:$16 sps:$4 sm:$0xff]   ;;  %v7592_v54 = vld [vmem:[%s10676_s5 + $0x384] ss:$16 sps:$4 sm:$0xff]  }
 0x49b   : > { %v6810_v34 = vadd.f32 %v3940_v27, %v2596_v52  ;;  %v3942_v29 = vpop.f32.mrb[121].mxu0  ;;  %v7591_v48 = vld [vmem:[%s10676_s5 + $0x360] ss:$16 sps:$4 sm:$0xff]   ;;  %v7595_v14 = vld [vmem:[%s10676_s5 + $0x3a4] ss:$16 sps:$4 sm:$0xff]  }
 0x49c   : > { %v6811_v16 = vadd.f32 %v3942_v29, %v2596_v52  ;;  %v3944_v60 = vpop.f32.mrb[122].mxu0  ;;  %5682 = vmatprep.subr.bf16.mxu1 %v4274_v57  ;;  %v7594_v53 = vld [vmem:[%s10676_s5 + $0x380] ss:$16 sps:$4 sm:$0xff]   ;;  %v7598_v52 = vld [vmem:[%s10676_s5 + $0x3c4] ss:$16 sps:$4 sm:$0xff]  }
 0x49d   : > { %v6812_v11 = vadd.f32 %v3944_v60, %v2601_v50  ;;  %v3946_v15 = vpop.f32.mrb[123].mxu0  ;;  %5683 = vmatpush1.bf16.msra.mxu1 %v4273_v17  ;;  %v4079_v28 = vmax.f32 %v6810_v34, 0.0  ;;  %v7597_v17 = vld [vmem:[%s10676_s5 + $0x3a0] ss:$16 sps:$4 sm:$0xff]   ;;  %v7601_v27 = vld [vmem:[%s10676_s5 + $0x3e4] ss:$16 sps:$4 sm:$0xff]  }
 0x49e   : > { %v6813_v20 = vadd.f32 %v3946_v15, %v2601_v50  ;;  %v4080_v23 = vmax.f32 %v6811_v16, 0.0  ;;  %v7600_v57 = vld [vmem:[%s10676_s5 + $0x3c0] ss:$16 sps:$4 sm:$0xff]   ;;  %v7606_v29 = vld [vmem:[%s10676_s5 + $0xc] ss:$16 sps:$4 sm:$0xff]  }
 0x49f   : > { %v4081_v38 = vmax.f32 %v6812_v11, 0.0  ;;  %v7603_v34 = vld [vmem:[%s10676_s5 + $0x3e0] ss:$16 sps:$4 sm:$0xff]   ;;  %v7604_v50 = vld [vmem:[%s10676_s5 + $0x8] ss:$16 sps:$4 sm:$0xff]  }
 0x4a0   : > { %v4082_v39 = vmax.f32 %v6813_v20, 0.0  ;;  %5476 = vmatmul.mubr.bf16.gmra.mrb[56].mxu1 %v7552_v1  ;;  %v7607_v16 = vld [vmem:[%s10676_s5 + $0x2c] ss:$16 sps:$4 sm:$0xff]   ;;  %v7609_v60 = vld [vmem:[%s10676_s5 + $0x28] ss:$16 sps:$4 sm:$0xff]  }
 0x4a1   : > { %v4275_v13 = vpack.c.bf16 %v4081_v38, %v4079_v28  ;;  %5485 = vmatprep.mubr.bf16.mxu1 %v7553_v7  ;;  %v7610_v1 = vld [vmem:[%s10676_s5 + $0x4c] ss:$16 sps:$4 sm:$0xff]   ;;  %v7612_v11 = vld [vmem:[%s10676_s5 + $0x48] ss:$16 sps:$4 sm:$0xff]  }
 0x4a2   : > { %v4276_v40 = vpack.c.bf16 %v4082_v39, %v4080_v23  ;;  %v3950_v0 = vpop.f32.mrb[124].mxu0  ;;  %v7613_v15 = vld [vmem:[%s10676_s5 + $0x6c] ss:$16 sps:$4 sm:$0xff]   ;;  %v7615_v7 = vld [vmem:[%s10676_s5 + $0x68] ss:$16 sps:$4 sm:$0xff]  }
 0x4a3   : > { %v6814_v21 = vadd.f32 %v3950_v0, %v2606_v3  ;;  %v3952_v47 = vpop.f32.mrb[125].mxu0  ;;  %v7616_v20 = vld [vmem:[%s10676_s5 + $0x8c] ss:$16 sps:$4 sm:$0xff]   ;;  %v7618_v28 = vld [vmem:[%s10676_s5 + $0x88] ss:$16 sps:$4 sm:$0xff]  }
 0x4a4   : > { %v6815_v31 = vadd.f32 %v3952_v47, %v2606_v3  ;;  %v3954_v9 = vpop.f32.mrb[126].mxu0  ;;  %5684 = vmatprep.subr.bf16.mxu1 %v4276_v40  ;;  %v7619_v38 = vld [vmem:[%s10676_s5 + $0xac] ss:$16 sps:$4 sm:$0xff]   ;;  %v7621_v23 = vld [vmem:[%s10676_s5 + $0xa8] ss:$16 sps:$4 sm:$0xff]  }
 0x4a5   : > { %v6816_v44 = vadd.f32 %v3954_v9, %v2611_v63  ;;  %v3956_v59 = vpop.f32.mrb[127].mxu0  ;;  %5685 = vmatpush1.bf16.msra.mxu1 %v4275_v13  ;;  %v4083_v45 = vmax.f32 %v6814_v21, 0.0  ;;  %v7622_v39 = vld [vmem:[%s10676_s5 + $0xcc] ss:$16 sps:$4 sm:$0xff]   ;;  %v7624_v13 = vld [vmem:[%s10676_s5 + $0xc8] ss:$16 sps:$4 sm:$0xff]  }
 0x4a6   : > { %v6817_v8 = vadd.f32 %v3956_v59, %v2611_v63  ;;  %v4084_v35 = vmax.f32 %v6815_v31, 0.0  ;;  %v7625_v3 = vld [vmem:[%s10676_s5 + $0xec] ss:$16 sps:$4 sm:$0xff]   ;;  %v7627_v40 = vld [vmem:[%s10676_s5 + $0xe8] ss:$16 sps:$4 sm:$0xff]  }
 0x4a7   : > { %v4085_v62 = vmax.f32 %v6816_v44, 0.0  ;;  %v7628_v0 = vld [vmem:[%s10676_s5 + $0x10c] ss:$16 sps:$4 sm:$0xff]   ;;  %v7630_v21 = vld [vmem:[%s10676_s5 + $0x108] ss:$16 sps:$4 sm:$0xff]  }
 0x4a8   : > { %v4086_v10 = vmax.f32 %v6817_v8, 0.0  ;;  %5486 = vmatmul.mubr.bf16.gmra.mrb[60].mxu1 %v7555_v55  ;;  %v7631_v47 = vld [vmem:[%s10676_s5 + $0x12c] ss:$16 sps:$4 sm:$0xff]   ;;  %v7633_v63 = vld [vmem:[%s10676_s5 + $0x128] ss:$16 sps:$4 sm:$0xff]  }
 0x4a9   : > { %v4277_v49 = vpack.c.bf16 %v4085_v62, %v4083_v45  ;;  %5495 = vmatprep.mubr.bf16.mxu1 %v7556_v41  ;;  %v7634_v31 = vld [vmem:[%s10676_s5 + $0x14c] ss:$16 sps:$4 sm:$0xff]   ;;  %v7636_v9 = vld [vmem:[%s10676_s5 + $0x148] ss:$16 sps:$4 sm:$0xff]  }
 0x4aa   : > { %v4278_v46 = vpack.c.bf16 %v4086_v10, %v4084_v35  ;;  %v7637_v55 = vld [vmem:[%s10676_s5 + $0x16c] ss:$16 sps:$4 sm:$0xff]   ;;  %v7639_v44 = vld [vmem:[%s10676_s5 + $0x168] ss:$16 sps:$4 sm:$0xff]  }
 0x4ab   : > { %v7640_v59 = vld [vmem:[%s10676_s5 + $0x18c] ss:$16 sps:$4 sm:$0xff]   ;;  %v7642_v41 = vld [vmem:[%s10676_s5 + $0x188] ss:$16 sps:$4 sm:$0xff]  }
 0x4ac   : > { %5686 = vmatprep.subr.bf16.mxu1 %v4278_v46  ;;  %v7643_v8 = vld [vmem:[%s10676_s5 + $0x1ac] ss:$16 sps:$4 sm:$0xff]   ;;  %v7645_v45 = vld [vmem:[%s10676_s5 + $0x1a8] ss:$16 sps:$4 sm:$0xff]  }
 0x4ad   : > { %5687 = vmatpush1.bf16.msra.mxu1 %v4277_v49  ;;  %v7646_v62 = vld [vmem:[%s10676_s5 + $0x1cc] ss:$16 sps:$4 sm:$0xff]   ;;  %v7648_v35 = vld [vmem:[%s10676_s5 + $0x1c8] ss:$16 sps:$4 sm:$0xff]  }
 0x4ae   : > { %v7649_v10 = vld [vmem:[%s10676_s5 + $0x1ec] ss:$16 sps:$4 sm:$0xff]   ;;  %v7651_v49 = vld [vmem:[%s10676_s5 + $0x1e8] ss:$16 sps:$4 sm:$0xff]  }
 0x4af   : > { %v7652_v46 = vld [vmem:[%s10676_s5 + $0x20c] ss:$16 sps:$4 sm:$0xff]  }
 0x4b0   : > { %5496 = vmatmul.mubr.bf16.gmra.mrb[64].mxu1 %v7558_v30  ;;  %v7654_v30 = vld [vmem:[%s10676_s5 + $0x208] ss:$16 sps:$4 sm:$0xff]  }
 0x4b1   : > { %5505 = vmatprep.mubr.bf16.mxu1 %v7559_v24  ;;  %v7655_v24 = vld [vmem:[%s10676_s5 + $0x22c] ss:$16 sps:$4 sm:$0xff]  }
 0x4b8   : > { %5506 = vmatmul.mubr.bf16.gmra.mrb[68].mxu1 %v7561_v36  ;;  %v7657_v36 = vld [vmem:[%s10676_s5 + $0x228] ss:$16 sps:$4 sm:$0xff]  }
 0x4b9   : > { %5515 = vmatprep.mubr.bf16.mxu1 %v7562_v51  ;;  %v7658_v51 = vld [vmem:[%s10676_s5 + $0x24c] ss:$16 sps:$4 sm:$0xff]  }
 0x4c0   : > { %5516 = vmatmul.mubr.bf16.gmra.mrb[72].mxu1 %v7564_v37  ;;  %v7660_v37 = vld [vmem:[%s10676_s5 + $0x248] ss:$16 sps:$4 sm:$0xff]  }
 0x4c1   : > { %5525 = vmatprep.mubr.bf16.mxu1 %v7565_v58  ;;  %v7661_v58 = vld [vmem:[%s10676_s5 + $0x26c] ss:$16 sps:$4 sm:$0xff]  }
 0x4c8   : > { %5526 = vmatmul.mubr.bf16.gmra.mrb[76].mxu1 %v7567_v2  ;;  %v7663_v2 = vld [vmem:[%s10676_s5 + $0x268] ss:$16 sps:$4 sm:$0xff]  }
 0x4c9   : > { %5535 = vmatprep.mubr.bf16.mxu1 %v7568_v12  ;;  %v7664_v12 = vld [vmem:[%s10676_s5 + $0x28c] ss:$16 sps:$4 sm:$0xff]  }
 0x4d0   : > { %5536 = vmatmul.mubr.bf16.gmra.mrb[80].mxu1 %v7570_v25  ;;  %v4346_v25 = vpop.permute.xlu0 %4345 }
 0x4d1   : > { %5545 = vmatprep.mubr.bf16.mxu1 %v7571_v4  ;;  %v4351_v4 = vpop.permute.xlu1 %4350 }
 0x4d8   : > { %5546 = vmatmul.mubr.bf16.gmra.mrb[84].mxu1 %v7573_v33  ;;  %v7666_v33 = vld [vmem:[%s10676_s5 + $0x288] ss:$16 sps:$4 sm:$0xff]  }
 0x4d9   : > { %5555 = vmatprep.mubr.bf16.mxu1 %v7574_v6  ;;  %v10343_v6 = vpop.permute.xlu0 %4505 }
 0x4e0   : > { %5556 = vmatmul.mubr.bf16.gmra.mrb[88].mxu1 %v7576_v61  ;;  %v7667_v61 = vld [vmem:[%s10676_s5 + $0x2ac] ss:$16 sps:$4 sm:$0xff]  }
 0x4e1   : > { %5565 = vmatprep.mubr.bf16.mxu1 %v7577_v32  ;;  %v10348_v32 = vpop.permute.xlu1 %4510 }
 0x4e8   : > { %5566 = vmatmul.mubr.bf16.gmra.mrb[92].mxu1 %v7579_v18  ;;  %v10350_v18 = vpop.permute.xlu0 %4355 }
 0x4e9   : > { %5575 = vmatprep.mubr.bf16.mxu1 %v7580_v56  ;;  %v7669_v56 = vld [vmem:[%s10676_s5 + $0x2a8] ss:$16 sps:$4 sm:$0xff]  }
 0x4f0   : > { %5576 = vmatmul.mubr.bf16.gmra.mrb[96].mxu1 %v7582_v26  ;;  %v10355_v26 = vpop.permute.xlu1 %4360 }
 0x4f1   : > { %5585 = vmatprep.mubr.bf16.mxu1 %v7583_v42  ;;  %v7670_v42 = vld [vmem:[%s10676_s5 + $0x2cc] ss:$16 sps:$4 sm:$0xff]  }
 0x4f8   : > { %5586 = vmatmul.mubr.bf16.gmra.mrb[100].mxu1 %v7585_v19  ;;  %v10360_v19 = vpop.permute.xlu0 %4515 }
 0x4f9   : > { %5595 = vmatprep.mubr.bf16.mxu1 %v7586_v5  ;;  %v10362_v5 = vpop.permute.xlu1 %4520 }
 0x500   : > { %5596 = vmatmul.mubr.bf16.gmra.mrb[104].mxu1 %v7588_v43  ;;  %v7672_v43 = vld [vmem:[%s10676_s5 + $0x2c8] ss:$16 sps:$4 sm:$0xff]  }
 0x501   : > { %5605 = vmatprep.mubr.bf16.mxu1 %v7589_v22  ;;  %v7673_v22 = vld [vmem:[%s10676_s5 + $0x2ec] ss:$16 sps:$4 sm:$0xff]  }
 0x508   : > { %5606 = vmatmul.mubr.bf16.gmra.mrb[108].mxu1 %v7591_v48  ;;  %v10370_v48 = vpop.permute.xlu0 %4365 }
 0x509   : > { %5615 = vmatprep.mubr.bf16.mxu1 %v7592_v54  ;;  %v10372_v54 = vpop.permute.xlu1 %4370 }
 0x510   : > { %5616 = vmatmul.mubr.bf16.gmra.mrb[112].mxu1 %v7594_v53  ;;  %v7675_v53 = vld [vmem:[%s10676_s5 + $0x2e8] ss:$16 sps:$4 sm:$0xff]  }
 0x511   : > { %5625 = vmatprep.mubr.bf16.mxu1 %v7595_v14  ;;  %v10377_v14 = vpop.permute.xlu0 %4525 }
 0x518   : > { %5626 = vmatmul.mubr.bf16.gmra.mrb[116].mxu1 %v7597_v17  ;;  %v7676_v17 = vld [vmem:[%s10676_s5 + $0x30c] ss:$16 sps:$4 sm:$0xff]  }
 0x519   : > { %5635 = vmatprep.mubr.bf16.mxu1 %v7598_v52  ;;  %v10382_v52 = vpop.permute.xlu1 %4530 }
 0x520   : > { %5636 = vmatmul.mubr.bf16.gmra.mrb[120].mxu1 %v7600_v57  ;;  %v10384_v57 = vpop.permute.xlu0 %4375 }
 0x521   : > { %5645 = vmatprep.mubr.bf16.mxu1 %v7601_v27  ;;  %v7678_v27 = vld [vmem:[%s10676_s5 + $0x308] ss:$16 sps:$4 sm:$0xff]  }
 0x528   : > { %5646 = vmatmul.mubr.bf16.gmra.mrb[124].mxu1 %v7603_v34  ;;  %v10389_v34 = vpop.permute.xlu1 %4380 }
 0x529   : > { %5688 = vmatprep.mubr.bf16.mxu1 %v7606_v29  ;;  %v7679_v29 = vld [vmem:[%s10676_s5 + $0x32c] ss:$16 sps:$4 sm:$0xff]  }
 0x530   : > { %5689 = vmatmul.mubr.bf16.vlgmr.msra.gmra.mrb[0].mxu1 %v7604_v50  ;;  %v10394_v50 = vpop.permute.xlu0 %4535 }
 0x531   : > { %5698 = vmatprep.mubr.bf16.mxu1 %v7607_v16  ;;  %v10396_v16 = vpop.permute.xlu1 %4540 }
 0x538   : > { %5699 = vmatmul.mubr.bf16.gmra.mrb[4].mxu1 %v7609_v60  ;;  %v7681_v60 = vld [vmem:[%s10676_s5 + $0x328] ss:$16 sps:$4 sm:$0xff]  }
 0x539   : > { %5708 = vmatprep.mubr.bf16.mxu1 %v7610_v1  ;;  %v7682_v1 = vld [vmem:[%s10676_s5 + $0x34c] ss:$16 sps:$4 sm:$0xff]  }
 0x540   : > { %5709 = vmatmul.mubr.bf16.gmra.mrb[8].mxu1 %v7612_v11  ;;  %v10404_v11 = vpop.permute.xlu0 %4385 }
 0x541   : > { %5718 = vmatprep.mubr.bf16.mxu1 %v7613_v15  ;;  %v10406_v15 = vpop.permute.xlu1 %4390 }
 0x548   : > { %5719 = vmatmul.mubr.bf16.gmra.mrb[12].mxu1 %v7615_v7  ;;  %v7684_v7 = vld [vmem:[%s10676_s5 + $0x348] ss:$16 sps:$4 sm:$0xff]  }
 0x549   : > { %5728 = vmatprep.mubr.bf16.mxu1 %v7616_v20  ;;  %v10411_v20 = vpop.permute.xlu0 %4545 }
 0x550   : > { %5729 = vmatmul.mubr.bf16.gmra.mrb[16].mxu1 %v7618_v28  ;;  %v7685_v28 = vld [vmem:[%s10676_s5 + $0x36c] ss:$16 sps:$4 sm:$0xff]  }
 0x551   : > { %5738 = vmatprep.mubr.bf16.mxu1 %v7619_v38  ;;  %v10416_v38 = vpop.permute.xlu1 %4550 }
 0x558   : > { %5739 = vmatmul.mubr.bf16.gmra.mrb[20].mxu1 %v7621_v23  ;;  %v10418_v23 = vpop.permute.xlu0 %4395 }
 0x559   : > { %5748 = vmatprep.mubr.bf16.mxu1 %v7622_v39 }
 0x560   : > { %5749 = vmatmul.mubr.bf16.gmra.mrb[24].mxu1 %v7624_v13 }
 0x561   : > { %5758 = vmatprep.mubr.bf16.mxu1 %v7625_v3 }
 0x568   : > { %5759 = vmatmul.mubr.bf16.gmra.mrb[28].mxu1 %v7627_v40  ;;  %v7687_v40 = vld [vmem:[%s10676_s5 + $0x368] ss:$16 sps:$4 sm:$0xff]  }
 0x569   : > { %5768 = vmatprep.mubr.bf16.mxu1 %v7628_v0  ;;  %v10423_v0 = vpop.permute.xlu1 %4400 }
 0x570   : > { %5769 = vmatmul.mubr.bf16.gmra.mrb[32].mxu1 %v7630_v21 }
 0x571   : > { %5778 = vmatprep.mubr.bf16.mxu1 %v7631_v47 }
 0x578   : > { %5779 = vmatmul.mubr.bf16.gmra.mrb[36].mxu1 %v7633_v63  ;;  %v7688_v63 = vld [vmem:[%s10676_s5 + $0x38c] ss:$16 sps:$4 sm:$0xff]  }
 0x579   : > { %5788 = vmatprep.mubr.bf16.mxu1 %v7634_v31 }
 0x580   : > { %5789 = vmatmul.mubr.bf16.gmra.mrb[40].mxu1 %v7636_v9 }
 0x581   : > { %5798 = vmatprep.mubr.bf16.mxu1 %v7637_v55 }
 0x588   : > { %5799 = vmatmul.mubr.bf16.gmra.mrb[44].mxu1 %v7639_v44 }
 0x589   : > { %5808 = vmatprep.mubr.bf16.mxu1 %v7640_v59 }
 0x590   : > { %5809 = vmatmul.mubr.bf16.gmra.mrb[48].mxu1 %v7642_v41  ;;  %v10428_v41 = vpop.permute.xlu0 %4555 }
 0x591   : > { %5818 = vmatprep.mubr.bf16.mxu1 %v7643_v8 }
 0x598   : > { %5819 = vmatmul.mubr.bf16.gmra.mrb[52].mxu1 %v7645_v45 }
 0x599   : > { %5828 = vmatprep.mubr.bf16.mxu1 %v7646_v62 }
 0x5a0   : > { %5829 = vmatmul.mubr.bf16.gmra.mrb[56].mxu1 %v7648_v35  ;;  %v10430_v35 = vpop.permute.xlu1 %4560 }
 0x5a1   : > { %5838 = vmatprep.mubr.bf16.mxu1 %v7649_v10 }
 0x5a8   : > { %5839 = vmatmul.mubr.bf16.gmra.mrb[60].mxu1 %v7651_v49 }
 0x5a9   : > { %5848 = vmatprep.mubr.bf16.mxu1 %v7652_v46 }
 0x5b0   : > { %5849 = vmatmul.mubr.bf16.gmra.mrb[64].mxu1 %v7654_v30 }
 0x5b1   : > { %5858 = vmatprep.mubr.bf16.mxu1 %v7655_v24  ;;  %v7690_v24 = vld [vmem:[%s10676_s5 + $0x388] ss:$16 sps:$4 sm:$0xff]  }
 0x5b8   : > { %5859 = vmatmul.mubr.bf16.gmra.mrb[68].mxu1 %v7657_v36 }
 0x5b9   : > { %5868 = vmatprep.mubr.bf16.mxu1 %v7658_v51 }
 0x5c0   : > { %5869 = vmatmul.mubr.bf16.gmra.mrb[72].mxu1 %v7660_v37  ;;  %v7691_v37 = vld [vmem:[%s10676_s5 + $0x3ac] ss:$16 sps:$4 sm:$0xff]  }
 0x5c1   : > { %5878 = vmatprep.mubr.bf16.mxu1 %v7661_v58 }
 0x5c8   : > { %5879 = vmatmul.mubr.bf16.gmra.mrb[76].mxu1 %v7663_v2 }
 0x5c9   : > { %5888 = vmatprep.mubr.bf16.mxu1 %v7664_v12  ;;  %v10441_v12 = vpop.permute.xlu0 %4405 }
 0x5d0   : > { %5889 = vmatmul.mubr.bf16.gmra.mrb[80].mxu1 %v7666_v33 }
 0x5d1   : > { %5898 = vmatprep.mubr.bf16.mxu1 %v7667_v61  ;;  %v10444_v61 = vpop.permute.xlu1 %4410 }
 0x5d8   : > { %5899 = vmatmul.mubr.bf16.gmra.mrb[84].mxu1 %v7669_v56 }
 0x5d9   : > { %5908 = vmatprep.mubr.bf16.mxu1 %v7670_v42 }
 0x5e0   : > { %5909 = vmatmul.mubr.bf16.gmra.mrb[88].mxu1 %v7672_v43 }
 0x5e1   : > { %5918 = vmatprep.mubr.bf16.mxu1 %v7673_v22 }
 0x5e8   : > { %5919 = vmatmul.mubr.bf16.gmra.mrb[92].mxu1 %v7675_v53 }
 0x5e9   : > { %5928 = vmatprep.mubr.bf16.mxu1 %v7676_v17 }
 0x5f0   : > { %5929 = vmatmul.mubr.bf16.gmra.mrb[96].mxu1 %v7678_v27  ;;  %v7693_v27 = vld [vmem:[%s10676_s5 + $0x3a8] ss:$16 sps:$4 sm:$0xff]  }
 0x5f1   : > { %5938 = vmatprep.mubr.bf16.mxu1 %v7679_v29  ;;  %v10450_v29 = vpop.permute.xlu0 %4565 }
 0x5f8   : > { %5939 = vmatmul.mubr.bf16.gmra.mrb[100].mxu1 %v7681_v60 }
 0x5f9   : > { %5948 = vmatprep.mubr.bf16.mxu1 %v7682_v1  ;;  %v7694_v1 = vld [vmem:[%s10676_s5 + $0x3cc] ss:$16 sps:$4 sm:$0xff]  }
 0x600   : > { %5949 = vmatmul.mubr.bf16.gmra.mrb[104].mxu1 %v7684_v7 }
 0x601   : > { %5958 = vmatprep.mubr.bf16.mxu1 %v7685_v28 }
 0x603   : > { %v5690_v39 = vpop.f32.mrb[0].mxu1 }
 0x604   : > { %v6818_v13 = vadd.f32 %v5690_v39, %v4346_v25  ;;  %v5692_v3 = vpop.f32.mrb[1].mxu1  ;;  %v10457_v39 = vpop.permute.xlu1 %4570 }
 0x605   : > { %v6819_v21 = vadd.f32 %v5692_v3, %v4346_v25  ;;  %v5694_v47 = vpop.f32.mrb[2].mxu1 }
 0x606   : > { %v6820_v31 = vadd.f32 %v5694_v47, %v4351_v4  ;;  %v5696_v9 = vpop.f32.mrb[3].mxu1  ;;  %v6009_v44 = vmax.f32 %v6818_v13, 0.0 }
 0x607   : > { %v6821_v55 = vadd.f32 %v5696_v9, %v4351_v4  ;;  %v6010_v8 = vmax.f32 %v6819_v21, 0.0  ;;  %v10460_v9 = vpop.permute.xlu0 %4415 }
 0x608   : > { %v6011_v59 = vmax.f32 %v6820_v31, 0.0  ;;  %5959 = vmatmul.mubr.bf16.gmra.mrb[108].mxu1 %v7687_v40 }
 0x609   : > { %v6012_v45 = vmax.f32 %v6821_v55, 0.0  ;;  %5968 = vmatprep.mubr.bf16.mxu1 %v7688_v63 }
 0x60a   : > { %v6138_v62 = vpack.c.bf16 %v6011_v59, %v6009_v44 }
 0x60b   : > { %v6139_v10 = vpack.c.bf16 %v6012_v45, %v6010_v8  ;;  %v5700_v49 = vpop.f32.mrb[4].mxu1  ;;  %v10466_v45 = vpop.permute.xlu1 %4420 }
 0x60c   : > { %v6822_v46 = vadd.f32 %v5700_v49, %v10350_v18  ;;  %v5702_v30 = vpop.f32.mrb[5].mxu1  ;;  %v7697_v49 = vld [vmem:[%s10676_s5 + $0x3ec] ss:$16 sps:$4 sm:$0xff]  }
 0x60d   : > { %v6823_v36 = vadd.f32 %v5702_v30, %v10350_v18  ;;  %v5704_v51 = vpop.f32.mrb[6].mxu1  ;;  %6241 = vmatprep.subr.bf16.mxu1 %v6139_v10 }
 0x60e   : > { %v6824_v58 = vadd.f32 %v5704_v51, %v10355_v26  ;;  %v5706_v2 = vpop.f32.mrb[7].mxu1  ;;  %6242 = vmatpush1.bf16.msra.mxu1 %v6138_v62  ;;  %v6013_v4 = vmax.f32 %v6822_v46, 0.0 }
 0x60f   : > { %v6825_v25 = vadd.f32 %v5706_v2, %v10355_v26  ;;  %v6014_v18 = vmax.f32 %v6823_v36, 0.0  ;;  %v10476_v36 = vld.sshfl [vmem:[%s10678_s7] sm:$0x33 pattern:$0x75316420] }
 0x610   : > { %v6015_v33 = vmax.f32 %v6824_v58, 0.0  ;;  %5969 = vmatmul.mubr.bf16.gmra.mrb[112].mxu1 %v7690_v24  ;;  %v10479_v58 = vpop.permute.xlu0 %4575 }
 0x611   : > { %v6016_v56 = vmax.f32 %v6825_v25, 0.0  ;;  %5978 = vmatprep.mubr.bf16.mxu1 %v7691_v37 }
 0x612   : > { %v6140_v42 = vpack.c.bf16 %v6015_v33, %v6013_v4  ;;  %v6220_v4 = vcombine.high %v10476_v36, %v10476_v36  ;;  %v10703_v33 = vld [vmem:[#allocation6_spill] sm:$0xff] }
 0x613   : > { %v6141_v43 = vpack.c.bf16 %v6016_v56, %v6014_v18  ;;  %v5710_v22 = vpop.f32.mrb[8].mxu1 }
 0x614   : > { %v6826_v53 = vadd.f32 %v5710_v22, %v10370_v48  ;;  %v5712_v17 = vpop.f32.mrb[9].mxu1 }
 0x615   : > { %v6827_v26 = vadd.f32 %v5712_v17, %v10370_v48  ;;  %v5714_v60 = vpop.f32.mrb[10].mxu1  ;;  %6243 = vmatprep.subr.bf16.mxu1 %v6141_v43  ;;  %v7782_v48 = vmov 1966171168   ;;  %v7699_v17 = vld [vmem:[%s10676_s5 + $0x3e8] ss:$16 sps:$4 sm:$0xff]  }
 0x616   : > { %v6828_v7 = vadd.f32 %v5714_v60, %v10372_v54  ;;  %v5716_v28 = vpop.f32.mrb[11].mxu1  ;;  %6244 = vmatpush1.bf16.msra.mxu1 %v6140_v42  ;;  %v6017_v3 = vmax.f32 %v6826_v53, 0.0  ;;  %v6222_v63 = vunpack.c.l.s4 %v7782_v48  ;;  %v10486_v42 = vpop.permute.xlu1 %4580 }
 0x617   : > { %v6829_v13 = vadd.f32 %v5716_v28, %v10372_v54  ;;  %v6018_v21 = vmax.f32 %v6827_v26, 0.0  ;;  %v7696_v54 = vld [vmem:[%s10676_s5 + $0x3c8] ss:$16 sps:$4 sm:$0xff]   ;;  %v10497_v28 = vpop.permute.xlu0 %4425 }
 0x618   : > { %v6019_v40 = vmax.f32 %v6828_v7, 0.0  ;;  %5979 = vmatmul.mubr.bf16.gmra.mrb[116].mxu1 %v7693_v27  ;;  %v6223_v46 = vunpack.c.0.s8 %v6222_v63 }
 0x619   : > { %v6020_v47 = vmax.f32 %v6829_v13, 0.0  ;;  %5988 = vmatprep.mubr.bf16.mxu1 %v7694_v1 }
 0x61a   : > { %v6142_v31 = vpack.c.bf16 %v6019_v40, %v6017_v3  ;;  %v10484_v18 = vsub.s32 %v6223_v46, %v10703_v33 }
 0x61b   : > { %v6143_v55 = vpack.c.bf16 %v6020_v47, %v6018_v21  ;;  %v5720_v44 = vpop.f32.mrb[12].mxu1  ;;  %v10500_v21 = vpop.permute.xlu1 %4430 }
 0x61c   : > { %v6830_v59 = vadd.f32 %v5720_v44, %v10384_v57  ;;  %v5722_v8 = vpop.f32.mrb[13].mxu1  ;;  %v10494_v60 = vrot.slane %v6220_v4, %v10484_v18 }
 0x61d   : > { %v6831_v62 = vadd.f32 %v5722_v8, %v10384_v57  ;;  %v5724_v10 = vpop.f32.mrb[14].mxu1  ;;  %6245 = vmatprep.subr.bf16.mxu1 %v6143_v55 }
 0x61e   : > { %v6832_v30 = vadd.f32 %v5724_v10, %v10389_v34  ;;  %v5726_v24 = vpop.f32.mrb[15].mxu1  ;;  %6246 = vmatpush1.bf16.msra.mxu1 %v6142_v31  ;;  %v6021_v37 = vmax.f32 %v6830_v59, 0.0  ;;  %v10504_v59 = vpop.permute.xlu0 %4585 }
 0x61f   : > { %v6833_v51 = vadd.f32 %v5726_v24, %v10389_v34  ;;  %v6022_v2 = vmax.f32 %v6831_v62, 0.0  ;;  %v10508_v10 = vpop.permute.xlu1 %4590 }
 0x620   : > { %v6023_v57 = vmax.f32 %v6832_v30, 0.0  ;;  %5989 = vmatmul.mubr.bf16.gmra.mrb[120].mxu1 %v7696_v54 }
 0x621   : > { %v6024_v25 = vmax.f32 %v6833_v51, 0.0  ;;  %5998 = vmatprep.mubr.bf16.mxu1 %v7697_v49 }
 0x622   : > { %v6144_v56 = vpack.c.bf16 %v6023_v57, %v6021_v37  ;;  %v4436_v57 = vpop.permute.xlu0 %4435 }
 0x623   : > { %v6145_v43 = vpack.c.bf16 %v6024_v25, %v6022_v2  ;;  %v5730_v22 = vpop.f32.mrb[16].mxu1  ;;  %v10512_v33 = vpop.permute.xlu1 %4440 }
 0x624   : > { %v6834_v34 = vadd.f32 %v5730_v22, %v10404_v11  ;;  %v5732_v53 = vpop.f32.mrb[17].mxu1 }
 0x625   : > { %v6835_v27 = vadd.f32 %v5732_v53, %v10404_v11  ;;  %v5734_v26 = vpop.f32.mrb[18].mxu1  ;;  %6247 = vmatprep.subr.bf16.mxu1 %v6145_v43 }
 0x626   : > { %v6836_v1 = vadd.f32 %v5734_v26, %v10406_v15  ;;  %v5736_v7 = vpop.f32.mrb[19].mxu1  ;;  %6248 = vmatpush1.bf16.msra.mxu1 %v6144_v56  ;;  %v6025_v3 = vmax.f32 %v6834_v34, 0.0 }
 0x627   : > { %v6837_v13 = vadd.f32 %v5736_v7, %v10406_v15  ;;  %v6026_v47 = vmax.f32 %v6835_v27, 0.0  ;;  %v10517_v27 = vpop.permute.xlu0 %4595 }
 0x628   : > { %v6027_v40 = vmax.f32 %v6836_v1, 0.0  ;;  %5999 = vmatmul.mubr.bf16.gmra.mrb[124].mxu1 %v7699_v17 }
 0x629   : > { %v6028_v11 = vmax.f32 %v6837_v13, 0.0  ;;  %6273 = vmatprep.mubr.bf16.mxu1 %v10494_v60  ;;  %v10519_v13 = vpop.permute.xlu1 %4600 }
 0x62a   : > { %v6146_v48 = vpack.c.bf16 %v6027_v40, %v6025_v3 }
 0x62b   : > { %v6147_v63 = vpack.c.bf16 %v6028_v11, %v6026_v47  ;;  %v5740_v31 = vpop.f32.mrb[20].mxu1 }
 0x62c   : > { %v6838_v55 = vadd.f32 %v5740_v31, %v10418_v23  ;;  %v5742_v44 = vpop.f32.mrb[21].mxu1  ;;  %v4446_v31 = vpop.permute.xlu0 %4445 }
 0x62d   : > { %v6839_v8 = vadd.f32 %v5742_v44, %v10418_v23  ;;  %v5744_v15 = vpop.f32.mrb[22].mxu1  ;;  %6249 = vmatprep.subr.bf16.mxu1 %v6147_v63 }
 0x62e   : > { %v6840_v54 = vadd.f32 %v5744_v15, %v10423_v0  ;;  %v5746_v62 = vpop.f32.mrb[23].mxu1  ;;  %6250 = vmatpush1.bf16.msra.mxu1 %v6146_v48  ;;  %v6029_v46 = vmax.f32 %v6838_v55, 0.0  ;;  %v4451_v15 = vpop.permute.xlu1 %4450 }
 0x62f   : > { %v6841_v49 = vadd.f32 %v5746_v62, %v10423_v0  ;;  %v6030_v24 = vmax.f32 %v6839_v8, 0.0 }
 0x630   : > { %v6031_v30 = vmax.f32 %v6840_v54, 0.0 }
 0x631   : > { %v6032_v51 = vmax.f32 %v6841_v49, 0.0 }
 0x632   : > { %v6148_v37 = vpack.c.bf16 %v6031_v30, %v6029_v46 }
 0x633   : > { %v6149_v2 = vpack.c.bf16 %v6032_v51, %v6030_v24  ;;  %v5750_v25 = vpop.f32.mrb[24].mxu1  ;;  %v10526_v51 = vpop.permute.xlu0 %4605 }
 0x634   : > { %v6842_v23 = vadd.f32 %v5750_v25, %v10441_v12  ;;  %v5752_v4 = vpop.f32.mrb[25].mxu1 }
 0x635   : > { %v6843_v56 = vadd.f32 %v5752_v4, %v10441_v12  ;;  %v5754_v43 = vpop.f32.mrb[26].mxu1  ;;  %6251 = vmatprep.subr.bf16.mxu1 %v6149_v2 }
 0x636   : > { %v6844_v22 = vadd.f32 %v5754_v43, %v10444_v61  ;;  %v5756_v0 = vpop.f32.mrb[27].mxu1  ;;  %6252 = vmatpush1.bf16.msra.mxu1 %v6148_v37  ;;  %v6033_v53 = vmax.f32 %v6842_v23, 0.0  ;;  %v10530_v23 = vpop.permute.xlu1 %4610 }
 0x637   : > { %v6845_v34 = vadd.f32 %v5756_v0, %v10444_v61  ;;  %v6034_v26 = vmax.f32 %v6843_v56, 0.0 }
 0x638   : > { %v6035_v17 = vmax.f32 %v6844_v22, 0.0 }
 0x639   : > { %v6036_v1 = vmax.f32 %v6845_v34, 0.0 }
 0x63a   : > { %v6150_v7 = vpack.c.bf16 %v6035_v17, %v6033_v53  ;;  %v4456_v53 = vpop.permute.xlu0 %4455 }
 0x63b   : > { %v6151_v3 = vpack.c.bf16 %v6036_v1, %v6034_v26  ;;  %v5760_v40 = vpop.f32.mrb[28].mxu1 }
 0x63c   : > { %v6846_v12 = vadd.f32 %v5760_v40, %v10460_v9  ;;  %v5762_v47 = vpop.f32.mrb[29].mxu1 }
 0x63d   : > { %v6847_v11 = vadd.f32 %v5762_v47, %v10460_v9  ;;  %v5764_v48 = vpop.f32.mrb[30].mxu1  ;;  %6253 = vmatprep.subr.bf16.mxu1 %v6151_v3 }
 0x63e   : > { %v6848_v61 = vadd.f32 %v5764_v48, %v10466_v45  ;;  %v5766_v63 = vpop.f32.mrb[31].mxu1  ;;  %6254 = vmatpush1.bf16.msra.mxu1 %v6150_v7  ;;  %v6037_v44 = vmax.f32 %v6846_v12, 0.0  ;;  %v4461_v7 = vpop.permute.xlu1 %4460 }
 0x63f   : > { %v6849_v55 = vadd.f32 %v5766_v63, %v10466_v45  ;;  %v6038_v54 = vmax.f32 %v6847_v11, 0.0 }
 0x640   : > { %v6039_v8 = vmax.f32 %v6848_v61, 0.0  ;;  %v10535_v61 = vpop.permute.xlu0 %4615 }
 0x641   : > { %v6040_v62 = vmax.f32 %v6849_v55, 0.0 }
 0x642   : > { %v6152_v49 = vpack.c.bf16 %v6039_v8, %v6037_v44  ;;  %v10537_v8 = vpop.permute.xlu1 %4620 }
 0x643   : > { %v6153_v46 = vpack.c.bf16 %v6040_v62, %v6038_v54  ;;  %v5770_v30 = vpop.f32.mrb[32].mxu1 }
 0x644   : > { %v6850_v24 = vadd.f32 %v5770_v30, %v10497_v28  ;;  %v5772_v9 = vpop.f32.mrb[33].mxu1 }
 0x645   : > { %v6851_v37 = vadd.f32 %v5772_v9, %v10497_v28  ;;  %v5774_v2 = vpop.f32.mrb[34].mxu1  ;;  %6255 = vmatprep.subr.bf16.mxu1 %v6153_v46 }
 0x646   : > { %v6852_v25 = vadd.f32 %v5774_v2, %v10500_v21  ;;  %v5776_v45 = vpop.f32.mrb[35].mxu1  ;;  %6256 = vmatpush1.bf16.msra.mxu1 %v6152_v49  ;;  %v6041_v56 = vmax.f32 %v6850_v24, 0.0 }
 0x647   : > { %v6853_v4 = vadd.f32 %v5776_v45, %v10500_v21  ;;  %v6042_v22 = vmax.f32 %v6851_v37, 0.0  ;;  %v4471_v45 = vpop.permute.xlu1 %4470 }
 0x648   : > { %v6043_v43 = vmax.f32 %v6852_v25, 0.0 }
 0x649   : > { %v6044_v0 = vmax.f32 %v6853_v4, 0.0 }
 0x64a   : > { %v6154_v34 = vpack.c.bf16 %v6043_v43, %v6041_v56 }
 0x64b   : > { %v6155_v17 = vpack.c.bf16 %v6044_v0, %v6042_v22  ;;  %v5780_v26 = vpop.f32.mrb[36].mxu1 }
 0x64c   : > { %v6854_v1 = vadd.f32 %v5780_v26, %v4436_v57  ;;  %v5782_v28 = vpop.f32.mrb[37].mxu1 }
 0x64d   : > { %v6855_v3 = vadd.f32 %v5782_v28, %v4436_v57  ;;  %v5784_v40 = vpop.f32.mrb[38].mxu1  ;;  %6257 = vmatprep.subr.bf16.mxu1 %v6155_v17 }
 0x64e   : > { %v6856_v12 = vadd.f32 %v5784_v40, %v10512_v33  ;;  %v5786_v47 = vpop.f32.mrb[39].mxu1  ;;  %6258 = vmatpush1.bf16.msra.mxu1 %v6154_v34  ;;  %v6045_v11 = vmax.f32 %v6854_v1, 0.0  ;;  %v10541_v40 = vpop.permute.xlu1 %4630 }
 0x64f   : > { %v6857_v21 = vadd.f32 %v5786_v47, %v10512_v33  ;;  %v6046_v63 = vmax.f32 %v6855_v3, 0.0  ;;  %v4466_v33 = vpop.permute.xlu0 %4465 }
 0x650   : > { %v6047_v48 = vmax.f32 %v6856_v12, 0.0 }
 0x651   : > { %v6048_v55 = vmax.f32 %v6857_v21, 0.0 }
 0x652   : > { %v6156_v44 = vpack.c.bf16 %v6047_v48, %v6045_v11 }
 0x653   : > { %v6157_v54 = vpack.c.bf16 %v6048_v55, %v6046_v63  ;;  %v5790_v62 = vpop.f32.mrb[40].mxu1  ;;  %v10539_v26 = vpop.permute.xlu0 %4625 }
 0x654   : > { %v6858_v57 = vadd.f32 %v5790_v62, %v4446_v31  ;;  %v5792_v49 = vpop.f32.mrb[41].mxu1 }
 0x655   : > { %v6859_v46 = vadd.f32 %v5792_v49, %v4446_v31  ;;  %v5794_v30 = vpop.f32.mrb[42].mxu1  ;;  %6259 = vmatprep.subr.bf16.mxu1 %v6157_v54 }
 0x656   : > { %v6860_v24 = vadd.f32 %v5794_v30, %v4451_v15  ;;  %v5796_v9 = vpop.f32.mrb[43].mxu1  ;;  %6260 = vmatpush1.bf16.msra.mxu1 %v6156_v44  ;;  %v6049_v2 = vmax.f32 %v6858_v57, 0.0  ;;  %v4481_v57 = vpop.permute.xlu1 %4480 }
 0x657   : > { %v6861_v37 = vadd.f32 %v5796_v9, %v4451_v15  ;;  %v6050_v4 = vmax.f32 %v6859_v46, 0.0  ;;  %v4476_v63 = vpop.permute.xlu0 %4475 }
 0x658   : > { %v6051_v25 = vmax.f32 %v6860_v24, 0.0 }
 0x659   : > { %v6052_v56 = vmax.f32 %v6861_v37, 0.0 }
 0x65a   : > { %v6158_v43 = vpack.c.bf16 %v6051_v25, %v6049_v2 }
 0x65b   : > { %v6159_v22 = vpack.c.bf16 %v6052_v56, %v6050_v4  ;;  %v5800_v0 = vpop.f32.mrb[44].mxu1  ;;  %v10543_v37 = vpop.permute.xlu0 %4635 }
 0x65c   : > { %v6862_v34 = vadd.f32 %v5800_v0, %v4456_v53  ;;  %v5802_v17 = vpop.f32.mrb[45].mxu1  ;;  %v10545_v56 = vpop.permute.xlu1 %4640 }
 0x65d   : > { %v6863_v31 = vadd.f32 %v5802_v17, %v4456_v53  ;;  %v5804_v1 = vpop.f32.mrb[46].mxu1  ;;  %6261 = vmatprep.subr.bf16.mxu1 %v6159_v22 }
 0x65e   : > { %v6864_v28 = vadd.f32 %v5804_v1, %v4461_v7  ;;  %v5806_v3 = vpop.f32.mrb[47].mxu1  ;;  %6262 = vmatpush1.bf16.msra.mxu1 %v6158_v43  ;;  %v6053_v12 = vmax.f32 %v6862_v34, 0.0 }
 0x65f   : > { %v6865_v15 = vadd.f32 %v5806_v3, %v4461_v7  ;;  %v6054_v21 = vmax.f32 %v6863_v31, 0.0 }
 0x660   : > { %v6055_v47 = vmax.f32 %v6864_v28, 0.0 }
 0x661   : > { %v6056_v11 = vmax.f32 %v6865_v15, 0.0 }
 0x662   : > { %v6160_v48 = vpack.c.bf16 %v6055_v47, %v6053_v12  ;;  %v4491_v12 = vpop.permute.xlu1 %4490 }
 0x663   : > { %v6161_v55 = vpack.c.bf16 %v6056_v11, %v6054_v21  ;;  %v5810_v44 = vpop.f32.mrb[48].mxu1 }
 0x664   : > { %v6866_v54 = vadd.f32 %v5810_v44, %v4466_v33  ;;  %v5812_v62 = vpop.f32.mrb[49].mxu1 }
 0x665   : > { %v6867_v53 = vadd.f32 %v5812_v62, %v4466_v33  ;;  %v5814_v49 = vpop.f32.mrb[50].mxu1  ;;  %6263 = vmatprep.subr.bf16.mxu1 %v6161_v55 }
 0x666   : > { %v6868_v46 = vadd.f32 %v5814_v49, %v4471_v45  ;;  %v5816_v30 = vpop.f32.mrb[51].mxu1  ;;  %6264 = vmatpush1.bf16.msra.mxu1 %v6160_v48  ;;  %v6057_v9 = vmax.f32 %v6866_v54, 0.0 }
 0x667   : > { %v6869_v24 = vadd.f32 %v5816_v30, %v4471_v45  ;;  %v6058_v2 = vmax.f32 %v6867_v53, 0.0  ;;  %v4486_v45 = vpop.permute.xlu0 %4485  ;;  %v10549_v30 = vpop.permute.xlu1 %4650 }
 0x668   : > { %v6059_v7 = vmax.f32 %v6868_v46, 0.0 }
 0x669   : > { %v6060_v25 = vmax.f32 %v6869_v24, 0.0 }
 0x66a   : > { %v6162_v4 = vpack.c.bf16 %v6059_v7, %v6057_v9 }
 0x66b   : > { %v6163_v43 = vpack.c.bf16 %v6060_v25, %v6058_v2  ;;  %v5820_v22 = vpop.f32.mrb[52].mxu1  ;;  %v10547_v62 = vpop.permute.xlu0 %4645 }
 0x66c   : > { %v6870_v0 = vadd.f32 %v5820_v22, %v4476_v63  ;;  %v5822_v34 = vpop.f32.mrb[53].mxu1 }
 0x66d   : > { %v6871_v33 = vadd.f32 %v5822_v34, %v4476_v63  ;;  %v5824_v17 = vpop.f32.mrb[54].mxu1  ;;  %6265 = vmatprep.subr.bf16.mxu1 %v6163_v43 }
 0x66e   : > { %v6872_v31 = vadd.f32 %v5824_v17, %v4481_v57  ;;  %v5826_v1 = vpop.f32.mrb[55].mxu1  ;;  %6266 = vmatpush1.bf16.msra.mxu1 %v6162_v4  ;;  %v6061_v3 = vmax.f32 %v6870_v0, 0.0 }
 0x66f   : > { %v6873_v28 = vadd.f32 %v5826_v1, %v4481_v57  ;;  %v6062_v47 = vmax.f32 %v6871_v33, 0.0  ;;  %v4496_v4 = vpop.permute.xlu0 %4495  ;;  %v4501_v33 = vpop.permute.xlu1 %4500 }
 0x670   : > { %v6063_v15 = vmax.f32 %v6872_v31, 0.0 }
 0x671   : > { %v6064_v21 = vmax.f32 %v6873_v28, 0.0 }
 0x672   : > { %v6164_v11 = vpack.c.bf16 %v6063_v15, %v6061_v3 }
 0x673   : > { %v6165_v48 = vpack.c.bf16 %v6064_v21, %v6062_v47  ;;  %v5830_v55 = vpop.f32.mrb[56].mxu1 }
 0x674   : > { %v6874_v44 = vadd.f32 %v5830_v55, %v4486_v45  ;;  %v5832_v54 = vpop.f32.mrb[57].mxu1 }
 0x675   : > { %v6875_v63 = vadd.f32 %v5832_v54, %v4486_v45  ;;  %v5834_v53 = vpop.f32.mrb[58].mxu1  ;;  %6267 = vmatprep.subr.bf16.mxu1 %v6165_v48 }
 0x676   : > { %v6876_v49 = vadd.f32 %v5834_v53, %v4491_v12  ;;  %v5836_v46 = vpop.f32.mrb[59].mxu1  ;;  %6268 = vmatpush1.bf16.msra.mxu1 %v6164_v11  ;;  %v6065_v24 = vmax.f32 %v6874_v44, 0.0  ;;  %v10555_v53 = vrot.slane %v10476_v36, %v10484_v18 }
 0x677   : > { %v6877_v57 = vadd.f32 %v5836_v46, %v4491_v12  ;;  %v6066_v7 = vmax.f32 %v6875_v63, 0.0 }
 0x678   : > { %v6067_v9 = vmax.f32 %v6876_v49, 0.0 }
 0x679   : > { %v6068_v2 = vmax.f32 %v6877_v57, 0.0  ;;  %v6236_v57 = vcombine.high %v10494_v60, %v10494_v60 }
 0x67a   : > { %v6166_v25 = vpack.c.bf16 %v6067_v9, %v6065_v24 }
 0x67b   : > { %v6167_v43 = vpack.c.bf16 %v6068_v2, %v6066_v7  ;;  %v5840_v22 = vpop.f32.mrb[60].mxu1  ;;  %6314 = vmatprep.mubr.bf16.mxu0 %v6236_v57 }
 0x67c   : > { %v6878_v0 = vadd.f32 %v5840_v22, %v4496_v4  ;;  %v5842_v34 = vpop.f32.mrb[61].mxu1 }
 0x67d   : > { %v6879_v17 = vadd.f32 %v5842_v34, %v4496_v4  ;;  %v5844_v31 = vpop.f32.mrb[62].mxu1  ;;  %6269 = vmatprep.subr.bf16.mxu1 %v6167_v43 }
 0x67e   : > { %v6880_v1 = vadd.f32 %v5844_v31, %v4501_v33  ;;  %v5846_v45 = vpop.f32.mrb[63].mxu1  ;;  %6270 = vmatpush1.bf16.msra.mxu1 %v6166_v25  ;;  %v6069_v3 = vmax.f32 %v6878_v0, 0.0 }
 0x67f   : > { %v6881_v28 = vadd.f32 %v5846_v45, %v4501_v33  ;;  %v6070_v12 = vmax.f32 %v6879_v17, 0.0 }
 0x680   : > { %v6071_v15 = vmax.f32 %v6880_v1, 0.0 }
 0x681   : > { %v6072_v47 = vmax.f32 %v6881_v28, 0.0 }
 0x682   : > { %v6168_v21 = vpack.c.bf16 %v6071_v15, %v6069_v3 }
 0x683   : > { %v6169_v11 = vpack.c.bf16 %v6072_v47, %v6070_v12  ;;  %v5850_v48 = vpop.f32.mrb[64].mxu1 }
 0x684   : > { %v6882_v55 = vadd.f32 %v5850_v48, %v10343_v6  ;;  %v5852_v44 = vpop.f32.mrb[65].mxu1 }
 0x685   : > { %v6883_v54 = vadd.f32 %v5852_v44, %v10343_v6  ;;  %v5854_v63 = vpop.f32.mrb[66].mxu1  ;;  %6271 = vmatprep.subr.bf16.mxu1 %v6169_v11 }
 0x686   : > { %v6884_v49 = vadd.f32 %v5854_v63, %v10348_v32  ;;  %v5856_v46 = vpop.f32.mrb[67].mxu1  ;;  %6272 = vmatpush1.bf16.msra.mxu1 %v6168_v21  ;;  %v6073_v9 = vmax.f32 %v6882_v55, 0.0 }
 0x687   : > { %v6885_v24 = vadd.f32 %v5856_v46, %v10348_v32  ;;  %v6074_v2 = vmax.f32 %v6883_v54, 0.0 }
 0x688   : > { %v6075_v7 = vmax.f32 %v6884_v49, 0.0 }
 0x689   : > { %v6076_v6 = vmax.f32 %v6885_v24, 0.0  ;;  %6274 = vmatmul.mubr.bf16.vlgmr.msra.gmra.mrb[128].mxu1 %v10555_v53 }
 0x68a   : > { %v6170_v25 = vpack.c.bf16 %v6075_v7, %v6073_v9 }
 0x68b   : > { %v6171_v4 = vpack.c.bf16 %v6076_v6, %v6074_v2  ;;  %v5860_v36 = vpop.f32.mrb[68].mxu1 }
 0x68c   : > { %v6886_v43 = vadd.f32 %v5860_v36, %v10360_v19  ;;  %v5862_v22 = vpop.f32.mrb[69].mxu1 }
 0x68d   : > { %v6887_v0 = vadd.f32 %v5862_v22, %v10360_v19  ;;  %v5864_v34 = vpop.f32.mrb[70].mxu1  ;;  %6282 = vmatprep.subr.bf16.mxu0 %v6171_v4 }
 0x68e   : > { %v6888_v60 = vadd.f32 %v5864_v34, %v10362_v5  ;;  %v5866_v32 = vpop.f32.mrb[71].mxu1  ;;  %6283 = vmatpush1.bf16.msra.mxu0 %v6170_v25  ;;  %v6077_v17 = vmax.f32 %v6886_v43, 0.0 }
 0x68f   : > { %v6889_v33 = vadd.f32 %v5866_v32, %v10362_v5  ;;  %v6078_v1 = vmax.f32 %v6887_v0, 0.0 }
 0x690   : > { %v6079_v31 = vmax.f32 %v6888_v60, 0.0 }
 0x691   : > { %v6080_v45 = vmax.f32 %v6889_v33, 0.0 }
 0x692   : > { %v6172_v28 = vpack.c.bf16 %v6079_v31, %v6077_v17 }
 0x693   : > { %v6173_v3 = vpack.c.bf16 %v6080_v45, %v6078_v1  ;;  %v5870_v15 = vpop.f32.mrb[72].mxu1 }
 0x694   : > { %v6890_v12 = vadd.f32 %v5870_v15, %v10377_v14  ;;  %v5872_v47 = vpop.f32.mrb[73].mxu1 }
 0x695   : > { %v6891_v19 = vadd.f32 %v5872_v47, %v10377_v14  ;;  %v5874_v21 = vpop.f32.mrb[74].mxu1  ;;  %6284 = vmatprep.subr.bf16.mxu0 %v6173_v3 }
 0x696   : > { %v6892_v11 = vadd.f32 %v5874_v21, %v10382_v52  ;;  %v5876_v48 = vpop.f32.mrb[75].mxu1  ;;  %6285 = vmatpush1.bf16.msra.mxu0 %v6172_v28  ;;  %v6081_v55 = vmax.f32 %v6890_v12, 0.0 }
 0x697   : > { %v6893_v5 = vadd.f32 %v5876_v48, %v10382_v52  ;;  %v6082_v54 = vmax.f32 %v6891_v19, 0.0 }
 0x698   : > { %v6083_v44 = vmax.f32 %v6892_v11, 0.0 }
 0x699   : > { %v6084_v63 = vmax.f32 %v6893_v5, 0.0 }
 0x69a   : > { %v6174_v49 = vpack.c.bf16 %v6083_v44, %v6081_v55 }
 0x69b   : > { %v6175_v46 = vpack.c.bf16 %v6084_v63, %v6082_v54  ;;  %v5880_v57 = vpop.f32.mrb[76].mxu1 }
 0x69c   : > { %v6894_v24 = vadd.f32 %v5880_v57, %v10394_v50  ;;  %v5882_v9 = vpop.f32.mrb[77].mxu1 }
 0x69d   : > { %v6895_v14 = vadd.f32 %v5882_v9, %v10394_v50  ;;  %v5884_v7 = vpop.f32.mrb[78].mxu1  ;;  %6286 = vmatprep.subr.bf16.mxu0 %v6175_v46 }
 0x69e   : > { %v6896_v2 = vadd.f32 %v5884_v7, %v10396_v16  ;;  %v5886_v6 = vpop.f32.mrb[79].mxu1  ;;  %6287 = vmatpush1.bf16.msra.mxu0 %v6174_v49  ;;  %v6085_v25 = vmax.f32 %v6894_v24, 0.0 }
 0x69f   : > { %v6897_v52 = vadd.f32 %v5886_v6, %v10396_v16  ;;  %v6086_v36 = vmax.f32 %v6895_v14, 0.0 }
 0x6a0   : > { %v6087_v4 = vmax.f32 %v6896_v2, 0.0 }
 0x6a1   : > { %v6088_v43 = vmax.f32 %v6897_v52, 0.0 }
 0x6a2   : > { %v6176_v22 = vpack.c.bf16 %v6087_v4, %v6085_v25 }
 0x6a3   : > { %v6177_v0 = vpack.c.bf16 %v6088_v43, %v6086_v36  ;;  %v5890_v34 = vpop.f32.mrb[80].mxu1 }
 0x6a4   : > { %v6898_v60 = vadd.f32 %v5890_v34, %v10411_v20  ;;  %v5892_v32 = vpop.f32.mrb[81].mxu1 }
 0x6a5   : > { %v6899_v50 = vadd.f32 %v5892_v32, %v10411_v20  ;;  %v5894_v33 = vpop.f32.mrb[82].mxu1  ;;  %6288 = vmatprep.subr.bf16.mxu0 %v6177_v0 }
 0x6a6   : > { %v6900_v17 = vadd.f32 %v5894_v33, %v10416_v38  ;;  %v5896_v31 = vpop.f32.mrb[83].mxu1  ;;  %6289 = vmatpush1.bf16.msra.mxu0 %v6176_v22  ;;  %v6089_v1 = vmax.f32 %v6898_v60, 0.0 }
 0x6a7   : > { %v6901_v16 = vadd.f32 %v5896_v31, %v10416_v38  ;;  %v6090_v28 = vmax.f32 %v6899_v50, 0.0 }
 0x6a8   : > { %v6091_v45 = vmax.f32 %v6900_v17, 0.0 }
 0x6a9   : > { %v6092_v3 = vmax.f32 %v6901_v16, 0.0 }
 0x6aa   : > { %v6178_v15 = vpack.c.bf16 %v6091_v45, %v6089_v1 }
 0x6ab   : > { %v6179_v12 = vpack.c.bf16 %v6092_v3, %v6090_v28  ;;  %v5900_v47 = vpop.f32.mrb[84].mxu1 }
 0x6ac   : > { %v6902_v19 = vadd.f32 %v5900_v47, %v10428_v41  ;;  %v5902_v21 = vpop.f32.mrb[85].mxu1 }
 0x6ad   : > { %v6903_v20 = vadd.f32 %v5902_v21, %v10428_v41  ;;  %v5904_v11 = vpop.f32.mrb[86].mxu1  ;;  %6290 = vmatprep.subr.bf16.mxu0 %v6179_v12 }
 0x6ae   : > { %v6904_v48 = vadd.f32 %v5904_v11, %v10430_v35  ;;  %v5906_v5 = vpop.f32.mrb[87].mxu1  ;;  %6291 = vmatpush1.bf16.msra.mxu0 %v6178_v15  ;;  %v6093_v55 = vmax.f32 %v6902_v19, 0.0 }
 0x6af   : > { %v6905_v38 = vadd.f32 %v5906_v5, %v10430_v35  ;;  %v6094_v54 = vmax.f32 %v6903_v20, 0.0 }
 0x6b0   : > { %v6095_v44 = vmax.f32 %v6904_v48, 0.0 }
 0x6b1   : > { %v6096_v63 = vmax.f32 %v6905_v38, 0.0 }
 0x6b2   : > { %v6180_v49 = vpack.c.bf16 %v6095_v44, %v6093_v55 }
 0x6b3   : > { %v6181_v46 = vpack.c.bf16 %v6096_v63, %v6094_v54  ;;  %v5910_v57 = vpop.f32.mrb[88].mxu1 }
 0x6b4   : > { %v6906_v24 = vadd.f32 %v5910_v57, %v10450_v29  ;;  %v5912_v9 = vpop.f32.mrb[89].mxu1 }
 0x6b5   : > { %v6907_v41 = vadd.f32 %v5912_v9, %v10450_v29  ;;  %v5914_v14 = vpop.f32.mrb[90].mxu1  ;;  %6292 = vmatprep.subr.bf16.mxu0 %v6181_v46 }
 0x6b6   : > { %v6908_v7 = vadd.f32 %v5914_v14, %v10457_v39  ;;  %v5916_v2 = vpop.f32.mrb[91].mxu1  ;;  %6293 = vmatpush1.bf16.msra.mxu0 %v6180_v49  ;;  %v6097_v6 = vmax.f32 %v6906_v24, 0.0 }
 0x6b7   : > { %v6909_v35 = vadd.f32 %v5916_v2, %v10457_v39  ;;  %v6098_v25 = vmax.f32 %v6907_v41, 0.0 }
 0x6b8   : > { %v6099_v52 = vmax.f32 %v6908_v7, 0.0 }
 0x6b9   : > { %v6100_v4 = vmax.f32 %v6909_v35, 0.0 }
 0x6ba   : > { %v6182_v36 = vpack.c.bf16 %v6099_v52, %v6097_v6 }
 0x6bb   : > { %v6183_v43 = vpack.c.bf16 %v6100_v4, %v6098_v25  ;;  %v5920_v22 = vpop.f32.mrb[92].mxu1 }
 0x6bc   : > { %v6910_v0 = vadd.f32 %v5920_v22, %v10479_v58  ;;  %v5922_v34 = vpop.f32.mrb[93].mxu1 }
 0x6bd   : > { %v6911_v29 = vadd.f32 %v5922_v34, %v10479_v58  ;;  %v5924_v60 = vpop.f32.mrb[94].mxu1  ;;  %6294 = vmatprep.subr.bf16.mxu0 %v6183_v43 }
 0x6be   : > { %v6912_v32 = vadd.f32 %v5924_v60, %v10486_v42  ;;  %v5926_v50 = vpop.f32.mrb[95].mxu1  ;;  %6295 = vmatpush1.bf16.msra.mxu0 %v6182_v36  ;;  %v6101_v33 = vmax.f32 %v6910_v0, 0.0 }
 0x6bf   : > { %v6913_v39 = vadd.f32 %v5926_v50, %v10486_v42  ;;  %v6102_v31 = vmax.f32 %v6911_v29, 0.0 }
 0x6c0   : > { %v6103_v17 = vmax.f32 %v6912_v32, 0.0 }
 0x6c1   : > { %v6104_v16 = vmax.f32 %v6913_v39, 0.0 }
 0x6c2   : > { %v6184_v1 = vpack.c.bf16 %v6103_v17, %v6101_v33 }
 0x6c3   : > { %v6185_v45 = vpack.c.bf16 %v6104_v16, %v6102_v31  ;;  %v5930_v28 = vpop.f32.mrb[96].mxu1 }
 0x6c4   : > { %v6914_v3 = vadd.f32 %v5930_v28, %v10504_v59  ;;  %v5932_v15 = vpop.f32.mrb[97].mxu1 }
 0x6c5   : > { %v6915_v58 = vadd.f32 %v5932_v15, %v10504_v59  ;;  %v5934_v12 = vpop.f32.mrb[98].mxu1  ;;  %6296 = vmatprep.subr.bf16.mxu0 %v6185_v45 }
 0x6c6   : > { %v6916_v47 = vadd.f32 %v5934_v12, %v10508_v10  ;;  %v5936_v19 = vpop.f32.mrb[99].mxu1  ;;  %6297 = vmatpush1.bf16.msra.mxu0 %v6184_v1  ;;  %v6105_v21 = vmax.f32 %v6914_v3, 0.0 }
 0x6c7   : > { %v6917_v42 = vadd.f32 %v5936_v19, %v10508_v10  ;;  %v6106_v11 = vmax.f32 %v6915_v58, 0.0 }
 0x6c8   : > { %v6107_v20 = vmax.f32 %v6916_v47, 0.0 }
 0x6c9   : > { %v6108_v48 = vmax.f32 %v6917_v42, 0.0 }
 0x6ca   : > { %v6186_v5 = vpack.c.bf16 %v6107_v20, %v6105_v21 }
 0x6cb   : > { %v6187_v38 = vpack.c.bf16 %v6108_v48, %v6106_v11  ;;  %v5940_v55 = vpop.f32.mrb[100].mxu1 }
 0x6cc   : > { %v6918_v44 = vadd.f32 %v5940_v55, %v10517_v27  ;;  %v5942_v54 = vpop.f32.mrb[101].mxu1 }
 0x6cd   : > { %v6919_v59 = vadd.f32 %v5942_v54, %v10517_v27  ;;  %v5944_v63 = vpop.f32.mrb[102].mxu1  ;;  %6298 = vmatprep.subr.bf16.mxu0 %v6187_v38 }
 0x6ce   : > { %v6920_v49 = vadd.f32 %v5944_v63, %v10519_v13  ;;  %v5946_v46 = vpop.f32.mrb[103].mxu1  ;;  %6299 = vmatpush1.bf16.msra.mxu0 %v6186_v5  ;;  %v6109_v57 = vmax.f32 %v6918_v44, 0.0 }
 0x6cf   : > { %v6921_v10 = vadd.f32 %v5946_v46, %v10519_v13  ;;  %v6110_v9 = vmax.f32 %v6919_v59, 0.0 }
 0x6d0   : > { %v6111_v24 = vmax.f32 %v6920_v49, 0.0 }
 0x6d1   : > { %v6112_v41 = vmax.f32 %v6921_v10, 0.0 }
 0x6d2   : > { %v6188_v14 = vpack.c.bf16 %v6111_v24, %v6109_v57 }
 0x6d3   : > { %v6189_v7 = vpack.c.bf16 %v6112_v41, %v6110_v9  ;;  %v5950_v2 = vpop.f32.mrb[104].mxu1 }
 0x6d4   : > { %v6922_v35 = vadd.f32 %v5950_v2, %v10526_v51  ;;  %v5952_v6 = vpop.f32.mrb[105].mxu1 }
 0x6d5   : > { %v6923_v27 = vadd.f32 %v5952_v6, %v10526_v51  ;;  %v5954_v52 = vpop.f32.mrb[106].mxu1  ;;  %6300 = vmatprep.subr.bf16.mxu0 %v6189_v7 }
 0x6d6   : > { %v6924_v25 = vadd.f32 %v5954_v52, %v10530_v23  ;;  %v5956_v4 = vpop.f32.mrb[107].mxu1  ;;  %6301 = vmatpush1.bf16.msra.mxu0 %v6188_v14  ;;  %v6113_v36 = vmax.f32 %v6922_v35, 0.0 }
 0x6d7   : > { %v6925_v13 = vadd.f32 %v5956_v4, %v10530_v23  ;;  %v6114_v22 = vmax.f32 %v6923_v27, 0.0 }
 0x6d8   : > { %v6115_v43 = vmax.f32 %v6924_v25, 0.0 }
 0x6d9   : > { %v6116_v0 = vmax.f32 %v6925_v13, 0.0 }
 0x6da   : > { %v6190_v34 = vpack.c.bf16 %v6115_v43, %v6113_v36  ;;  %v4656_v43 = vpop.permute.xlu0 %4655 }
 0x6db   : > { %v6191_v29 = vpack.c.bf16 %v6116_v0, %v6114_v22  ;;  %v5960_v60 = vpop.f32.mrb[108].mxu1 }
 0x6dc   : > { %v6926_v32 = vadd.f32 %v5960_v60, %v10535_v61  ;;  %v5962_v50 = vpop.f32.mrb[109].mxu1  ;;  %v4661_v60 = vpop.permute.xlu1 %4660 }
 0x6dd   : > { %v6927_v51 = vadd.f32 %v5962_v50, %v10535_v61  ;;  %v5964_v39 = vpop.f32.mrb[110].mxu1  ;;  %6302 = vmatprep.subr.bf16.mxu0 %v6191_v29 }
 0x6de   : > { %v6928_v33 = vadd.f32 %v5964_v39, %v10537_v8  ;;  %v5966_v17 = vpop.f32.mrb[111].mxu1  ;;  %6303 = vmatpush1.bf16.msra.mxu0 %v6190_v34  ;;  %v6117_v31 = vmax.f32 %v6926_v32, 0.0 }
 0x6df   : > { %v6929_v23 = vadd.f32 %v5966_v17, %v10537_v8  ;;  %v6118_v1 = vmax.f32 %v6927_v51, 0.0 }
 0x6e0   : > { %v6119_v16 = vmax.f32 %v6928_v33, 0.0 }
 0x6e1   : > { %v6120_v45 = vmax.f32 %v6929_v23, 0.0 }
 0x6e2   : > { %v6192_v28 = vpack.c.bf16 %v6119_v16, %v6117_v31 }
 0x6e3   : > { %v6193_v3 = vpack.c.bf16 %v6120_v45, %v6118_v1  ;;  %v5970_v15 = vpop.f32.mrb[112].mxu1  ;;  %v6235_v1 = vcombine.high %v10555_v53, %v10555_v53 }
 0x6e4   : > { %v6930_v58 = vadd.f32 %v5970_v15, %v10539_v26  ;;  %v5972_v12 = vpop.f32.mrb[113].mxu1 }
 0x6e5   : > { %v6931_v61 = vadd.f32 %v5972_v12, %v10539_v26  ;;  %v5974_v47 = vpop.f32.mrb[114].mxu1  ;;  %6304 = vmatprep.subr.bf16.mxu0 %v6193_v3  ;;  %v10704_v12 = vld [vmem:[#allocation8_spill] sm:$0xff] }
 0x6e6   : > { %v6932_v19 = vadd.f32 %v5974_v47, %v10541_v40  ;;  %v5976_v42 = vpop.f32.mrb[115].mxu1  ;;  %6305 = vmatpush1.bf16.msra.mxu0 %v6192_v28  ;;  %v6121_v21 = vmax.f32 %v6930_v58, 0.0  ;;  %v6206_v58 = vpop.permute.xlu0 %6205 }
 0x6e7   : > { %v6933_v8 = vadd.f32 %v5976_v42, %v10541_v40  ;;  %v6122_v11 = vmax.f32 %v6931_v61, 0.0  ;;  %v6211_v61 = vrot.slane %v6206_v58, %v10704_v12 }
 0x6e8   : > { %v6123_v20 = vmax.f32 %v6932_v19, 0.0 }
 0x6e9   : > { %v6124_v48 = vmax.f32 %v6933_v8, 0.0 }
 0x6ea   : > { %v6194_v5 = vpack.c.bf16 %v6123_v20, %v6121_v21 }
 0x6eb   : > { %v6195_v38 = vpack.c.bf16 %v6124_v48, %v6122_v11  ;;  %v5980_v55 = vpop.f32.mrb[116].mxu1 }
 0x6ec   : > { %v6934_v44 = vadd.f32 %v5980_v55, %v10543_v37  ;;  %v5982_v54 = vpop.f32.mrb[117].mxu1 }
 0x6ed   : > { %v6935_v26 = vadd.f32 %v5982_v54, %v10543_v37  ;;  %v5984_v59 = vpop.f32.mrb[118].mxu1  ;;  %6306 = vmatprep.subr.bf16.mxu0 %v6195_v38  ;;  %v10705_v38 = vlaneseq }
 0x6ee   : > { %v6936_v63 = vadd.f32 %v5984_v59, %v10545_v56  ;;  %v5986_v49 = vpop.f32.mrb[119].mxu1  ;;  %6307 = vmatpush1.bf16.msra.mxu0 %v6194_v5  ;;  %v6125_v46 = vmax.f32 %v6934_v44, 0.0 }
 0x6ef   : > { %v6937_v40 = vadd.f32 %v5986_v49, %v10545_v56  ;;  %v6126_v57 = vmax.f32 %v6935_v26, 0.0  ;;  %vm6343_vm0 = vcmp.lt.s32.totalorder %v10705_v38, 256 }
 0x6f0   : > { %v6127_v10 = vmax.f32 %v6936_v63, 0.0 }
 0x6f1   : > { %v6128_v24 = vmax.f32 %v6937_v40, 0.0 }
 0x6f2   : > { %v6196_v9 = vpack.c.bf16 %v6127_v10, %v6125_v46 }
 0x6f3   : > { %v6197_v41 = vpack.c.bf16 %v6128_v24, %v6126_v57  ;;  %v5990_v14 = vpop.f32.mrb[120].mxu1 }
 0x6f4   : > { %v6938_v7 = vadd.f32 %v5990_v14, %v10547_v62  ;;  %v5992_v2 = vpop.f32.mrb[121].mxu1 }
 0x6f5   : > { %v6939_v37 = vadd.f32 %v5992_v2, %v10547_v62  ;;  %v5994_v35 = vpop.f32.mrb[122].mxu1  ;;  %6308 = vmatprep.subr.bf16.mxu0 %v6197_v41 }
 0x6f6   : > { %v6940_v6 = vadd.f32 %v5994_v35, %v10549_v30  ;;  %v5996_v27 = vpop.f32.mrb[123].mxu1  ;;  %6309 = vmatpush1.bf16.msra.mxu0 %v6196_v9  ;;  %v6129_v52 = vmax.f32 %v6938_v7, 0.0 }
 0x6f7   : > { %v6941_v56 = vadd.f32 %v5996_v27, %v10549_v30  ;;  %v6130_v4 = vmax.f32 %v6939_v37, 0.0 }
 0x6f8   : > { %v6131_v25 = vmax.f32 %v6940_v6, 0.0 }
 0x6f9   : > { %v6132_v13 = vmax.f32 %v6941_v56, 0.0 }
 0x6fa   : > { %v6198_v36 = vpack.c.bf16 %v6131_v25, %v6129_v52 }
 0x6fb   : > { %v6199_v22 = vpack.c.bf16 %v6132_v13, %v6130_v4  ;;  %v6000_v0 = vpop.f32.mrb[124].mxu1 }
 0x6fc   : > { %v6942_v34 = vadd.f32 %v6000_v0, %v4656_v43  ;;  %v6002_v29 = vpop.f32.mrb[125].mxu1 }
 0x6fd   : > { %v6943_v62 = vadd.f32 %v6002_v29, %v4656_v43  ;;  %v6004_v32 = vpop.f32.mrb[126].mxu1  ;;  %6310 = vmatprep.subr.bf16.mxu0 %v6199_v22 }
 0x6fe   : > { %v6944_v50 = vadd.f32 %v6004_v32, %v4661_v60  ;;  %v6006_v51 = vpop.f32.mrb[127].mxu1  ;;  %6311 = vmatpush1.bf16.msra.mxu0 %v6198_v36  ;;  %v6133_v30 = vmax.f32 %v6942_v34, 0.0 }
 0x6ff   : > { %v6945_v39 = vadd.f32 %v6006_v51, %v4661_v60  ;;  %v6134_v17 = vmax.f32 %v6943_v62, 0.0 }
 0x700   : > { %v6135_v33 = vmax.f32 %v6944_v50, 0.0 }
 0x701   : > { %v6136_v23 = vmax.f32 %v6945_v39, 0.0 }
 0x702   : > { %v6200_v31 = vpack.c.bf16 %v6135_v33, %v6133_v30 }
 0x703   : > { %v6201_v16 = vpack.c.bf16 %v6136_v23, %v6134_v17 }
 0x705   : > { %6312 = vmatprep.subr.bf16.mxu0 %v6201_v16 }
 0x706   : > { %6313 = vmatpush1.bf16.msra.mxu0 %v6200_v31 }
 0x709   : > { %6315 = vmatmul.mubr.bf16.vlgmr.msra.gmra.mrb[128].mxu0 %v6235_v1 }
 0x75c   : > { %v6275_v45 = vpop.f32.mrb[128].mxu1 }
 0x75d   : > { %v6277_v28 = vpop.f32.mrb[129].mxu1  ;;  %v6276_v47 = vadd.f32 %v6275_v45, %v6211_v61 }
 0x75e   : > { %v6279_v3 = vpop.f32.mrb[130].mxu1  ;;  %v6278_v19 = vadd.f32 %v6277_v28, %v6211_v61 }
 0x75f   : > { %v6280_v15 = vpop.f32.mrb[131].mxu1 }
 0x7dc   : > { %v6316_v42 = vpop.f32.mrb[128].mxu0 }
 0x7dd   : > { %v6317_v8 = vadd.f32 %v6316_v42, %v6276_v47  ;;  %v6318_v21 = vpop.f32.mrb[129].mxu0 }
 0x7de   : > { %v6319_v20 = vadd.f32 %v6318_v21, %v6278_v19  ;;  %v6320_v53 = vpop.f32.mrb[130].mxu0 }
 0x7df   : > { %v6321_v11 = vpop.f32.mrb[131].mxu0 }
 0x7e0   : > { %v6325_v48 = vcombine.low %v6317_v8, %v6319_v20 }
 0x7e2   : > { %v6332_v5 = vrot.slane %v6325_v48, %v10484_v18 }
 0x7e4   : > { %v6339_v55 = vrot.slane %v6332_v5, %v10484_v18 }
 0x7e6   : > { %6345 = vst.msk [vmem:[%s328_s23] sm:$0x3] %vm6343_vm0, %v6339_v55 }
 0x7e7   : > { %7729 = shalt.err (!%p7726_p3)
}
 0x7e8   : > { %s7730_s10 = scalar_lea.hbm %s10629_s26, 32  ;;  %s7734_s22 = scalar_lea.hbm %s10680_s9, 64 }
 0x7e9   : > { %p7731_p4 = scmp.ne.s32.totalorder %s10629_s26, %s7730_s10  ;;  %p7735_p9 = scmp.lt.u32.totalorder %s10629_s26, %s10680_s9 }
 0x7ea   : > { %p7736_p10 = scmp.lt.u32.totalorder %s7734_s22, %s7730_s10  ;;  %p7738_p12 = scmp.lt.u32.totalorder %s7730_s10, %s10629_s26 }
 0x7eb   : > { %p7732_p7 = pnand %p7731_p4, %p7875_p5 }
 0x7ec   : > { %p7737_p11 = por %p7736_p10, %p7735_p9 }
 0x7ed   : > { %p7733_p8 = pneg %p7732_p7 }
 0x7ee   : > { %p7739_p13 = por %p7738_p12, %p7737_p11 }
 0x7f0   : > { %p7740_p0 = pnand %p7739_p13, %p7733_p8 }
 0x7f2   : > { %7743 = shalt.err (!%p7740_p0)
}
 0x7f3   : > { %7206 = dma.vmem_to_hbm [thread:$0]  (%p7875_p5), %s10631_s18, 32, %s10629_s26, %s6347_s8  }
 0x7f4 PF: > { %p7212_p1 = scmp.ge.s32.totalorder %s7778_s14, 2  ;;  %s6373_s25 = sand.u32 1, %s7766_s11  }
 0x7f5   : > { %s6374_s27 = scalar_lea.sflag [#allocation4], %s6373_s25 }
 0x7f6   : > { %p7209_p2 = pnand %p7212_p1, %p7879_p6 }
 0x7f8   : > { %7761 = dma.done.wait (!%p7209_p2), %s6374_s27, 32  }
 0x7f9   : > { %7763 = vsyncadd (!%p7209_p2), %s6374_s27, 4294967264  ;;  %p21_p3 = scmp.ge.s32.totalorder %s7862_s16, 4   ;;  %s10706_s11 = smov %s7770_s12 }
 0x7fa   : > { %s10707_s12 = smov %s7774_s13  ;;  %s10708_s13 = smov %s7873_s19 }
 0x7fb   : > { %s10709_s14 = smov %s7862_s16  ;;  %23 = sbr.rel (!%p21_p3) target bundleno = 6 (0x6), region = 91 }
 0x802   :  { %6379 = vsyncpa [#allocation4], 1 }
 0x803   :  { %6381 = vsyncpa [#allocation4 + $0x1], 1 }

// kernel: discriminator_forward.1
= control target key start
LH: loop header
LB: loop body
LE: loop exit
PB: predicated region body
PF: predicated region fallthrough
CT: control target
= control target key end

     0   :  { %s10671_s0 = inlined_call_operand.vmem [shape: f32[2,512], index: 0, kind: input, shape index: {}]   ;;  %s10672_s1 = inlined_call_operand.vmem [shape: f32[512,2], index: 1, kind: input, shape index: {}]   ;;  %s10673_s2 = inlined_call_operand.vmem [shape: f32[512,1], index: 2, kind: input, shape index: {}]   ;;  %s10674_s3 = inlined_call_operand.vmem [shape: bf16[512,512], index: 3, kind: input, shape index: {}]   ;;  %s10675_s4 = inlined_call_operand.vmem [shape: f32[512,1], index: 4, kind: input, shape index: {}]   ;;  %s10676_s5 = inlined_call_operand.vmem [shape: bf16[512,512], index: 5, kind: input, shape index: {}]   ;;  %s10677_s6 = inlined_call_operand.vmem [shape: f32[512,1], index: 6, kind: input, shape index: {}]   ;;  %s10678_s7 = inlined_call_operand.vmem [shape: bf16[1,512], index: 7, kind: input, shape index: {}]   ;;  %s10679_s8 = inlined_call_operand.<no memory space> [shape: f32[1,1], index: 8, kind: input, shape index: {}]   ;;  %s10680_s9 = inlined_call_operand.hbm [shape: f32[2,1,256], index: 9, kind: output, shape index: {}]  }
   0x1   :  { %v14_v0 = vstv %s10679_s8 }
   0x2   :  { %15 = vst [vmem:[#allocation2] sm:$0x1] %v14_v0 }
   0x3   :  { %16 = vsyncpa [#allocation4], 0 }
   0x4   :  { %18 = vsyncpa [#allocation4 + $0x1], 0  ;;  %s7837_s11 = smov 0   ;;  %s7839_s12 = smov 0  }
   0x5   :  { %s7841_s13 = smov 0   ;;  %s7843_s14 = smov 0  }
   0x6 LB: > { %s7858_s8 = sadd.s32 4294967295, %s7778_s14   ;;  %s6420_s15 = sadd.s32 4294967294, %s7778_s14   ;;  %s7778_s14 = sphi %s7843_s14, %s10709_s14   ;;  %s7774_s13 = sphi %s7841_s13, %s10708_s13   ;;  %s7770_s12 = sphi %s7839_s12, %s10707_s12   ;;  %s7766_s11 = sphi %s7837_s11, %s10706_s11  }
   0x7   : > { %s7862_s16 = sadd.s32 1, %s7778_s14   ;;  %s225_s17 = sadd.s32 1, %s7774_s13 }
   0x8   : > { %s222_s18 = ssub.s32 %s7778_s14, %s7862_s16  ;;  %p235_p0 = scmp.ne.s32.totalorder %s7774_s13, %s7770_s12 }
   0x9   : > { %p223_p1 = scmp.eq.s32.totalorder %s222_s18, 0  ;;  %p236_p2 = scmp.eq.s32.totalorder %s7858_s8, 1 }
   0xa   : > { %p241_p3 = scmp.ne.s32.totalorder %s7770_s12, %s7766_s11  ;;  %p242_p4 = scmp.eq.s32.totalorder %s6420_s15, 1 }
   0xb   : > { %s7873_s19 = scalar_select %p223_p1, %s7774_s13, %s225_s17  }
   0xc   : > { %p7875_p5 = por %p236_p2, %p235_p0  ;;  %p7879_p6 = por %p242_p4, %p241_p3 }
   0xd   : > { %p6423_p7 = scmp.ge.s32.totalorder %s7778_s14, 1  ;;  %p293_p8 = scmp.lt.s32.totalorder %s7778_s14, 3 }
   0xf   : > { %p294_p9 = pnand %p6423_p7, %p293_p8 }
  0x11   : > { %297 = sbr.rel (%p294_p9) target bundleno = 2036 (0x7f4), region = 56 }
  0x18   : > { %v7888_v1 = vld [vmem:[%s10672_s1 + $0x10] sm:$0xff]  ;;  %v7893_v2 = vld [vmem:[%s10672_s1] sm:$0xff]  ;;  %v10682_v3 = vmov 1   ;;  %v337_v5 = vld [vmem:[%s10672_s1 + $0x8] sm:$0xff]  ;;  %v10685_v8 = vmov 0   ;;  %s6425_s18 = sshll.u32 %s7858_s8, 1 }
  0x19   : > { %7250 = vset.pattern.permute.xlu0 %v10682_v3  ;;  %7248 = vset.pattern.permute.xlu1 %v10682_v3  ;;  %v340_v4 = vld [vmem:[%s10672_s1 + $0x20] sm:$0xff]  ;;  %v342_v6 = vld [vmem:[%s10672_s1 + $0x30] sm:$0xff]  ;;  %v339_v7 = vld [vmem:[%s10672_s1 + $0x18] sm:$0xff]  ;;  %p330_p10 = scmp.lt.s32.totalorder %s6425_s18, 3  ;;  %s326_s15 = sand.u32 1, %s7770_s12  }
  0x1a   : > { %876 = vperm.xlu0 %7250, %v7888_v1   ;;  %868 = vperm.xlu1 %7248, %v7893_v2   ;;  %v344_v9 = vld [vmem:[%s10672_s1 + $0x40] sm:$0xff]  ;;  %v346_v10 = vld [vmem:[%s10672_s1 + $0x50] sm:$0xff]  ;;  %v341_v14 = vld [vmem:[%s10672_s1 + $0x28] sm:$0xff]  ;;  %s6424_s17 = sshll.u32 %s326_s15, 1  ;;  %s6689_s22 = sshll.u32 %s7858_s8, 5 }
  0x1b   : > { %v1397_v11 = vld [vmem:[%s10673_s2] sm:$0xff]  ;;  %v7932_v13 = vld [vmem:[%s10672_s1 + $0x70] sm:$0xff]  ;;  %v343_v21 = vld [vmem:[%s10672_s1 + $0x38] sm:$0xff]  ;;  %s10711_s18 = smov (!%p330_p10, %s6425_s18), 3  ;;  %s10629_s26 = scalar_lea.hbm %s10680_s9, %s6689_s22 }
  0x1c   : > { %v7925_v12 = vld [vmem:[%s10672_s1 + $0x60] sm:$0xff]  ;;  %v7947_v16 = vld [vmem:[%s10672_s1 + $0x90] sm:$0xff]  ;;  %v345_v26 = vld [vmem:[%s10672_s1 + $0x48] sm:$0xff]  ;;  %s6426_s30 = sshll.u32 %s10711_s18, 1  ;;  %s6347_s8 = scalar_lea.sflag [#allocation4], %s326_s15 }
  0x1d   : > { %v7941_v15 = vld [vmem:[%s10672_s1 + $0x80] sm:$0xff]  ;;  %v1399_v18 = vld [vmem:[%s10673_s2 + $0x10] sm:$0xff]  ;;  %v1398_v27 = vld [vmem:[%s10673_s2 + $0x8] sm:$0xff]  ;;  %s333_s23 = scalar_lea.vmem %s10671_s0, %s6426_s30  ;;  %s7783_s28 = smov [#allocation3]  }
  0x1e   : > { %884 = vperm.xlu0 %7250, %v340_v4   ;;  %872 = vperm.xlu1 %7248, %v337_v5   ;;  %v7954_v17 = vld [vmem:[%s10672_s1 + $0xa0] sm:$0xff]  ;;  %v7964_v19 = vld [vmem:[%s10672_s1 + $0xb0] sm:$0xff]  ;;  %v1400_v29 = vld [vmem:[%s10673_s2 + $0x18] sm:$0xff]  ;;  %s7720_s29 = sshll.u32 %s7783_s28, 4  ;;  %s7721_s29 = int_to_ptr.vmem [resolvable:$false] %s7720_s29 }
  0x1f   : > { %v7970_v20 = vld [vmem:[%s10672_s1 + $0xc0] sm:$0xff]  ;;  %v362_v22 = vld [vmem:[%s10672_s1 + $0xd0] sm:$0xff]  ;;  %v1402_v30 = vld [vmem:[%s10673_s2 + $0x28] sm:$0xff]  ;;  %s7722_s30 = scalar_lea.vmem %s7721_s29, 64 }
  0x20   : > { %v364_v23 = vld [vmem:[%s10672_s1 + $0xe0] sm:$0xff]  ;;  %v366_v25 = vld [vmem:[%s10672_s1 + $0xf0] sm:$0xff]  ;;  %v347_v31 = vld [vmem:[%s10672_s1 + $0x58] sm:$0xff] }
  0x21   : > { %v1401_v24 = vld [vmem:[%s10673_s2 + $0x20] sm:$0xff]  ;;  %v1403_v28 = vld [vmem:[%s10673_s2 + $0x30] sm:$0xff]  ;;  %v1404_v32 = vld [vmem:[%s10673_s2 + $0x38] sm:$0xff] }
  0x22   : > { %892 = vperm.xlu0 %7250, %v342_v6   ;;  %7249 = vset.pattern.permute.xlu1 %v10685_v8  ;;  %v1406_v33 = vld [vmem:[%s10673_s2 + $0x48] sm:$0xff]  ;;  %v1405_v34 = vld [vmem:[%s10673_s2 + $0x40] sm:$0xff]  ;;  %v1408_v35 = vld [vmem:[%s10673_s2 + $0x58] sm:$0xff] }
  0x23   : > { %417 = vperm.xlu1 %7249, %v339_v7   ;;  %v1410_v36 = vld [vmem:[%s10673_s2 + $0x68] sm:$0xff]  ;;  %v1412_v38 = vld [vmem:[%s10673_s2 + $0x78] sm:$0xff]  ;;  %v1407_v41 = vld [vmem:[%s10673_s2 + $0x50] sm:$0xff] }
  0x24   : > { %v349_v37 = vld [vmem:[%s10672_s1 + $0x68] sm:$0xff]  ;;  %v1416_v40 = vld [vmem:[%s10673_s2 + $0x98] sm:$0xff]  ;;  %v1409_v47 = vld [vmem:[%s10673_s2 + $0x60] sm:$0xff] }
  0x25   : > { %v1414_v39 = vld [vmem:[%s10673_s2 + $0x88] sm:$0xff]  ;;  %v1420_v43 = vld [vmem:[%s10673_s2 + $0xb8] sm:$0xff]  ;;  %v8084_v53 = vld [vmem:[%s10672_s1 + $0x100] sm:$0xff] }
  0x26   : > { %900 = vperm.xlu0 %7250, %v344_v9   ;;  %v1418_v42 = vld [vmem:[%s10673_s2 + $0xa8] sm:$0xff]  ;;  %v351_v44 = vld [vmem:[%s10672_s1 + $0x78] sm:$0xff]  ;;  %v8096_v56 = vld [vmem:[%s10672_s1 + $0x120] sm:$0xff] }
  0x27   : > { %7251 = vset.pattern.permute.xlu1 %v10682_v3  ;;  %v1422_v45 = vld [vmem:[%s10673_s2 + $0xc8] sm:$0xff]  ;;  %v1424_v46 = vld [vmem:[%s10673_s2 + $0xd8] sm:$0xff]  ;;  %v374_v59 = vld [vmem:[%s10672_s1 + $0x130] sm:$0xff] }
  0x28   : > { %880 = vperm.xlu1 %7251, %v339_v7   ;;  %v1426_v48 = vld [vmem:[%s10673_s2 + $0xe8] sm:$0xff]  ;;  %v1411_v61 = vld [vmem:[%s10673_s2 + $0x70] sm:$0xff]  ;;  %v376_v63 = vld [vmem:[%s10672_s1 + $0x140] sm:$0xff] }
  0x29   : > { %v353_v54 = vld [vmem:[%s10672_s1 + $0x88] sm:$0xff]  ;;  %v380_v7 = vld [vmem:[%s10672_s1 + $0x160] sm:$0xff] }
  0x2a   : > { %908 = vperm.xlu0 %7250, %v346_v10  }
  0x2c   : > { %7252 = vset.pattern.permute.xlu1 %v10685_v8 }
  0x2d   : > { %1463 = vperm.xlu1 %7252, %v1397_v11   ;;  %v382_v11 = vld [vmem:[%s10672_s1 + $0x170] sm:$0xff] }
  0x2e   : > { %916 = vperm.xlu0 %7250, %v7925_v12  }
  0x31   : > { %422 = vperm.xlu1 %7252, %v340_v4  }
  0x32   : > { %924 = vperm.xlu0 %7250, %v7932_v13  }
  0x35   : > { %427 = vperm.xlu1 %7252, %v341_v14  }
  0x36   : > { %932 = vperm.xlu0 %7250, %v7941_v15  }
  0x39   : > { %7253 = vset.pattern.permute.xlu1 %v10682_v3 }
  0x3a   : > { %940 = vperm.xlu0 %7250, %v7947_v16   ;;  %888 = vperm.xlu1 %7253, %v341_v14   ;;  %v384_v14 = vld [vmem:[%s10672_s1 + $0x180] sm:$0xff] }
  0x3e   : > { %948 = vperm.xlu0 %7250, %v7954_v17   ;;  %7254 = vset.pattern.permute.xlu1 %v10685_v8 }
  0x3f   : > { %1473 = vperm.xlu1 %7254, %v1399_v18   ;;  %v386_v18 = vld [vmem:[%s10672_s1 + $0x190] sm:$0xff] }
  0x42   : > { %956 = vperm.xlu0 %7250, %v7964_v19  }
  0x43   : > { %432 = vperm.xlu1 %7254, %v342_v6  }
  0x46   : > { %964 = vperm.xlu0 %7250, %v7970_v20  }
  0x47   : > { %437 = vperm.xlu1 %7254, %v343_v21  }
  0x4a   : > { %972 = vperm.xlu0 %7250, %v362_v22  }
  0x4b   : > { %7255 = vset.pattern.permute.xlu1 %v10682_v3 }
  0x4c   : > { %896 = vperm.xlu1 %7255, %v343_v21  }
  0x4e   : > { %980 = vperm.xlu0 %7250, %v364_v23   ;;  %v388_v23 = vld [vmem:[%s10672_s1 + $0x1a0] sm:$0xff] }
  0x50   : > { %7256 = vset.pattern.permute.xlu1 %v10685_v8 }
  0x51   : > { %1483 = vperm.xlu1 %7256, %v1401_v24  }
  0x52   : > { %988 = vperm.xlu0 %7250, %v366_v25   ;;  %v357_v25 = vld [vmem:[%s10672_s1 + $0xa8] sm:$0xff] }
  0x55   : > { %442 = vperm.xlu1 %7256, %v344_v9  }
  0x56   : > { %7279 = vset.pattern.permute.xlu0 %v10685_v8 }
  0x57   : > { %402 = vperm.xlu0 %7279, %v7893_v2   ;;  %v378_v2 = vld [vmem:[%s10672_s1 + $0x150] sm:$0xff] }
  0x59   : > { %447 = vperm.xlu1 %7256, %v345_v26  }
  0x5b   : > { %407 = vperm.xlu0 %7279, %v337_v5   ;;  %v355_v5 = vld [vmem:[%s10672_s1 + $0x98] sm:$0xff] }
  0x5d   : > { %7257 = vset.pattern.permute.xlu1 %v10682_v3 }
  0x5e   : > { %904 = vperm.xlu1 %7257, %v345_v26   ;;  %v10681_v26 = vlaneseq }
  0x5f   : > { %412 = vperm.xlu0 %7279, %v7888_v1  }
  0x62   : > { %7258 = vset.pattern.permute.xlu1 %v10685_v8 }
  0x63   : > { %1468 = vperm.xlu0 %7279, %v1398_v27   ;;  %1493 = vperm.xlu1 %7258, %v1403_v28  }
  0x67   : > { %1478 = vperm.xlu0 %7279, %v1400_v29   ;;  %452 = vperm.xlu1 %7258, %v346_v10   ;;  %v8182_v29 = vshrl.u32 %v10681_v26, 7 }
  0x69   : > { %10693 = vst [vmem:[#allocation6_spill] sm:$0xff] %v8182_v29 }
  0x6b   : > { %1488 = vperm.xlu0 %7279, %v1402_v30   ;;  %457 = vperm.xlu1 %7258, %v347_v31  }
  0x6f   : > { %1498 = vperm.xlu0 %7279, %v1404_v32   ;;  %7259 = vset.pattern.permute.xlu1 %v10682_v3 }
  0x70   : > { %912 = vperm.xlu1 %7259, %v347_v31   ;;  %v392_v31 = vld [vmem:[%s10672_s1 + $0x1c0] sm:$0xff] }
  0x73   : > { %1508 = vperm.xlu0 %7279, %v1406_v33   ;;  %v1415_v33 = vld [vmem:[%s10673_s2 + $0x90] sm:$0xff] }
  0x74   : > { %7260 = vset.pattern.permute.xlu1 %v10685_v8 }
  0x75   : > { %1503 = vperm.xlu1 %7260, %v1405_v34   ;;  %v1125_v34 = vsub.s32 1, %v8182_v29 }
  0x77   : > { %1518 = vperm.xlu0 %7279, %v1408_v35   ;;  %v1129_v35 = vsub.s32 3, %v8182_v29 }
  0x79   : > { %462 = vperm.xlu1 %7260, %v7925_v12  }
  0x7b   : > { %1528 = vperm.xlu0 %7279, %v1410_v36  }
  0x7d   : > { %467 = vperm.xlu1 %7260, %v349_v37  }
  0x7f   : > { %1538 = vperm.xlu0 %7279, %v1412_v38   ;;  %v335_v38 = vld [vmem:[%s333_s23] sm:$0xf]  ;;  %s328_s23 = scalar_lea.vmem [#allocation3], %s6424_s17 }
  0x80   : > { %s6361_s18 = sshll.u32 %s328_s23, 4  ;;  %s10631_s18 = int_to_ptr.vmem [resolvable:$true] %s6361_s18 }
  0x81   : > { %7261 = vset.pattern.permute.xlu1 %v10682_v3  ;;  %s7716_s27 = scalar_lea.vmem %s10631_s18, 32  ;;  %p7723_p0 = scmp.lt.s32.totalorder %s10631_s18, %s7721_s29 }
  0x82   : > { %920 = vperm.xlu1 %7261, %v349_v37   ;;  %v394_v37 = vld [vmem:[%s10672_s1 + $0x1d0] sm:$0xff]  ;;  %p7717_p11 = scmp.ne.s32.totalorder %s10631_s18, %s7716_s27  ;;  %p7724_p1 = scmp.lt.s32.totalorder %s7722_s30, %s7716_s27 }
  0x83   : > { %1548 = vperm.xlu0 %7279, %v1414_v39   ;;  %v8207_v39 = vsub.s32 0, %v8182_v29 }
  0x84   : > { %p7718_p12 = pnand %p7717_p11, %p7875_p5  ;;  %p7725_p2 = por %p7724_p1, %p7723_p0 }
  0x85   : > { %10695 = vst [vmem:[#allocation8_spill] sm:$0xff] %v8207_v39 }
  0x86   : > { %7262 = vset.pattern.permute.xlu1 %v10685_v8  ;;  %p7719_p13 = pneg %p7718_p12 }
  0x87   : > { %1558 = vperm.xlu0 %7279, %v1416_v40   ;;  %1513 = vperm.xlu1 %7262, %v1407_v41   ;;  %v727_v40 = vsub.s32 2, %v8182_v29 }
  0x88   : > { %p7726_p3 = pnand %p7725_p2, %p7719_p13 }
  0x8b   : > { %1568 = vperm.xlu0 %7279, %v1418_v42   ;;  %472 = vperm.xlu1 %7262, %v7932_v13   ;;  %v1126_v42 = vrot.slane %v335_v38, %v1125_v34 }
  0x8f   : > { %1578 = vperm.xlu0 %7279, %v1420_v43   ;;  %477 = vperm.xlu1 %7262, %v351_v44   ;;  %v1130_v43 = vrot.slane %v335_v38, %v1129_v35 }
  0x93   : > { %1588 = vperm.xlu0 %7279, %v1422_v45   ;;  %7263 = vset.pattern.permute.xlu1 %v10682_v3  ;;  %v396_v45 = vld [vmem:[%s10672_s1 + $0x1e0] sm:$0xff] }
  0x94   : > { %928 = vperm.xlu1 %7263, %v351_v44  }
  0x97   : > { %1598 = vperm.xlu0 %7279, %v1424_v46   ;;  %v724_v46 = vrot.slane %v335_v38, %v8207_v39 }
  0x98   : > { %7264 = vset.pattern.permute.xlu1 %v10685_v8 }
  0x99   : > { %1523 = vperm.xlu1 %7264, %v1409_v47   ;;  %v8072_v49 = vpop.permute.xlu1 %868  ;;  %v8074_v50 = vpop.permute.xlu0 %876  ;;  %v728_v47 = vrot.slane %v335_v38, %v727_v40 }
  0x9b   : > { %1608 = vperm.xlu0 %7279, %v1426_v48  }
  0x9d   : > { %482 = vperm.xlu1 %7264, %v7941_v15   ;;  %v8077_v51 = vpop.permute.xlu1 %872  ;;  %v8079_v52 = vpop.permute.xlu0 %884  ;;  %v1413_v15 = vld [vmem:[%s10673_s2 + $0x80] sm:$0xff] }
  0x9f   : > { %7282 = vset.pattern.permute.xlu0 %v10682_v3 }
  0xa0   : > { %996 = vperm.xlu0 %7282, %v8084_v53  }
  0xa1   : > { %487 = vperm.xlu1 %7264, %v353_v54   ;;  %v8091_v55 = vpop.permute.xlu0 %892 }
  0xa2   : > { %v8098_v57 = vpop.permute.xlu1 %417 }
  0xa4   : > { %1012 = vperm.xlu0 %7282, %v8096_v56  }
  0xa5   : > { %7265 = vset.pattern.permute.xlu1 %v10682_v3  ;;  %v8102_v58 = vpop.permute.xlu0 %900 }
  0xa6   : > { %936 = vperm.xlu1 %7265, %v353_v54   ;;  %v359_v54 = vld [vmem:[%s10672_s1 + $0xb8] sm:$0xff] }
  0xa7   : > { %v8107_v60 = vpop.permute.xlu1 %880 }
  0xa8   : > { %1020 = vperm.xlu0 %7282, %v374_v59   ;;  %v8224_v59 = vrot.slane %v1126_v42, %v1125_v34 }
  0xa9   : > { %v8112_v62 = vpop.permute.xlu0 %908 }
  0xaa   : > { %7266 = vset.pattern.permute.xlu1 %v10685_v8  ;;  %v8262_v35 = vmul.f32 %v8224_v59, %v8091_v55  ;;  %v8275_v38 = vmul.f32 %v8224_v59, %v8102_v58 }
  0xab   : > { %1533 = vperm.xlu1 %7266, %v1411_v61   ;;  %v8226_v61 = vrot.slane %v1130_v43, %v1125_v34 }
  0xac   : > { %1028 = vperm.xlu0 %7282, %v376_v63   ;;  %v8118_v0 = vpop.permute.xlu1 %1463  ;;  %v398_v63 = vld [vmem:[%s10672_s1 + $0x1f0] sm:$0xff] }
  0xad   : > { %v8120_v1 = vpop.permute.xlu0 %916  ;;  %v1150_v34 = vmul.f32 %v8226_v61, %v8079_v52  ;;  %v8284_v43 = vmul.f32 %v8226_v61, %v8102_v58 }
  0xaf   : > { %492 = vperm.xlu1 %7266, %v7947_v16  }
  0xb0   : > { %1036 = vperm.xlu0 %7282, %v378_v2   ;;  %v8126_v4 = vpop.permute.xlu1 %422 }
  0xb1   : > { %v8131_v6 = vpop.permute.xlu0 %924 }
  0xb3   : > { %497 = vperm.xlu1 %7266, %v355_v5  }
  0xb4   : > { %1044 = vperm.xlu0 %7282, %v380_v7   ;;  %v8136_v9 = vpop.permute.xlu1 %427 }
  0xb5   : > { %v8138_v10 = vpop.permute.xlu0 %932 }
  0xb7   : > { %7267 = vset.pattern.permute.xlu1 %v10682_v3 }
  0xb8   : > { %1052 = vperm.xlu0 %7282, %v382_v11   ;;  %944 = vperm.xlu1 %7267, %v355_v5   ;;  %v8235_v5 = vrot.slane %v728_v47, %v8207_v39  ;;  %v1141_v11 = vmul.f32 %v8224_v59, %v8072_v49  ;;  %v8291_v47 = vld [vmem:[%s10672_s1 + $0x118] sm:$0xff] }
  0xb9   : > { %v8144_v12 = vpop.permute.xlu1 %888  ;;  %v8146_v13 = vpop.permute.xlu0 %940 }
  0xbc   : > { %1060 = vperm.xlu0 %7282, %v384_v14   ;;  %7268 = vset.pattern.permute.xlu1 %v10685_v8  ;;  %v1142_v14 = vmul.f32 %v8226_v61, %v8072_v49  ;;  %v1149_v49 = vmul.f32 %v8224_v59, %v8079_v52  ;;  %v746_v52 = vmul.f32 %v8235_v5, %v8098_v57 }
  0xbd   : > { %1543 = vperm.xlu1 %7268, %v1413_v15   ;;  %v8156_v16 = vpop.permute.xlu0 %948  ;;  %v1145_v15 = vmul.f32 %v8224_v59, %v8074_v50 }
  0xbe   : > { %v8161_v21 = vpop.permute.xlu1 %1473 }
  0xc0   : > { %1068 = vperm.xlu0 %7282, %v386_v18   ;;  %v1146_v18 = vmul.f32 %v8226_v61, %v8074_v50  ;;  %v1147_v50 = vmul.f32 %v8224_v59, %v8107_v60 }
  0xc1   : > { %502 = vperm.xlu1 %7268, %v7954_v17   ;;  %v8164_v22 = vpop.permute.xlu0 %956  ;;  %v390_v17 = vld [vmem:[%s10672_s1 + $0x1b0] sm:$0xff] }
  0xc2   : > { %v8169_v24 = vpop.permute.xlu1 %432 }
  0xc4   : > { %1076 = vperm.xlu0 %7282, %v388_v23   ;;  %v1143_v23 = vmul.f32 %v8224_v59, %v8077_v51 }
  0xc5   : > { %507 = vperm.xlu1 %7268, %v357_v25   ;;  %v8174_v27 = vpop.permute.xlu0 %964 }
  0xc6   : > { %v8179_v28 = vpop.permute.xlu1 %437 }
  0xc8   : > { %1084 = vperm.xlu0 %7282, %v390_v17  }
  0xc9   : > { %7269 = vset.pattern.permute.xlu1 %v10682_v3  ;;  %v8185_v30 = vpop.permute.xlu0 %972 }
  0xca   : > { %952 = vperm.xlu1 %7269, %v357_v25  }
  0xcb   : > { %v8193_v32 = vpop.permute.xlu1 %896 }
  0xcc   : > { %1092 = vperm.xlu0 %7282, %v392_v31  }
  0xcd   : > { %v8200_v36 = vpop.permute.xlu0 %980 }
  0xce   : > { %10694 = vst [vmem:[#allocation7_spill] sm:$0xff] %v8200_v36  ;;  %7270 = vset.pattern.permute.xlu1 %v10685_v8 }
  0xcf   : > { %1553 = vperm.xlu1 %7270, %v1415_v33   ;;  %v1144_v33 = vmul.f32 %v8226_v61, %v8077_v51 }
  0xd0   : > { %1100 = vperm.xlu0 %7282, %v394_v37   ;;  %v8210_v41 = vpop.permute.xlu1 %1483  ;;  %v8266_v37 = vmul.f32 %v8226_v61, %v8091_v55 }
  0xd1   : > { %v8212_v44 = vpop.permute.xlu0 %988 }
  0xd2   : > { %10696 = vst [vmem:[#allocation9_spill] sm:$0xff] %v8212_v44 }
  0xd3   : > { %512 = vperm.xlu1 %7270, %v7964_v19   ;;  %v8232_v19 = vrot.slane %v724_v46, %v8207_v39  ;;  %v1429_v39 = vld [vmem:[%s10673_s2 + $0x100] sm:$0xff] }
  0xd4   : > { %1108 = vperm.xlu0 %7282, %v396_v45   ;;  %v8219_v48 = vpop.permute.xlu1 %442  ;;  %v1148_v45 = vmul.f32 %v8226_v61, %v8107_v60 }
  0xd5   : > { %v745_v51 = vmul.f32 %v8232_v19, %v8098_v57 }
  0xd6   : > { %v403_v2 = vpop.permute.xlu0 %402  ;;  %v1276_v44 = vadd.f32 %v1148_v45, %v746_v52 }
  0xd7   : > { %517 = vperm.xlu1 %7270, %v359_v54   ;;  %v739_v25 = vmul.f32 %v8232_v19, %v403_v2  ;;  %v740_v17 = vmul.f32 %v8235_v5, %v403_v2  ;;  %v1275_v60 = vadd.f32 %v1147_v50, %v745_v51 }
  0xd8   : > { %1116 = vperm.xlu0 %7282, %v398_v63   ;;  %v8237_v7 = vpop.permute.xlu1 %447  ;;  %v747_v63 = vmul.f32 %v8232_v19, %v8126_v4 }
  0xd9   : > { %v1269_v57 = vadd.f32 %v1141_v11, %v739_v25  ;;  %v748_v11 = vmul.f32 %v8235_v5, %v8126_v4  ;;  %v749_v25 = vmul.f32 %v8232_v19, %v8136_v9 }
  0xda   : > { %v408_v31 = vpop.permute.xlu0 %407  ;;  %v1277_v29 = vadd.f32 %v1149_v49, %v747_v63  ;;  %v753_v63 = vmul.f32 %v8232_v19, %v8179_v28 }
  0xdb   : > { %7271 = vset.pattern.permute.xlu1 %v10682_v3  ;;  %v741_v40 = vmul.f32 %v8232_v19, %v408_v31  ;;  %v742_v42 = vmul.f32 %v8235_v5, %v408_v31  ;;  %v1151_v31 = vmul.f32 %v8224_v59, %v8144_v12 }
  0xdc   : > { %7313 = vset.pattern.permute.xlu0 %v10685_v8  ;;  %960 = vperm.xlu1 %7271, %v359_v54   ;;  %v1270_v54 = vadd.f32 %v1142_v14, %v740_v17  ;;  %v1152_v14 = vmul.f32 %v8226_v61, %v8144_v12  ;;  %v750_v17 = vmul.f32 %v8235_v5, %v8136_v9 }
  0xdd   : > { %562 = vperm.xlu0 %7313, %v8084_v53   ;;  %v8280_v55 = vpop.permute.xlu1 %904  ;;  %v1417_v53 = vld [vmem:[%s10673_s2 + $0xa0] sm:$0xff]  ;;  %v1271_v50 = vadd.f32 %v1143_v23, %v741_v40  ;;  %v1272_v51 = vadd.f32 %v1144_v33, %v742_v42  ;;  %v751_v23 = vmul.f32 %v8232_v19, %v8169_v24  ;;  %v752_v40 = vmul.f32 %v8235_v5, %v8169_v24 }
  0xde   : > { %v413_v46 = vpop.permute.xlu0 %412  ;;  %v1782_v12 = vadd.f32 %v8118_v0, %v1270_v54  ;;  %v1280_v33 = vadd.f32 %v1152_v14, %v750_v17  ;;  %v1155_v42 = vmul.f32 %v8224_v59, %v8193_v32 }
  0xdf   : > { %v743_v58 = vmul.f32 %v8232_v19, %v413_v46  ;;  %v744_v2 = vmul.f32 %v8235_v5, %v413_v46 }
  0xe0   : > { %7272 = vset.pattern.permute.xlu1 %v10685_v8  ;;  %v1781_v8 = vadd.f32 %v8118_v0, %v1269_v57  ;;  %v1283_v14 = vadd.f32 %v1155_v42, %v753_v63 }
  0xe1   : > { %577 = vperm.xlu0 %7313, %v8291_v47   ;;  %1563 = vperm.xlu1 %7272, %v1417_v53   ;;  %v1273_v4 = vadd.f32 %v1145_v15, %v743_v58  ;;  %v1274_v46 = vadd.f32 %v1146_v18, %v744_v2  ;;  %v1278_v15 = vadd.f32 %v1150_v34, %v748_v11  ;;  %v1910_v34 = vmax.f32 %v1782_v12, 0.0 }
  0xe2   : > { %v1469_v26 = vpop.permute.xlu0 %1468  ;;  %v8312_v3 = vpop.permute.xlu1 %1493  ;;  %v1279_v18 = vadd.f32 %v1151_v31, %v749_v25  ;;  %v1909_v45 = vmax.f32 %v1781_v8, 0.0  ;;  %v754_v8 = vmul.f32 %v8235_v5, %v8179_v28  ;;  %v1281_v25 = vadd.f32 %v8262_v35, %v751_v23 }
  0xe3   : > { %v1783_v9 = vadd.f32 %v1469_v26, %v1271_v50  ;;  %v1784_v36 = vadd.f32 %v1469_v26, %v1272_v51  ;;  %v361_v26 = vld [vmem:[%s10672_s1 + $0xc8] sm:$0xff]  ;;  %v1786_v53 = vadd.f32 %v8161_v21, %v1274_v46  ;;  %v1785_v24 = vadd.f32 %v8161_v21, %v1273_v4 }
  0xe4   : > { %v1790_v58 = vadd.f32 %v8210_v41, %v1278_v15  ;;  %v756_v12 = vmul.f32 %v8235_v5, %v8219_v48  ;;  %v1793_v42 = vadd.f32 %v8312_v3, %v1281_v25 }
  0xe5   : > { %1623 = vperm.xlu0 %7313, %v1429_v39   ;;  %522 = vperm.xlu1 %7272, %v7970_v20   ;;  %v1912_v0 = vmax.f32 %v1784_v36, 0.0  ;;  %v1911_v49 = vmax.f32 %v1783_v9, 0.0  ;;  %v1156_v39 = vmul.f32 %v8226_v61, %v8193_v32  ;;  %v1789_v20 = vadd.f32 %v8210_v41, %v1277_v29  ;;  %v1432_v41 = vld [vmem:[%s10673_s2 + $0x118] sm:$0xff] }
  0xe6   : > { %v1479_v57 = vpop.permute.xlu0 %1478  ;;  %v8326_v52 = vpop.permute.xlu1 %452  ;;  %v1282_v29 = vadd.f32 %v8266_v37, %v752_v40  ;;  %v1913_v28 = vmax.f32 %v1785_v24, 0.0  ;;  %v755_v37 = vmul.f32 %v8232_v19, %v8219_v48  ;;  %v10697_v40 = vmov 1   ;;  %v1434_v48 = vld [vmem:[%s10673_s2 + $0x128] sm:$0xff] }
  0xe7   : > { %v1787_v36 = vadd.f32 %v1479_v57, %v1275_v60  ;;  %v1788_v54 = vadd.f32 %v1479_v57, %v1276_v44  ;;  %v2166_v2 = vpack.c.bf16 %v1912_v0, %v1910_v34  ;;  %v2165_v11 = vpack.c.bf16 %v1911_v49, %v1909_v45 }
  0xe8   : > { %v1914_v60 = vmax.f32 %v1786_v53, 0.0  ;;  %v1917_v17 = vmax.f32 %v1789_v20, 0.0  ;;  %v1284_v51 = vadd.f32 %v1156_v39, %v754_v8  ;;  %v1794_v9 = vadd.f32 %v8312_v3, %v1282_v29  ;;  %v1419_v3 = vld [vmem:[%s10673_s2 + $0xb0] sm:$0xff] }
  0xe9   : > { %v1915_v21 = vmax.f32 %v1787_v36, 0.0  ;;  %v1916_v31 = vmax.f32 %v1788_v54, 0.0  ;;  %582 = vperm.xlu0 %7313, %v8096_v56   ;;  %527 = vperm.xlu1 %7272, %v361_v26   ;;  %v1918_v56 = vmax.f32 %v1790_v58, 0.0  ;;  %v757_v24 = vmul.f32 %v8232_v19, %v8237_v7 }
  0xea   : > { %3253 = vmatprep.subr.bf16.mxu0 %v2166_v2  ;;  %v1489_v32 = vpop.permute.xlu0 %1488  ;;  %v8344_v44 = vpop.permute.xlu1 %457  ;;  %v1921_v36 = vmax.f32 %v1793_v42, 0.0  ;;  %v10698_v2 = vmov 0   ;;  %v1286_v8 = vadd.f32 %v8284_v43, %v756_v12  ;;  %v1440_v12 = vld [vmem:[%s10673_s2 + $0x158] sm:$0xff]  ;;  %v1161_v42 = vmul.f32 %v8224_v59, %v8112_v62 }
  0xeb   : > { %v1791_v35 = vadd.f32 %v1489_v32, %v1279_v18  ;;  %v1792_v50 = vadd.f32 %v1489_v32, %v1280_v33  ;;  %3254 = vmatpush1.bf16.msra.mxu0 %v2165_v11  ;;  %v2168_v4 = vpack.c.bf16 %v1916_v31, %v1914_v60  ;;  %v2167_v46 = vpack.c.bf16 %v1915_v21, %v1913_v28  ;;  %v1436_v11 = vld [vmem:[%s10673_s2 + $0x138] sm:$0xff]  ;;  %v1438_v28 = vld [vmem:[%s10673_s2 + $0x148] sm:$0xff] }
  0xec   : > { %v1159_v18 = vmul.f32 %v8224_v59, %v8280_v55  ;;  %v1160_v33 = vmul.f32 %v8226_v61, %v8280_v55  ;;  %v758_v55 = vmul.f32 %v8235_v5, %v8237_v7  ;;  %v1285_v7 = vadd.f32 %v8275_v38, %v755_v37  ;;  %v7700_v38 = vld [vmem:[%s10672_s1 + $0xd0] sm:$0xff] }
  0xed   : > { %v1919_v23 = vmax.f32 %v1791_v35, 0.0  ;;  %v1920_v15 = vmax.f32 %v1792_v50, 0.0  ;;  %1638 = vperm.xlu0 %7313, %v1432_v41   ;;  %7273 = vset.pattern.permute.xlu1 %v10697_v40 }
  0xee   : > { %3255 = vmatprep.subr.bf16.mxu0 %v2168_v4  ;;  %v1499_v0 = vpop.permute.xlu0 %1498  ;;  %968 = vperm.xlu1 %7273, %v361_v26   ;;  %v1922_v26 = vmax.f32 %v1794_v9, 0.0  ;;  %v1287_v63 = vadd.f32 %v1159_v18, %v757_v24  ;;  %v1288_v58 = vadd.f32 %v1160_v33, %v758_v55  ;;  %v1444_v24 = vld [vmem:[%s10673_s2 + $0x178] sm:$0xff] }
  0xef   : > { %v1795_v49 = vadd.f32 %v1499_v0, %v1283_v14  ;;  %v1796_v57 = vadd.f32 %v1499_v0, %v1284_v51  ;;  %3256 = vmatpush1.bf16.msra.mxu0 %v2167_v46  ;;  %v913_v34 = vpop.permute.xlu1 %912  ;;  %v2170_v45 = vpack.c.bf16 %v1920_v15, %v1918_v56  ;;  %v2169_v53 = vpack.c.bf16 %v1919_v23, %v1917_v17  ;;  %v363_v56 = vld [vmem:[%s10672_s1 + $0xd8] sm:$0xff]  ;;  %v1442_v15 = vld [vmem:[%s10673_s2 + $0x168] sm:$0xff] }
  0xf0   : > { %v1163_v18 = vmul.f32 %v8224_v59, %v913_v34  ;;  %v1164_v33 = vmul.f32 %v8226_v61, %v913_v34  ;;  %v759_v0 = vmul.f32 %v8232_v19, %v8326_v52  ;;  %v762_v34 = vmul.f32 %v8235_v5, %v8344_v44 }
  0xf1   : > { %v1923_v39 = vmax.f32 %v1795_v49, 0.0  ;;  %v1924_v20 = vmax.f32 %v1796_v57, 0.0  ;;  %1648 = vperm.xlu0 %7313, %v1434_v48   ;;  %3257 = vmatprep.subr.bf16.mxu0 %v2170_v45  ;;  %v1162_v48 = vmul.f32 %v8226_v61, %v8112_v62  ;;  %v760_v49 = vmul.f32 %v8235_v5, %v8326_v52  ;;  %v1421_v62 = vld [vmem:[%s10673_s2 + $0xc0] sm:$0xff] }
  0xf2   : > { %v1509_v54 = vpop.permute.xlu0 %1508  ;;  %7274 = vset.pattern.permute.xlu1 %v10698_v2  ;;  %v761_v57 = vmul.f32 %v8232_v19, %v8344_v44  ;;  %v1292_v52 = vadd.f32 %v1164_v33, %v762_v34 }
  0xf3   : > { %3258 = vmatpush1.bf16.msra.mxu0 %v2169_v53  ;;  %1573 = vperm.xlu1 %7274, %v1419_v3   ;;  %v2172_v25 = vpack.c.bf16 %v1924_v20, %v1922_v26  ;;  %v1799_v21 = vadd.f32 %v1509_v54, %v1287_v63  ;;  %v1800_v31 = vadd.f32 %v1509_v54, %v1288_v58  ;;  %v1446_v54 = vld [vmem:[%s10673_s2 + $0x188] sm:$0xff] }
  0xf4   : > { %v1504_v29 = vpop.permute.xlu1 %1503  ;;  %v2171_v32 = vpack.c.bf16 %v1923_v39, %v1921_v36  ;;  %v1291_v55 = vadd.f32 %v1163_v18, %v761_v57  ;;  %v1289_v3 = vadd.f32 %v1161_v42, %v759_v0  ;;  %v1290_v44 = vadd.f32 %v1162_v48, %v760_v49  ;;  %v1454_v49 = vld [vmem:[%s10673_s2 + $0x1c8] sm:$0xff] }
  0xf5   : > { %v1797_v41 = vadd.f32 %v1504_v29, %v1285_v7  ;;  %v1798_v60 = vadd.f32 %v1504_v29, %v1286_v8  ;;  %1658 = vperm.xlu0 %7313, %v1436_v11   ;;  %3259 = vmatprep.subr.bf16.mxu0 %v2172_v25  ;;  %v1927_v43 = vmax.f32 %v1799_v21, 0.0  ;;  %v1928_v50 = vmax.f32 %v1800_v31, 0.0  ;;  %v7701_v21 = vld [vmem:[%s10672_s1 + $0xe0] sm:$0xff] }
  0xf6   : > { %v1519_v14 = vpop.permute.xlu0 %1518 }
  0xf7   : > { %v1925_v17 = vmax.f32 %v1797_v41, 0.0  ;;  %v1926_v35 = vmax.f32 %v1798_v60, 0.0  ;;  %3260 = vmatpush1.bf16.msra.mxu0 %v2171_v32  ;;  %532 = vperm.xlu1 %7274, %v7700_v38   ;;  %v1803_v26 = vadd.f32 %v1519_v14, %v1291_v55  ;;  %v1804_v39 = vadd.f32 %v1519_v14, %v1292_v52  ;;  %v1448_v32 = vld [vmem:[%s10673_s2 + $0x198] sm:$0xff]  ;;  %v365_v41 = vld [vmem:[%s10672_s1 + $0xe8] sm:$0xff] }
  0xf8   : > { %v8382_v51 = vpop.permute.xlu1 %462 }
  0xf9   : > { %1668 = vperm.xlu0 %7313, %v1438_v28   ;;  %v2174_v37 = vpack.c.bf16 %v1928_v50, %v1926_v35  ;;  %v2173_v46 = vpack.c.bf16 %v1927_v43, %v1925_v17  ;;  %v1931_v11 = vmax.f32 %v1803_v26, 0.0  ;;  %v1932_v7 = vmax.f32 %v1804_v39, 0.0  ;;  %v1450_v35 = vld [vmem:[%s10673_s2 + $0x1a8] sm:$0xff] }
  0xfa   : > { %v8387_v4 = vpop.permute.xlu0 %1528  ;;  %v763_v18 = vmul.f32 %v8232_v19, %v8382_v51 }
  0xfb   : > { %537 = vperm.xlu1 %7274, %v363_v56   ;;  %3261 = vmatprep.subr.bf16.mxu0 %v2174_v37  ;;  %v1165_v37 = vmul.f32 %v8224_v59, %v8120_v1 }
  0xfc   : > { %v468_v9 = vpop.permute.xlu1 %467  ;;  %3262 = vmatpush1.bf16.msra.mxu0 %v2173_v46  ;;  %v1166_v46 = vmul.f32 %v8226_v61, %v8120_v1  ;;  %v1423_v1 = vld [vmem:[%s10673_s2 + $0xd0] sm:$0xff] }
  0xfd   : > { %1678 = vperm.xlu0 %7313, %v1440_v12   ;;  %v765_v50 = vmul.f32 %v8232_v19, %v468_v9  ;;  %v1293_v57 = vadd.f32 %v1165_v37, %v763_v18  ;;  %v1425_v18 = vld [vmem:[%s10673_s2 + $0xe0] sm:$0xff] }
  0xfe   : > { %v8392_v23 = vpop.permute.xlu0 %1538 }
  0xff   : > { %7275 = vset.pattern.permute.xlu1 %v10697_v40 }
 0x100   : > { %976 = vperm.xlu1 %7275, %v363_v56   ;;  %v766_v56 = vmul.f32 %v8235_v5, %v468_v9  ;;  %v764_v9 = vmul.f32 %v8235_v5, %v8382_v51 }
 0x101   : > { %1688 = vperm.xlu0 %7313, %v1442_v15   ;;  %v921_v45 = vpop.permute.xlu1 %920  ;;  %v1452_v15 = vld [vmem:[%s10673_s2 + $0x1b8] sm:$0xff] }
 0x102   : > { %v8412_v53 = vpop.permute.xlu0 %1548  ;;  %v1167_v38 = vmul.f32 %v8224_v59, %v921_v45  ;;  %v1168_v43 = vmul.f32 %v8226_v61, %v921_v45  ;;  %v1294_v34 = vadd.f32 %v1166_v46, %v764_v9 }
 0x104   : > { %7276 = vset.pattern.permute.xlu1 %v10698_v2  ;;  %v1295_v33 = vadd.f32 %v1167_v38, %v765_v50  ;;  %v1296_v42 = vadd.f32 %v1168_v43, %v766_v56  ;;  %v1169_v38 = vmul.f32 %v8224_v59, %v8131_v6  ;;  %v1170_v50 = vmul.f32 %v8226_v61, %v8131_v6 }
 0x105   : > { %1698 = vperm.xlu0 %7313, %v1444_v24   ;;  %1583 = vperm.xlu1 %7276, %v1421_v62  }
 0x106   : > { %v1514_v20 = vpop.permute.xlu1 %1513  ;;  %v8421_v36 = vpop.permute.xlu0 %1558  ;;  %v1808_v51 = vadd.f32 %v8387_v4, %v1296_v42  ;;  %v1807_v45 = vadd.f32 %v8387_v4, %v1295_v33 }
 0x107   : > { %v1801_v63 = vadd.f32 %v1514_v20, %v1289_v3  ;;  %v1802_v58 = vadd.f32 %v1514_v20, %v1290_v44  ;;  %v1456_v3 = vld [vmem:[%s10673_s2 + $0x1d8] sm:$0xff]  ;;  %v7702_v44 = vld [vmem:[%s10672_s1 + $0xf0] sm:$0xff] }
 0x108   : > { %v1936_v20 = vmax.f32 %v1808_v51, 0.0 }
 0x109   : > { %v1929_v8 = vmax.f32 %v1801_v63, 0.0  ;;  %v1930_v25 = vmax.f32 %v1802_v58, 0.0  ;;  %1708 = vperm.xlu0 %7313, %v1446_v54   ;;  %542 = vperm.xlu1 %7276, %v7701_v21   ;;  %v1935_v54 = vmax.f32 %v1807_v45, 0.0  ;;  %v367_v63 = vld [vmem:[%s10672_s1 + $0xf8] sm:$0xff] }
 0x10a   : > { %v8429_v31 = vpop.permute.xlu1 %472  ;;  %v8431_v29 = vpop.permute.xlu0 %1568 }
 0x10b   : > { %v2176_v60 = vpack.c.bf16 %v1932_v7, %v1930_v25  ;;  %v2175_v14 = vpack.c.bf16 %v1931_v11, %v1929_v8  ;;  %v1458_v7 = vld [vmem:[%s10673_s2 + $0x1e8] sm:$0xff]  ;;  %v767_v43 = vmul.f32 %v8232_v19, %v8429_v31  ;;  %v768_v56 = vmul.f32 %v8235_v5, %v8429_v31 }
 0x10d   : > { %1718 = vperm.xlu0 %7313, %v1448_v32   ;;  %547 = vperm.xlu1 %7276, %v365_v41   ;;  %v1297_v6 = vadd.f32 %v1169_v38, %v767_v43  ;;  %v1298_v31 = vadd.f32 %v1170_v50, %v768_v56  ;;  %v2239_v38 = vld [vmem:[%s10675_s4 + $0x50] sm:$0xff] }
 0x10e   : > { %3263 = vmatprep.subr.bf16.mxu0 %v2176_v60  ;;  %v478_v28 = vpop.permute.xlu1 %477  ;;  %v8439_v17 = vpop.permute.xlu0 %1578 }
 0x10f   : > { %3264 = vmatpush1.bf16.msra.mxu0 %v2175_v14  ;;  %v769_v60 = vmul.f32 %v8232_v19, %v478_v28  ;;  %v770_v14 = vmul.f32 %v8235_v5, %v478_v28 }
 0x111   : > { %1728 = vperm.xlu0 %7313, %v1450_v35   ;;  %7277 = vset.pattern.permute.xlu1 %v10697_v40 }
 0x112   : > { %984 = vperm.xlu1 %7277, %v365_v41   ;;  %v8453_v12 = vpop.permute.xlu0 %1588  ;;  %v2229_v41 = vld [vmem:[%s10675_s4] sm:$0xff] }
 0x113   : > { %v929_v0 = vpop.permute.xlu1 %928 }
 0x114   : > { %v1171_v21 = vmul.f32 %v8224_v59, %v929_v0  ;;  %v1172_v32 = vmul.f32 %v8226_v61, %v929_v0 }
 0x115   : > { %1738 = vperm.xlu0 %7313, %v1452_v15   ;;  %v2231_v15 = vld [vmem:[%s10675_s4 + $0x10] sm:$0xff] }
 0x116   : > { %7278 = vset.pattern.permute.xlu1 %v10698_v2  ;;  %v8466_v48 = vpop.permute.xlu0 %1598  ;;  %v1299_v37 = vadd.f32 %v1171_v21, %v769_v60  ;;  %v1300_v46 = vadd.f32 %v1172_v32, %v770_v14  ;;  %v1173_v60 = vmul.f32 %v8224_v59, %v8138_v10  ;;  %v1174_v14 = vmul.f32 %v8226_v61, %v8138_v10  ;;  %v2241_v10 = vld [vmem:[%s10675_s4 + $0x60] sm:$0xff] }
 0x117   : > { %1593 = vperm.xlu1 %7278, %v1423_v1   ;;  %v2233_v1 = vld [vmem:[%s10675_s4 + $0x20] sm:$0xff] }
 0x118   : > { %v1524_v24 = vpop.permute.xlu1 %1523  ;;  %v1812_v33 = vadd.f32 %v8392_v23, %v1300_v46  ;;  %v1811_v42 = vadd.f32 %v8392_v23, %v1299_v37 }
 0x119   : > { %v1805_v62 = vadd.f32 %v1524_v24, %v1293_v57  ;;  %v1806_v55 = vadd.f32 %v1524_v24, %v1294_v34  ;;  %1748 = vperm.xlu0 %7313, %v1454_v49   ;;  %v1427_v49 = vld [vmem:[%s10673_s2 + $0xf0] sm:$0xff] }
 0x11a   : > { %v8473_v52 = vpop.permute.xlu0 %1608 }
 0x11b   : > { %v1933_v26 = vmax.f32 %v1805_v62, 0.0  ;;  %v1934_v39 = vmax.f32 %v1806_v55, 0.0  ;;  %552 = vperm.xlu1 %7278, %v7702_v44   ;;  %v1940_v62 = vmax.f32 %v1812_v33, 0.0  ;;  %v1939_v55 = vmax.f32 %v1811_v42, 0.0  ;;  %v370_v33 = vld [vmem:[%s10672_s1 + $0x110] sm:$0xff] }
 0x11c   : > { %v8481_v4 = vpop.permute.xlu1 %482 }
 0x11d   : > { %1758 = vperm.xlu0 %7313, %v1456_v3   ;;  %v2178_v58 = vpack.c.bf16 %v1936_v20, %v1934_v39  ;;  %v2177_v11 = vpack.c.bf16 %v1935_v54, %v1933_v26  ;;  %v2235_v3 = vld [vmem:[%s10675_s4 + $0x30] sm:$0xff]  ;;  %v1428_v26 = vld [vmem:[%s10673_s2 + $0xf8] sm:$0xff]  ;;  %v771_v43 = vmul.f32 %v8232_v19, %v8481_v4  ;;  %v772_v50 = vmul.f32 %v8235_v5, %v8481_v4 }
 0x11f   : > { %557 = vperm.xlu1 %7278, %v367_v63   ;;  %3265 = vmatprep.subr.bf16.mxu0 %v2178_v58  ;;  %v8489_v8 = vpop.permute.xlu0 %996  ;;  %v369_v58 = vld [vmem:[%s10672_s1 + $0x108] sm:$0xff] }
 0x120   : > { %v488_v25 = vpop.permute.xlu1 %487  ;;  %3266 = vmatpush1.bf16.msra.mxu0 %v2177_v11 }
 0x121   : > { %1768 = vperm.xlu0 %7313, %v1458_v7   ;;  %v773_v32 = vmul.f32 %v8232_v19, %v488_v25 }
 0x123   : > { %7280 = vset.pattern.permute.xlu1 %v10697_v40  ;;  %v8499_v35 = vpop.permute.xlu0 %1012 }
 0x124   : > { %992 = vperm.xlu1 %7280, %v367_v63   ;;  %v2237_v63 = vld [vmem:[%s10675_s4 + $0x40] sm:$0xff] }
 0x125   : > { %2295 = vperm.xlu0 %7313, %v2229_v41   ;;  %v937_v28 = vpop.permute.xlu1 %936  ;;  %v774_v41 = vmul.f32 %v8235_v5, %v488_v25 }
 0x126   : > { %v1175_v11 = vmul.f32 %v8224_v59, %v937_v28  ;;  %v1176_v7 = vmul.f32 %v8226_v61, %v937_v28 }
 0x127   : > { %v8515_v9 = vpop.permute.xlu0 %1020 }
 0x128   : > { %7281 = vset.pattern.permute.xlu1 %v10698_v2  ;;  %v1303_v56 = vadd.f32 %v1175_v11, %v773_v32  ;;  %v1304_v25 = vadd.f32 %v1176_v7, %v774_v41  ;;  %v1177_v41 = vmul.f32 %v8224_v59, %v8146_v13 }
 0x129   : > { %2305 = vperm.xlu0 %7313, %v2231_v15   ;;  %1603 = vperm.xlu1 %7281, %v1425_v18   ;;  %v1301_v15 = vadd.f32 %v1173_v60, %v771_v43  ;;  %v1302_v18 = vadd.f32 %v1174_v14, %v772_v50  ;;  %v1178_v14 = vmul.f32 %v8226_v61, %v8146_v13 }
 0x12a   : > { %v1534_v0 = vpop.permute.xlu1 %1533  ;;  %v1815_v4 = vadd.f32 %v8412_v53, %v1303_v56  ;;  %v2249_v56 = vld [vmem:[%s10675_s4 + $0xa0] sm:$0xff] }
 0x12b   : > { %v1809_v57 = vadd.f32 %v1534_v0, %v1297_v6  ;;  %v1810_v34 = vadd.f32 %v1534_v0, %v1298_v31  ;;  %v8526_v51 = vpop.permute.xlu0 %1028  ;;  %v1816_v6 = vadd.f32 %v8412_v53, %v1304_v25  ;;  %v1430_v25 = vld [vmem:[%s10673_s2 + $0x108] sm:$0xff] }
 0x12d   : > { %v1937_v45 = vmax.f32 %v1809_v57, 0.0  ;;  %v1938_v24 = vmax.f32 %v1810_v34, 0.0  ;;  %2315 = vperm.xlu0 %7313, %v2233_v1   ;;  %1613 = vperm.xlu1 %7281, %v1427_v49   ;;  %v2243_v1 = vld [vmem:[%s10675_s4 + $0x70] sm:$0xff]  ;;  %v1944_v53 = vmax.f32 %v1816_v6, 0.0  ;;  %v373_v6 = vld [vmem:[%s10672_s1 + $0x128] sm:$0xff] }
 0x12e   : > { %v8528_v23 = vpop.permute.xlu1 %492 }
 0x12f   : > { %v8536_v39 = vpop.permute.xlu0 %1036  ;;  %v2180_v44 = vpack.c.bf16 %v1940_v62, %v1938_v24  ;;  %v2179_v20 = vpack.c.bf16 %v1939_v55, %v1937_v45  ;;  %v1943_v45 = vmax.f32 %v1815_v4, 0.0  ;;  %v775_v60 = vmul.f32 %v8232_v19, %v8528_v23 }
 0x131   : > { %2325 = vperm.xlu0 %7313, %v2235_v3   ;;  %1618 = vperm.xlu1 %7281, %v1428_v26   ;;  %v2245_v3 = vld [vmem:[%s10675_s4 + $0x80] sm:$0xff]  ;;  %v1305_v13 = vadd.f32 %v1177_v41, %v775_v60 }
 0x132   : > { %3267 = vmatprep.subr.bf16.mxu0 %v2180_v44  ;;  %v498_v54 = vpop.permute.xlu1 %497 }
 0x133   : > { %3268 = vmatpush1.bf16.msra.mxu0 %v2179_v20  ;;  %v8546_v21 = vpop.permute.xlu0 %1044  ;;  %v777_v11 = vmul.f32 %v8232_v19, %v498_v54  ;;  %v778_v7 = vmul.f32 %v8235_v5, %v498_v54 }
 0x135   : > { %2335 = vperm.xlu0 %7313, %v2237_v63   ;;  %567 = vperm.xlu1 %7281, %v369_v58  }
 0x137   : > { %v945_v37 = vpop.permute.xlu1 %944  ;;  %v8561_v46 = vpop.permute.xlu0 %1052 }
 0x138   : > { %v1179_v20 = vmul.f32 %v8224_v59, %v945_v37  ;;  %v1180_v63 = vmul.f32 %v8226_v61, %v945_v37 }
 0x139   : > { %2345 = vperm.xlu0 %7313, %v2239_v38   ;;  %7283 = vset.pattern.permute.xlu1 %v10697_v40  ;;  %v776_v38 = vmul.f32 %v8235_v5, %v8528_v23 }
 0x13a   : > { %1000 = vperm.xlu1 %7283, %v369_v58   ;;  %v2247_v58 = vld [vmem:[%s10675_s4 + $0x90] sm:$0xff]  ;;  %v1307_v43 = vadd.f32 %v1179_v20, %v777_v11  ;;  %v1308_v50 = vadd.f32 %v1180_v63, %v778_v7 }
 0x13b   : > { %v8567_v28 = vpop.permute.xlu0 %1060  ;;  %v2255_v20 = vld [vmem:[%s10675_s4 + $0xd0] sm:$0xff] }
 0x13c   : > { %v1544_v31 = vpop.permute.xlu1 %1543  ;;  %v1820_v23 = vadd.f32 %v8421_v36, %v1308_v50  ;;  %v1431_v11 = vld [vmem:[%s10673_s2 + $0x110] sm:$0xff] }
 0x13d   : > { %v1813_v42 = vadd.f32 %v1544_v31, %v1301_v15  ;;  %v1814_v0 = vadd.f32 %v1544_v31, %v1302_v18  ;;  %2355 = vperm.xlu0 %7313, %v2241_v10   ;;  %v1819_v10 = vadd.f32 %v8421_v36, %v1307_v43  ;;  %v2251_v18 = vld [vmem:[%s10675_s4 + $0xb0] sm:$0xff]  ;;  %v1182_v43 = vmul.f32 %v8226_v61, %v8156_v16 }
 0x13e   : > { %7284 = vset.pattern.permute.xlu1 %v10698_v2 }
 0x13f   : > { %v1941_v49 = vmax.f32 %v1813_v42, 0.0  ;;  %v1942_v57 = vmax.f32 %v1814_v0, 0.0  ;;  %572 = vperm.xlu1 %7284, %v370_v33   ;;  %v8578_v34 = vpop.permute.xlu0 %1068 }
 0x140   : > { %v8580_v24 = vpop.permute.xlu1 %502 }
 0x141   : > { %2365 = vperm.xlu0 %7313, %v2243_v1   ;;  %v2182_v62 = vpack.c.bf16 %v1944_v53, %v1942_v57  ;;  %v2181_v55 = vpack.c.bf16 %v1943_v45, %v1941_v49  ;;  %v1948_v1 = vmax.f32 %v1820_v23, 0.0  ;;  %v1947_v49 = vmax.f32 %v1819_v10, 0.0  ;;  %v2253_v57 = vld [vmem:[%s10675_s4 + $0xc0] sm:$0xff] }
 0x142   : > { %v7318_v53 = vld [vmem:[%s10674_s3 + $0x4] ss:$16 sps:$4 sm:$0xff]   ;;  %v779_v50 = vmul.f32 %v8232_v19, %v8580_v24 }
 0x143   : > { %7285 = vset.pattern.permute.xlu1 %v10697_v40  ;;  %3269 = vmatprep.subr.bf16.mxu0 %v2182_v62  ;;  %v8586_v26 = vpop.permute.xlu0 %1076 }
 0x144   : > { %1004 = vperm.xlu1 %7285, %v370_v33   ;;  %v508_v44 = vpop.permute.xlu1 %507  ;;  %3270 = vmatpush1.bf16.msra.mxu0 %v2181_v55 }
 0x145   : > { %2375 = vperm.xlu0 %7313, %v2245_v3   ;;  %3285 = vmatprep.mubr.bf16.mxu0 %v7318_v53  ;;  %v781_v7 = vmul.f32 %v8232_v19, %v508_v44  ;;  %v782_v41 = vmul.f32 %v8235_v5, %v508_v44  ;;  %v780_v44 = vmul.f32 %v8235_v5, %v8580_v24  ;;  %v375_v24 = vld [vmem:[%s10672_s1 + $0x138] sm:$0xff] }
 0x147   : > { %v8595_v32 = vpop.permute.xlu0 %1084  ;;  %v1310_v23 = vadd.f32 %v1182_v43, %v780_v44 }
 0x148   : > { %1008 = vperm.xlu1 %7285, %v8291_v47   ;;  %v1306_v47 = vadd.f32 %v1178_v14, %v776_v38  ;;  %v2257_v14 = vld [vmem:[%s10675_s4 + $0xe0] sm:$0xff]  ;;  %v1181_v38 = vmul.f32 %v8224_v59, %v8156_v16 }
 0x149   : > { %2385 = vperm.xlu0 %7313, %v2247_v58   ;;  %v953_v54 = vpop.permute.xlu1 %952 }
 0x14a   : > { %v1183_v63 = vmul.f32 %v8224_v59, %v953_v54  ;;  %v1184_v58 = vmul.f32 %v8226_v61, %v953_v54  ;;  %v1309_v16 = vadd.f32 %v1181_v38, %v779_v50  ;;  %v2265_v38 = vld [vmem:[%s10675_s4 + $0x120] sm:$0xff] }
 0x14b   : > { %v8612_v37 = vpop.permute.xlu0 %1092 }
 0x14c   : > { %7286 = vset.pattern.permute.xlu1 %v10698_v2 }
 0x14d   : > { %2395 = vperm.xlu0 %7313, %v2249_v56   ;;  %1628 = vperm.xlu1 %7286, %v1430_v25   ;;  %v1311_v56 = vadd.f32 %v1183_v63, %v781_v7  ;;  %v1312_v25 = vadd.f32 %v1184_v58, %v782_v41  ;;  %v1433_v7 = vld [vmem:[%s10673_s2 + $0x120] sm:$0xff] }
 0x14e   : > { %v1554_v15 = vpop.permute.xlu1 %1553 }
 0x14f   : > { %v1817_v4 = vadd.f32 %v1554_v15, %v1305_v13  ;;  %v1818_v31 = vadd.f32 %v1554_v15, %v1306_v47  ;;  %v8623_v33 = vpop.permute.xlu0 %1100  ;;  %v2259_v13 = vld [vmem:[%s10675_s4 + $0xf0] sm:$0xff] }
 0x150   : > { %v7703_v47 = vld [vmem:[%s10672_s1 + $0x130] sm:$0xff] }
 0x151   : > { %v1945_v42 = vmax.f32 %v1817_v4, 0.0  ;;  %v1946_v0 = vmax.f32 %v1818_v31, 0.0  ;;  %2405 = vperm.xlu0 %7313, %v2251_v18   ;;  %587 = vperm.xlu1 %7286, %v373_v6   ;;  %v1824_v18 = vadd.f32 %v8431_v29, %v1312_v25 }
 0x152   : > { %v8625_v36 = vpop.permute.xlu1 %512 }
 0x153   : > { %v2184_v45 = vpack.c.bf16 %v1948_v1, %v1946_v0  ;;  %v2183_v62 = vpack.c.bf16 %v1947_v49, %v1945_v42  ;;  %v8633_v55 = vpop.permute.xlu0 %1108  ;;  %v2261_v42 = vld [vmem:[%s10675_s4 + $0x100] sm:$0xff]  ;;  %v783_v50 = vmul.f32 %v8232_v19, %v8625_v36  ;;  %v784_v44 = vmul.f32 %v8235_v5, %v8625_v36 }
 0x155   : > { %2415 = vperm.xlu0 %7313, %v2253_v57   ;;  %7287 = vset.pattern.permute.xlu1 %v10697_v40  ;;  %v1952_v57 = vmax.f32 %v1824_v18, 0.0 }
 0x156   : > { %3271 = vmatprep.subr.bf16.mxu0 %v2184_v45  ;;  %1016 = vperm.xlu1 %7287, %v373_v6   ;;  %v518_v3 = vpop.permute.xlu1 %517  ;;  %v1823_v6 = vadd.f32 %v8431_v29, %v1311_v56  ;;  %v2263_v29 = vld [vmem:[%s10675_s4 + $0x110] sm:$0xff] }
 0x157   : > { %3272 = vmatpush1.bf16.msra.mxu0 %v2183_v62  ;;  %v8646_v60 = vpop.permute.xlu0 %1116  ;;  %v785_v41 = vmul.f32 %v8232_v19, %v518_v3 }
 0x158   : > { %v1951_v53 = vmax.f32 %v1823_v6, 0.0 }
 0x159   : > { %2425 = vperm.xlu0 %7313, %v2255_v20  }
 0x15a   : > { %7288 = vset.pattern.permute.xlu1 %v10698_v2 }
 0x15b   : > { %1633 = vperm.xlu1 %7288, %v1431_v11   ;;  %v961_v54 = vpop.permute.xlu1 %960 }
 0x15c   : > { %v8666_v10 = vpop.permute.xlu0 %562  ;;  %v1187_v58 = vmul.f32 %v8224_v59, %v961_v54  ;;  %v1188_v11 = vmul.f32 %v8226_v61, %v961_v54 }
 0x15d   : > { %2435 = vperm.xlu0 %7313, %v2257_v14   ;;  %v786_v14 = vmul.f32 %v8235_v5, %v518_v3  ;;  %v1185_v3 = vmul.f32 %v8224_v59, %v8164_v22 }
 0x15e   : > { %v1315_v54 = vadd.f32 %v1187_v58, %v785_v41 }
 0x15f   : > { %592 = vperm.xlu1 %7288, %v7703_v47   ;;  %v1316_v56 = vadd.f32 %v1188_v11, %v786_v14  ;;  %v2267_v47 = vld [vmem:[%s10675_s4 + $0x130] sm:$0xff]  ;;  %v1313_v36 = vadd.f32 %v1185_v3, %v783_v50  ;;  %v2273_v14 = vld [vmem:[%s10675_s4 + $0x160] sm:$0xff] }
 0x160   : > { %v1564_v15 = vpop.permute.xlu1 %1563  ;;  %v8678_v45 = vpop.permute.xlu0 %577 }
 0x161   : > { %v1821_v4 = vadd.f32 %v1564_v15, %v1309_v16  ;;  %v1822_v31 = vadd.f32 %v1564_v15, %v1310_v23  ;;  %2445 = vperm.xlu0 %7313, %v2259_v13   ;;  %v1186_v13 = vmul.f32 %v8226_v61, %v8164_v22  ;;  %v7704_v16 = vld [vmem:[%s10672_s1 + $0x140] sm:$0xff]  ;;  %v1828_v15 = vadd.f32 %v8439_v17, %v1316_v56  ;;  %v377_v22 = vld [vmem:[%s10672_s1 + $0x148] sm:$0xff] }
 0x163   : > { %v1949_v0 = vmax.f32 %v1821_v4, 0.0  ;;  %v1950_v1 = vmax.f32 %v1822_v31, 0.0  ;;  %597 = vperm.xlu1 %7288, %v375_v24   ;;  %v1314_v23 = vadd.f32 %v1186_v13, %v784_v44 }
 0x164   : > { %v8676_v49 = vpop.permute.xlu1 %522  ;;  %v8694_v43 = vpop.permute.xlu0 %1623 }
 0x165   : > { %2455 = vperm.xlu0 %7313, %v2261_v42   ;;  %v2186_v62 = vpack.c.bf16 %v1952_v57, %v1950_v1  ;;  %v2185_v20 = vpack.c.bf16 %v1951_v53, %v1949_v0  ;;  %v2269_v42 = vld [vmem:[%s10675_s4 + $0x140] sm:$0xff]  ;;  %v1956_v57 = vmax.f32 %v1828_v15, 0.0  ;;  %v787_v56 = vmul.f32 %v8232_v19, %v8676_v49 }
 0x167   : > { %7289 = vset.pattern.permute.xlu1 %v10697_v40  ;;  %3273 = vmatprep.subr.bf16.mxu0 %v2186_v62  ;;  %v2271_v62 = vld [vmem:[%s10675_s4 + $0x150] sm:$0xff] }
 0x168   : > { %1024 = vperm.xlu1 %7289, %v375_v24   ;;  %v528_v63 = vpop.permute.xlu1 %527  ;;  %3274 = vmatpush1.bf16.msra.mxu0 %v2185_v20  ;;  %v1827_v24 = vadd.f32 %v8439_v17, %v1315_v54  ;;  %v8713_v18 = vpop.permute.xlu0 %582 }
 0x169   : > { %2465 = vperm.xlu0 %7313, %v2263_v29   ;;  %v789_v50 = vmul.f32 %v8232_v19, %v528_v63  ;;  %v790_v44 = vmul.f32 %v8235_v5, %v528_v63  ;;  %v1189_v63 = vmul.f32 %v8224_v59, %v8174_v27 }
 0x16a   : > { %v1955_v53 = vmax.f32 %v1827_v24, 0.0  ;;  %v2277_v24 = vld [vmem:[%s10675_s4 + $0x180] sm:$0xff] }
 0x16c   : > { %7290 = vset.pattern.permute.xlu1 %v10698_v2  ;;  %v8726_v58 = vpop.permute.xlu0 %1638 }
 0x16d   : > { %1643 = vperm.xlu1 %7290, %v1433_v7   ;;  %v969_v25 = vpop.permute.xlu1 %968  ;;  %2475 = vperm.xlu0 %7313, %v2265_v38   ;;  %v1435_v38 = vld [vmem:[%s10673_s2 + $0x130] sm:$0xff] }
 0x16e   : > { %v1191_v7 = vmul.f32 %v8224_v59, %v969_v25  ;;  %v1192_v41 = vmul.f32 %v8226_v61, %v969_v25  ;;  %v788_v25 = vmul.f32 %v8235_v5, %v8676_v49  ;;  %v1317_v49 = vadd.f32 %v1189_v63, %v787_v56  ;;  %v1437_v56 = vld [vmem:[%s10673_s2 + $0x140] sm:$0xff] }
 0x170   : > { %v8739_v54 = vpop.permute.xlu0 %1648  ;;  %v1319_v3 = vadd.f32 %v1191_v7, %v789_v50  ;;  %v1320_v13 = vadd.f32 %v1192_v41, %v790_v44 }
 0x171   : > { %602 = vperm.xlu1 %7290, %v7704_v16   ;;  %2485 = vperm.xlu0 %7313, %v2267_v47   ;;  %v2275_v16 = vld [vmem:[%s10675_s4 + $0x170] sm:$0xff] }
 0x172   : > { %v1574_v6 = vpop.permute.xlu1 %1573 }
 0x173   : > { %v1825_v4 = vadd.f32 %v1574_v6, %v1313_v36  ;;  %v1826_v31 = vadd.f32 %v1574_v6, %v1314_v23  ;;  %v1190_v36 = vmul.f32 %v8226_v61, %v8174_v27  ;;  %v7705_v23 = vld [vmem:[%s10672_s1 + $0x150] sm:$0xff]  ;;  %v1832_v6 = vadd.f32 %v8453_v12, %v1320_v13  ;;  %v379_v27 = vld [vmem:[%s10672_s1 + $0x158] sm:$0xff] }
 0x174   : > { %v2283_v13 = vld [vmem:[%s10675_s4 + $0x1b0] sm:$0xff] }
 0x175   : > { %v1953_v0 = vmax.f32 %v1825_v4, 0.0  ;;  %v1954_v1 = vmax.f32 %v1826_v31, 0.0  ;;  %607 = vperm.xlu1 %7290, %v377_v22   ;;  %2495 = vperm.xlu0 %7313, %v2269_v42   ;;  %v1318_v15 = vadd.f32 %v1190_v36, %v788_v25  ;;  %v8761_v4 = vpop.permute.xlu0 %1658 }
 0x176   : > { %v8721_v17 = vpop.permute.xlu1 %532 }
 0x177   : > { %v2188_v20 = vpack.c.bf16 %v1956_v57, %v1954_v1  ;;  %v2187_v29 = vpack.c.bf16 %v1955_v53, %v1953_v0  ;;  %v2279_v53 = vld [vmem:[%s10675_s4 + $0x190] sm:$0xff]  ;;  %v792_v63 = vmul.f32 %v8235_v5, %v8721_v17 }
 0x179   : > { %7291 = vset.pattern.permute.xlu1 %v10697_v40  ;;  %3275 = vmatprep.subr.bf16.mxu0 %v2188_v20  ;;  %v8771_v41 = vpop.permute.xlu0 %1668 }
 0x17a   : > { %2505 = vperm.xlu0 %7313, %v2271_v62   ;;  %1032 = vperm.xlu1 %7291, %v377_v22   ;;  %v538_v11 = vpop.permute.xlu1 %537  ;;  %v1831_v22 = vadd.f32 %v8453_v12, %v1319_v3  ;;  %v1960_v62 = vmax.f32 %v1832_v6, 0.0  ;;  %v7706_v6 = vld [vmem:[%s10672_s1 + $0x160] sm:$0xff] }
 0x17b   : > { %3276 = vmatpush1.bf16.msra.mxu0 %v2187_v29  ;;  %v793_v25 = vmul.f32 %v8232_v19, %v538_v11  ;;  %v794_v3 = vmul.f32 %v8235_v5, %v538_v11  ;;  %v1193_v11 = vmul.f32 %v8224_v59, %v8185_v30 }
 0x17c   : > { %v1959_v20 = vmax.f32 %v1831_v22, 0.0 }
 0x17e   : > { %2515 = vperm.xlu0 %7313, %v2273_v14   ;;  %7292 = vset.pattern.permute.xlu1 %v10698_v2  ;;  %v2281_v14 = vld [vmem:[%s10675_s4 + $0x1a0] sm:$0xff] }
 0x17f   : > { %1653 = vperm.xlu1 %7292, %v1435_v38   ;;  %v977_v47 = vpop.permute.xlu1 %976 }
 0x180   : > { %v1195_v50 = vmul.f32 %v8224_v59, %v977_v47  ;;  %v1196_v44 = vmul.f32 %v8226_v61, %v977_v47  ;;  %v791_v47 = vmul.f32 %v8232_v19, %v8721_v17 }
 0x182   : > { %2525 = vperm.xlu0 %7313, %v2275_v16   ;;  %v8787_v16 = vpop.permute.xlu0 %1678  ;;  %v1323_v36 = vadd.f32 %v1195_v50, %v793_v25  ;;  %v1321_v17 = vadd.f32 %v1193_v11, %v791_v47  ;;  %v2291_v47 = vld [vmem:[%s10675_s4 + $0x1f0] sm:$0xff] }
 0x183   : > { %612 = vperm.xlu1 %7292, %v7705_v23   ;;  %v1324_v23 = vadd.f32 %v1196_v44, %v794_v3 }
 0x184   : > { %v1584_v31 = vpop.permute.xlu1 %1583 }
 0x185   : > { %v1829_v42 = vadd.f32 %v1584_v31, %v1317_v49  ;;  %v1830_v0 = vadd.f32 %v1584_v31, %v1318_v15  ;;  %v1194_v15 = vmul.f32 %v8226_v61, %v8185_v30  ;;  %v1836_v31 = vadd.f32 %v8466_v48, %v1324_v23  ;;  %v381_v30 = vld [vmem:[%s10672_s1 + $0x168] sm:$0xff] }
 0x186   : > { %2535 = vperm.xlu0 %7313, %v2277_v24   ;;  %v2285_v24 = vld [vmem:[%s10675_s4 + $0x1c0] sm:$0xff] }
 0x187   : > { %v1957_v1 = vmax.f32 %v1829_v42, 0.0  ;;  %v1958_v57 = vmax.f32 %v1830_v0, 0.0  ;;  %617 = vperm.xlu1 %7292, %v379_v27   ;;  %v1322_v22 = vadd.f32 %v1194_v15, %v792_v63  ;;  %v8806_v42 = vpop.permute.xlu0 %1688 }
 0x188   : > { %v8769_v12 = vpop.permute.xlu1 %542 }
 0x189   : > { %v2190_v29 = vpack.c.bf16 %v1960_v62, %v1958_v57  ;;  %v2189_v7 = vpack.c.bf16 %v1959_v20, %v1957_v1 }
 0x18a   : > { %2545 = vperm.xlu0 %7313, %v2279_v53   ;;  %v2287_v53 = vld [vmem:[%s10675_s4 + $0x1d0] sm:$0xff] }
 0x18b   : > { %7293 = vset.pattern.permute.xlu1 %v10697_v40  ;;  %3277 = vmatprep.subr.bf16.mxu0 %v2190_v29  ;;  %v1964_v29 = vmax.f32 %v1836_v31, 0.0 }
 0x18c   : > { %1040 = vperm.xlu1 %7293, %v379_v27   ;;  %v548_v38 = vpop.permute.xlu1 %547  ;;  %3278 = vmatpush1.bf16.msra.mxu0 %v2189_v7  ;;  %v1835_v27 = vadd.f32 %v8466_v48, %v1323_v36  ;;  %v1439_v36 = vld [vmem:[%s10673_s2 + $0x150] sm:$0xff] }
 0x18d   : > { %v798_v63 = vmul.f32 %v8235_v5, %v548_v38  ;;  %v797_v23 = vmul.f32 %v8232_v19, %v548_v38  ;;  %v10699_v38 = vld [vmem:[#allocation7_spill] sm:$0xff] }
 0x18e   : > { %2555 = vperm.xlu0 %7313, %v2281_v14   ;;  %v1963_v7 = vmax.f32 %v1835_v27, 0.0  ;;  %v2289_v14 = vld [vmem:[%s10675_s4 + $0x1e0] sm:$0xff]  ;;  %v1197_v31 = vmul.f32 %v8224_v59, %v10699_v38  ;;  %v1198_v27 = vmul.f32 %v8226_v61, %v10699_v38 }
 0x190   : > { %7294 = vset.pattern.permute.xlu1 %v10698_v2 }
 0x191   : > { %1663 = vperm.xlu1 %7294, %v1437_v56   ;;  %v985_v49 = vpop.permute.xlu1 %984  ;;  %v8817_v56 = vpop.permute.xlu0 %1698 }
 0x192   : > { %2565 = vperm.xlu0 %7313, %v2283_v13   ;;  %v1200_v25 = vmul.f32 %v8226_v61, %v985_v49  ;;  %v1199_v13 = vmul.f32 %v8224_v59, %v985_v49  ;;  %v795_v49 = vmul.f32 %v8232_v19, %v8769_v12 }
 0x194   : > { %v1328_v15 = vadd.f32 %v1200_v25, %v798_v63  ;;  %v10700_v25 = vld [vmem:[#allocation9_spill] sm:$0xff] }
 0x195   : > { %622 = vperm.xlu1 %7294, %v7706_v6   ;;  %v8830_v11 = vpop.permute.xlu0 %1708  ;;  %v1327_v6 = vadd.f32 %v1199_v13, %v797_v23  ;;  %v1201_v13 = vmul.f32 %v8224_v59, %v10700_v25 }
 0x196   : > { %2575 = vperm.xlu0 %7313, %v2285_v24   ;;  %v1594_v0 = vpop.permute.xlu1 %1593  ;;  %v796_v24 = vmul.f32 %v8235_v5, %v8769_v12  ;;  %v7707_v12 = vld [vmem:[%s10672_s1 + $0x170] sm:$0xff] }
 0x197   : > { %v1833_v1 = vadd.f32 %v1594_v0, %v1321_v17  ;;  %v1834_v57 = vadd.f32 %v1594_v0, %v1322_v22  ;;  %v4279_v22 = vld [vmem:[%s10677_s6] sm:$0xff]  ;;  %v1840_v0 = vadd.f32 %v8473_v52, %v1328_v15 }
 0x199   : > { %v1961_v62 = vmax.f32 %v1833_v1, 0.0  ;;  %v1962_v20 = vmax.f32 %v1834_v57, 0.0  ;;  %627 = vperm.xlu1 %7294, %v381_v30   ;;  %v1326_v1 = vadd.f32 %v1198_v27, %v796_v24  ;;  %v4311_v57 = vld [vmem:[%s10677_s6 + $0x100] sm:$0xff]  ;;  %v1968_v63 = vmax.f32 %v1840_v0, 0.0 }
 0x19a   : > { %2585 = vperm.xlu0 %7313, %v2287_v53   ;;  %v553_v48 = vpop.permute.xlu1 %552  ;;  %v1839_v53 = vadd.f32 %v8473_v52, %v1327_v6 }
 0x19b   : > { %v2192_v50 = vpack.c.bf16 %v1964_v29, %v1962_v20  ;;  %v2191_v44 = vpack.c.bf16 %v1963_v7, %v1961_v62  ;;  %v8852_v62 = vpop.permute.xlu0 %1718  ;;  %v799_v20 = vmul.f32 %v8232_v19, %v553_v48  ;;  %v383_v7 = vld [vmem:[%s10672_s1 + $0x178] sm:$0xff] }
 0x19d   : > { %7295 = vset.pattern.permute.xlu1 %v10697_v40  ;;  %3279 = vmatprep.subr.bf16.mxu0 %v2192_v50 }
 0x19e   : > { %2595 = vperm.xlu0 %7313, %v2289_v14   ;;  %1048 = vperm.xlu1 %7295, %v381_v30   ;;  %v558_v3 = vpop.permute.xlu1 %557  ;;  %v1325_v30 = vadd.f32 %v1197_v31, %v795_v49  ;;  %v800_v14 = vmul.f32 %v8235_v5, %v553_v48  ;;  %v4281_v48 = vld [vmem:[%s10677_s6 + $0x10] sm:$0xff]  ;;  %v1967_v49 = vmax.f32 %v1839_v53, 0.0 }
 0x19f   : > { %3280 = vmatpush1.bf16.msra.mxu0 %v2191_v44  ;;  %v801_v24 = vmul.f32 %v8232_v19, %v558_v3  ;;  %v802_v38 = vmul.f32 %v8235_v5, %v558_v3  ;;  %v8870_v0 = vpop.permute.xlu0 %1728  ;;  %v4313_v53 = vld [vmem:[%s10677_s6 + $0x110] sm:$0xff] }
 0x1a2   : > { %2605 = vperm.xlu0 %7313, %v2291_v47   ;;  %7296 = vset.pattern.permute.xlu1 %v10698_v2  ;;  %v1202_v47 = vmul.f32 %v8226_v61, %v10700_v25 }
 0x1a3   : > { %1673 = vperm.xlu1 %7296, %v1439_v36   ;;  %v993_v17 = vpop.permute.xlu1 %992 }
 0x1a4   : > { %v1203_v52 = vmul.f32 %v8224_v59, %v993_v17  ;;  %v1204_v36 = vmul.f32 %v8226_v61, %v993_v17  ;;  %v1330_v31 = vadd.f32 %v1202_v47, %v800_v14  ;;  %v1441_v14 = vld [vmem:[%s10673_s2 + $0x160] sm:$0xff] }
 0x1a5   : > { %v4283_v47 = vld [vmem:[%s10677_s6 + $0x20] sm:$0xff] }
 0x1a6   : > { %4345 = vperm.xlu0 %7313, %v4279_v22   ;;  %v1329_v22 = vadd.f32 %v1201_v13, %v799_v20  ;;  %v1331_v17 = vadd.f32 %v1203_v52, %v801_v24  ;;  %v8882_v52 = vpop.permute.xlu0 %1738 }
 0x1a7   : > { %632 = vperm.xlu1 %7296, %v7707_v12  }
 0x1a8   : > { %v1604_v29 = vpop.permute.xlu1 %1603 }
 0x1a9   : > { %v1837_v50 = vadd.f32 %v1604_v29, %v1325_v30  ;;  %v1838_v44 = vadd.f32 %v1604_v29, %v1326_v1 }
 0x1aa   : > { %4505 = vperm.xlu0 %7313, %v4311_v57   ;;  %v1332_v57 = vadd.f32 %v1204_v36, %v802_v38  ;;  %v4285_v38 = vld [vmem:[%s10677_s6 + $0x30] sm:$0xff] }
 0x1ab   : > { %v1965_v23 = vmax.f32 %v1837_v50, 0.0  ;;  %v1966_v15 = vmax.f32 %v1838_v44, 0.0  ;;  %637 = vperm.xlu1 %7296, %v383_v7  }
 0x1ac   : > { %v1614_v6 = vpop.permute.xlu1 %1613 }
 0x1ad   : > { %v2194_v27 = vpack.c.bf16 %v1968_v63, %v1966_v15  ;;  %v2193_v12 = vpack.c.bf16 %v1967_v49, %v1965_v23  ;;  %v1841_v30 = vadd.f32 %v1614_v6, %v1329_v22  ;;  %v1842_v1 = vadd.f32 %v1614_v6, %v1330_v31  ;;  %v4315_v23 = vld [vmem:[%s10677_s6 + $0x120] sm:$0xff]  ;;  %v8897_v6 = vpop.permute.xlu0 %1748  ;;  %v385_v22 = vld [vmem:[%s10672_s1 + $0x188] sm:$0xff] }
 0x1ae   : > { %4355 = vperm.xlu0 %7313, %v4281_v48   ;;  %v7316_v15 = vld [vmem:[%s10674_s3] ss:$16 sps:$4 sm:$0xff]   ;;  %v7319_v48 = vld [vmem:[%s10674_s3 + $0x24] ss:$16 sps:$4 sm:$0xff]  }
 0x1af   : > { %7297 = vset.pattern.permute.xlu1 %v10697_v40  ;;  %3281 = vmatprep.subr.bf16.mxu0 %v2194_v27  ;;  %v1969_v50 = vmax.f32 %v1841_v30, 0.0  ;;  %v1970_v44 = vmax.f32 %v1842_v1, 0.0  ;;  %v7708_v49 = vld [vmem:[%s10672_s1 + $0x180] sm:$0xff]  ;;  %v4317_v27 = vld [vmem:[%s10677_s6 + $0x130] sm:$0xff]  ;;  %v1205_v1 = vmul.f32 %v8224_v59, %v8489_v8 }
 0x1b0   : > { %1056 = vperm.xlu1 %7297, %v383_v7   ;;  %v1619_v20 = vpop.permute.xlu1 %1618  ;;  %3282 = vmatpush1.bf16.msra.mxu0 %v2193_v12  ;;  %v7321_v12 = vld [vmem:[%s10674_s3 + $0x20] ss:$16 sps:$4 sm:$0xff]   ;;  %v7322_v30 = vld [vmem:[%s10674_s3 + $0x44] ss:$16 sps:$4 sm:$0xff]  }
 0x1b1   : > { %v1843_v3 = vadd.f32 %v1619_v20, %v1331_v17  ;;  %v1844_v29 = vadd.f32 %v1619_v20, %v1332_v57  ;;  %v8913_v17 = vpop.permute.xlu0 %1758  ;;  %v1206_v57 = vmul.f32 %v8226_v61, %v8489_v8  ;;  %v804_v20 = vmul.f32 %v8235_v5, %v8666_v10  ;;  %v1443_v8 = vld [vmem:[%s10673_s2 + $0x170] sm:$0xff] }
 0x1b2   : > { %4515 = vperm.xlu0 %7313, %v4313_v53   ;;  %v803_v53 = vmul.f32 %v8232_v19, %v8666_v10 }
 0x1b3   : > { %v1971_v25 = vmax.f32 %v1843_v3, 0.0  ;;  %v1972_v13 = vmax.f32 %v1844_v29, 0.0  ;;  %v4287_v29 = vld [vmem:[%s10677_s6 + $0x40] sm:$0xff] }
 0x1b4   : > { %7298 = vset.pattern.permute.xlu1 %v10698_v2  ;;  %v568_v7 = vpop.permute.xlu1 %567 }
 0x1b5   : > { %1683 = vperm.xlu1 %7298, %v1441_v14   ;;  %v2196_v63 = vpack.c.bf16 %v1972_v13, %v1970_v44  ;;  %v2195_v36 = vpack.c.bf16 %v1971_v25, %v1969_v50  ;;  %v1333_v14 = vadd.f32 %v1205_v1, %v803_v53  ;;  %v1334_v50 = vadd.f32 %v1206_v57, %v804_v20  ;;  %v8933_v44 = vpop.permute.xlu0 %1768 }
 0x1b6   : > { %4365 = vperm.xlu0 %7313, %v4283_v47   ;;  %v4319_v47 = vld [vmem:[%s10677_s6 + $0x140] sm:$0xff] }
 0x1b7   : > { %3283 = vmatprep.subr.bf16.mxu0 %v2196_v63  ;;  %v7324_v63 = vld [vmem:[%s10674_s3 + $0x40] ss:$16 sps:$4 sm:$0xff]  }
 0x1b8   : > { %3284 = vmatpush1.bf16.msra.mxu0 %v2195_v36  ;;  %v7325_v36 = vld [vmem:[%s10674_s3 + $0x64] ss:$16 sps:$4 sm:$0xff]  }
 0x1b9   : > { %642 = vperm.xlu1 %7298, %v7708_v49   ;;  %v1001_v24 = vpop.permute.xlu1 %1000  ;;  %v806_v49 = vmul.f32 %v8235_v5, %v568_v7 }
 0x1ba   : > { %4525 = vperm.xlu0 %7313, %v4315_v23   ;;  %v1207_v10 = vmul.f32 %v8224_v59, %v1001_v24  ;;  %v1208_v25 = vmul.f32 %v8226_v61, %v1001_v24  ;;  %v1845_v23 = vadd.f32 %v8694_v43, %v1333_v14  ;;  %v7709_v24 = vld [vmem:[%s10672_s1 + $0x190] sm:$0xff]  ;;  %v809_v14 = vmul.f32 %v8232_v19, %v8678_v45 }
 0x1bb   : > { %3286 = vmatmul.mubr.bf16.vlgmr.msra.gmra.mrb[0].mxu0 %v7316_v15  ;;  %v1846_v15 = vadd.f32 %v8694_v43, %v1334_v50  ;;  %v810_v50 = vmul.f32 %v8235_v5, %v8678_v45  ;;  %v4291_v45 = vld [vmem:[%s10677_s6 + $0x60] sm:$0xff] }
 0x1bc   : > { %3295 = vmatprep.mubr.bf16.mxu0 %v7319_v48  ;;  %v805_v48 = vmul.f32 %v8232_v19, %v568_v7  ;;  %v387_v7 = vld [vmem:[%s10672_s1 + $0x198] sm:$0xff] }
 0x1bd   : > { %647 = vperm.xlu1 %7298, %v385_v22   ;;  %v1974_v1 = vmax.f32 %v1846_v15, 0.0 }
 0x1be   : > { %4375 = vperm.xlu0 %7313, %v4285_v38   ;;  %v8905_v31 = vpop.permute.xlu1 %572  ;;  %v1336_v38 = vadd.f32 %v1208_v25, %v806_v49 }
 0x1c1   : > { %7299 = vset.pattern.permute.xlu1 %v10697_v40 }
 0x1c2   : > { %4535 = vperm.xlu0 %7313, %v4317_v27   ;;  %1064 = vperm.xlu1 %7299, %v385_v22   ;;  %v1335_v22 = vadd.f32 %v1207_v10, %v805_v48  ;;  %v4289_v27 = vld [vmem:[%s10677_s6 + $0x50] sm:$0xff] }
 0x1c3   : > { %v1005_v3 = vpop.permute.xlu1 %1004  ;;  %3296 = vmatmul.mubr.bf16.gmra.mrb[4].mxu0 %v7321_v12  ;;  %v8957_v12 = vpop.permute.xlu0 %2295  ;;  %v7328_v48 = vld [vmem:[%s10674_s3 + $0x84] ss:$16 sps:$4 sm:$0xff]  }
 0x1c4   : > { %3305 = vmatprep.mubr.bf16.mxu0 %v7322_v30  ;;  %v1973_v30 = vmax.f32 %v1845_v23, 0.0  ;;  %v7327_v23 = vld [vmem:[%s10674_s3 + $0x60] ss:$16 sps:$4 sm:$0xff]   ;;  %v1210_v49 = vmul.f32 %v8226_v61, %v1005_v3 }
 0x1c6   : > { %4385 = vperm.xlu0 %7313, %v4287_v29   ;;  %7300 = vset.pattern.permute.xlu1 %v10698_v2 }
 0x1c7   : > { %1693 = vperm.xlu1 %7300, %v1443_v8   ;;  %v1009_v13 = vpop.permute.xlu1 %1008  ;;  %v4321_v8 = vld [vmem:[%s10677_s6 + $0x150] sm:$0xff]  ;;  %v8976_v15 = vpop.permute.xlu0 %2305 }
 0x1c8   : > { %v1211_v25 = vmul.f32 %v8224_v59, %v1009_v13 }
 0x1ca   : > { %4545 = vperm.xlu0 %7313, %v4319_v47   ;;  %v1212_v47 = vmul.f32 %v8226_v61, %v1009_v13  ;;  %v1209_v13 = vmul.f32 %v8224_v59, %v1005_v3  ;;  %v4323_v3 = vld [vmem:[%s10677_s6 + $0x160] sm:$0xff] }
 0x1cb   : > { %652 = vperm.xlu1 %7300, %v7709_v24   ;;  %3306 = vmatmul.mubr.bf16.gmra.mrb[8].mxu0 %v7324_v63  ;;  %v1339_v24 = vadd.f32 %v1211_v25, %v809_v14  ;;  %v4293_v25 = vld [vmem:[%s10677_s6 + $0x70] sm:$0xff] }
 0x1cc   : > { %v1629_v43 = vpop.permute.xlu1 %1628  ;;  %3315 = vmatprep.mubr.bf16.mxu0 %v7325_v36 }
 0x1cd   : > { %v1847_v57 = vadd.f32 %v1629_v43, %v1335_v22  ;;  %v1848_v53 = vadd.f32 %v1629_v43, %v1336_v38  ;;  %v1340_v22 = vadd.f32 %v1212_v47, %v810_v50  ;;  %v807_v43 = vmul.f32 %v8232_v19, %v8905_v31 }
 0x1ce   : > { %4395 = vperm.xlu0 %7313, %v4289_v27   ;;  %v1445_v27 = vld [vmem:[%s10673_s2 + $0x180] sm:$0xff] }
 0x1cf   : > { %v1975_v20 = vmax.f32 %v1847_v57, 0.0  ;;  %v1976_v29 = vmax.f32 %v1848_v53, 0.0  ;;  %657 = vperm.xlu1 %7300, %v387_v7   ;;  %v1337_v57 = vadd.f32 %v1209_v13, %v807_v43  ;;  %v389_v13 = vld [vmem:[%s10672_s1 + $0x1a8] sm:$0xff] }
 0x1d0   : > { %v8969_v10 = vpop.permute.xlu1 %587 }
 0x1d1   : > { %v2197_v63 = vpack.c.bf16 %v1975_v20, %v1973_v30  ;;  %v2198_v36 = vpack.c.bf16 %v1976_v29, %v1974_v1  ;;  %v8997_v30 = vpop.permute.xlu0 %2315  ;;  %v1851_v1 = vadd.f32 %v8726_v58, %v1339_v24  ;;  %v1852_v20 = vadd.f32 %v8726_v58, %v1340_v22  ;;  %v7330_v29 = vld [vmem:[%s10674_s3 + $0x80] ss:$16 sps:$4 sm:$0xff]  }
 0x1d2   : > { %4555 = vperm.xlu0 %7313, %v4321_v8   ;;  %v7331_v8 = vld [vmem:[%s10674_s3 + $0xa4] ss:$16 sps:$4 sm:$0xff]  }
 0x1d3   : > { %7301 = vset.pattern.permute.xlu1 %v10697_v40  ;;  %3606 = vmatprep.subr.bf16.mxu0 %v2198_v36  ;;  %v1979_v36 = vmax.f32 %v1851_v1, 0.0  ;;  %v7710_v58 = vld [vmem:[%s10672_s1 + $0x1a0] sm:$0xff]  ;;  %v4325_v24 = vld [vmem:[%s10677_s6 + $0x170] sm:$0xff] }
 0x1d4   : > { %1072 = vperm.xlu1 %7301, %v387_v7   ;;  %3607 = vmatpush1.bf16.msra.mxu0 %v2197_v63  ;;  %v808_v7 = vmul.f32 %v8235_v5, %v8905_v31  ;;  %v4295_v1 = vld [vmem:[%s10677_s6 + $0x80] sm:$0xff] }
 0x1d5   : > { %v1017_v38 = vpop.permute.xlu1 %1016  ;;  %3316 = vmatmul.mubr.bf16.gmra.mrb[12].mxu0 %v7327_v23  ;;  %v1980_v23 = vmax.f32 %v1852_v20, 0.0  ;;  %v1214_v20 = vmul.f32 %v8226_v61, %v8499_v35 }
 0x1d6   : > { %4405 = vperm.xlu0 %7313, %v4291_v45   ;;  %3325 = vmatprep.mubr.bf16.mxu0 %v7328_v48  ;;  %v1338_v53 = vadd.f32 %v1210_v49, %v808_v7  ;;  %v9014_v48 = vpop.permute.xlu0 %2325  ;;  %v1215_v7 = vmul.f32 %v8224_v59, %v1017_v38 }
 0x1d8   : > { %7302 = vset.pattern.permute.xlu1 %v10698_v2 }
 0x1d9   : > { %1703 = vperm.xlu1 %7302, %v1445_v27   ;;  %v7333_v27 = vld [vmem:[%s10674_s3 + $0xa0] ss:$16 sps:$4 sm:$0xff]  }
 0x1da   : > { %4565 = vperm.xlu0 %7313, %v4323_v3   ;;  %v1634_v31 = vpop.permute.xlu1 %1633  ;;  %v1216_v3 = vmul.f32 %v8226_v61, %v1017_v38  ;;  %v812_v38 = vmul.f32 %v8235_v5, %v8713_v18 }
 0x1db   : > { %v1849_v14 = vadd.f32 %v1634_v31, %v1337_v57  ;;  %v1850_v50 = vadd.f32 %v1634_v31, %v1338_v53  ;;  %v7334_v57 = vld [vmem:[%s10674_s3 + $0xc4] ss:$16 sps:$4 sm:$0xff]   ;;  %v1213_v53 = vmul.f32 %v8224_v59, %v8499_v35  ;;  %v9043_v31 = vpop.permute.xlu0 %2335 }
 0x1dd   : > { %v1977_v47 = vmax.f32 %v1849_v14, 0.0  ;;  %v1978_v63 = vmax.f32 %v1850_v50, 0.0  ;;  %662 = vperm.xlu1 %7302, %v7710_v58   ;;  %3326 = vmatmul.mubr.bf16.gmra.mrb[16].mxu0 %v7330_v29  ;;  %v811_v29 = vmul.f32 %v8232_v19, %v8713_v18  ;;  %v814_v14 = vmul.f32 %v8235_v5, %v8969_v10  ;;  %v1447_v18 = vld [vmem:[%s10673_s2 + $0x190] sm:$0xff] }
 0x1de   : > { %4415 = vperm.xlu0 %7313, %v4293_v25   ;;  %v9016_v45 = vpop.permute.xlu1 %592  ;;  %3335 = vmatprep.mubr.bf16.mxu0 %v7331_v8  ;;  %v813_v8 = vmul.f32 %v8232_v19, %v8969_v10  ;;  %v7336_v10 = vld [vmem:[%s10674_s3 + $0xc0] ss:$16 sps:$4 sm:$0xff]  }
 0x1df   : > { %v2199_v49 = vpack.c.bf16 %v1979_v36, %v1977_v47  ;;  %v2200_v22 = vpack.c.bf16 %v1980_v23, %v1978_v63  ;;  %v1344_v50 = vadd.f32 %v1216_v3, %v814_v14  ;;  %v4327_v47 = vld [vmem:[%s10677_s6 + $0x180] sm:$0xff]  ;;  %v1341_v63 = vadd.f32 %v1213_v53, %v811_v29  ;;  %v9061_v58 = vpop.permute.xlu0 %2345  ;;  %v7711_v53 = vld [vmem:[%s10672_s1 + $0x1b0] sm:$0xff] }
 0x1e0   : > { %v1343_v35 = vadd.f32 %v1215_v7, %v813_v8  ;;  %v1342_v36 = vadd.f32 %v1214_v20, %v812_v38  ;;  %v7337_v23 = vld [vmem:[%s10674_s3 + $0xe4] ss:$16 sps:$4 sm:$0xff]   ;;  %v391_v8 = vld [vmem:[%s10672_s1 + $0x1b8] sm:$0xff] }
 0x1e1   : > { %667 = vperm.xlu1 %7302, %v389_v13   ;;  %3608 = vmatprep.subr.bf16.mxu0 %v2200_v22  ;;  %v4329_v20 = vld [vmem:[%s10677_s6 + $0x190] sm:$0xff] }
 0x1e2   : > { %4575 = vperm.xlu0 %7313, %v4325_v24   ;;  %v9027_v43 = vpop.permute.xlu1 %597  ;;  %3609 = vmatpush1.bf16.msra.mxu0 %v2199_v49  ;;  %v4297_v49 = vld [vmem:[%s10677_s6 + $0x90] sm:$0xff]  ;;  %v1856_v24 = vadd.f32 %v8739_v54, %v1344_v50 }
 0x1e3   : > { %v7339_v50 = vld [vmem:[%s10674_s3 + $0xe0] ss:$16 sps:$4 sm:$0xff]  }
 0x1e4   : > { %v1984_v29 = vmax.f32 %v1856_v24, 0.0  ;;  %v4331_v24 = vld [vmem:[%s10677_s6 + $0x1a0] sm:$0xff] }
 0x1e5   : > { %7303 = vset.pattern.permute.xlu1 %v10697_v40  ;;  %3336 = vmatmul.mubr.bf16.gmra.mrb[20].mxu0 %v7333_v27 }
 0x1e6   : > { %4425 = vperm.xlu0 %7313, %v4295_v1   ;;  %1080 = vperm.xlu1 %7303, %v389_v13   ;;  %v1855_v13 = vadd.f32 %v8739_v54, %v1343_v35  ;;  %v9078_v54 = vpop.permute.xlu0 %2355 }
 0x1e7   : > { %v1025_v25 = vpop.permute.xlu1 %1024  ;;  %3345 = vmatprep.mubr.bf16.mxu0 %v7334_v57 }
 0x1e8   : > { %v1983_v57 = vmax.f32 %v1855_v13, 0.0  ;;  %v817_v13 = vmul.f32 %v8232_v19, %v9027_v43 }
 0x1ea   : > { %4585 = vperm.xlu0 %7313, %v4327_v47   ;;  %7304 = vset.pattern.permute.xlu1 %v10698_v2  ;;  %v7340_v47 = vld [vmem:[%s10674_s3 + $0x104] ss:$16 sps:$4 sm:$0xff]  }
 0x1eb   : > { %1713 = vperm.xlu1 %7304, %v1447_v18   ;;  %v4299_v18 = vld [vmem:[%s10677_s6 + $0xa0] sm:$0xff] }
 0x1ec   : > { %v1644_v22 = vpop.permute.xlu1 %1643 }
 0x1ed   : > { %v1853_v27 = vadd.f32 %v1644_v22, %v1341_v63  ;;  %v1854_v7 = vadd.f32 %v1644_v22, %v1342_v36  ;;  %3346 = vmatmul.mubr.bf16.gmra.mrb[24].mxu0 %v7336_v10  ;;  %v1219_v36 = vmul.f32 %v8224_v59, %v1025_v25  ;;  %v1220_v10 = vmul.f32 %v8226_v61, %v1025_v25 }
 0x1ee   : > { %4435 = vperm.xlu0 %7313, %v4297_v49   ;;  %3355 = vmatprep.mubr.bf16.mxu0 %v7337_v23  ;;  %v9098_v23 = vpop.permute.xlu0 %2365  ;;  %v818_v49 = vmul.f32 %v8235_v5, %v9027_v43  ;;  %v1217_v25 = vmul.f32 %v8224_v59, %v8515_v9  ;;  %v815_v22 = vmul.f32 %v8232_v19, %v9016_v45 }
 0x1ef   : > { %v1981_v3 = vmax.f32 %v1853_v27, 0.0  ;;  %v1982_v1 = vmax.f32 %v1854_v7, 0.0  ;;  %672 = vperm.xlu1 %7304, %v7711_v53   ;;  %v1218_v27 = vmul.f32 %v8226_v61, %v8515_v9  ;;  %v816_v7 = vmul.f32 %v8235_v5, %v9016_v45  ;;  %v1449_v53 = vld [vmem:[%s10673_s2 + $0x1a0] sm:$0xff]  ;;  %v4301_v9 = vld [vmem:[%s10677_s6 + $0xb0] sm:$0xff] }
 0x1f0   : > { %v9080_v38 = vpop.permute.xlu1 %602  ;;  %v1347_v43 = vadd.f32 %v1219_v36, %v817_v13  ;;  %v4333_v36 = vld [vmem:[%s10677_s6 + $0x1b0] sm:$0xff] }
 0x1f1   : > { %v2201_v14 = vpack.c.bf16 %v1983_v57, %v1981_v3  ;;  %v2202_v35 = vpack.c.bf16 %v1984_v29, %v1982_v1  ;;  %v1348_v3 = vadd.f32 %v1220_v10, %v818_v49  ;;  %v7342_v57 = vld [vmem:[%s10674_s3 + $0x100] ss:$16 sps:$4 sm:$0xff]   ;;  %v1345_v29 = vadd.f32 %v1217_v25, %v815_v22 }
 0x1f2   : > { %4595 = vperm.xlu0 %7313, %v4329_v20   ;;  %v7343_v20 = vld [vmem:[%s10674_s3 + $0x124] ss:$16 sps:$4 sm:$0xff]   ;;  %v9128_v45 = vpop.permute.xlu0 %2375 }
 0x1f3   : > { %677 = vperm.xlu1 %7304, %v391_v8   ;;  %3610 = vmatprep.subr.bf16.mxu0 %v2202_v35  ;;  %v1860_v35 = vadd.f32 %v8761_v4, %v1348_v3 }
 0x1f4   : > { %v9094_v63 = vpop.permute.xlu1 %607  ;;  %3611 = vmatpush1.bf16.msra.mxu0 %v2201_v14  ;;  %v1346_v14 = vadd.f32 %v1218_v27, %v816_v7  ;;  %v393_v27 = vld [vmem:[%s10672_s1 + $0x1c8] sm:$0xff] }
 0x1f5   : > { %3356 = vmatmul.mubr.bf16.gmra.mrb[28].mxu0 %v7339_v50  ;;  %v1988_v25 = vmax.f32 %v1860_v35, 0.0  ;;  %v821_v35 = vmul.f32 %v8232_v19, %v9094_v63 }
 0x1f6   : > { %4445 = vperm.xlu0 %7313, %v4299_v18   ;;  %3365 = vmatprep.mubr.bf16.mxu0 %v7340_v47 }
 0x1f7   : > { %7305 = vset.pattern.permute.xlu1 %v10697_v40 }
 0x1f8   : > { %1088 = vperm.xlu1 %7305, %v391_v8   ;;  %v1859_v8 = vadd.f32 %v8761_v4, %v1347_v43  ;;  %v9139_v4 = vpop.permute.xlu0 %2385  ;;  %v4303_v43 = vld [vmem:[%s10677_s6 + $0xc0] sm:$0xff] }
 0x1f9   : > { %v1033_v1 = vpop.permute.xlu1 %1032 }
 0x1fa   : > { %4605 = vperm.xlu0 %7313, %v4331_v24   ;;  %v1987_v49 = vmax.f32 %v1859_v8, 0.0  ;;  %v7712_v24 = vld [vmem:[%s10672_s1 + $0x1c0] sm:$0xff] }
 0x1fb   : > { %v4335_v8 = vld [vmem:[%s10677_s6 + $0x1c0] sm:$0xff] }
 0x1fc   : > { %7306 = vset.pattern.permute.xlu1 %v10698_v2 }
 0x1fd   : > { %1723 = vperm.xlu1 %7306, %v1449_v53   ;;  %3366 = vmatmul.mubr.bf16.gmra.mrb[32].mxu0 %v7342_v57  ;;  %v7345_v57 = vld [vmem:[%s10674_s3 + $0x120] ss:$16 sps:$4 sm:$0xff]   ;;  %v7346_v53 = vld [vmem:[%s10674_s3 + $0x144] ss:$16 sps:$4 sm:$0xff]  }
 0x1fe   : > { %4455 = vperm.xlu0 %7313, %v4301_v9   ;;  %v1654_v50 = vpop.permute.xlu1 %1653  ;;  %3375 = vmatprep.mubr.bf16.mxu0 %v7343_v20  ;;  %v1223_v9 = vmul.f32 %v8224_v59, %v1033_v1 }
 0x1ff   : > { %v1857_v47 = vadd.f32 %v1654_v50, %v1345_v29  ;;  %v1858_v18 = vadd.f32 %v1654_v50, %v1346_v14  ;;  %v1224_v29 = vmul.f32 %v8226_v61, %v1033_v1  ;;  %v9162_v14 = vpop.permute.xlu0 %2395  ;;  %v822_v50 = vmul.f32 %v8235_v5, %v9094_v63  ;;  %v4305_v63 = vld [vmem:[%s10677_s6 + $0xd0] sm:$0xff] }
 0x200   : > { %v819_v1 = vmul.f32 %v8232_v19, %v9080_v38 }
 0x201   : > { %v1985_v10 = vmax.f32 %v1857_v47, 0.0  ;;  %v1986_v13 = vmax.f32 %v1858_v18, 0.0  ;;  %682 = vperm.xlu1 %7306, %v7712_v24   ;;  %v1221_v47 = vmul.f32 %v8224_v59, %v8526_v51  ;;  %v1222_v18 = vmul.f32 %v8226_v61, %v8526_v51  ;;  %v7348_v24 = vld [vmem:[%s10674_s3 + $0x140] ss:$16 sps:$4 sm:$0xff]   ;;  %v7349_v51 = vld [vmem:[%s10674_s3 + $0x164] ss:$16 sps:$4 sm:$0xff]  }
 0x202   : > { %4615 = vperm.xlu0 %7313, %v4333_v36   ;;  %v9141_v22 = vpop.permute.xlu1 %612  ;;  %v820_v36 = vmul.f32 %v8235_v5, %v9080_v38 }
 0x203   : > { %v2203_v7 = vpack.c.bf16 %v1987_v49, %v1985_v10  ;;  %v2204_v3 = vpack.c.bf16 %v1988_v25, %v1986_v13  ;;  %v1351_v10 = vadd.f32 %v1223_v9, %v821_v35  ;;  %v1352_v13 = vadd.f32 %v1224_v29, %v822_v50  ;;  %v1451_v25 = vld [vmem:[%s10673_s2 + $0x1b0] sm:$0xff]  ;;  %v9189_v38 = vpop.permute.xlu0 %2405 }
 0x205   : > { %687 = vperm.xlu1 %7306, %v393_v27   ;;  %3612 = vmatprep.subr.bf16.mxu0 %v2204_v3  ;;  %v4337_v3 = vld [vmem:[%s10677_s6 + $0x1d0] sm:$0xff] }
 0x206   : > { %4465 = vperm.xlu0 %7313, %v4303_v43   ;;  %v9155_v20 = vpop.permute.xlu1 %617  ;;  %3613 = vmatpush1.bf16.msra.mxu0 %v2203_v7  ;;  %v1863_v7 = vadd.f32 %v8771_v41, %v1351_v10  ;;  %v1350_v43 = vadd.f32 %v1222_v18, %v820_v36  ;;  %v395_v10 = vld [vmem:[%s10672_s1 + $0x1d8] sm:$0xff] }
 0x207   : > { %3376 = vmatmul.mubr.bf16.gmra.mrb[36].mxu0 %v7345_v57  ;;  %v1864_v57 = vadd.f32 %v8771_v41, %v1352_v13  ;;  %v9203_v41 = vpop.permute.xlu0 %2415 }
 0x208   : > { %3385 = vmatprep.mubr.bf16.mxu0 %v7346_v53  ;;  %v1991_v50 = vmax.f32 %v1863_v7, 0.0 }
 0x209   : > { %7307 = vset.pattern.permute.xlu1 %v10697_v40  ;;  %v1992_v18 = vmax.f32 %v1864_v57, 0.0  ;;  %v825_v57 = vmul.f32 %v8232_v19, %v9155_v20 }
 0x20a   : > { %4625 = vperm.xlu0 %7313, %v4335_v8   ;;  %1096 = vperm.xlu1 %7307, %v393_v27   ;;  %v1349_v27 = vadd.f32 %v1221_v47, %v819_v1  ;;  %v7713_v47 = vld [vmem:[%s10672_s1 + $0x1d0] sm:$0xff]  ;;  %v4307_v1 = vld [vmem:[%s10677_s6 + $0xe0] sm:$0xff] }
 0x20b   : > { %v1041_v49 = vpop.permute.xlu1 %1040 }
 0x20c   : > { %v1227_v7 = vmul.f32 %v8224_v59, %v1041_v49 }
 0x20e   : > { %4475 = vperm.xlu0 %7313, %v4305_v63   ;;  %7308 = vset.pattern.permute.xlu1 %v10698_v2 }
 0x20f   : > { %1733 = vperm.xlu1 %7308, %v1451_v25   ;;  %3386 = vmatmul.mubr.bf16.gmra.mrb[40].mxu0 %v7348_v24  ;;  %v7351_v24 = vld [vmem:[%s10674_s3 + $0x160] ss:$16 sps:$4 sm:$0xff]   ;;  %v7352_v25 = vld [vmem:[%s10674_s3 + $0x184] ss:$16 sps:$4 sm:$0xff]  }
 0x210   : > { %v1664_v53 = vpop.permute.xlu1 %1663  ;;  %3395 = vmatprep.mubr.bf16.mxu0 %v7349_v51  ;;  %v4339_v51 = vld [vmem:[%s10677_s6 + $0x1e0] sm:$0xff] }
 0x211   : > { %v1861_v9 = vadd.f32 %v1664_v53, %v1349_v27  ;;  %v1862_v29 = vadd.f32 %v1664_v53, %v1350_v43  ;;  %v1228_v43 = vmul.f32 %v8226_v61, %v1041_v49  ;;  %v826_v53 = vmul.f32 %v8235_v5, %v9155_v20 }
 0x212   : > { %4635 = vperm.xlu0 %7313, %v4337_v3   ;;  %v9221_v3 = vpop.permute.xlu0 %2425  ;;  %v1225_v49 = vmul.f32 %v8224_v59, %v8536_v39  ;;  %v1355_v20 = vadd.f32 %v1227_v7, %v825_v57  ;;  %v6202_v57 = vld [vmem:[#allocation2] sm:$0x1] }
 0x213   : > { %v1989_v8 = vmax.f32 %v1861_v9, 0.0  ;;  %v1990_v35 = vmax.f32 %v1862_v29, 0.0  ;;  %692 = vperm.xlu1 %7308, %v7713_v47   ;;  %10701 = vst [vmem:[#allocation7_spill] sm:$0xff] %v9221_v3  ;;  %v4309_v9 = vld [vmem:[%s10677_s6 + $0xf0] sm:$0xff]  ;;  %v823_v29 = vmul.f32 %v8232_v19, %v9141_v22 }
 0x214   : > { %v9205_v36 = vpop.permute.xlu1 %622 }
 0x215   : > { %v2205_v13 = vpack.c.bf16 %v1991_v50, %v1989_v8  ;;  %v2206_v63 = vpack.c.bf16 %v1992_v18, %v1990_v35  ;;  %v1226_v8 = vmul.f32 %v8226_v61, %v8536_v39  ;;  %v824_v35 = vmul.f32 %v8235_v5, %v9141_v22  ;;  %v1453_v18 = vld [vmem:[%s10673_s2 + $0x1c0] sm:$0xff]  ;;  %v4341_v39 = vld [vmem:[%s10677_s6 + $0x1f0] sm:$0xff] }
 0x216   : > { %4485 = vperm.xlu0 %7313, %v4307_v1   ;;  %v1356_v50 = vadd.f32 %v1228_v43, %v826_v53  ;;  %v7354_v1 = vld [vmem:[%s10674_s3 + $0x180] ss:$16 sps:$4 sm:$0xff]   ;;  %v9251_v22 = vpop.permute.xlu0 %2435 }
 0x217   : > { %697 = vperm.xlu1 %7308, %v395_v10   ;;  %3614 = vmatprep.subr.bf16.mxu0 %v2206_v63  ;;  %v1867_v63 = vadd.f32 %v8787_v16, %v1355_v20 }
 0x218   : > { %v628_v27 = vpop.permute.xlu1 %627  ;;  %3615 = vmatpush1.bf16.msra.mxu0 %v2205_v13  ;;  %v1353_v13 = vadd.f32 %v1225_v49, %v823_v29  ;;  %v7714_v49 = vld [vmem:[%s10672_s1 + $0x1e0] sm:$0xff] }
 0x219   : > { %3396 = vmatmul.mubr.bf16.gmra.mrb[44].mxu0 %v7351_v24  ;;  %v1354_v24 = vadd.f32 %v1226_v8, %v824_v35  ;;  %v1995_v3 = vmax.f32 %v1867_v63, 0.0  ;;  %v397_v8 = vld [vmem:[%s10672_s1 + $0x1e8] sm:$0xff]  ;;  %v830_v63 = vmul.f32 %v8235_v5, %v628_v27 }
 0x21a   : > { %4645 = vperm.xlu0 %7313, %v4339_v51   ;;  %3405 = vmatprep.mubr.bf16.mxu0 %v7352_v25  ;;  %v1868_v25 = vadd.f32 %v8787_v16, %v1356_v50  ;;  %v9259_v20 = vpop.permute.xlu0 %2445 }
 0x21b   : > { %7309 = vset.pattern.permute.xlu1 %v10697_v40 }
 0x21c   : > { %1104 = vperm.xlu1 %7309, %v395_v10   ;;  %v7355_v10 = vld [vmem:[%s10674_s3 + $0x1a4] ss:$16 sps:$4 sm:$0xff]   ;;  %v1996_v29 = vmax.f32 %v1868_v25, 0.0  ;;  %v827_v25 = vmul.f32 %v8232_v19, %v9205_v36 }
 0x21d   : > { %v1049_v47 = vpop.permute.xlu1 %1048 }
 0x21e   : > { %4495 = vperm.xlu0 %7313, %v4309_v9  }
 0x220   : > { %7310 = vset.pattern.permute.xlu1 %v10698_v2 }
 0x221   : > { %1743 = vperm.xlu1 %7310, %v1453_v18   ;;  %3406 = vmatmul.mubr.bf16.gmra.mrb[48].mxu0 %v7354_v1  ;;  %v7357_v1 = vld [vmem:[%s10674_s3 + $0x1a0] ss:$16 sps:$4 sm:$0xff]   ;;  %v7358_v18 = vld [vmem:[%s10674_s3 + $0x1c4] ss:$16 sps:$4 sm:$0xff]  }
 0x222   : > { %4655 = vperm.xlu0 %7313, %v4341_v39   ;;  %v1674_v51 = vpop.permute.xlu1 %1673  ;;  %3415 = vmatprep.mubr.bf16.mxu0 %v7355_v10  ;;  %v1231_v39 = vmul.f32 %v8224_v59, %v1049_v47 }
 0x223   : > { %v1865_v7 = vadd.f32 %v1674_v51, %v1353_v13  ;;  %v1866_v43 = vadd.f32 %v1674_v51, %v1354_v24  ;;  %v1232_v13 = vmul.f32 %v8226_v61, %v1049_v47  ;;  %v1229_v24 = vmul.f32 %v8224_v59, %v8546_v21 }
 0x224   : > { %v1230_v51 = vmul.f32 %v8226_v61, %v8546_v21  ;;  %v828_v47 = vmul.f32 %v8235_v5, %v9205_v36 }
 0x225   : > { %v1993_v53 = vmax.f32 %v1865_v7, 0.0  ;;  %v1994_v9 = vmax.f32 %v1866_v43, 0.0  ;;  %702 = vperm.xlu1 %7310, %v7714_v49   ;;  %v1360_v43 = vadd.f32 %v1232_v13, %v830_v63  ;;  %v1357_v21 = vadd.f32 %v1229_v24, %v827_v25  ;;  %v7715_v13 = vld [vmem:[%s10672_s1 + $0x1f0] sm:$0xff] }
 0x226   : > { %6205 = vperm.xlu0 %7313, %v6202_v57   ;;  %v9261_v16 = vpop.permute.xlu1 %632  ;;  %v1358_v49 = vadd.f32 %v1230_v51, %v828_v47  ;;  %v7363_v51 = vld [vmem:[%s10674_s3 + $0x1e0] ss:$16 sps:$4 sm:$0xff]   ;;  %v7364_v47 = vld [vmem:[%s10674_s3 + $0x204] ss:$16 sps:$4 sm:$0xff]  }
 0x227   : > { %v2207_v35 = vpack.c.bf16 %v1995_v3, %v1993_v53  ;;  %v2208_v50 = vpack.c.bf16 %v1996_v29, %v1994_v9  ;;  %v829_v3 = vmul.f32 %v8232_v19, %v628_v27  ;;  %v7360_v27 = vld [vmem:[%s10674_s3 + $0x1c0] ss:$16 sps:$4 sm:$0xff]   ;;  %v7361_v9 = vld [vmem:[%s10674_s3 + $0x1e4] ss:$16 sps:$4 sm:$0xff]   ;;  %v1872_v29 = vadd.f32 %v8806_v42, %v1360_v43 }
 0x228   : > { %v1455_v53 = vld [vmem:[%s10673_s2 + $0x1d0] sm:$0xff] }
 0x229   : > { %707 = vperm.xlu1 %7310, %v397_v8   ;;  %3616 = vmatprep.subr.bf16.mxu0 %v2208_v50  ;;  %v1359_v7 = vadd.f32 %v1231_v39, %v829_v3  ;;  %v2000_v3 = vmax.f32 %v1872_v29, 0.0 }
 0x22a   : > { %v638_v10 = vpop.permute.xlu1 %637  ;;  %3617 = vmatpush1.bf16.msra.mxu0 %v2207_v35 }
 0x22b   : > { %3416 = vmatmul.mubr.bf16.gmra.mrb[52].mxu0 %v7357_v1  ;;  %v1871_v36 = vadd.f32 %v8806_v42, %v1359_v7  ;;  %v399_v42 = vld [vmem:[%s10672_s1 + $0x1f8] sm:$0xff] }
 0x22c   : > { %3425 = vmatprep.mubr.bf16.mxu0 %v7358_v18 }
 0x22d   : > { %7311 = vset.pattern.permute.xlu1 %v10697_v40  ;;  %v1999_v39 = vmax.f32 %v1871_v36, 0.0  ;;  %v831_v36 = vmul.f32 %v8232_v19, %v9261_v16 }
 0x22e   : > { %1112 = vperm.xlu1 %7311, %v397_v8  }
 0x22f   : > { %v1057_v57 = vpop.permute.xlu1 %1056 }
 0x230   : > { %v1235_v43 = vmul.f32 %v8224_v59, %v1057_v57 }
 0x232   : > { %7312 = vset.pattern.permute.xlu1 %v10698_v2 }
 0x233   : > { %1753 = vperm.xlu1 %7312, %v1455_v53   ;;  %3426 = vmatmul.mubr.bf16.gmra.mrb[56].mxu0 %v7360_v27  ;;  %v1236_v27 = vmul.f32 %v8226_v61, %v1057_v57  ;;  %v833_v53 = vmul.f32 %v8232_v19, %v638_v10  ;;  %v832_v57 = vmul.f32 %v8235_v5, %v9261_v16 }
 0x234   : > { %v1684_v8 = vpop.permute.xlu1 %1683  ;;  %3435 = vmatprep.mubr.bf16.mxu0 %v7361_v9  ;;  %v834_v9 = vmul.f32 %v8235_v5, %v638_v10  ;;  %v1457_v10 = vld [vmem:[%s10673_s2 + $0x1e0] sm:$0xff] }
 0x235   : > { %v1869_v35 = vadd.f32 %v1684_v8, %v1357_v21  ;;  %v1870_v50 = vadd.f32 %v1684_v8, %v1358_v49  ;;  %v1233_v21 = vmul.f32 %v8224_v59, %v8561_v46  ;;  %v1234_v49 = vmul.f32 %v8226_v61, %v8561_v46 }
 0x236   : > { %v1363_v29 = vadd.f32 %v1235_v43, %v833_v53  ;;  %v1364_v8 = vadd.f32 %v1236_v27, %v834_v9  ;;  %v7369_v53 = vld [vmem:[%s10674_s3 + $0x220] ss:$16 sps:$4 sm:$0xff]   ;;  %v7370_v9 = vld [vmem:[%s10674_s3 + $0x244] ss:$16 sps:$4 sm:$0xff]  }
 0x237   : > { %v1997_v1 = vmax.f32 %v1869_v35, 0.0  ;;  %v1998_v18 = vmax.f32 %v1870_v50, 0.0  ;;  %712 = vperm.xlu1 %7312, %v7715_v13   ;;  %v7367_v50 = vld [vmem:[%s10674_s3 + $0x224] ss:$16 sps:$4 sm:$0xff]   ;;  %v1361_v46 = vadd.f32 %v1233_v21, %v831_v36  ;;  %v2230_v36 = vld [vmem:[%s10675_s4 + $0x8] sm:$0xff] }
 0x238   : > { %v9300_v63 = vpop.permute.xlu1 %642  ;;  %v1875_v16 = vadd.f32 %v8817_v56, %v1363_v29  ;;  %v1459_v13 = vld [vmem:[%s10673_s2 + $0x1f0] sm:$0xff] }
 0x239   : > { %v2209_v24 = vpack.c.bf16 %v1999_v39, %v1997_v1  ;;  %v2210_v25 = vpack.c.bf16 %v2000_v3, %v1998_v18  ;;  %v1362_v1 = vadd.f32 %v1234_v49, %v832_v57  ;;  %v1876_v18 = vadd.f32 %v8817_v56, %v1364_v8  ;;  %v1460_v56 = vld [vmem:[%s10673_s2 + $0x1f8] sm:$0xff] }
 0x23b   : > { %717 = vperm.xlu1 %7312, %v399_v42   ;;  %3618 = vmatprep.subr.bf16.mxu0 %v2210_v25 }
 0x23c   : > { %v648_v7 = vpop.permute.xlu1 %647  ;;  %3619 = vmatpush1.bf16.msra.mxu0 %v2209_v24 }
 0x23d   : > { %3436 = vmatmul.mubr.bf16.gmra.mrb[60].mxu0 %v7363_v51  ;;  %v2003_v51 = vmax.f32 %v1875_v16, 0.0  ;;  %v837_v29 = vmul.f32 %v8232_v19, %v648_v7  ;;  %v838_v8 = vmul.f32 %v8235_v5, %v648_v7 }
 0x23e   : > { %3445 = vmatprep.mubr.bf16.mxu0 %v7364_v47 }
 0x23f   : > { %7314 = vset.pattern.permute.xlu1 %v10697_v40  ;;  %v7366_v40 = vld [vmem:[%s10674_s3 + $0x200] ss:$16 sps:$4 sm:$0xff]  }
 0x240   : > { %1120 = vperm.xlu1 %7314, %v399_v42  }
 0x241   : > { %v1065_v35 = vpop.permute.xlu1 %1064 }
 0x242   : > { %v1239_v49 = vmul.f32 %v8224_v59, %v1065_v35  ;;  %v1240_v57 = vmul.f32 %v8226_v61, %v1065_v35  ;;  %v835_v35 = vmul.f32 %v8232_v19, %v9300_v63 }
 0x244   : > { %7315 = vset.pattern.permute.xlu1 %v10698_v2  ;;  %v2004_v2 = vmax.f32 %v1876_v18, 0.0  ;;  %v1367_v16 = vadd.f32 %v1239_v49, %v837_v29  ;;  %v7372_v18 = vld [vmem:[%s10674_s3 + $0x240] ss:$16 sps:$4 sm:$0xff]   ;;  %v2238_v29 = vld [vmem:[%s10675_s4 + $0x48] sm:$0xff] }
 0x245   : > { %1763 = vperm.xlu1 %7315, %v1457_v10   ;;  %3446 = vmatmul.mubr.bf16.gmra.mrb[64].mxu0 %v7366_v40  ;;  %v1237_v40 = vmul.f32 %v8224_v59, %v8567_v28  ;;  %v1238_v10 = vmul.f32 %v8226_v61, %v8567_v28  ;;  %v7373_v28 = vld [vmem:[%s10674_s3 + $0x264] ss:$16 sps:$4 sm:$0xff]  }
 0x246   : > { %v1694_v39 = vpop.permute.xlu1 %1693  ;;  %3455 = vmatprep.mubr.bf16.mxu0 %v7367_v50  ;;  %v2232_v50 = vld [vmem:[%s10675_s4 + $0x18] sm:$0xff] }
 0x247   : > { %v1873_v3 = vadd.f32 %v1694_v39, %v1361_v46  ;;  %v1874_v42 = vadd.f32 %v1694_v39, %v1362_v1  ;;  %v836_v46 = vmul.f32 %v8235_v5, %v9300_v63  ;;  %v1368_v1 = vadd.f32 %v1240_v57, %v838_v8  ;;  %v2234_v39 = vld [vmem:[%s10675_s4 + $0x28] sm:$0xff] }
 0x249   : > { %v2001_v24 = vmax.f32 %v1873_v3, 0.0  ;;  %v2002_v25 = vmax.f32 %v1874_v42, 0.0  ;;  %1773 = vperm.xlu1 %7315, %v1459_v13   ;;  %v1879_v13 = vadd.f32 %v8830_v11, %v1367_v16  ;;  %v1365_v3 = vadd.f32 %v1237_v40, %v835_v35  ;;  %v7378_v16 = vld [vmem:[%s10674_s3 + $0x280] ss:$16 sps:$4 sm:$0xff]  }
 0x24a   : > { %v9339_v47 = vpop.permute.xlu1 %652  ;;  %v1366_v63 = vadd.f32 %v1238_v10, %v836_v46  ;;  %v1880_v42 = vadd.f32 %v8830_v11, %v1368_v1  ;;  %v7376_v11 = vld [vmem:[%s10674_s3 + $0x284] ss:$16 sps:$4 sm:$0xff]  }
 0x24b   : > { %v2211_v43 = vpack.c.bf16 %v2003_v51, %v2001_v24  ;;  %v2212_v27 = vpack.c.bf16 %v2004_v2, %v2002_v25  ;;  %v2236_v2 = vld [vmem:[%s10675_s4 + $0x38] sm:$0xff]  ;;  %v7379_v1 = vld [vmem:[%s10674_s3 + $0x2a4] ss:$16 sps:$4 sm:$0xff]  }
 0x24d   : > { %1778 = vperm.xlu1 %7315, %v1460_v56   ;;  %3620 = vmatprep.subr.bf16.mxu0 %v2212_v27  ;;  %v2007_v27 = vmax.f32 %v1879_v13, 0.0 }
 0x24e   : > { %v658_v21 = vpop.permute.xlu1 %657  ;;  %3621 = vmatpush1.bf16.msra.mxu0 %v2211_v43 }
 0x24f   : > { %3456 = vmatmul.mubr.bf16.gmra.mrb[68].mxu0 %v7369_v53  ;;  %v2008_v53 = vmax.f32 %v1880_v42, 0.0  ;;  %v841_v35 = vmul.f32 %v8232_v19, %v658_v21  ;;  %v842_v46 = vmul.f32 %v8235_v5, %v658_v21  ;;  %v2242_v21 = vld [vmem:[%s10675_s4 + $0x68] sm:$0xff] }
 0x250   : > { %3465 = vmatprep.mubr.bf16.mxu0 %v7370_v9  ;;  %v7375_v9 = vld [vmem:[%s10674_s3 + $0x260] ss:$16 sps:$4 sm:$0xff]  }
 0x251   : > { %2300 = vperm.xlu1 %7315, %v2230_v36  }
 0x253   : > { %v1073_v7 = vpop.permute.xlu1 %1072 }
 0x254   : > { %v1243_v40 = vmul.f32 %v8224_v59, %v1073_v7  ;;  %v1244_v10 = vmul.f32 %v8226_v61, %v1073_v7  ;;  %v839_v7 = vmul.f32 %v8232_v19, %v9339_v47 }
 0x255   : > { %2310 = vperm.xlu1 %7315, %v2232_v50   ;;  %v2240_v50 = vld [vmem:[%s10675_s4 + $0x58] sm:$0xff] }
 0x257   : > { %3466 = vmatmul.mubr.bf16.gmra.mrb[72].mxu0 %v7372_v18  ;;  %v840_v18 = vmul.f32 %v8235_v5, %v9339_v47 }
 0x258   : > { %v1704_v24 = vpop.permute.xlu1 %1703  ;;  %3475 = vmatprep.mubr.bf16.mxu0 %v7373_v28  ;;  %v1371_v28 = vadd.f32 %v1243_v40, %v841_v35 }
 0x259   : > { %v1877_v25 = vadd.f32 %v1704_v24, %v1365_v3  ;;  %v1878_v51 = vadd.f32 %v1704_v24, %v1366_v63  ;;  %2320 = vperm.xlu1 %7315, %v2234_v39   ;;  %v1372_v39 = vadd.f32 %v1244_v10, %v842_v46  ;;  %v1241_v3 = vmul.f32 %v8224_v59, %v8578_v34 }
 0x25a   : > { %v1242_v63 = vmul.f32 %v8226_v61, %v8578_v34  ;;  %v1883_v42 = vadd.f32 %v8852_v62, %v1371_v28  ;;  %v7381_v34 = vld [vmem:[%s10674_s3 + $0x2a0] ss:$16 sps:$4 sm:$0xff]   ;;  %v2250_v28 = vld [vmem:[%s10675_s4 + $0xa8] sm:$0xff] }
 0x25b   : > { %v2005_v56 = vmax.f32 %v1877_v25, 0.0  ;;  %v2006_v43 = vmax.f32 %v1878_v51, 0.0  ;;  %v1369_v47 = vadd.f32 %v1241_v3, %v839_v7  ;;  %v1884_v25 = vadd.f32 %v8852_v62, %v1372_v39 }
 0x25c   : > { %v9385_v36 = vpop.permute.xlu1 %662  ;;  %v1370_v24 = vadd.f32 %v1242_v63, %v840_v18 }
 0x25d   : > { %v2213_v49 = vpack.c.bf16 %v2007_v27, %v2005_v56  ;;  %2330 = vperm.xlu1 %7315, %v2236_v2   ;;  %v2214_v57 = vpack.c.bf16 %v2008_v53, %v2006_v43  ;;  %v2244_v2 = vld [vmem:[%s10675_s4 + $0x78] sm:$0xff]  ;;  %v7382_v27 = vld [vmem:[%s10674_s3 + $0x2c4] ss:$16 sps:$4 sm:$0xff]   ;;  %v2012_v62 = vmax.f32 %v1884_v25, 0.0  ;;  %v843_v39 = vmul.f32 %v8232_v19, %v9385_v36 }
 0x25f   : > { %3622 = vmatprep.subr.bf16.mxu0 %v2214_v57  ;;  %3476 = vmatmul.mubr.bf16.gmra.mrb[76].mxu0 %v7375_v9  ;;  %v2246_v57 = vld [vmem:[%s10675_s4 + $0x88] sm:$0xff] }
 0x260   : > { %v668_v8 = vpop.permute.xlu1 %667  ;;  %3623 = vmatpush1.bf16.msra.mxu0 %v2213_v49  ;;  %3485 = vmatprep.mubr.bf16.mxu0 %v7376_v11  ;;  %v2011_v11 = vmax.f32 %v1883_v42, 0.0  ;;  %v1245_v42 = vmul.f32 %v8224_v59, %v8586_v26 }
 0x261   : > { %2340 = vperm.xlu1 %7315, %v2238_v29   ;;  %v845_v7 = vmul.f32 %v8232_v19, %v668_v8  ;;  %v846_v18 = vmul.f32 %v8235_v5, %v668_v8  ;;  %v1246_v8 = vmul.f32 %v8226_v61, %v8586_v26  ;;  %v7388_v26 = vld [vmem:[%s10674_s3 + $0x304] ss:$16 sps:$4 sm:$0xff]  }
 0x262   : > { %v1373_v25 = vadd.f32 %v1245_v42, %v843_v39  ;;  %v2260_v42 = vld [vmem:[%s10675_s4 + $0xf8] sm:$0xff] }
 0x265   : > { %2350 = vperm.xlu1 %7315, %v2240_v50   ;;  %v1081_v13 = vpop.permute.xlu1 %1080  ;;  %v2248_v50 = vld [vmem:[%s10675_s4 + $0x98] sm:$0xff] }
 0x266   : > { %v1247_v35 = vmul.f32 %v8224_v59, %v1081_v13  ;;  %v1248_v46 = vmul.f32 %v8226_v61, %v1081_v13  ;;  %v844_v13 = vmul.f32 %v8235_v5, %v9385_v36 }
 0x267   : > { %3486 = vmatmul.mubr.bf16.gmra.mrb[80].mxu0 %v7378_v16  ;;  %v7384_v16 = vld [vmem:[%s10674_s3 + $0x2c0] ss:$16 sps:$4 sm:$0xff]  }
 0x268   : > { %3495 = vmatprep.mubr.bf16.mxu0 %v7379_v1  ;;  %v7385_v1 = vld [vmem:[%s10674_s3 + $0x2e4] ss:$16 sps:$4 sm:$0xff]   ;;  %v1376_v3 = vadd.f32 %v1248_v46, %v846_v18  ;;  %v1374_v36 = vadd.f32 %v1246_v8, %v844_v13  ;;  %v1249_v8 = vmul.f32 %v8224_v59, %v8595_v32 }
 0x269   : > { %2360 = vperm.xlu1 %7315, %v2242_v21   ;;  %v1375_v21 = vadd.f32 %v1247_v35, %v845_v7  ;;  %v7391_v46 = vld [vmem:[%s10674_s3 + $0x324] ss:$16 sps:$4 sm:$0xff]   ;;  %v2258_v7 = vld [vmem:[%s10675_s4 + $0xe8] sm:$0xff] }
 0x26a   : > { %v1714_v51 = vpop.permute.xlu1 %1713 }
 0x26b   : > { %v1881_v56 = vadd.f32 %v1714_v51, %v1369_v47  ;;  %v1882_v43 = vadd.f32 %v1714_v51, %v1370_v24  ;;  %v2252_v47 = vld [vmem:[%s10675_s4 + $0xb8] sm:$0xff]  ;;  %v1887_v24 = vadd.f32 %v8870_v0, %v1375_v21  ;;  %v1888_v51 = vadd.f32 %v8870_v0, %v1376_v3 }
 0x26d   : > { %v2009_v53 = vmax.f32 %v1881_v56, 0.0  ;;  %v2010_v9 = vmax.f32 %v1882_v43, 0.0  ;;  %2370 = vperm.xlu1 %7315, %v2244_v2   ;;  %v7387_v2 = vld [vmem:[%s10674_s3 + $0x2e0] ss:$16 sps:$4 sm:$0xff]   ;;  %v2016_v0 = vmax.f32 %v1888_v51, 0.0 }
 0x26e   : > { %v9428_v49 = vpop.permute.xlu1 %672 }
 0x26f   : > { %v2215_v29 = vpack.c.bf16 %v2011_v11, %v2009_v53  ;;  %v2216_v40 = vpack.c.bf16 %v2012_v62, %v2010_v9  ;;  %3496 = vmatmul.mubr.bf16.gmra.mrb[84].mxu0 %v7381_v34  ;;  %v2015_v11 = vmax.f32 %v1887_v24, 0.0  ;;  %v847_v39 = vmul.f32 %v8232_v19, %v9428_v49 }
 0x270   : > { %3505 = vmatprep.mubr.bf16.mxu0 %v7382_v27  ;;  %v2254_v27 = vld [vmem:[%s10675_s4 + $0xc8] sm:$0xff]  ;;  %v848_v13 = vmul.f32 %v8235_v5, %v9428_v49  ;;  %v7394_v49 = vld [vmem:[%s10674_s3 + $0x344] ss:$16 sps:$4 sm:$0xff]  }
 0x271   : > { %2380 = vperm.xlu1 %7315, %v2246_v57   ;;  %3624 = vmatprep.subr.bf16.mxu0 %v2216_v40  ;;  %v2256_v40 = vld [vmem:[%s10675_s4 + $0xd8] sm:$0xff] }
 0x272   : > { %v678_v10 = vpop.permute.xlu1 %677  ;;  %3625 = vmatpush1.bf16.msra.mxu0 %v2215_v29 }
 0x273   : > { %v849_v18 = vmul.f32 %v8232_v19, %v678_v10 }
 0x275   : > { %2390 = vperm.xlu1 %7315, %v2248_v50   ;;  %v7390_v50 = vld [vmem:[%s10674_s3 + $0x300] ss:$16 sps:$4 sm:$0xff]  }
 0x277   : > { %v1089_v63 = vpop.permute.xlu1 %1088  ;;  %3506 = vmatmul.mubr.bf16.gmra.mrb[88].mxu0 %v7384_v16 }
 0x278   : > { %3515 = vmatprep.mubr.bf16.mxu0 %v7385_v1  ;;  %v1251_v16 = vmul.f32 %v8224_v59, %v1089_v63  ;;  %v1252_v1 = vmul.f32 %v8226_v61, %v1089_v63 }
 0x279   : > { %2400 = vperm.xlu1 %7315, %v2250_v28   ;;  %v850_v28 = vmul.f32 %v8235_v5, %v678_v10  ;;  %v1250_v10 = vmul.f32 %v8226_v61, %v8595_v32  ;;  %v2262_v32 = vld [vmem:[%s10675_s4 + $0x108] sm:$0xff] }
 0x27a   : > { %v1379_v21 = vadd.f32 %v1251_v16, %v849_v18  ;;  %v2268_v18 = vld [vmem:[%s10675_s4 + $0x138] sm:$0xff] }
 0x27b   : > { %v1380_v3 = vadd.f32 %v1252_v1, %v850_v28 }
 0x27c   : > { %v1724_v56 = vpop.permute.xlu1 %1723  ;;  %v1891_v24 = vadd.f32 %v8882_v52, %v1379_v21 }
 0x27d   : > { %v1885_v43 = vadd.f32 %v1724_v56, %v1373_v25  ;;  %v1886_v34 = vadd.f32 %v1724_v56, %v1374_v36  ;;  %2410 = vperm.xlu1 %7315, %v2252_v47   ;;  %v7393_v47 = vld [vmem:[%s10674_s3 + $0x320] ss:$16 sps:$4 sm:$0xff]   ;;  %v1377_v25 = vadd.f32 %v1249_v8, %v847_v39  ;;  %v1378_v36 = vadd.f32 %v1250_v10, %v848_v13 }
 0x27e   : > { %v1892_v51 = vadd.f32 %v8882_v52, %v1380_v3  ;;  %v2264_v52 = vld [vmem:[%s10675_s4 + $0x118] sm:$0xff]  ;;  %v1254_v8 = vmul.f32 %v8226_v61, %v8612_v37 }
 0x27f   : > { %v2013_v53 = vmax.f32 %v1885_v43, 0.0  ;;  %v2014_v9 = vmax.f32 %v1886_v34, 0.0  ;;  %3516 = vmatmul.mubr.bf16.gmra.mrb[92].mxu0 %v7387_v2 }
 0x280   : > { %v9471_v62 = vpop.permute.xlu1 %682  ;;  %3525 = vmatprep.mubr.bf16.mxu0 %v7388_v26 }
 0x281   : > { %v2217_v57 = vpack.c.bf16 %v2015_v11, %v2013_v53  ;;  %2420 = vperm.xlu1 %7315, %v2254_v27   ;;  %v2218_v29 = vpack.c.bf16 %v2016_v0, %v2014_v9  ;;  %v2019_v27 = vmax.f32 %v1891_v24, 0.0  ;;  %v2020_v53 = vmax.f32 %v1892_v51, 0.0 }
 0x282   : > { %v851_v28 = vmul.f32 %v8232_v19, %v9471_v62  ;;  %v852_v39 = vmul.f32 %v8235_v5, %v9471_v62  ;;  %v2270_v62 = vld [vmem:[%s10675_s4 + $0x148] sm:$0xff] }
 0x283   : > { %3626 = vmatprep.subr.bf16.mxu0 %v2218_v29  ;;  %v7397_v29 = vld [vmem:[%s10674_s3 + $0x364] ss:$16 sps:$4 sm:$0xff]  }
 0x284   : > { %v688_v35 = vpop.permute.xlu1 %687  ;;  %3627 = vmatpush1.bf16.msra.mxu0 %v2217_v57  ;;  %v7396_v57 = vld [vmem:[%s10674_s3 + $0x340] ss:$16 sps:$4 sm:$0xff]  }
 0x285   : > { %2430 = vperm.xlu1 %7315, %v2256_v40   ;;  %v853_v1 = vmul.f32 %v8232_v19, %v688_v35 }
 0x287   : > { %3526 = vmatmul.mubr.bf16.gmra.mrb[96].mxu0 %v7390_v50  ;;  %v2266_v50 = vld [vmem:[%s10675_s4 + $0x128] sm:$0xff] }
 0x288   : > { %3535 = vmatprep.mubr.bf16.mxu0 %v7391_v46 }
 0x289   : > { %2440 = vperm.xlu1 %7315, %v2258_v7   ;;  %v1097_v63 = vpop.permute.xlu1 %1096  ;;  %v854_v7 = vmul.f32 %v8235_v5, %v688_v35  ;;  %v7400_v35 = vld [vmem:[%s10674_s3 + $0x384] ss:$16 sps:$4 sm:$0xff]  }
 0x28a   : > { %v1255_v46 = vmul.f32 %v8224_v59, %v1097_v63  ;;  %v1256_v16 = vmul.f32 %v8226_v61, %v1097_v63  ;;  %v7399_v63 = vld [vmem:[%s10674_s3 + $0x360] ss:$16 sps:$4 sm:$0xff]  }
 0x28c   : > { %v1383_v13 = vadd.f32 %v1255_v46, %v853_v1  ;;  %v1384_v21 = vadd.f32 %v1256_v16, %v854_v7  ;;  %v7405_v16 = vld [vmem:[%s10674_s3 + $0x3a0] ss:$16 sps:$4 sm:$0xff]   ;;  %v7406_v1 = vld [vmem:[%s10674_s3 + $0x3c4] ss:$16 sps:$4 sm:$0xff]  }
 0x28d   : > { %2450 = vperm.xlu1 %7315, %v2260_v42   ;;  %v1253_v42 = vmul.f32 %v8224_v59, %v8612_v37  ;;  %v2272_v37 = vld [vmem:[%s10675_s4 + $0x158] sm:$0xff] }
 0x28e   : > { %v1734_v2 = vpop.permute.xlu1 %1733  ;;  %v1895_v10 = vadd.f32 %v8897_v6, %v1383_v13  ;;  %v1896_v24 = vadd.f32 %v8897_v6, %v1384_v21  ;;  %v7403_v6 = vld [vmem:[%s10674_s3 + $0x3a4] ss:$16 sps:$4 sm:$0xff]   ;;  %v1257_v21 = vmul.f32 %v8224_v59, %v8623_v33 }
 0x28f   : > { %v1889_v56 = vadd.f32 %v1734_v2, %v1377_v25  ;;  %v1890_v26 = vadd.f32 %v1734_v2, %v1378_v36  ;;  %3536 = vmatmul.mubr.bf16.gmra.mrb[100].mxu0 %v7393_v47  ;;  %v1381_v47 = vadd.f32 %v1253_v42, %v851_v28 }
 0x290   : > { %3545 = vmatprep.mubr.bf16.mxu0 %v7394_v49  ;;  %v1382_v49 = vadd.f32 %v1254_v8, %v852_v39 }
 0x291   : > { %v2017_v43 = vmax.f32 %v1889_v56, 0.0  ;;  %v2018_v34 = vmax.f32 %v1890_v26, 0.0  ;;  %2460 = vperm.xlu1 %7315, %v2262_v32   ;;  %v2023_v56 = vmax.f32 %v1895_v10, 0.0  ;;  %v2024_v26 = vmax.f32 %v1896_v24, 0.0 }
 0x292   : > { %v9511_v9 = vpop.permute.xlu1 %692 }
 0x293   : > { %v2219_v11 = vpack.c.bf16 %v2019_v27, %v2017_v43  ;;  %v2220_v0 = vpack.c.bf16 %v2020_v53, %v2018_v34  ;;  %v7402_v43 = vld [vmem:[%s10674_s3 + $0x380] ss:$16 sps:$4 sm:$0xff]   ;;  %v855_v7 = vmul.f32 %v8232_v19, %v9511_v9 }
 0x295   : > { %2470 = vperm.xlu1 %7315, %v2264_v52   ;;  %3628 = vmatprep.subr.bf16.mxu0 %v2220_v0  ;;  %v2274_v52 = vld [vmem:[%s10675_s4 + $0x168] sm:$0xff] }
 0x296   : > { %v698_v40 = vpop.permute.xlu1 %697  ;;  %3629 = vmatpush1.bf16.msra.mxu0 %v2219_v11 }
 0x297   : > { %3546 = vmatmul.mubr.bf16.gmra.mrb[104].mxu0 %v7396_v57  ;;  %v858_v46 = vmul.f32 %v8235_v5, %v698_v40 }
 0x298   : > { %3555 = vmatprep.mubr.bf16.mxu0 %v7397_v29  ;;  %v2276_v29 = vld [vmem:[%s10675_s4 + $0x178] sm:$0xff] }
 0x299   : > { %2480 = vperm.xlu1 %7315, %v2266_v50   ;;  %v857_v50 = vmul.f32 %v8232_v19, %v698_v40  ;;  %v2278_v40 = vld [vmem:[%s10675_s4 + $0x188] sm:$0xff] }
 0x29b   : > { %v1105_v3 = vpop.permute.xlu1 %1104 }
 0x29c   : > { %v1259_v0 = vmul.f32 %v8224_v59, %v1105_v3  ;;  %v1260_v57 = vmul.f32 %v8226_v61, %v1105_v3  ;;  %v1258_v3 = vmul.f32 %v8226_v61, %v8623_v33  ;;  %v7408_v33 = vld [vmem:[%s10674_s3 + $0x3c0] ss:$16 sps:$4 sm:$0xff]  }
 0x29d   : > { %2490 = vperm.xlu1 %7315, %v2268_v18   ;;  %v856_v18 = vmul.f32 %v8235_v5, %v9511_v9  ;;  %v1385_v9 = vadd.f32 %v1257_v21, %v855_v7  ;;  %v1262_v7 = vmul.f32 %v8226_v61, %v8633_v55 }
 0x29e   : > { %v1387_v28 = vadd.f32 %v1259_v0, %v857_v50  ;;  %v1388_v39 = vadd.f32 %v1260_v57, %v858_v46  ;;  %v7414_v0 = vld [vmem:[%s10674_s3 + $0xc] ss:$16 sps:$4 sm:$0xff]  }
 0x29f   : > { %3556 = vmatmul.mubr.bf16.gmra.mrb[108].mxu0 %v7399_v63  ;;  %v2286_v50 = vld [vmem:[%s10675_s4 + $0x1c8] sm:$0xff] }
 0x2a0   : > { %v1744_v25 = vpop.permute.xlu1 %1743  ;;  %3565 = vmatprep.mubr.bf16.mxu0 %v7400_v35  ;;  %v1899_v63 = vadd.f32 %v8913_v17, %v1387_v28  ;;  %v1386_v35 = vadd.f32 %v1258_v3, %v856_v18  ;;  %v1900_v42 = vadd.f32 %v8913_v17, %v1388_v39  ;;  %v2288_v28 = vld [vmem:[%s10675_s4 + $0x1d8] sm:$0xff] }
 0x2a1   : > { %v1893_v36 = vadd.f32 %v1744_v25, %v1381_v47  ;;  %v1894_v51 = vadd.f32 %v1744_v25, %v1382_v49  ;;  %2500 = vperm.xlu1 %7315, %v2270_v62   ;;  %v2280_v62 = vld [vmem:[%s10675_s4 + $0x198] sm:$0xff]  ;;  %v7409_v49 = vld [vmem:[%s10674_s3 + $0x3e4] ss:$16 sps:$4 sm:$0xff]  }
 0x2a2   : > { %v2028_v17 = vmax.f32 %v1900_v42, 0.0 }
 0x2a3   : > { %v2021_v2 = vmax.f32 %v1893_v36, 0.0  ;;  %v2022_v32 = vmax.f32 %v1894_v51, 0.0  ;;  %v2027_v36 = vmax.f32 %v1899_v63, 0.0 }
 0x2a4   : > { %v9557_v34 = vpop.permute.xlu1 %702 }
 0x2a5   : > { %v2221_v27 = vpack.c.bf16 %v2023_v56, %v2021_v2  ;;  %2510 = vperm.xlu1 %7315, %v2272_v37   ;;  %v2222_v53 = vpack.c.bf16 %v2024_v26, %v2022_v32  ;;  %v2282_v37 = vld [vmem:[%s10675_s4 + $0x1a8] sm:$0xff]  ;;  %v859_v46 = vmul.f32 %v8232_v19, %v9557_v34 }
 0x2a7   : > { %3630 = vmatprep.subr.bf16.mxu0 %v2222_v53  ;;  %3566 = vmatmul.mubr.bf16.gmra.mrb[112].mxu0 %v7402_v43 }
 0x2a8   : > { %v708_v11 = vpop.permute.xlu1 %707  ;;  %3631 = vmatpush1.bf16.msra.mxu0 %v2221_v27  ;;  %3575 = vmatprep.mubr.bf16.mxu0 %v7403_v6  ;;  %v2284_v6 = vld [vmem:[%s10675_s4 + $0x1b8] sm:$0xff]  ;;  %v7411_v27 = vld [vmem:[%s10674_s3 + $0x3e0] ss:$16 sps:$4 sm:$0xff]  }
 0x2a9   : > { %2520 = vperm.xlu1 %7315, %v2274_v52   ;;  %v861_v53 = vmul.f32 %v8232_v19, %v708_v11  ;;  %v862_v52 = vmul.f32 %v8235_v5, %v708_v11  ;;  %v1261_v11 = vmul.f32 %v8224_v59, %v8633_v55  ;;  %v1265_v55 = vmul.f32 %v8224_v59, %v8646_v60 }
 0x2ad   : > { %2530 = vperm.xlu1 %7315, %v2276_v29   ;;  %v1113_v13 = vpop.permute.xlu1 %1112 }
 0x2ae   : > { %v1263_v56 = vmul.f32 %v8224_v59, %v1113_v13  ;;  %v1264_v26 = vmul.f32 %v8226_v61, %v1113_v13  ;;  %v1389_v13 = vadd.f32 %v1261_v11, %v859_v46  ;;  %v4282_v46 = vld [vmem:[%s10677_s6 + $0x18] sm:$0xff] }
 0x2af   : > { %3576 = vmatmul.mubr.bf16.gmra.mrb[116].mxu0 %v7405_v16  ;;  %v860_v16 = vmul.f32 %v8235_v5, %v9557_v34  ;;  %v7418_v11 = vld [vmem:[%s10674_s3 + $0x4c] ss:$16 sps:$4 sm:$0xff]  }
 0x2b0   : > { %3585 = vmatprep.mubr.bf16.mxu0 %v7406_v1  ;;  %v1391_v57 = vadd.f32 %v1263_v56, %v861_v53  ;;  %v1392_v29 = vadd.f32 %v1264_v26, %v862_v52 }
 0x2b1   : > { %2540 = vperm.xlu1 %7315, %v2278_v40   ;;  %v1390_v34 = vadd.f32 %v1262_v7, %v860_v16  ;;  %v4314_v16 = vld [vmem:[%s10677_s6 + $0x118] sm:$0xff]  ;;  %v4284_v7 = vld [vmem:[%s10677_s6 + $0x28] sm:$0xff] }
 0x2b2   : > { %v1754_v8 = vpop.permute.xlu1 %1753  ;;  %v1903_v18 = vadd.f32 %v8933_v44, %v1391_v57  ;;  %v1904_v39 = vadd.f32 %v8933_v44, %v1392_v29  ;;  %v2290_v44 = vld [vmem:[%s10675_s4 + $0x1e8] sm:$0xff] }
 0x2b3   : > { %v1897_v10 = vadd.f32 %v1754_v8, %v1385_v9  ;;  %v1898_v47 = vadd.f32 %v1754_v8, %v1386_v35  ;;  %v1266_v35 = vmul.f32 %v8226_v61, %v8646_v60  ;;  %v4312_v57 = vld [vmem:[%s10677_s6 + $0x108] sm:$0xff] }
 0x2b4   : > { %v2031_v42 = vmax.f32 %v1903_v18, 0.0  ;;  %v2032_v8 = vmax.f32 %v1904_v39, 0.0  ;;  %v7412_v29 = vld [vmem:[%s10674_s3 + $0x8] ss:$16 sps:$4 sm:$0xff]   ;;  %v7421_v39 = vld [vmem:[%s10674_s3 + $0x6c] ss:$16 sps:$4 sm:$0xff]  }
 0x2b5   : > { %v2025_v24 = vmax.f32 %v1897_v10, 0.0  ;;  %v2026_v25 = vmax.f32 %v1898_v47, 0.0  ;;  %2550 = vperm.xlu1 %7315, %v2280_v62   ;;  %v4316_v18 = vld [vmem:[%s10677_s6 + $0x128] sm:$0xff] }
 0x2b6   : > { %v713_v51 = vpop.permute.xlu1 %712 }
 0x2b7   : > { %v2223_v2 = vpack.c.bf16 %v2027_v36, %v2025_v24  ;;  %v2224_v32 = vpack.c.bf16 %v2028_v17, %v2026_v25  ;;  %3586 = vmatmul.mubr.bf16.gmra.mrb[120].mxu0 %v7408_v33  ;;  %v863_v40 = vmul.f32 %v8232_v19, %v713_v51  ;;  %v864_v21 = vmul.f32 %v8235_v5, %v713_v51 }
 0x2b8   : > { %3595 = vmatprep.mubr.bf16.mxu0 %v7409_v49 }
 0x2b9   : > { %2560 = vperm.xlu1 %7315, %v2282_v37   ;;  %3632 = vmatprep.subr.bf16.mxu0 %v2224_v32  ;;  %v1393_v24 = vadd.f32 %v1265_v55, %v863_v40  ;;  %v1394_v25 = vadd.f32 %v1266_v35, %v864_v21  ;;  %v2292_v37 = vld [vmem:[%s10675_s4 + $0x1f8] sm:$0xff] }
 0x2ba   : > { %v718_v43 = vpop.permute.xlu1 %717  ;;  %3633 = vmatpush1.bf16.msra.mxu0 %v2223_v2  ;;  %v7423_v40 = vld [vmem:[%s10674_s3 + $0x68] ss:$16 sps:$4 sm:$0xff]   ;;  %v7424_v21 = vld [vmem:[%s10674_s3 + $0x8c] ss:$16 sps:$4 sm:$0xff]  }
 0x2bb   : > { %v865_v36 = vmul.f32 %v8232_v19, %v718_v43  ;;  %v866_v17 = vmul.f32 %v8235_v5, %v718_v43  ;;  %v4280_v19 = vld [vmem:[%s10677_s6 + $0x8] sm:$0xff]  ;;  %v4290_v35 = vld [vmem:[%s10677_s6 + $0x58] sm:$0xff] }
 0x2bc   : > { %v7427_v55 = vld [vmem:[%s10674_s3 + $0xac] ss:$16 sps:$4 sm:$0xff]  }
 0x2bd   : > { %2570 = vperm.xlu1 %7315, %v2284_v6  }
 0x2bf   : > { %v1121_v1 = vpop.permute.xlu1 %1120  ;;  %3596 = vmatmul.mubr.bf16.gmra.mrb[124].mxu0 %v7411_v27 }
 0x2c0   : > { %3638 = vmatprep.mubr.bf16.mxu0 %v7414_v0  ;;  %v1267_v62 = vmul.f32 %v8224_v59, %v1121_v1  ;;  %v1268_v10 = vmul.f32 %v8226_v61, %v1121_v1  ;;  %v7417_v1 = vld [vmem:[%s10674_s3 + $0x28] ss:$16 sps:$4 sm:$0xff]  }
 0x2c1   : > { %2580 = vperm.xlu1 %7315, %v2286_v50   ;;  %v7415_v50 = vld [vmem:[%s10674_s3 + $0x2c] ss:$16 sps:$4 sm:$0xff]  }
 0x2c2   : > { %v1395_v61 = vadd.f32 %v1267_v62, %v865_v36  ;;  %v1396_v32 = vadd.f32 %v1268_v10, %v866_v17  ;;  %v7430_v62 = vld [vmem:[%s10674_s3 + $0xcc] ss:$16 sps:$4 sm:$0xff]  }
 0x2c3   : > { %v4292_v10 = vld [vmem:[%s10677_s6 + $0x68] sm:$0xff]  ;;  %v4294_v36 = vld [vmem:[%s10677_s6 + $0x78] sm:$0xff] }
 0x2c4   : > { %v1764_v3 = vpop.permute.xlu1 %1763  ;;  %v4326_v17 = vld [vmem:[%s10677_s6 + $0x178] sm:$0xff] }
 0x2c5   : > { %v1901_v63 = vadd.f32 %v1764_v3, %v1389_v13  ;;  %v1902_v9 = vadd.f32 %v1764_v3, %v1390_v34  ;;  %2590 = vperm.xlu1 %7315, %v2288_v28   ;;  %v7420_v28 = vld [vmem:[%s10674_s3 + $0x48] ss:$16 sps:$4 sm:$0xff]  }
 0x2c6   : > { %v4286_v13 = vld [vmem:[%s10677_s6 + $0x38] sm:$0xff]  ;;  %v4288_v3 = vld [vmem:[%s10677_s6 + $0x48] sm:$0xff] }
 0x2c7   : > { %v2029_v47 = vmax.f32 %v1901_v63, 0.0  ;;  %v2030_v33 = vmax.f32 %v1902_v9, 0.0  ;;  %v4318_v34 = vld [vmem:[%s10677_s6 + $0x138] sm:$0xff]  ;;  %v4320_v63 = vld [vmem:[%s10677_s6 + $0x148] sm:$0xff] }
 0x2c8   : > { %v1774_v49 = vpop.permute.xlu1 %1773  ;;  %v7426_v9 = vld [vmem:[%s10674_s3 + $0x88] ss:$16 sps:$4 sm:$0xff]  }
 0x2c9   : > { %v2225_v60 = vpack.c.bf16 %v2031_v42, %v2029_v47  ;;  %2600 = vperm.xlu1 %7315, %v2290_v44   ;;  %v2226_v51 = vpack.c.bf16 %v2032_v8, %v2030_v33  ;;  %v1905_v2 = vadd.f32 %v1774_v49, %v1393_v24  ;;  %v1906_v59 = vadd.f32 %v1774_v49, %v1394_v25  ;;  %v4322_v44 = vld [vmem:[%s10677_s6 + $0x158] sm:$0xff]  ;;  %v4324_v33 = vld [vmem:[%s10677_s6 + $0x168] sm:$0xff] }
 0x2ca   : > { %v7429_v8 = vld [vmem:[%s10674_s3 + $0xa8] ss:$16 sps:$4 sm:$0xff]   ;;  %v7433_v24 = vld [vmem:[%s10674_s3 + $0xec] ss:$16 sps:$4 sm:$0xff]  }
 0x2cb   : > { %3634 = vmatprep.subr.bf16.mxu0 %v2226_v51  ;;  %v2033_v5 = vmax.f32 %v1905_v2, 0.0  ;;  %v2034_v43 = vmax.f32 %v1906_v59, 0.0  ;;  %v7432_v49 = vld [vmem:[%s10674_s3 + $0xc8] ss:$16 sps:$4 sm:$0xff]  }
 0x2cc   : > { %v1779_v56 = vpop.permute.xlu1 %1778  ;;  %3635 = vmatpush1.bf16.msra.mxu0 %v2225_v60  ;;  %v7435_v51 = vld [vmem:[%s10674_s3 + $0xe8] ss:$16 sps:$4 sm:$0xff]  }
 0x2cd   : > { %v1907_v26 = vadd.f32 %v1779_v56, %v1395_v61  ;;  %v1908_v6 = vadd.f32 %v1779_v56, %v1396_v32  ;;  %2610 = vperm.xlu1 %7315, %v2292_v37   ;;  %v7436_v37 = vld [vmem:[%s10674_s3 + $0x10c] ss:$16 sps:$4 sm:$0xff]   ;;  %v7438_v32 = vld [vmem:[%s10674_s3 + $0x108] ss:$16 sps:$4 sm:$0xff]  }
 0x2ce   : > { %v4296_v2 = vld [vmem:[%s10677_s6 + $0x88] sm:$0xff] }
 0x2cf   : > { %v2035_v27 = vmax.f32 %v1907_v26, 0.0  ;;  %v2036_v53 = vmax.f32 %v1908_v6, 0.0  ;;  %v4328_v61 = vld [vmem:[%s10677_s6 + $0x188] sm:$0xff]  ;;  %v4298_v26 = vld [vmem:[%s10677_s6 + $0x98] sm:$0xff] }
 0x2d0   : > { %v9711_v42 = vpop.permute.xlu1 %2300  ;;  %v7439_v56 = vld [vmem:[%s10674_s3 + $0x12c] ss:$16 sps:$4 sm:$0xff]  }
 0x2d1   : > { %v2227_v52 = vpack.c.bf16 %v2035_v27, %v2033_v5  ;;  %4350 = vperm.xlu1 %7315, %v4280_v19   ;;  %v2228_v0 = vpack.c.bf16 %v2036_v53, %v2034_v43  ;;  %v4330_v19 = vld [vmem:[%s10677_s6 + $0x198] sm:$0xff]  ;;  %v4300_v53 = vld [vmem:[%s10677_s6 + $0xa8] sm:$0xff] }
 0x2d2   : > { %v7441_v5 = vld [vmem:[%s10674_s3 + $0x128] ss:$16 sps:$4 sm:$0xff]   ;;  %v7442_v43 = vld [vmem:[%s10674_s3 + $0x14c] ss:$16 sps:$4 sm:$0xff]  }
 0x2d3   : > { %3636 = vmatprep.subr.bf16.mxu0 %v2228_v0 }
 0x2d4   : > { %3637 = vmatpush1.bf16.msra.mxu0 %v2227_v52  ;;  %v9725_v47 = vpop.permute.xlu1 %2310  ;;  %v4332_v52 = vld [vmem:[%s10677_s6 + $0x1a8] sm:$0xff] }
 0x2d5   : > { %4510 = vperm.xlu1 %7315, %v4312_v57   ;;  %v7444_v57 = vld [vmem:[%s10674_s3 + $0x148] ss:$16 sps:$4 sm:$0xff]  }
 0x2d7   : > { %3639 = vmatmul.mubr.bf16.vlgmr.msra.gmra.mrb[0].mxu0 %v7412_v29  ;;  %v7445_v29 = vld [vmem:[%s10674_s3 + $0x16c] ss:$16 sps:$4 sm:$0xff]  }
 0x2d8   : > { %3648 = vmatprep.mubr.bf16.mxu0 %v7415_v50  ;;  %v9736_v25 = vpop.permute.xlu1 %2320  ;;  %v4302_v50 = vld [vmem:[%s10677_s6 + $0xb8] sm:$0xff] }
 0x2d9   : > { %4360 = vperm.xlu1 %7315, %v4282_v46  }
 0x2dc   : > { %v9744_v60 = vpop.permute.xlu1 %2330 }
 0x2dd   : > { %4520 = vperm.xlu1 %7315, %v4314_v16   ;;  %v4334_v16 = vld [vmem:[%s10677_s6 + $0x1b8] sm:$0xff] }
 0x2df   : > { %3649 = vmatmul.mubr.bf16.gmra.mrb[4].mxu0 %v7417_v1  ;;  %v7447_v1 = vld [vmem:[%s10674_s3 + $0x168] ss:$16 sps:$4 sm:$0xff]  }
 0x2e0   : > { %3658 = vmatprep.mubr.bf16.mxu0 %v7418_v11  ;;  %v9755_v59 = vpop.permute.xlu1 %2340  ;;  %v7448_v11 = vld [vmem:[%s10674_s3 + $0x18c] ss:$16 sps:$4 sm:$0xff]  }
 0x2e1   : > { %4370 = vperm.xlu1 %7315, %v4284_v7   ;;  %v4304_v7 = vld [vmem:[%s10677_s6 + $0xc8] sm:$0xff] }
 0x2e4   : > { %v9769_v6 = vpop.permute.xlu1 %2350 }
 0x2e5   : > { %4530 = vperm.xlu1 %7315, %v4316_v18  }
 0x2e7   : > { %3659 = vmatmul.mubr.bf16.gmra.mrb[8].mxu0 %v7420_v28  ;;  %v4336_v28 = vld [vmem:[%s10677_s6 + $0x1c8] sm:$0xff] }
 0x2e8   : > { %3668 = vmatprep.mubr.bf16.mxu0 %v7421_v39  ;;  %v9780_v27 = vpop.permute.xlu1 %2360  ;;  %v7450_v39 = vld [vmem:[%s10674_s3 + $0x188] ss:$16 sps:$4 sm:$0xff]  }
 0x2e9   : > { %4380 = vperm.xlu1 %7315, %v4286_v13   ;;  %v7451_v13 = vld [vmem:[%s10674_s3 + $0x1ac] ss:$16 sps:$4 sm:$0xff]  }
 0x2ec   : > { %v9788_v0 = vpop.permute.xlu1 %2370 }
 0x2ed   : > { %4540 = vperm.xlu1 %7315, %v4318_v34  }
 0x2ef   : > { %3669 = vmatmul.mubr.bf16.gmra.mrb[12].mxu0 %v7423_v40  ;;  %v4306_v40 = vld [vmem:[%s10677_s6 + $0xd8] sm:$0xff] }
 0x2f0   : > { %3678 = vmatprep.mubr.bf16.mxu0 %v7424_v21  ;;  %v9799_v46 = vpop.permute.xlu1 %2380  ;;  %v4338_v21 = vld [vmem:[%s10677_s6 + $0x1d8] sm:$0xff] }
 0x2f1   : > { %4390 = vperm.xlu1 %7315, %v4288_v3  }
 0x2f4   : > { %v9813_v18 = vpop.permute.xlu1 %2390 }
 0x2f5   : > { %4550 = vperm.xlu1 %7315, %v4320_v63   ;;  %v7453_v63 = vld [vmem:[%s10674_s3 + $0x1a8] ss:$16 sps:$4 sm:$0xff]  }
 0x2f7   : > { %3679 = vmatmul.mubr.bf16.gmra.mrb[16].mxu0 %v7426_v9  ;;  %v7454_v9 = vld [vmem:[%s10674_s3 + $0x1cc] ss:$16 sps:$4 sm:$0xff]  }
 0x2f8   : > { %3688 = vmatprep.mubr.bf16.mxu0 %v7427_v55  ;;  %v9824_v34 = vpop.permute.xlu1 %2400  ;;  %v4308_v55 = vld [vmem:[%s10677_s6 + $0xe8] sm:$0xff] }
 0x2f9   : > { %4400 = vperm.xlu1 %7315, %v4290_v35  }
 0x2fc   : > { %v9832_v3 = vpop.permute.xlu1 %2410 }
 0x2fd   : > { %4560 = vperm.xlu1 %7315, %v4322_v44   ;;  %v4340_v44 = vld [vmem:[%s10677_s6 + $0x1e8] sm:$0xff] }
 0x2ff   : > { %3689 = vmatmul.mubr.bf16.gmra.mrb[20].mxu0 %v7429_v8  ;;  %v7456_v8 = vld [vmem:[%s10674_s3 + $0x1c8] ss:$16 sps:$4 sm:$0xff]  }
 0x300   : > { %3698 = vmatprep.mubr.bf16.mxu0 %v7430_v62  ;;  %v9843_v35 = vpop.permute.xlu1 %2420  ;;  %v7457_v62 = vld [vmem:[%s10674_s3 + $0x1ec] ss:$16 sps:$4 sm:$0xff]  }
 0x301   : > { %4410 = vperm.xlu1 %7315, %v4292_v10   ;;  %v4310_v10 = vld [vmem:[%s10677_s6 + $0xf8] sm:$0xff] }
 0x305   : > { %4570 = vperm.xlu1 %7315, %v4324_v33   ;;  %v9857_v33 = vpop.permute.xlu1 %2430 }
 0x307   : > { %3699 = vmatmul.mubr.bf16.gmra.mrb[24].mxu0 %v7432_v49  ;;  %v4342_v49 = vld [vmem:[%s10677_s6 + $0x1f8] sm:$0xff] }
 0x308   : > { %3708 = vmatprep.mubr.bf16.mxu0 %v7433_v24  ;;  %v7459_v24 = vld [vmem:[%s10674_s3 + $0x1e8] ss:$16 sps:$4 sm:$0xff]  }
 0x309   : > { %4420 = vperm.xlu1 %7315, %v4294_v36   ;;  %v7460_v36 = vld [vmem:[%s10674_s3 + $0x20c] ss:$16 sps:$4 sm:$0xff]  }
 0x30d   : > { %4580 = vperm.xlu1 %7315, %v4326_v17   ;;  %v9868_v17 = vpop.permute.xlu1 %2440 }
 0x30f   : > { %3709 = vmatmul.mubr.bf16.gmra.mrb[28].mxu0 %v7435_v51  ;;  %v7462_v51 = vld [vmem:[%s10674_s3 + $0x208] ss:$16 sps:$4 sm:$0xff]  }
 0x310   : > { %3718 = vmatprep.mubr.bf16.mxu0 %v7436_v37  ;;  %v7463_v37 = vld [vmem:[%s10674_s3 + $0x22c] ss:$16 sps:$4 sm:$0xff]  }
 0x311   : > { %4430 = vperm.xlu1 %7315, %v4296_v2   ;;  %v7465_v2 = vld [vmem:[%s10674_s3 + $0x228] ss:$16 sps:$4 sm:$0xff]  }
 0x315   : > { %4590 = vperm.xlu1 %7315, %v4328_v61   ;;  %v7466_v61 = vld [vmem:[%s10674_s3 + $0x24c] ss:$16 sps:$4 sm:$0xff]  }
 0x317   : > { %3719 = vmatmul.mubr.bf16.gmra.mrb[32].mxu0 %v7438_v32  ;;  %v7468_v32 = vld [vmem:[%s10674_s3 + $0x248] ss:$16 sps:$4 sm:$0xff]  }
 0x318   : > { %3728 = vmatprep.mubr.bf16.mxu0 %v7439_v56  ;;  %v7469_v56 = vld [vmem:[%s10674_s3 + $0x26c] ss:$16 sps:$4 sm:$0xff]  }
 0x319   : > { %4440 = vperm.xlu1 %7315, %v4298_v26   ;;  %v7471_v26 = vld [vmem:[%s10674_s3 + $0x268] ss:$16 sps:$4 sm:$0xff]  }
 0x31d   : > { %4600 = vperm.xlu1 %7315, %v4330_v19   ;;  %v7472_v19 = vld [vmem:[%s10674_s3 + $0x28c] ss:$16 sps:$4 sm:$0xff]  }
 0x31f   : > { %3729 = vmatmul.mubr.bf16.gmra.mrb[36].mxu0 %v7441_v5  ;;  %v7474_v5 = vld [vmem:[%s10674_s3 + $0x288] ss:$16 sps:$4 sm:$0xff]  }
 0x320   : > { %3738 = vmatprep.mubr.bf16.mxu0 %v7442_v43  ;;  %v7475_v43 = vld [vmem:[%s10674_s3 + $0x2ac] ss:$16 sps:$4 sm:$0xff]  }
 0x321   : > { %4450 = vperm.xlu1 %7315, %v4300_v53   ;;  %v7477_v53 = vld [vmem:[%s10674_s3 + $0x2a8] ss:$16 sps:$4 sm:$0xff]  }
 0x325   : > { %4610 = vperm.xlu1 %7315, %v4332_v52   ;;  %v7478_v52 = vld [vmem:[%s10674_s3 + $0x2cc] ss:$16 sps:$4 sm:$0xff]  }
 0x327   : > { %3739 = vmatmul.mubr.bf16.gmra.mrb[40].mxu0 %v7444_v57  ;;  %v7480_v57 = vld [vmem:[%s10674_s3 + $0x2c8] ss:$16 sps:$4 sm:$0xff]  }
 0x328   : > { %3748 = vmatprep.mubr.bf16.mxu0 %v7445_v29  ;;  %v7481_v29 = vld [vmem:[%s10674_s3 + $0x2ec] ss:$16 sps:$4 sm:$0xff]  }
 0x329   : > { %4460 = vperm.xlu1 %7315, %v4302_v50   ;;  %v7483_v50 = vld [vmem:[%s10674_s3 + $0x2e8] ss:$16 sps:$4 sm:$0xff]  }
 0x32d   : > { %4620 = vperm.xlu1 %7315, %v4334_v16   ;;  %v7484_v16 = vld [vmem:[%s10674_s3 + $0x30c] ss:$16 sps:$4 sm:$0xff]  }
 0x32f   : > { %3749 = vmatmul.mubr.bf16.gmra.mrb[44].mxu0 %v7447_v1  ;;  %v7486_v1 = vld [vmem:[%s10674_s3 + $0x308] ss:$16 sps:$4 sm:$0xff]  }
 0x330   : > { %3758 = vmatprep.mubr.bf16.mxu0 %v7448_v11  ;;  %v7487_v11 = vld [vmem:[%s10674_s3 + $0x32c] ss:$16 sps:$4 sm:$0xff]  }
 0x331   : > { %4470 = vperm.xlu1 %7315, %v4304_v7   ;;  %v7489_v7 = vld [vmem:[%s10674_s3 + $0x328] ss:$16 sps:$4 sm:$0xff]  }
 0x335   : > { %4630 = vperm.xlu1 %7315, %v4336_v28   ;;  %v7490_v28 = vld [vmem:[%s10674_s3 + $0x34c] ss:$16 sps:$4 sm:$0xff]  }
 0x337   : > { %3759 = vmatmul.mubr.bf16.gmra.mrb[48].mxu0 %v7450_v39  ;;  %v7492_v39 = vld [vmem:[%s10674_s3 + $0x348] ss:$16 sps:$4 sm:$0xff]  }
 0x338   : > { %3768 = vmatprep.mubr.bf16.mxu0 %v7451_v13  ;;  %v7493_v13 = vld [vmem:[%s10674_s3 + $0x36c] ss:$16 sps:$4 sm:$0xff]  }
 0x339   : > { %4480 = vperm.xlu1 %7315, %v4306_v40  }
 0x33d   : > { %4640 = vperm.xlu1 %7315, %v4338_v21  }
 0x33f   : > { %3769 = vmatmul.mubr.bf16.gmra.mrb[52].mxu0 %v7453_v63 }
 0x340   : > { %3778 = vmatprep.mubr.bf16.mxu0 %v7454_v9  ;;  %v7495_v9 = vld [vmem:[%s10674_s3 + $0x368] ss:$16 sps:$4 sm:$0xff]  }
 0x341   : > { %4490 = vperm.xlu1 %7315, %v4308_v55  }
 0x345   : > { %4650 = vperm.xlu1 %7315, %v4340_v44  }
 0x347   : > { %3779 = vmatmul.mubr.bf16.gmra.mrb[56].mxu0 %v7456_v8  ;;  %v7496_v8 = vld [vmem:[%s10674_s3 + $0x38c] ss:$16 sps:$4 sm:$0xff]  }
 0x348   : > { %3788 = vmatprep.mubr.bf16.mxu0 %v7457_v62 }
 0x349   : > { %4500 = vperm.xlu1 %7315, %v4310_v10  }
 0x34d   : > { %4660 = vperm.xlu1 %7315, %v4342_v49  }
 0x34f   : > { %3789 = vmatmul.mubr.bf16.gmra.mrb[60].mxu0 %v7459_v24  ;;  %v7510_v24 = vld [vmem:[%s10676_s5 + $0x4] ss:$16 sps:$4 sm:$0xff]  }
 0x350   : > { %3798 = vmatprep.mubr.bf16.mxu0 %v7460_v36  ;;  %5335 = vmatprep.mubr.bf16.mxu1 %v7510_v24 }
 0x357   : > { %3799 = vmatmul.mubr.bf16.gmra.mrb[64].mxu0 %v7462_v51 }
 0x358   : > { %3808 = vmatprep.mubr.bf16.mxu0 %v7463_v37 }
 0x35f   : > { %3809 = vmatmul.mubr.bf16.gmra.mrb[68].mxu0 %v7465_v2 }
 0x360   : > { %3818 = vmatprep.mubr.bf16.mxu0 %v7466_v61 }
 0x367   : > { %3819 = vmatmul.mubr.bf16.gmra.mrb[72].mxu0 %v7468_v32 }
 0x368   : > { %3828 = vmatprep.mubr.bf16.mxu0 %v7469_v56 }
 0x36f   : > { %3829 = vmatmul.mubr.bf16.gmra.mrb[76].mxu0 %v7471_v26 }
 0x370   : > { %3838 = vmatprep.mubr.bf16.mxu0 %v7472_v19 }
 0x377   : > { %3839 = vmatmul.mubr.bf16.gmra.mrb[80].mxu0 %v7474_v5 }
 0x378   : > { %3848 = vmatprep.mubr.bf16.mxu0 %v7475_v43  ;;  %v7499_v43 = vld [vmem:[%s10674_s3 + $0x3ac] ss:$16 sps:$4 sm:$0xff]  }
 0x37f   : > { %3849 = vmatmul.mubr.bf16.gmra.mrb[84].mxu0 %v7477_v53 }
 0x380   : > { %3858 = vmatprep.mubr.bf16.mxu0 %v7478_v52 }
 0x387   : > { %3859 = vmatmul.mubr.bf16.gmra.mrb[88].mxu0 %v7480_v57 }
 0x388   : > { %3868 = vmatprep.mubr.bf16.mxu0 %v7481_v29 }
 0x38f   : > { %3869 = vmatmul.mubr.bf16.gmra.mrb[92].mxu0 %v7483_v50 }
 0x390   : > { %3878 = vmatprep.mubr.bf16.mxu0 %v7484_v16 }
 0x397   : > { %3879 = vmatmul.mubr.bf16.gmra.mrb[96].mxu0 %v7486_v1 }
 0x398   : > { %3888 = vmatprep.mubr.bf16.mxu0 %v7487_v11 }
 0x39f   : > { %3889 = vmatmul.mubr.bf16.gmra.mrb[100].mxu0 %v7489_v7 }
 0x3a0   : > { %3898 = vmatprep.mubr.bf16.mxu0 %v7490_v28 }
 0x3a7   : > { %3899 = vmatmul.mubr.bf16.gmra.mrb[104].mxu0 %v7492_v39 }
 0x3a8   : > { %3908 = vmatprep.mubr.bf16.mxu0 %v7493_v13  ;;  %v7501_v13 = vld [vmem:[%s10674_s3 + $0x3a8] ss:$16 sps:$4 sm:$0xff]  }
 0x3aa   : > { %v3640_v40 = vpop.f32.mrb[0].mxu0 }
 0x3ab   : > { %v6690_v21 = vadd.f32 %v3640_v40, %v8957_v12  ;;  %v3642_v63 = vpop.f32.mrb[1].mxu0 }
 0x3ac   : > { %v6691_v55 = vadd.f32 %v3642_v63, %v8957_v12  ;;  %v3644_v44 = vpop.f32.mrb[2].mxu0 }
 0x3ad   : > { %v6692_v62 = vadd.f32 %v3644_v44, %v9711_v42  ;;  %v3646_v10 = vpop.f32.mrb[3].mxu0  ;;  %v3959_v36 = vmax.f32 %v6690_v21, 0.0 }
 0x3ae   : > { %v6693_v49 = vadd.f32 %v3646_v10, %v9711_v42  ;;  %v3960_v37 = vmax.f32 %v6691_v55, 0.0  ;;  %v7498_v42 = vld [vmem:[%s10674_s3 + $0x388] ss:$16 sps:$4 sm:$0xff]  }
 0x3af   : > { %v3961_v51 = vmax.f32 %v6692_v62, 0.0  ;;  %3909 = vmatmul.mubr.bf16.gmra.mrb[108].mxu0 %v7495_v9 }
 0x3b0   : > { %v3962_v2 = vmax.f32 %v6693_v49, 0.0  ;;  %3918 = vmatprep.mubr.bf16.mxu0 %v7496_v8 }
 0x3b1   : > { %v4215_v12 = vpack.c.bf16 %v3961_v51, %v3959_v36 }
 0x3b2   : > { %v3650_v61 = vpop.f32.mrb[4].mxu0  ;;  %v4216_v32 = vpack.c.bf16 %v3962_v2, %v3960_v37  ;;  %v7504_v37 = vld [vmem:[%s10674_s3 + $0x3c8] ss:$16 sps:$4 sm:$0xff]  }
 0x3b3   : > { %v6694_v56 = vadd.f32 %v3650_v61, %v8976_v15  ;;  %v3652_v26 = vpop.f32.mrb[5].mxu0 }
 0x3b4   : > { %v6695_v19 = vadd.f32 %v3652_v26, %v8976_v15  ;;  %v3654_v5 = vpop.f32.mrb[6].mxu0  ;;  %5303 = vmatprep.subr.bf16.mxu1 %v4216_v32 }
 0x3b5   : > { %v6696_v53 = vadd.f32 %v3654_v5, %v9725_v47  ;;  %v3656_v52 = vpop.f32.mrb[7].mxu0  ;;  %5304 = vmatpush1.bf16.msra.mxu1 %v4215_v12  ;;  %v3963_v29 = vmax.f32 %v6694_v56, 0.0 }
 0x3b6   : > { %v6697_v57 = vadd.f32 %v3656_v52, %v9725_v47  ;;  %v3964_v16 = vmax.f32 %v6695_v19, 0.0  ;;  %v7502_v47 = vld [vmem:[%s10674_s3 + $0x3cc] ss:$16 sps:$4 sm:$0xff]  }
 0x3b7   : > { %v3965_v50 = vmax.f32 %v6696_v53, 0.0  ;;  %3919 = vmatmul.mubr.bf16.gmra.mrb[112].mxu0 %v7498_v42 }
 0x3b8   : > { %v3966_v1 = vmax.f32 %v6697_v57, 0.0  ;;  %3928 = vmatprep.mubr.bf16.mxu0 %v7499_v43 }
 0x3b9   : > { %v4217_v11 = vpack.c.bf16 %v3965_v50, %v3963_v29  ;;  %v7507_v29 = vld [vmem:[%s10674_s3 + $0x3e8] ss:$16 sps:$4 sm:$0xff]  }
 0x3ba   : > { %v4218_v15 = vpack.c.bf16 %v3966_v1, %v3964_v16  ;;  %v3660_v7 = vpop.f32.mrb[8].mxu0 }
 0x3bb   : > { %v6698_v28 = vadd.f32 %v3660_v7, %v8997_v30  ;;  %v3662_v39 = vpop.f32.mrb[9].mxu0 }
 0x3bc   : > { %v6699_v40 = vadd.f32 %v3662_v39, %v8997_v30  ;;  %v3664_v21 = vpop.f32.mrb[10].mxu0  ;;  %5305 = vmatprep.subr.bf16.mxu1 %v4218_v15 }
 0x3bd   : > { %v6700_v63 = vadd.f32 %v3664_v21, %v9736_v25  ;;  %v3666_v9 = vpop.f32.mrb[11].mxu0  ;;  %5306 = vmatpush1.bf16.msra.mxu1 %v4217_v11  ;;  %v3967_v44 = vmax.f32 %v6698_v28, 0.0 }
 0x3be   : > { %v6701_v55 = vadd.f32 %v3666_v9, %v9736_v25  ;;  %v3968_v62 = vmax.f32 %v6699_v40, 0.0  ;;  %v7505_v25 = vld [vmem:[%s10674_s3 + $0x3ec] ss:$16 sps:$4 sm:$0xff]  }
 0x3bf   : > { %v3969_v8 = vmax.f32 %v6700_v63, 0.0  ;;  %3929 = vmatmul.mubr.bf16.gmra.mrb[116].mxu0 %v7501_v13 }
 0x3c0   : > { %v3970_v10 = vmax.f32 %v6701_v55, 0.0  ;;  %3938 = vmatprep.mubr.bf16.mxu0 %v7502_v47 }
 0x3c1   : > { %v4219_v49 = vpack.c.bf16 %v3969_v8, %v3967_v44 }
 0x3c2   : > { %v4220_v30 = vpack.c.bf16 %v3970_v10, %v3968_v62  ;;  %v3670_v24 = vpop.f32.mrb[12].mxu0 }
 0x3c3   : > { %v6702_v36 = vadd.f32 %v3670_v24, %v9014_v48  ;;  %v3672_v51 = vpop.f32.mrb[13].mxu0 }
 0x3c4   : > { %v6703_v2 = vadd.f32 %v3672_v51, %v9014_v48  ;;  %v3674_v12 = vpop.f32.mrb[14].mxu0  ;;  %5307 = vmatprep.subr.bf16.mxu1 %v4220_v30 }
 0x3c5   : > { %v6704_v61 = vadd.f32 %v3674_v12, %v9744_v60  ;;  %v3676_v32 = vpop.f32.mrb[15].mxu0  ;;  %5308 = vmatpush1.bf16.msra.mxu1 %v4219_v49  ;;  %v3971_v26 = vmax.f32 %v6702_v36, 0.0 }
 0x3c6   : > { %v6705_v56 = vadd.f32 %v3676_v32, %v9744_v60  ;;  %v3972_v19 = vmax.f32 %v6703_v2, 0.0 }
 0x3c7   : > { %v3973_v42 = vmax.f32 %v6704_v61, 0.0  ;;  %3939 = vmatmul.mubr.bf16.gmra.mrb[120].mxu0 %v7504_v37 }
 0x3c8   : > { %v3974_v5 = vmax.f32 %v6705_v56, 0.0  ;;  %3948 = vmatprep.mubr.bf16.mxu0 %v7505_v25 }
 0x3c9   : > { %v4221_v43 = vpack.c.bf16 %v3973_v42, %v3971_v26 }
 0x3ca   : > { %v4222_v48 = vpack.c.bf16 %v3974_v5, %v3972_v19  ;;  %v3680_v53 = vpop.f32.mrb[16].mxu0 }
 0x3cb   : > { %v6706_v52 = vadd.f32 %v3680_v53, %v9043_v31  ;;  %v3682_v57 = vpop.f32.mrb[17].mxu0 }
 0x3cc   : > { %v6707_v50 = vadd.f32 %v3682_v57, %v9043_v31  ;;  %v3684_v16 = vpop.f32.mrb[18].mxu0  ;;  %5309 = vmatprep.subr.bf16.mxu1 %v4222_v48 }
 0x3cd   : > { %v6708_v60 = vadd.f32 %v3684_v16, %v9755_v59  ;;  %v3686_v1 = vpop.f32.mrb[19].mxu0  ;;  %5310 = vmatpush1.bf16.msra.mxu1 %v4221_v43  ;;  %v3975_v15 = vmax.f32 %v6706_v52, 0.0 }
 0x3ce   : > { %v6709_v11 = vadd.f32 %v3686_v1, %v9755_v59  ;;  %v3976_v28 = vmax.f32 %v6707_v50, 0.0 }
 0x3cf   : > { %v3977_v7 = vmax.f32 %v6708_v60, 0.0  ;;  %3949 = vmatmul.mubr.bf16.gmra.mrb[124].mxu0 %v7507_v29 }
 0x3d0   : > { %v3978_v39 = vmax.f32 %v6709_v11, 0.0 }
 0x3d1   : > { %v4223_v13 = vpack.c.bf16 %v3977_v7, %v3975_v15 }
 0x3d2   : > { %v4224_v40 = vpack.c.bf16 %v3978_v39, %v3976_v28  ;;  %v3690_v21 = vpop.f32.mrb[20].mxu0 }
 0x3d3   : > { %v6710_v47 = vadd.f32 %v3690_v21, %v9061_v58  ;;  %v3692_v63 = vpop.f32.mrb[21].mxu0 }
 0x3d4   : > { %v6711_v31 = vadd.f32 %v3692_v63, %v9061_v58  ;;  %v3694_v9 = vpop.f32.mrb[22].mxu0  ;;  %5311 = vmatprep.subr.bf16.mxu1 %v4224_v40 }
 0x3d5   : > { %v6712_v55 = vadd.f32 %v3694_v9, %v9769_v6  ;;  %v3696_v44 = vpop.f32.mrb[23].mxu0  ;;  %5312 = vmatpush1.bf16.msra.mxu1 %v4223_v13  ;;  %v3979_v8 = vmax.f32 %v6710_v47, 0.0 }
 0x3d6   : > { %v6713_v59 = vadd.f32 %v3696_v44, %v9769_v6  ;;  %v3980_v10 = vmax.f32 %v6711_v31, 0.0 }
 0x3d7   : > { %v3981_v62 = vmax.f32 %v6712_v55, 0.0 }
 0x3d8   : > { %v3982_v49 = vmax.f32 %v6713_v59, 0.0 }
 0x3d9   : > { %v4225_v30 = vpack.c.bf16 %v3981_v62, %v3979_v8 }
 0x3da   : > { %v4226_v24 = vpack.c.bf16 %v3982_v49, %v3980_v10  ;;  %v3700_v36 = vpop.f32.mrb[24].mxu0 }
 0x3db   : > { %v6714_v51 = vadd.f32 %v3700_v36, %v9078_v54  ;;  %v3702_v37 = vpop.f32.mrb[25].mxu0 }
 0x3dc   : > { %v6715_v58 = vadd.f32 %v3702_v37, %v9078_v54  ;;  %v3704_v2 = vpop.f32.mrb[26].mxu0  ;;  %5313 = vmatprep.subr.bf16.mxu1 %v4226_v24 }
 0x3dd   : > { %v6716_v12 = vadd.f32 %v3704_v2, %v9780_v27  ;;  %v3706_v25 = vpop.f32.mrb[27].mxu0  ;;  %5314 = vmatpush1.bf16.msra.mxu1 %v4225_v30  ;;  %v3983_v61 = vmax.f32 %v6714_v51, 0.0 }
 0x3de   : > { %v6717_v6 = vadd.f32 %v3706_v25, %v9780_v27  ;;  %v3984_v56 = vmax.f32 %v6715_v58, 0.0 }
 0x3df   : > { %v3985_v32 = vmax.f32 %v6716_v12, 0.0 }
 0x3e0   : > { %v3986_v26 = vmax.f32 %v6717_v6, 0.0 }
 0x3e1   : > { %v4227_v42 = vpack.c.bf16 %v3985_v32, %v3983_v61 }
 0x3e2   : > { %v4228_v19 = vpack.c.bf16 %v3986_v26, %v3984_v56  ;;  %v3710_v5 = vpop.f32.mrb[28].mxu0 }
 0x3e3   : > { %v6718_v43 = vadd.f32 %v3710_v5, %v9098_v23  ;;  %v3712_v48 = vpop.f32.mrb[29].mxu0 }
 0x3e4   : > { %v6719_v54 = vadd.f32 %v3712_v48, %v9098_v23  ;;  %v3714_v53 = vpop.f32.mrb[30].mxu0  ;;  %5315 = vmatprep.subr.bf16.mxu1 %v4228_v19 }
 0x3e5   : > { %v6720_v52 = vadd.f32 %v3714_v53, %v9788_v0  ;;  %v3716_v57 = vpop.f32.mrb[31].mxu0  ;;  %5316 = vmatpush1.bf16.msra.mxu1 %v4227_v42  ;;  %v3987_v29 = vmax.f32 %v6718_v43, 0.0 }
 0x3e6   : > { %v6721_v27 = vadd.f32 %v3716_v57, %v9788_v0  ;;  %v3988_v16 = vmax.f32 %v6719_v54, 0.0 }
 0x3e7   : > { %v3989_v50 = vmax.f32 %v6720_v52, 0.0 }
 0x3e8   : > { %v3990_v60 = vmax.f32 %v6721_v27, 0.0 }
 0x3e9   : > { %v4229_v1 = vpack.c.bf16 %v3989_v50, %v3987_v29 }
 0x3ea   : > { %v4230_v11 = vpack.c.bf16 %v3990_v60, %v3988_v16  ;;  %v3720_v15 = vpop.f32.mrb[32].mxu0 }
 0x3eb   : > { %v6722_v7 = vadd.f32 %v3720_v15, %v9128_v45  ;;  %v3722_v28 = vpop.f32.mrb[33].mxu0 }
 0x3ec   : > { %v6723_v23 = vadd.f32 %v3722_v28, %v9128_v45  ;;  %v3724_v39 = vpop.f32.mrb[34].mxu0  ;;  %5317 = vmatprep.subr.bf16.mxu1 %v4230_v11 }
 0x3ed   : > { %v6724_v13 = vadd.f32 %v3724_v39, %v9799_v46  ;;  %v3726_v40 = vpop.f32.mrb[35].mxu0  ;;  %5318 = vmatpush1.bf16.msra.mxu1 %v4229_v1  ;;  %v3991_v21 = vmax.f32 %v6722_v7, 0.0 }
 0x3ee   : > { %v6725_v0 = vadd.f32 %v3726_v40, %v9799_v46  ;;  %v3992_v63 = vmax.f32 %v6723_v23, 0.0 }
 0x3ef   : > { %v3993_v47 = vmax.f32 %v6724_v13, 0.0 }
 0x3f0   : > { %v3994_v31 = vmax.f32 %v6725_v0, 0.0 }
 0x3f1   : > { %v4231_v9 = vpack.c.bf16 %v3993_v47, %v3991_v21 }
 0x3f2   : > { %v4232_v55 = vpack.c.bf16 %v3994_v31, %v3992_v63  ;;  %v3730_v44 = vpop.f32.mrb[36].mxu0 }
 0x3f3   : > { %v6726_v59 = vadd.f32 %v3730_v44, %v9139_v4  ;;  %v3732_v8 = vpop.f32.mrb[37].mxu0 }
 0x3f4   : > { %v6727_v45 = vadd.f32 %v3732_v8, %v9139_v4  ;;  %v3734_v62 = vpop.f32.mrb[38].mxu0  ;;  %5319 = vmatprep.subr.bf16.mxu1 %v4232_v55  ;;  %v10702_v55 = vld [vmem:[#allocation7_spill] sm:$0xff] }
 0x3f5   : > { %v6728_v10 = vadd.f32 %v3734_v62, %v9813_v18  ;;  %v3736_v49 = vpop.f32.mrb[39].mxu0  ;;  %5320 = vmatpush1.bf16.msra.mxu1 %v4231_v9  ;;  %v3995_v30 = vmax.f32 %v6726_v59, 0.0 }
 0x3f6   : > { %v6729_v46 = vadd.f32 %v3736_v49, %v9813_v18  ;;  %v3996_v36 = vmax.f32 %v6727_v45, 0.0 }
 0x3f7   : > { %v3997_v24 = vmax.f32 %v6728_v10, 0.0 }
 0x3f8   : > { %v3998_v51 = vmax.f32 %v6729_v46, 0.0 }
 0x3f9   : > { %v4233_v37 = vpack.c.bf16 %v3997_v24, %v3995_v30 }
 0x3fa   : > { %v4234_v58 = vpack.c.bf16 %v3998_v51, %v3996_v36  ;;  %v3740_v2 = vpop.f32.mrb[40].mxu0 }
 0x3fb   : > { %v6730_v12 = vadd.f32 %v3740_v2, %v9162_v14  ;;  %v3742_v25 = vpop.f32.mrb[41].mxu0 }
 0x3fc   : > { %v6731_v4 = vadd.f32 %v3742_v25, %v9162_v14  ;;  %v3744_v6 = vpop.f32.mrb[42].mxu0  ;;  %5321 = vmatprep.subr.bf16.mxu1 %v4234_v58 }
 0x3fd   : > { %v6732_v61 = vadd.f32 %v3744_v6, %v9824_v34  ;;  %v3746_v32 = vpop.f32.mrb[43].mxu0  ;;  %5322 = vmatpush1.bf16.msra.mxu1 %v4233_v37  ;;  %v3999_v56 = vmax.f32 %v6730_v12, 0.0 }
 0x3fe   : > { %v6733_v18 = vadd.f32 %v3746_v32, %v9824_v34  ;;  %v4000_v42 = vmax.f32 %v6731_v4, 0.0 }
 0x3ff   : > { %v4001_v26 = vmax.f32 %v6732_v61, 0.0 }
 0x400   : > { %v4002_v19 = vmax.f32 %v6733_v18, 0.0 }
 0x401   : > { %v4235_v5 = vpack.c.bf16 %v4001_v26, %v3999_v56 }
 0x402   : > { %v4236_v43 = vpack.c.bf16 %v4002_v19, %v4000_v42  ;;  %v3750_v48 = vpop.f32.mrb[44].mxu0 }
 0x403   : > { %v6734_v54 = vadd.f32 %v3750_v48, %v9189_v38  ;;  %v3752_v53 = vpop.f32.mrb[45].mxu0 }
 0x404   : > { %v6735_v14 = vadd.f32 %v3752_v53, %v9189_v38  ;;  %v3754_v52 = vpop.f32.mrb[46].mxu0  ;;  %5323 = vmatprep.subr.bf16.mxu1 %v4236_v43  ;;  %v2451_v43 = vpop.permute.xlu1 %2450 }
 0x405   : > { %v6736_v57 = vadd.f32 %v3754_v52, %v9832_v3  ;;  %v3756_v27 = vpop.f32.mrb[47].mxu0  ;;  %5324 = vmatpush1.bf16.msra.mxu1 %v4235_v5  ;;  %v4003_v29 = vmax.f32 %v6734_v54, 0.0 }
 0x406   : > { %v6737_v34 = vadd.f32 %v3756_v27, %v9832_v3  ;;  %v4004_v16 = vmax.f32 %v6735_v14, 0.0 }
 0x407   : > { %v4005_v50 = vmax.f32 %v6736_v57, 0.0 }
 0x408   : > { %v4006_v60 = vmax.f32 %v6737_v34, 0.0 }
 0x409   : > { %v4237_v1 = vpack.c.bf16 %v4005_v50, %v4003_v29  ;;  %v2456_v29 = vpop.permute.xlu0 %2455 }
 0x40a   : > { %v4238_v11 = vpack.c.bf16 %v4006_v60, %v4004_v16  ;;  %v3760_v15 = vpop.f32.mrb[48].mxu0 }
 0x40b   : > { %v6738_v7 = vadd.f32 %v3760_v15, %v9203_v41  ;;  %v3762_v28 = vpop.f32.mrb[49].mxu0 }
 0x40c   : > { %v6739_v38 = vadd.f32 %v3762_v28, %v9203_v41  ;;  %v3764_v23 = vpop.f32.mrb[50].mxu0  ;;  %5325 = vmatprep.subr.bf16.mxu1 %v4238_v11  ;;  %v2461_v11 = vpop.permute.xlu1 %2460 }
 0x40d   : > { %v6740_v39 = vadd.f32 %v3764_v23, %v9843_v35  ;;  %v3766_v13 = vpop.f32.mrb[51].mxu0  ;;  %5326 = vmatpush1.bf16.msra.mxu1 %v4237_v1  ;;  %v4007_v40 = vmax.f32 %v6738_v7, 0.0  ;;  %v7511_v23 = vld [vmem:[%s10676_s5 + $0x24] ss:$16 sps:$4 sm:$0xff]  }
 0x40e   : > { %v6741_v3 = vadd.f32 %v3766_v13, %v9843_v35  ;;  %v4008_v21 = vmax.f32 %v6739_v38, 0.0 }
 0x40f   : > { %v4009_v0 = vmax.f32 %v6740_v39, 0.0 }
 0x410   : > { %v4010_v47 = vmax.f32 %v6741_v3, 0.0 }
 0x411   : > { %v4239_v63 = vpack.c.bf16 %v4009_v0, %v4007_v40 }
 0x412   : > { %v4240_v31 = vpack.c.bf16 %v4010_v47, %v4008_v21  ;;  %v3770_v9 = vpop.f32.mrb[52].mxu0  ;;  %v2466_v47 = vpop.permute.xlu0 %2465 }
 0x413   : > { %v6742_v44 = vadd.f32 %v3770_v9, %v10702_v55  ;;  %v3772_v59 = vpop.f32.mrb[53].mxu0 }
 0x414   : > { %v6743_v41 = vadd.f32 %v3772_v59, %v10702_v55  ;;  %v3774_v8 = vpop.f32.mrb[54].mxu0  ;;  %5327 = vmatprep.subr.bf16.mxu1 %v4240_v31 }
 0x415   : > { %v6744_v45 = vadd.f32 %v3774_v8, %v9857_v33  ;;  %v3776_v62 = vpop.f32.mrb[55].mxu0  ;;  %5328 = vmatpush1.bf16.msra.mxu1 %v4239_v63  ;;  %v4011_v10 = vmax.f32 %v6742_v44, 0.0  ;;  %v2471_v44 = vpop.permute.xlu1 %2470  ;;  %v7513_v8 = vld [vmem:[%s10676_s5 + $0x20] ss:$16 sps:$4 sm:$0xff]  }
 0x416   : > { %v6745_v35 = vadd.f32 %v3776_v62, %v9857_v33  ;;  %v4012_v46 = vmax.f32 %v6743_v41, 0.0 }
 0x417   : > { %v4013_v49 = vmax.f32 %v6744_v45, 0.0 }
 0x418   : > { %v4014_v30 = vmax.f32 %v6745_v35, 0.0  ;;  %v7514_v35 = vld [vmem:[%s10676_s5 + $0x44] ss:$16 sps:$4 sm:$0xff]  }
 0x419   : > { %v4241_v24 = vpack.c.bf16 %v4013_v49, %v4011_v10 }
 0x41a   : > { %v4242_v36 = vpack.c.bf16 %v4014_v30, %v4012_v46  ;;  %v3780_v51 = vpop.f32.mrb[56].mxu0 }
 0x41b   : > { %v6746_v37 = vadd.f32 %v3780_v51, %v9251_v22  ;;  %v3782_v58 = vpop.f32.mrb[57].mxu0  ;;  %v2476_v51 = vpop.permute.xlu0 %2475 }
 0x41c   : > { %v6747_v2 = vadd.f32 %v3782_v58, %v9251_v22  ;;  %v3784_v12 = vpop.f32.mrb[58].mxu0  ;;  %5329 = vmatprep.subr.bf16.mxu1 %v4242_v36 }
 0x41d   : > { %v6748_v25 = vadd.f32 %v3784_v12, %v9868_v17  ;;  %v3786_v4 = vpop.f32.mrb[59].mxu0  ;;  %5330 = vmatpush1.bf16.msra.mxu1 %v4241_v24  ;;  %v4015_v6 = vmax.f32 %v6746_v37, 0.0 }
 0x41e   : > { %v6749_v33 = vadd.f32 %v3786_v4, %v9868_v17  ;;  %v4016_v32 = vmax.f32 %v6747_v2, 0.0 }
 0x41f   : > { %v4017_v61 = vmax.f32 %v6748_v25, 0.0  ;;  %v2481_v25 = vpop.permute.xlu1 %2480 }
 0x420   : > { %v4018_v18 = vmax.f32 %v6749_v33, 0.0 }
 0x421   : > { %v4243_v56 = vpack.c.bf16 %v4017_v61, %v4015_v6  ;;  %v7516_v6 = vld [vmem:[%s10676_s5 + $0x40] ss:$16 sps:$4 sm:$0xff]  }
 0x422   : > { %v4244_v26 = vpack.c.bf16 %v4018_v18, %v4016_v32  ;;  %v3790_v42 = vpop.f32.mrb[60].mxu0  ;;  %v7517_v18 = vld [vmem:[%s10676_s5 + $0x64] ss:$16 sps:$4 sm:$0xff]  }
 0x423   : > { %v6750_v19 = vadd.f32 %v3790_v42, %v9259_v20  ;;  %v3792_v5 = vpop.f32.mrb[61].mxu0 }
 0x424   : > { %v6751_v22 = vadd.f32 %v3792_v5, %v9259_v20  ;;  %v3794_v48 = vpop.f32.mrb[62].mxu0  ;;  %5331 = vmatprep.subr.bf16.mxu1 %v4244_v26  ;;  %v7508_v20 = vld [vmem:[%s10676_s5] ss:$16 sps:$4 sm:$0xff]  }
 0x425   : > { %v6752_v54 = vadd.f32 %v3794_v48, %v2451_v43  ;;  %v3796_v53 = vpop.f32.mrb[63].mxu0  ;;  %5332 = vmatpush1.bf16.msra.mxu1 %v4243_v56  ;;  %v4019_v17 = vmax.f32 %v6750_v19, 0.0 }
 0x426   : > { %v6753_v14 = vadd.f32 %v3796_v53, %v2451_v43  ;;  %v4020_v57 = vmax.f32 %v6751_v22, 0.0  ;;  %v2486_v22 = vpop.permute.xlu0 %2485 }
 0x427   : > { %v4021_v52 = vmax.f32 %v6752_v54, 0.0 }
 0x428   : > { %v4022_v27 = vmax.f32 %v6753_v14, 0.0 }
 0x429   : > { %v4245_v34 = vpack.c.bf16 %v4021_v52, %v4019_v17  ;;  %v2491_v17 = vpop.permute.xlu1 %2490 }
 0x42a   : > { %v4246_v50 = vpack.c.bf16 %v4022_v27, %v4020_v57  ;;  %v3800_v16 = vpop.f32.mrb[64].mxu0  ;;  %v7519_v27 = vld [vmem:[%s10676_s5 + $0x60] ss:$16 sps:$4 sm:$0xff]  }
 0x42b   : > { %v6754_v60 = vadd.f32 %v3800_v16, %v2456_v29  ;;  %v3802_v1 = vpop.f32.mrb[65].mxu0 }
 0x42c   : > { %v6755_v15 = vadd.f32 %v3802_v1, %v2456_v29  ;;  %v3804_v7 = vpop.f32.mrb[66].mxu0  ;;  %5333 = vmatprep.subr.bf16.mxu1 %v4246_v50  ;;  %v7520_v50 = vld [vmem:[%s10676_s5 + $0x84] ss:$16 sps:$4 sm:$0xff]  }
 0x42d   : > { %v6756_v28 = vadd.f32 %v3804_v7, %v2461_v11  ;;  %v3806_v38 = vpop.f32.mrb[67].mxu0  ;;  %5334 = vmatpush1.bf16.msra.mxu1 %v4245_v34  ;;  %v4023_v13 = vmax.f32 %v6754_v60, 0.0 }
 0x42e   : > { %v6757_v39 = vadd.f32 %v3806_v38, %v2461_v11  ;;  %v4024_v40 = vmax.f32 %v6755_v15, 0.0 }
 0x42f   : > { %v4025_v3 = vmax.f32 %v6756_v28, 0.0 }
 0x430   : > { %v4026_v0 = vmax.f32 %v6757_v39, 0.0  ;;  %5336 = vmatmul.mubr.bf16.vlgmr.msra.gmra.mrb[0].mxu1 %v7508_v20  ;;  %v2496_v20 = vpop.permute.xlu0 %2495 }
 0x431   : > { %v4247_v21 = vpack.c.bf16 %v4025_v3, %v4023_v13  ;;  %5345 = vmatprep.mubr.bf16.mxu1 %v7511_v23  ;;  %v2501_v13 = vpop.permute.xlu1 %2500 }
 0x432   : > { %v4248_v63 = vpack.c.bf16 %v4026_v0, %v4024_v40  ;;  %v3810_v31 = vpop.f32.mrb[68].mxu0  ;;  %v7522_v0 = vld [vmem:[%s10676_s5 + $0x80] ss:$16 sps:$4 sm:$0xff]  }
 0x433   : > { %v6758_v9 = vadd.f32 %v3810_v31, %v2466_v47  ;;  %v3812_v55 = vpop.f32.mrb[69].mxu0 }
 0x434   : > { %v6759_v59 = vadd.f32 %v3812_v55, %v2466_v47  ;;  %v3814_v41 = vpop.f32.mrb[70].mxu0  ;;  %5656 = vmatprep.subr.bf16.mxu1 %v4248_v63  ;;  %v7523_v63 = vld [vmem:[%s10676_s5 + $0xa4] ss:$16 sps:$4 sm:$0xff]  }
 0x435   : > { %v6760_v45 = vadd.f32 %v3814_v41, %v2471_v44  ;;  %v3816_v62 = vpop.f32.mrb[71].mxu0  ;;  %5657 = vmatpush1.bf16.msra.mxu1 %v4247_v21  ;;  %v4027_v49 = vmax.f32 %v6758_v9, 0.0 }
 0x436   : > { %v6761_v10 = vadd.f32 %v3816_v62, %v2471_v44  ;;  %v4028_v30 = vmax.f32 %v6759_v59, 0.0 }
 0x437   : > { %v4029_v46 = vmax.f32 %v6760_v45, 0.0 }
 0x438   : > { %v4030_v24 = vmax.f32 %v6761_v10, 0.0  ;;  %5346 = vmatmul.mubr.bf16.gmra.mrb[4].mxu1 %v7513_v8  ;;  %v2506_v8 = vpop.permute.xlu0 %2505 }
 0x439   : > { %v4249_v36 = vpack.c.bf16 %v4029_v46, %v4027_v49  ;;  %5355 = vmatprep.mubr.bf16.mxu1 %v7514_v35  ;;  %v2511_v49 = vpop.permute.xlu1 %2510 }
 0x43a   : > { %v4250_v37 = vpack.c.bf16 %v4030_v24, %v4028_v30  ;;  %v3820_v58 = vpop.f32.mrb[72].mxu0  ;;  %v7525_v24 = vld [vmem:[%s10676_s5 + $0xa0] ss:$16 sps:$4 sm:$0xff]  }
 0x43b   : > { %v6762_v2 = vadd.f32 %v3820_v58, %v2476_v51  ;;  %v3822_v12 = vpop.f32.mrb[73].mxu0 }
 0x43c   : > { %v6763_v4 = vadd.f32 %v3822_v12, %v2476_v51  ;;  %v3824_v33 = vpop.f32.mrb[74].mxu0  ;;  %5658 = vmatprep.subr.bf16.mxu1 %v4250_v37  ;;  %v7526_v37 = vld [vmem:[%s10676_s5 + $0xc4] ss:$16 sps:$4 sm:$0xff]  }
 0x43d   : > { %v6764_v61 = vadd.f32 %v3824_v33, %v2481_v25  ;;  %v3826_v32 = vpop.f32.mrb[75].mxu0  ;;  %5659 = vmatpush1.bf16.msra.mxu1 %v4249_v36  ;;  %v4031_v26 = vmax.f32 %v6762_v2, 0.0 }
 0x43e   : > { %v6765_v56 = vadd.f32 %v3826_v32, %v2481_v25  ;;  %v4032_v19 = vmax.f32 %v6763_v4, 0.0 }
 0x43f   : > { %v4033_v42 = vmax.f32 %v6764_v61, 0.0 }
 0x440   : > { %v4034_v5 = vmax.f32 %v6765_v56, 0.0  ;;  %5356 = vmatmul.mubr.bf16.gmra.mrb[8].mxu1 %v7516_v6  ;;  %v2516_v6 = vpop.permute.xlu0 %2515 }
 0x441   : > { %v4251_v43 = vpack.c.bf16 %v4033_v42, %v4031_v26  ;;  %5365 = vmatprep.mubr.bf16.mxu1 %v7517_v18  ;;  %v2521_v26 = vpop.permute.xlu1 %2520 }
 0x442   : > { %v4252_v48 = vpack.c.bf16 %v4034_v5, %v4032_v19  ;;  %v3830_v54 = vpop.f32.mrb[76].mxu0  ;;  %v7528_v5 = vld [vmem:[%s10676_s5 + $0xc0] ss:$16 sps:$4 sm:$0xff]  }
 0x443   : > { %v6766_v53 = vadd.f32 %v3830_v54, %v2486_v22  ;;  %v3832_v14 = vpop.f32.mrb[77].mxu0 }
 0x444   : > { %v6767_v52 = vadd.f32 %v3832_v14, %v2486_v22  ;;  %v3834_v57 = vpop.f32.mrb[78].mxu0  ;;  %5660 = vmatprep.subr.bf16.mxu1 %v4252_v48  ;;  %v7529_v48 = vld [vmem:[%s10676_s5 + $0xe4] ss:$16 sps:$4 sm:$0xff]  }
 0x445   : > { %v6768_v34 = vadd.f32 %v3834_v57, %v2491_v17  ;;  %v3836_v29 = vpop.f32.mrb[79].mxu0  ;;  %5661 = vmatpush1.bf16.msra.mxu1 %v4251_v43  ;;  %v4035_v60 = vmax.f32 %v6766_v53, 0.0 }
 0x446   : > { %v6769_v16 = vadd.f32 %v3836_v29, %v2491_v17  ;;  %v4036_v11 = vmax.f32 %v6767_v52, 0.0 }
 0x447   : > { %v4037_v1 = vmax.f32 %v6768_v34, 0.0 }
 0x448   : > { %v4038_v15 = vmax.f32 %v6769_v16, 0.0  ;;  %5366 = vmatmul.mubr.bf16.gmra.mrb[12].mxu1 %v7519_v27  ;;  %v2526_v27 = vpop.permute.xlu0 %2525 }
 0x449   : > { %v4253_v7 = vpack.c.bf16 %v4037_v1, %v4035_v60  ;;  %5375 = vmatprep.mubr.bf16.mxu1 %v7520_v50  ;;  %v2531_v60 = vpop.permute.xlu1 %2530 }
 0x44a   : > { %v4254_v28 = vpack.c.bf16 %v4038_v15, %v4036_v11  ;;  %v3840_v38 = vpop.f32.mrb[80].mxu0  ;;  %v7531_v15 = vld [vmem:[%s10676_s5 + $0xe0] ss:$16 sps:$4 sm:$0xff]  }
 0x44b   : > { %v6770_v23 = vadd.f32 %v3840_v38, %v2496_v20  ;;  %v3842_v39 = vpop.f32.mrb[81].mxu0 }
 0x44c   : > { %v6771_v3 = vadd.f32 %v3842_v39, %v2496_v20  ;;  %v3844_v40 = vpop.f32.mrb[82].mxu0  ;;  %5662 = vmatprep.subr.bf16.mxu1 %v4254_v28  ;;  %v7532_v28 = vld [vmem:[%s10676_s5 + $0x104] ss:$16 sps:$4 sm:$0xff]  }
 0x44d   : > { %v6772_v21 = vadd.f32 %v3844_v40, %v2501_v13  ;;  %v3846_v47 = vpop.f32.mrb[83].mxu0  ;;  %5663 = vmatpush1.bf16.msra.mxu1 %v4253_v7  ;;  %v4039_v9 = vmax.f32 %v6770_v23, 0.0 }
 0x44e   : > { %v6773_v31 = vadd.f32 %v3846_v47, %v2501_v13  ;;  %v4040_v44 = vmax.f32 %v6771_v3, 0.0 }
 0x44f   : > { %v4041_v55 = vmax.f32 %v6772_v21, 0.0 }
 0x450   : > { %v4042_v59 = vmax.f32 %v6773_v31, 0.0  ;;  %5376 = vmatmul.mubr.bf16.gmra.mrb[16].mxu1 %v7522_v0  ;;  %v2536_v0 = vpop.permute.xlu0 %2535 }
 0x451   : > { %v4255_v41 = vpack.c.bf16 %v4041_v55, %v4039_v9  ;;  %5385 = vmatprep.mubr.bf16.mxu1 %v7523_v63  ;;  %v2541_v9 = vpop.permute.xlu1 %2540 }
 0x452   : > { %v4256_v45 = vpack.c.bf16 %v4042_v59, %v4040_v44  ;;  %v3850_v62 = vpop.f32.mrb[84].mxu0  ;;  %v7534_v59 = vld [vmem:[%s10676_s5 + $0x100] ss:$16 sps:$4 sm:$0xff]  }
 0x453   : > { %v6774_v35 = vadd.f32 %v3850_v62, %v2506_v8  ;;  %v3852_v10 = vpop.f32.mrb[85].mxu0 }
 0x454   : > { %v6775_v46 = vadd.f32 %v3852_v10, %v2506_v8  ;;  %v3854_v30 = vpop.f32.mrb[86].mxu0  ;;  %5664 = vmatprep.subr.bf16.mxu1 %v4256_v45  ;;  %v7535_v45 = vld [vmem:[%s10676_s5 + $0x124] ss:$16 sps:$4 sm:$0xff]  }
 0x455   : > { %v6776_v36 = vadd.f32 %v3854_v30, %v2511_v49  ;;  %v3856_v51 = vpop.f32.mrb[87].mxu0  ;;  %5665 = vmatpush1.bf16.msra.mxu1 %v4255_v41  ;;  %v4043_v2 = vmax.f32 %v6774_v35, 0.0 }
 0x456   : > { %v6777_v58 = vadd.f32 %v3856_v51, %v2511_v49  ;;  %v4044_v25 = vmax.f32 %v6775_v46, 0.0 }
 0x457   : > { %v4045_v12 = vmax.f32 %v6776_v36, 0.0 }
 0x458   : > { %v4046_v4 = vmax.f32 %v6777_v58, 0.0  ;;  %5386 = vmatmul.mubr.bf16.gmra.mrb[20].mxu1 %v7525_v24  ;;  %v2546_v24 = vpop.permute.xlu0 %2545 }
 0x459   : > { %v4257_v33 = vpack.c.bf16 %v4045_v12, %v4043_v2  ;;  %5395 = vmatprep.mubr.bf16.mxu1 %v7526_v37  ;;  %v2551_v2 = vpop.permute.xlu1 %2550 }
 0x45a   : > { %v4258_v61 = vpack.c.bf16 %v4046_v4, %v4044_v25  ;;  %v3860_v32 = vpop.f32.mrb[88].mxu0  ;;  %v7537_v4 = vld [vmem:[%s10676_s5 + $0x120] ss:$16 sps:$4 sm:$0xff]  }
 0x45b   : > { %v6778_v18 = vadd.f32 %v3860_v32, %v2516_v6  ;;  %v3862_v56 = vpop.f32.mrb[89].mxu0 }
 0x45c   : > { %v6779_v42 = vadd.f32 %v3862_v56, %v2516_v6  ;;  %v3864_v19 = vpop.f32.mrb[90].mxu0  ;;  %5666 = vmatprep.subr.bf16.mxu1 %v4258_v61  ;;  %v7538_v61 = vld [vmem:[%s10676_s5 + $0x144] ss:$16 sps:$4 sm:$0xff]  }
 0x45d   : > { %v6780_v43 = vadd.f32 %v3864_v19, %v2521_v26  ;;  %v3866_v22 = vpop.f32.mrb[91].mxu0  ;;  %5667 = vmatpush1.bf16.msra.mxu1 %v4257_v33  ;;  %v4047_v53 = vmax.f32 %v6778_v18, 0.0 }
 0x45e   : > { %v6781_v54 = vadd.f32 %v3866_v22, %v2521_v26  ;;  %v4048_v17 = vmax.f32 %v6779_v42, 0.0 }
 0x45f   : > { %v4049_v14 = vmax.f32 %v6780_v43, 0.0 }
 0x460   : > { %v4050_v52 = vmax.f32 %v6781_v54, 0.0  ;;  %5396 = vmatmul.mubr.bf16.gmra.mrb[24].mxu1 %v7528_v5  ;;  %v2556_v5 = vpop.permute.xlu0 %2555 }
 0x461   : > { %v4259_v57 = vpack.c.bf16 %v4049_v14, %v4047_v53  ;;  %5405 = vmatprep.mubr.bf16.mxu1 %v7529_v48  ;;  %v2561_v53 = vpop.permute.xlu1 %2560 }
 0x462   : > { %v4260_v34 = vpack.c.bf16 %v4050_v52, %v4048_v17  ;;  %v3870_v29 = vpop.f32.mrb[92].mxu0  ;;  %v7540_v52 = vld [vmem:[%s10676_s5 + $0x140] ss:$16 sps:$4 sm:$0xff]  }
 0x463   : > { %v6782_v50 = vadd.f32 %v3870_v29, %v2526_v27  ;;  %v3872_v16 = vpop.f32.mrb[93].mxu0 }
 0x464   : > { %v6783_v1 = vadd.f32 %v3872_v16, %v2526_v27  ;;  %v3874_v11 = vpop.f32.mrb[94].mxu0  ;;  %5668 = vmatprep.subr.bf16.mxu1 %v4260_v34  ;;  %v7541_v34 = vld [vmem:[%s10676_s5 + $0x164] ss:$16 sps:$4 sm:$0xff]  }
 0x465   : > { %v6784_v7 = vadd.f32 %v3874_v11, %v2531_v60  ;;  %v3876_v20 = vpop.f32.mrb[95].mxu0  ;;  %5669 = vmatpush1.bf16.msra.mxu1 %v4259_v57  ;;  %v4051_v23 = vmax.f32 %v6782_v50, 0.0 }
 0x466   : > { %v6785_v38 = vadd.f32 %v3876_v20, %v2531_v60  ;;  %v4052_v13 = vmax.f32 %v6783_v1, 0.0 }
 0x467   : > { %v4053_v39 = vmax.f32 %v6784_v7, 0.0 }
 0x468   : > { %v4054_v3 = vmax.f32 %v6785_v38, 0.0  ;;  %5406 = vmatmul.mubr.bf16.gmra.mrb[28].mxu1 %v7531_v15  ;;  %v2566_v15 = vpop.permute.xlu0 %2565 }
 0x469   : > { %v4261_v40 = vpack.c.bf16 %v4053_v39, %v4051_v23  ;;  %5415 = vmatprep.mubr.bf16.mxu1 %v7532_v28  ;;  %v2571_v23 = vpop.permute.xlu1 %2570 }
 0x46a   : > { %v4262_v21 = vpack.c.bf16 %v4054_v3, %v4052_v13  ;;  %v3880_v47 = vpop.f32.mrb[96].mxu0  ;;  %v7543_v3 = vld [vmem:[%s10676_s5 + $0x160] ss:$16 sps:$4 sm:$0xff]  }
 0x46b   : > { %v6786_v63 = vadd.f32 %v3880_v47, %v2536_v0  ;;  %v3882_v31 = vpop.f32.mrb[97].mxu0 }
 0x46c   : > { %v6787_v55 = vadd.f32 %v3882_v31, %v2536_v0  ;;  %v3884_v44 = vpop.f32.mrb[98].mxu0  ;;  %5670 = vmatprep.subr.bf16.mxu1 %v4262_v21  ;;  %v7544_v21 = vld [vmem:[%s10676_s5 + $0x184] ss:$16 sps:$4 sm:$0xff]  }
 0x46d   : > { %v6788_v41 = vadd.f32 %v3884_v44, %v2541_v9  ;;  %v3886_v8 = vpop.f32.mrb[99].mxu0  ;;  %5671 = vmatpush1.bf16.msra.mxu1 %v4261_v40  ;;  %v4055_v35 = vmax.f32 %v6786_v63, 0.0 }
 0x46e   : > { %v6789_v62 = vadd.f32 %v3886_v8, %v2541_v9  ;;  %v4056_v49 = vmax.f32 %v6787_v55, 0.0 }
 0x46f   : > { %v4057_v10 = vmax.f32 %v6788_v41, 0.0 }
 0x470   : > { %v4058_v46 = vmax.f32 %v6789_v62, 0.0  ;;  %5416 = vmatmul.mubr.bf16.gmra.mrb[32].mxu1 %v7534_v59  ;;  %v2576_v59 = vpop.permute.xlu0 %2575 }
 0x471   : > { %v4263_v30 = vpack.c.bf16 %v4057_v10, %v4055_v35  ;;  %5425 = vmatprep.mubr.bf16.mxu1 %v7535_v45  ;;  %v2581_v35 = vpop.permute.xlu1 %2580 }
 0x472   : > { %v4264_v36 = vpack.c.bf16 %v4058_v46, %v4056_v49  ;;  %v3890_v51 = vpop.f32.mrb[100].mxu0  ;;  %v7546_v46 = vld [vmem:[%s10676_s5 + $0x180] ss:$16 sps:$4 sm:$0xff]  }
 0x473   : > { %v6790_v37 = vadd.f32 %v3890_v51, %v2546_v24  ;;  %v3892_v58 = vpop.f32.mrb[101].mxu0 }
 0x474   : > { %v6791_v12 = vadd.f32 %v3892_v58, %v2546_v24  ;;  %v3894_v25 = vpop.f32.mrb[102].mxu0  ;;  %5672 = vmatprep.subr.bf16.mxu1 %v4264_v36  ;;  %v7547_v36 = vld [vmem:[%s10676_s5 + $0x1a4] ss:$16 sps:$4 sm:$0xff]  }
 0x475   : > { %v6792_v33 = vadd.f32 %v3894_v25, %v2551_v2  ;;  %v3896_v6 = vpop.f32.mrb[103].mxu0  ;;  %5673 = vmatpush1.bf16.msra.mxu1 %v4263_v30  ;;  %v4059_v18 = vmax.f32 %v6790_v37, 0.0 }
 0x476   : > { %v6793_v32 = vadd.f32 %v3896_v6, %v2551_v2  ;;  %v4060_v26 = vmax.f32 %v6791_v12, 0.0 }
 0x477   : > { %v4061_v56 = vmax.f32 %v6792_v33, 0.0 }
 0x478   : > { %v4062_v42 = vmax.f32 %v6793_v32, 0.0  ;;  %5426 = vmatmul.mubr.bf16.gmra.mrb[36].mxu1 %v7537_v4  ;;  %v2586_v4 = vpop.permute.xlu0 %2585 }
 0x479   : > { %v4265_v19 = vpack.c.bf16 %v4061_v56, %v4059_v18  ;;  %5435 = vmatprep.mubr.bf16.mxu1 %v7538_v61  ;;  %v2591_v18 = vpop.permute.xlu1 %2590 }
 0x47a   : > { %v4266_v43 = vpack.c.bf16 %v4062_v42, %v4060_v26  ;;  %v3900_v22 = vpop.f32.mrb[104].mxu0  ;;  %v7549_v42 = vld [vmem:[%s10676_s5 + $0x1a0] ss:$16 sps:$4 sm:$0xff]  }
 0x47b   : > { %v6794_v48 = vadd.f32 %v3900_v22, %v2556_v5  ;;  %v3902_v54 = vpop.f32.mrb[105].mxu0 }
 0x47c   : > { %v6795_v14 = vadd.f32 %v3902_v54, %v2556_v5  ;;  %v3904_v17 = vpop.f32.mrb[106].mxu0  ;;  %5674 = vmatprep.subr.bf16.mxu1 %v4266_v43  ;;  %v7550_v43 = vld [vmem:[%s10676_s5 + $0x1c4] ss:$16 sps:$4 sm:$0xff]  }
 0x47d   : > { %v6796_v57 = vadd.f32 %v3904_v17, %v2561_v53  ;;  %v3906_v27 = vpop.f32.mrb[107].mxu0  ;;  %5675 = vmatpush1.bf16.msra.mxu1 %v4265_v19  ;;  %v4063_v50 = vmax.f32 %v6794_v48, 0.0 }
 0x47e   : > { %v6797_v29 = vadd.f32 %v3906_v27, %v2561_v53  ;;  %v4064_v60 = vmax.f32 %v6795_v14, 0.0 }
 0x47f   : > { %v4065_v16 = vmax.f32 %v6796_v57, 0.0 }
 0x480   : > { %v4066_v1 = vmax.f32 %v6797_v29, 0.0  ;;  %5436 = vmatmul.mubr.bf16.gmra.mrb[40].mxu1 %v7540_v52  ;;  %v2596_v52 = vpop.permute.xlu0 %2595 }
 0x481   : > { %v4267_v11 = vpack.c.bf16 %v4065_v16, %v4063_v50  ;;  %5445 = vmatprep.mubr.bf16.mxu1 %v7541_v34  ;;  %v2601_v50 = vpop.permute.xlu1 %2600 }
 0x482   : > { %v4268_v7 = vpack.c.bf16 %v4066_v1, %v4064_v60  ;;  %v3910_v20 = vpop.f32.mrb[108].mxu0  ;;  %v7552_v1 = vld [vmem:[%s10676_s5 + $0x1c0] ss:$16 sps:$4 sm:$0xff]  }
 0x483   : > { %v6798_v28 = vadd.f32 %v3910_v20, %v2566_v15  ;;  %v3912_v38 = vpop.f32.mrb[109].mxu0 }
 0x484   : > { %v6799_v39 = vadd.f32 %v3912_v38, %v2566_v15  ;;  %v3914_v13 = vpop.f32.mrb[110].mxu0  ;;  %5676 = vmatprep.subr.bf16.mxu1 %v4268_v7  ;;  %v7553_v7 = vld [vmem:[%s10676_s5 + $0x1e4] ss:$16 sps:$4 sm:$0xff]  }
 0x485   : > { %v6800_v40 = vadd.f32 %v3914_v13, %v2571_v23  ;;  %v3916_v0 = vpop.f32.mrb[111].mxu0  ;;  %5677 = vmatpush1.bf16.msra.mxu1 %v4267_v11  ;;  %v4067_v63 = vmax.f32 %v6798_v28, 0.0 }
 0x486   : > { %v6801_v47 = vadd.f32 %v3916_v0, %v2571_v23  ;;  %v4068_v9 = vmax.f32 %v6799_v39, 0.0 }
 0x487   : > { %v4069_v31 = vmax.f32 %v6800_v40, 0.0 }
 0x488   : > { %v4070_v55 = vmax.f32 %v6801_v47, 0.0  ;;  %5446 = vmatmul.mubr.bf16.gmra.mrb[44].mxu1 %v7543_v3  ;;  %v2606_v3 = vpop.permute.xlu0 %2605 }
 0x489   : > { %v4269_v44 = vpack.c.bf16 %v4069_v31, %v4067_v63  ;;  %5455 = vmatprep.mubr.bf16.mxu1 %v7544_v21  ;;  %v2611_v63 = vpop.permute.xlu1 %2610 }
 0x48a   : > { %v4270_v41 = vpack.c.bf16 %v4070_v55, %v4068_v9  ;;  %v3920_v8 = vpop.f32.mrb[112].mxu0  ;;  %v7555_v55 = vld [vmem:[%s10676_s5 + $0x1e0] ss:$16 sps:$4 sm:$0xff]  }
 0x48b   : > { %v6802_v45 = vadd.f32 %v3920_v8, %v2576_v59  ;;  %v3922_v62 = vpop.f32.mrb[113].mxu0 }
 0x48c   : > { %v6803_v10 = vadd.f32 %v3922_v62, %v2576_v59  ;;  %v3924_v49 = vpop.f32.mrb[114].mxu0  ;;  %5678 = vmatprep.subr.bf16.mxu1 %v4270_v41  ;;  %v7556_v41 = vld [vmem:[%s10676_s5 + $0x204] ss:$16 sps:$4 sm:$0xff]  }
 0x48d   : > { %v6804_v30 = vadd.f32 %v3924_v49, %v2581_v35  ;;  %v3926_v24 = vpop.f32.mrb[115].mxu0  ;;  %5679 = vmatpush1.bf16.msra.mxu1 %v4269_v44  ;;  %v4071_v37 = vmax.f32 %v6802_v45, 0.0 }
 0x48e   : > { %v6805_v51 = vadd.f32 %v3926_v24, %v2581_v35  ;;  %v4072_v2 = vmax.f32 %v6803_v10, 0.0  ;;  %v7559_v24 = vld [vmem:[%s10676_s5 + $0x224] ss:$16 sps:$4 sm:$0xff]  }
 0x48f   : > { %v4073_v58 = vmax.f32 %v6804_v30, 0.0  ;;  %v7558_v30 = vld [vmem:[%s10676_s5 + $0x200] ss:$16 sps:$4 sm:$0xff]  }
 0x490   : > { %v4074_v12 = vmax.f32 %v6805_v51, 0.0  ;;  %5456 = vmatmul.mubr.bf16.gmra.mrb[48].mxu1 %v7546_v46  ;;  %v7562_v51 = vld [vmem:[%s10676_s5 + $0x244] ss:$16 sps:$4 sm:$0xff]  }
 0x491   : > { %v4271_v25 = vpack.c.bf16 %v4073_v58, %v4071_v37  ;;  %5465 = vmatprep.mubr.bf16.mxu1 %v7547_v36  ;;  %v7561_v36 = vld [vmem:[%s10676_s5 + $0x220] ss:$16 sps:$4 sm:$0xff]   ;;  %v7565_v58 = vld [vmem:[%s10676_s5 + $0x264] ss:$16 sps:$4 sm:$0xff]  }
 0x492   : > { %v4272_v33 = vpack.c.bf16 %v4074_v12, %v4072_v2  ;;  %v3930_v6 = vpop.f32.mrb[116].mxu0  ;;  %v7564_v37 = vld [vmem:[%s10676_s5 + $0x240] ss:$16 sps:$4 sm:$0xff]   ;;  %v7568_v12 = vld [vmem:[%s10676_s5 + $0x284] ss:$16 sps:$4 sm:$0xff]  }
 0x493   : > { %v6806_v61 = vadd.f32 %v3930_v6, %v2586_v4  ;;  %v3932_v32 = vpop.f32.mrb[117].mxu0  ;;  %v7567_v2 = vld [vmem:[%s10676_s5 + $0x260] ss:$16 sps:$4 sm:$0xff]   ;;  %v7574_v6 = vld [vmem:[%s10676_s5 + $0x2c4] ss:$16 sps:$4 sm:$0xff]  }
 0x494   : > { %v6807_v56 = vadd.f32 %v3932_v32, %v2586_v4  ;;  %v3934_v26 = vpop.f32.mrb[118].mxu0  ;;  %5680 = vmatprep.subr.bf16.mxu1 %v4272_v33  ;;  %v7571_v4 = vld [vmem:[%s10676_s5 + $0x2a4] ss:$16 sps:$4 sm:$0xff]   ;;  %v7573_v33 = vld [vmem:[%s10676_s5 + $0x2a0] ss:$16 sps:$4 sm:$0xff]  }
 0x495   : > { %v6808_v19 = vadd.f32 %v3934_v26, %v2591_v18  ;;  %v3936_v5 = vpop.f32.mrb[119].mxu0  ;;  %5681 = vmatpush1.bf16.msra.mxu1 %v4271_v25  ;;  %v4075_v48 = vmax.f32 %v6806_v61, 0.0  ;;  %v7570_v25 = vld [vmem:[%s10676_s5 + $0x280] ss:$16 sps:$4 sm:$0xff]   ;;  %v7577_v32 = vld [vmem:[%s10676_s5 + $0x2e4] ss:$16 sps:$4 sm:$0xff]  }
 0x496   : > { %v6809_v22 = vadd.f32 %v3936_v5, %v2591_v18  ;;  %v4076_v53 = vmax.f32 %v6807_v56, 0.0  ;;  %v7576_v61 = vld [vmem:[%s10676_s5 + $0x2c0] ss:$16 sps:$4 sm:$0xff]   ;;  %v7580_v56 = vld [vmem:[%s10676_s5 + $0x304] ss:$16 sps:$4 sm:$0xff]  }
 0x497   : > { %v4077_v54 = vmax.f32 %v6808_v19, 0.0  ;;  %v7579_v18 = vld [vmem:[%s10676_s5 + $0x2e0] ss:$16 sps:$4 sm:$0xff]   ;;  %v7586_v5 = vld [vmem:[%s10676_s5 + $0x344] ss:$16 sps:$4 sm:$0xff]  }
 0x498   : > { %v4078_v14 = vmax.f32 %v6809_v22, 0.0  ;;  %5466 = vmatmul.mubr.bf16.gmra.mrb[52].mxu1 %v7549_v42  ;;  %v7582_v26 = vld [vmem:[%s10676_s5 + $0x300] ss:$16 sps:$4 sm:$0xff]   ;;  %v7583_v42 = vld [vmem:[%s10676_s5 + $0x324] ss:$16 sps:$4 sm:$0xff]  }
 0x499   : > { %v4273_v17 = vpack.c.bf16 %v4077_v54, %v4075_v48  ;;  %5475 = vmatprep.mubr.bf16.mxu1 %v7550_v43  ;;  %v7585_v19 = vld [vmem:[%s10676_s5 + $0x320] ss:$16 sps:$4 sm:$0xff]   ;;  %v7589_v22 = vld [vmem:[%s10676_s5 + $0x364] ss:$16 sps:$4 sm:$0xff]  }
 0x49a   : > { %v4274_v57 = vpack.c.bf16 %v4078_v14, %v4076_v53  ;;  %v3940_v27 = vpop.f32.mrb[120].mxu0  ;;  %v7588_v43 = vld [vmem:[%s10676_s5 + $0x340] ss:$16 sps:$4 sm:$0xff]   ;;  %v7592_v54 = vld [vmem:[%s10676_s5 + $0x384] ss:$16 sps:$4 sm:$0xff]  }
 0x49b   : > { %v6810_v34 = vadd.f32 %v3940_v27, %v2596_v52  ;;  %v3942_v29 = vpop.f32.mrb[121].mxu0  ;;  %v7591_v48 = vld [vmem:[%s10676_s5 + $0x360] ss:$16 sps:$4 sm:$0xff]   ;;  %v7595_v14 = vld [vmem:[%s10676_s5 + $0x3a4] ss:$16 sps:$4 sm:$0xff]  }
 0x49c   : > { %v6811_v16 = vadd.f32 %v3942_v29, %v2596_v52  ;;  %v3944_v60 = vpop.f32.mrb[122].mxu0  ;;  %5682 = vmatprep.subr.bf16.mxu1 %v4274_v57  ;;  %v7594_v53 = vld [vmem:[%s10676_s5 + $0x380] ss:$16 sps:$4 sm:$0xff]   ;;  %v7598_v52 = vld [vmem:[%s10676_s5 + $0x3c4] ss:$16 sps:$4 sm:$0xff]  }
 0x49d   : > { %v6812_v11 = vadd.f32 %v3944_v60, %v2601_v50  ;;  %v3946_v15 = vpop.f32.mrb[123].mxu0  ;;  %5683 = vmatpush1.bf16.msra.mxu1 %v4273_v17  ;;  %v4079_v28 = vmax.f32 %v6810_v34, 0.0  ;;  %v7597_v17 = vld [vmem:[%s10676_s5 + $0x3a0] ss:$16 sps:$4 sm:$0xff]   ;;  %v7601_v27 = vld [vmem:[%s10676_s5 + $0x3e4] ss:$16 sps:$4 sm:$0xff]  }
 0x49e   : > { %v6813_v20 = vadd.f32 %v3946_v15, %v2601_v50  ;;  %v4080_v23 = vmax.f32 %v6811_v16, 0.0  ;;  %v7600_v57 = vld [vmem:[%s10676_s5 + $0x3c0] ss:$16 sps:$4 sm:$0xff]   ;;  %v7606_v29 = vld [vmem:[%s10676_s5 + $0xc] ss:$16 sps:$4 sm:$0xff]  }
 0x49f   : > { %v4081_v38 = vmax.f32 %v6812_v11, 0.0  ;;  %v7603_v34 = vld [vmem:[%s10676_s5 + $0x3e0] ss:$16 sps:$4 sm:$0xff]   ;;  %v7604_v50 = vld [vmem:[%s10676_s5 + $0x8] ss:$16 sps:$4 sm:$0xff]  }
 0x4a0   : > { %v4082_v39 = vmax.f32 %v6813_v20, 0.0  ;;  %5476 = vmatmul.mubr.bf16.gmra.mrb[56].mxu1 %v7552_v1  ;;  %v7607_v16 = vld [vmem:[%s10676_s5 + $0x2c] ss:$16 sps:$4 sm:$0xff]   ;;  %v7609_v60 = vld [vmem:[%s10676_s5 + $0x28] ss:$16 sps:$4 sm:$0xff]  }
 0x4a1   : > { %v4275_v13 = vpack.c.bf16 %v4081_v38, %v4079_v28  ;;  %5485 = vmatprep.mubr.bf16.mxu1 %v7553_v7  ;;  %v7610_v1 = vld [vmem:[%s10676_s5 + $0x4c] ss:$16 sps:$4 sm:$0xff]   ;;  %v7612_v11 = vld [vmem:[%s10676_s5 + $0x48] ss:$16 sps:$4 sm:$0xff]  }
 0x4a2   : > { %v4276_v40 = vpack.c.bf16 %v4082_v39, %v4080_v23  ;;  %v3950_v0 = vpop.f32.mrb[124].mxu0  ;;  %v7613_v15 = vld [vmem:[%s10676_s5 + $0x6c] ss:$16 sps:$4 sm:$0xff]   ;;  %v7615_v7 = vld [vmem:[%s10676_s5 + $0x68] ss:$16 sps:$4 sm:$0xff]  }
 0x4a3   : > { %v6814_v21 = vadd.f32 %v3950_v0, %v2606_v3  ;;  %v3952_v47 = vpop.f32.mrb[125].mxu0  ;;  %v7616_v20 = vld [vmem:[%s10676_s5 + $0x8c] ss:$16 sps:$4 sm:$0xff]   ;;  %v7618_v28 = vld [vmem:[%s10676_s5 + $0x88] ss:$16 sps:$4 sm:$0xff]  }
 0x4a4   : > { %v6815_v31 = vadd.f32 %v3952_v47, %v2606_v3  ;;  %v3954_v9 = vpop.f32.mrb[126].mxu0  ;;  %5684 = vmatprep.subr.bf16.mxu1 %v4276_v40  ;;  %v7619_v38 = vld [vmem:[%s10676_s5 + $0xac] ss:$16 sps:$4 sm:$0xff]   ;;  %v7621_v23 = vld [vmem:[%s10676_s5 + $0xa8] ss:$16 sps:$4 sm:$0xff]  }
 0x4a5   : > { %v6816_v44 = vadd.f32 %v3954_v9, %v2611_v63  ;;  %v3956_v59 = vpop.f32.mrb[127].mxu0  ;;  %5685 = vmatpush1.bf16.msra.mxu1 %v4275_v13  ;;  %v4083_v45 = vmax.f32 %v6814_v21, 0.0  ;;  %v7622_v39 = vld [vmem:[%s10676_s5 + $0xcc] ss:$16 sps:$4 sm:$0xff]   ;;  %v7624_v13 = vld [vmem:[%s10676_s5 + $0xc8] ss:$16 sps:$4 sm:$0xff]  }
 0x4a6   : > { %v6817_v8 = vadd.f32 %v3956_v59, %v2611_v63  ;;  %v4084_v35 = vmax.f32 %v6815_v31, 0.0  ;;  %v7625_v3 = vld [vmem:[%s10676_s5 + $0xec] ss:$16 sps:$4 sm:$0xff]   ;;  %v7627_v40 = vld [vmem:[%s10676_s5 + $0xe8] ss:$16 sps:$4 sm:$0xff]  }
 0x4a7   : > { %v4085_v62 = vmax.f32 %v6816_v44, 0.0  ;;  %v7628_v0 = vld [vmem:[%s10676_s5 + $0x10c] ss:$16 sps:$4 sm:$0xff]   ;;  %v7630_v21 = vld [vmem:[%s10676_s5 + $0x108] ss:$16 sps:$4 sm:$0xff]  }
 0x4a8   : > { %v4086_v10 = vmax.f32 %v6817_v8, 0.0  ;;  %5486 = vmatmul.mubr.bf16.gmra.mrb[60].mxu1 %v7555_v55  ;;  %v7631_v47 = vld [vmem:[%s10676_s5 + $0x12c] ss:$16 sps:$4 sm:$0xff]   ;;  %v7633_v63 = vld [vmem:[%s10676_s5 + $0x128] ss:$16 sps:$4 sm:$0xff]  }
 0x4a9   : > { %v4277_v49 = vpack.c.bf16 %v4085_v62, %v4083_v45  ;;  %5495 = vmatprep.mubr.bf16.mxu1 %v7556_v41  ;;  %v7634_v31 = vld [vmem:[%s10676_s5 + $0x14c] ss:$16 sps:$4 sm:$0xff]   ;;  %v7636_v9 = vld [vmem:[%s10676_s5 + $0x148] ss:$16 sps:$4 sm:$0xff]  }
 0x4aa   : > { %v4278_v46 = vpack.c.bf16 %v4086_v10, %v4084_v35  ;;  %v7637_v55 = vld [vmem:[%s10676_s5 + $0x16c] ss:$16 sps:$4 sm:$0xff]   ;;  %v7639_v44 = vld [vmem:[%s10676_s5 + $0x168] ss:$16 sps:$4 sm:$0xff]  }
 0x4ab   : > { %v7640_v59 = vld [vmem:[%s10676_s5 + $0x18c] ss:$16 sps:$4 sm:$0xff]   ;;  %v7642_v41 = vld [vmem:[%s10676_s5 + $0x188] ss:$16 sps:$4 sm:$0xff]  }
 0x4ac   : > { %5686 = vmatprep.subr.bf16.mxu1 %v4278_v46  ;;  %v7643_v8 = vld [vmem:[%s10676_s5 + $0x1ac] ss:$16 sps:$4 sm:$0xff]   ;;  %v7645_v45 = vld [vmem:[%s10676_s5 + $0x1a8] ss:$16 sps:$4 sm:$0xff]  }
 0x4ad   : > { %5687 = vmatpush1.bf16.msra.mxu1 %v4277_v49  ;;  %v7646_v62 = vld [vmem:[%s10676_s5 + $0x1cc] ss:$16 sps:$4 sm:$0xff]   ;;  %v7648_v35 = vld [vmem:[%s10676_s5 + $0x1c8] ss:$16 sps:$4 sm:$0xff]  }
 0x4ae   : > { %v7649_v10 = vld [vmem:[%s10676_s5 + $0x1ec] ss:$16 sps:$4 sm:$0xff]   ;;  %v7651_v49 = vld [vmem:[%s10676_s5 + $0x1e8] ss:$16 sps:$4 sm:$0xff]  }
 0x4af   : > { %v7652_v46 = vld [vmem:[%s10676_s5 + $0x20c] ss:$16 sps:$4 sm:$0xff]  }
 0x4b0   : > { %5496 = vmatmul.mubr.bf16.gmra.mrb[64].mxu1 %v7558_v30  ;;  %v7654_v30 = vld [vmem:[%s10676_s5 + $0x208] ss:$16 sps:$4 sm:$0xff]  }
 0x4b1   : > { %5505 = vmatprep.mubr.bf16.mxu1 %v7559_v24  ;;  %v7655_v24 = vld [vmem:[%s10676_s5 + $0x22c] ss:$16 sps:$4 sm:$0xff]  }
 0x4b8   : > { %5506 = vmatmul.mubr.bf16.gmra.mrb[68].mxu1 %v7561_v36  ;;  %v7657_v36 = vld [vmem:[%s10676_s5 + $0x228] ss:$16 sps:$4 sm:$0xff]  }
 0x4b9   : > { %5515 = vmatprep.mubr.bf16.mxu1 %v7562_v51  ;;  %v7658_v51 = vld [vmem:[%s10676_s5 + $0x24c] ss:$16 sps:$4 sm:$0xff]  }
 0x4c0   : > { %5516 = vmatmul.mubr.bf16.gmra.mrb[72].mxu1 %v7564_v37  ;;  %v7660_v37 = vld [vmem:[%s10676_s5 + $0x248] ss:$16 sps:$4 sm:$0xff]  }
 0x4c1   : > { %5525 = vmatprep.mubr.bf16.mxu1 %v7565_v58  ;;  %v7661_v58 = vld [vmem:[%s10676_s5 + $0x26c] ss:$16 sps:$4 sm:$0xff]  }
 0x4c8   : > { %5526 = vmatmul.mubr.bf16.gmra.mrb[76].mxu1 %v7567_v2  ;;  %v7663_v2 = vld [vmem:[%s10676_s5 + $0x268] ss:$16 sps:$4 sm:$0xff]  }
 0x4c9   : > { %5535 = vmatprep.mubr.bf16.mxu1 %v7568_v12  ;;  %v7664_v12 = vld [vmem:[%s10676_s5 + $0x28c] ss:$16 sps:$4 sm:$0xff]  }
 0x4d0   : > { %5536 = vmatmul.mubr.bf16.gmra.mrb[80].mxu1 %v7570_v25  ;;  %v4346_v25 = vpop.permute.xlu0 %4345 }
 0x4d1   : > { %5545 = vmatprep.mubr.bf16.mxu1 %v7571_v4  ;;  %v4351_v4 = vpop.permute.xlu1 %4350 }
 0x4d8   : > { %5546 = vmatmul.mubr.bf16.gmra.mrb[84].mxu1 %v7573_v33  ;;  %v7666_v33 = vld [vmem:[%s10676_s5 + $0x288] ss:$16 sps:$4 sm:$0xff]  }
 0x4d9   : > { %5555 = vmatprep.mubr.bf16.mxu1 %v7574_v6  ;;  %v10343_v6 = vpop.permute.xlu0 %4505 }
 0x4e0   : > { %5556 = vmatmul.mubr.bf16.gmra.mrb[88].mxu1 %v7576_v61  ;;  %v7667_v61 = vld [vmem:[%s10676_s5 + $0x2ac] ss:$16 sps:$4 sm:$0xff]  }
 0x4e1   : > { %5565 = vmatprep.mubr.bf16.mxu1 %v7577_v32  ;;  %v10348_v32 = vpop.permute.xlu1 %4510 }
 0x4e8   : > { %5566 = vmatmul.mubr.bf16.gmra.mrb[92].mxu1 %v7579_v18  ;;  %v10350_v18 = vpop.permute.xlu0 %4355 }
 0x4e9   : > { %5575 = vmatprep.mubr.bf16.mxu1 %v7580_v56  ;;  %v7669_v56 = vld [vmem:[%s10676_s5 + $0x2a8] ss:$16 sps:$4 sm:$0xff]  }
 0x4f0   : > { %5576 = vmatmul.mubr.bf16.gmra.mrb[96].mxu1 %v7582_v26  ;;  %v10355_v26 = vpop.permute.xlu1 %4360 }
 0x4f1   : > { %5585 = vmatprep.mubr.bf16.mxu1 %v7583_v42  ;;  %v7670_v42 = vld [vmem:[%s10676_s5 + $0x2cc] ss:$16 sps:$4 sm:$0xff]  }
 0x4f8   : > { %5586 = vmatmul.mubr.bf16.gmra.mrb[100].mxu1 %v7585_v19  ;;  %v10360_v19 = vpop.permute.xlu0 %4515 }
 0x4f9   : > { %5595 = vmatprep.mubr.bf16.mxu1 %v7586_v5  ;;  %v10362_v5 = vpop.permute.xlu1 %4520 }
 0x500   : > { %5596 = vmatmul.mubr.bf16.gmra.mrb[104].mxu1 %v7588_v43  ;;  %v7672_v43 = vld [vmem:[%s10676_s5 + $0x2c8] ss:$16 sps:$4 sm:$0xff]  }
 0x501   : > { %5605 = vmatprep.mubr.bf16.mxu1 %v7589_v22  ;;  %v7673_v22 = vld [vmem:[%s10676_s5 + $0x2ec] ss:$16 sps:$4 sm:$0xff]  }
 0x508   : > { %5606 = vmatmul.mubr.bf16.gmra.mrb[108].mxu1 %v7591_v48  ;;  %v10370_v48 = vpop.permute.xlu0 %4365 }
 0x509   : > { %5615 = vmatprep.mubr.bf16.mxu1 %v7592_v54  ;;  %v10372_v54 = vpop.permute.xlu1 %4370 }
 0x510   : > { %5616 = vmatmul.mubr.bf16.gmra.mrb[112].mxu1 %v7594_v53  ;;  %v7675_v53 = vld [vmem:[%s10676_s5 + $0x2e8] ss:$16 sps:$4 sm:$0xff]  }
 0x511   : > { %5625 = vmatprep.mubr.bf16.mxu1 %v7595_v14  ;;  %v10377_v14 = vpop.permute.xlu0 %4525 }
 0x518   : > { %5626 = vmatmul.mubr.bf16.gmra.mrb[116].mxu1 %v7597_v17  ;;  %v7676_v17 = vld [vmem:[%s10676_s5 + $0x30c] ss:$16 sps:$4 sm:$0xff]  }
 0x519   : > { %5635 = vmatprep.mubr.bf16.mxu1 %v7598_v52  ;;  %v10382_v52 = vpop.permute.xlu1 %4530 }
 0x520   : > { %5636 = vmatmul.mubr.bf16.gmra.mrb[120].mxu1 %v7600_v57  ;;  %v10384_v57 = vpop.permute.xlu0 %4375 }
 0x521   : > { %5645 = vmatprep.mubr.bf16.mxu1 %v7601_v27  ;;  %v7678_v27 = vld [vmem:[%s10676_s5 + $0x308] ss:$16 sps:$4 sm:$0xff]  }
 0x528   : > { %5646 = vmatmul.mubr.bf16.gmra.mrb[124].mxu1 %v7603_v34  ;;  %v10389_v34 = vpop.permute.xlu1 %4380 }
 0x529   : > { %5688 = vmatprep.mubr.bf16.mxu1 %v7606_v29  ;;  %v7679_v29 = vld [vmem:[%s10676_s5 + $0x32c] ss:$16 sps:$4 sm:$0xff]  }
 0x530   : > { %5689 = vmatmul.mubr.bf16.vlgmr.msra.gmra.mrb[0].mxu1 %v7604_v50  ;;  %v10394_v50 = vpop.permute.xlu0 %4535 }
 0x531   : > { %5698 = vmatprep.mubr.bf16.mxu1 %v7607_v16  ;;  %v10396_v16 = vpop.permute.xlu1 %4540 }
 0x538   : > { %5699 = vmatmul.mubr.bf16.gmra.mrb[4].mxu1 %v7609_v60  ;;  %v7681_v60 = vld [vmem:[%s10676_s5 + $0x328] ss:$16 sps:$4 sm:$0xff]  }
 0x539   : > { %5708 = vmatprep.mubr.bf16.mxu1 %v7610_v1  ;;  %v7682_v1 = vld [vmem:[%s10676_s5 + $0x34c] ss:$16 sps:$4 sm:$0xff]  }
 0x540   : > { %5709 = vmatmul.mubr.bf16.gmra.mrb[8].mxu1 %v7612_v11  ;;  %v10404_v11 = vpop.permute.xlu0 %4385 }
 0x541   : > { %5718 = vmatprep.mubr.bf16.mxu1 %v7613_v15  ;;  %v10406_v15 = vpop.permute.xlu1 %4390 }
 0x548   : > { %5719 = vmatmul.mubr.bf16.gmra.mrb[12].mxu1 %v7615_v7  ;;  %v7684_v7 = vld [vmem:[%s10676_s5 + $0x348] ss:$16 sps:$4 sm:$0xff]  }
 0x549   : > { %5728 = vmatprep.mubr.bf16.mxu1 %v7616_v20  ;;  %v10411_v20 = vpop.permute.xlu0 %4545 }
 0x550   : > { %5729 = vmatmul.mubr.bf16.gmra.mrb[16].mxu1 %v7618_v28  ;;  %v7685_v28 = vld [vmem:[%s10676_s5 + $0x36c] ss:$16 sps:$4 sm:$0xff]  }
 0x551   : > { %5738 = vmatprep.mubr.bf16.mxu1 %v7619_v38  ;;  %v10416_v38 = vpop.permute.xlu1 %4550 }
 0x558   : > { %5739 = vmatmul.mubr.bf16.gmra.mrb[20].mxu1 %v7621_v23  ;;  %v10418_v23 = vpop.permute.xlu0 %4395 }
 0x559   : > { %5748 = vmatprep.mubr.bf16.mxu1 %v7622_v39 }
 0x560   : > { %5749 = vmatmul.mubr.bf16.gmra.mrb[24].mxu1 %v7624_v13 }
 0x561   : > { %5758 = vmatprep.mubr.bf16.mxu1 %v7625_v3 }
 0x568   : > { %5759 = vmatmul.mubr.bf16.gmra.mrb[28].mxu1 %v7627_v40  ;;  %v7687_v40 = vld [vmem:[%s10676_s5 + $0x368] ss:$16 sps:$4 sm:$0xff]  }
 0x569   : > { %5768 = vmatprep.mubr.bf16.mxu1 %v7628_v0  ;;  %v10423_v0 = vpop.permute.xlu1 %4400 }
 0x570   : > { %5769 = vmatmul.mubr.bf16.gmra.mrb[32].mxu1 %v7630_v21 }
 0x571   : > { %5778 = vmatprep.mubr.bf16.mxu1 %v7631_v47 }
 0x578   : > { %5779 = vmatmul.mubr.bf16.gmra.mrb[36].mxu1 %v7633_v63  ;;  %v7688_v63 = vld [vmem:[%s10676_s5 + $0x38c] ss:$16 sps:$4 sm:$0xff]  }
 0x579   : > { %5788 = vmatprep.mubr.bf16.mxu1 %v7634_v31 }
 0x580   : > { %5789 = vmatmul.mubr.bf16.gmra.mrb[40].mxu1 %v7636_v9 }
 0x581   : > { %5798 = vmatprep.mubr.bf16.mxu1 %v7637_v55 }
 0x588   : > { %5799 = vmatmul.mubr.bf16.gmra.mrb[44].mxu1 %v7639_v44 }
 0x589   : > { %5808 = vmatprep.mubr.bf16.mxu1 %v7640_v59 }
 0x590   : > { %5809 = vmatmul.mubr.bf16.gmra.mrb[48].mxu1 %v7642_v41  ;;  %v10428_v41 = vpop.permute.xlu0 %4555 }
 0x591   : > { %5818 = vmatprep.mubr.bf16.mxu1 %v7643_v8 }
 0x598   : > { %5819 = vmatmul.mubr.bf16.gmra.mrb[52].mxu1 %v7645_v45 }
 0x599   : > { %5828 = vmatprep.mubr.bf16.mxu1 %v7646_v62 }
 0x5a0   : > { %5829 = vmatmul.mubr.bf16.gmra.mrb[56].mxu1 %v7648_v35  ;;  %v10430_v35 = vpop.permute.xlu1 %4560 }
 0x5a1   : > { %5838 = vmatprep.mubr.bf16.mxu1 %v7649_v10 }
 0x5a8   : > { %5839 = vmatmul.mubr.bf16.gmra.mrb[60].mxu1 %v7651_v49 }
 0x5a9   : > { %5848 = vmatprep.mubr.bf16.mxu1 %v7652_v46 }
 0x5b0   : > { %5849 = vmatmul.mubr.bf16.gmra.mrb[64].mxu1 %v7654_v30 }
 0x5b1   : > { %5858 = vmatprep.mubr.bf16.mxu1 %v7655_v24  ;;  %v7690_v24 = vld [vmem:[%s10676_s5 + $0x388] ss:$16 sps:$4 sm:$0xff]  }
 0x5b8   : > { %5859 = vmatmul.mubr.bf16.gmra.mrb[68].mxu1 %v7657_v36 }
 0x5b9   : > { %5868 = vmatprep.mubr.bf16.mxu1 %v7658_v51 }
 0x5c0   : > { %5869 = vmatmul.mubr.bf16.gmra.mrb[72].mxu1 %v7660_v37  ;;  %v7691_v37 = vld [vmem:[%s10676_s5 + $0x3ac] ss:$16 sps:$4 sm:$0xff]  }
 0x5c1   : > { %5878 = vmatprep.mubr.bf16.mxu1 %v7661_v58 }
 0x5c8   : > { %5879 = vmatmul.mubr.bf16.gmra.mrb[76].mxu1 %v7663_v2 }
 0x5c9   : > { %5888 = vmatprep.mubr.bf16.mxu1 %v7664_v12  ;;  %v10441_v12 = vpop.permute.xlu0 %4405 }
 0x5d0   : > { %5889 = vmatmul.mubr.bf16.gmra.mrb[80].mxu1 %v7666_v33 }
 0x5d1   : > { %5898 = vmatprep.mubr.bf16.mxu1 %v7667_v61  ;;  %v10444_v61 = vpop.permute.xlu1 %4410 }
 0x5d8   : > { %5899 = vmatmul.mubr.bf16.gmra.mrb[84].mxu1 %v7669_v56 }
 0x5d9   : > { %5908 = vmatprep.mubr.bf16.mxu1 %v7670_v42 }
 0x5e0   : > { %5909 = vmatmul.mubr.bf16.gmra.mrb[88].mxu1 %v7672_v43 }
 0x5e1   : > { %5918 = vmatprep.mubr.bf16.mxu1 %v7673_v22 }
 0x5e8   : > { %5919 = vmatmul.mubr.bf16.gmra.mrb[92].mxu1 %v7675_v53 }
 0x5e9   : > { %5928 = vmatprep.mubr.bf16.mxu1 %v7676_v17 }
 0x5f0   : > { %5929 = vmatmul.mubr.bf16.gmra.mrb[96].mxu1 %v7678_v27  ;;  %v7693_v27 = vld [vmem:[%s10676_s5 + $0x3a8] ss:$16 sps:$4 sm:$0xff]  }
 0x5f1   : > { %5938 = vmatprep.mubr.bf16.mxu1 %v7679_v29  ;;  %v10450_v29 = vpop.permute.xlu0 %4565 }
 0x5f8   : > { %5939 = vmatmul.mubr.bf16.gmra.mrb[100].mxu1 %v7681_v60 }
 0x5f9   : > { %5948 = vmatprep.mubr.bf16.mxu1 %v7682_v1  ;;  %v7694_v1 = vld [vmem:[%s10676_s5 + $0x3cc] ss:$16 sps:$4 sm:$0xff]  }
 0x600   : > { %5949 = vmatmul.mubr.bf16.gmra.mrb[104].mxu1 %v7684_v7 }
 0x601   : > { %5958 = vmatprep.mubr.bf16.mxu1 %v7685_v28 }
 0x603   : > { %v5690_v39 = vpop.f32.mrb[0].mxu1 }
 0x604   : > { %v6818_v13 = vadd.f32 %v5690_v39, %v4346_v25  ;;  %v5692_v3 = vpop.f32.mrb[1].mxu1  ;;  %v10457_v39 = vpop.permute.xlu1 %4570 }
 0x605   : > { %v6819_v21 = vadd.f32 %v5692_v3, %v4346_v25  ;;  %v5694_v47 = vpop.f32.mrb[2].mxu1 }
 0x606   : > { %v6820_v31 = vadd.f32 %v5694_v47, %v4351_v4  ;;  %v5696_v9 = vpop.f32.mrb[3].mxu1  ;;  %v6009_v44 = vmax.f32 %v6818_v13, 0.0 }
 0x607   : > { %v6821_v55 = vadd.f32 %v5696_v9, %v4351_v4  ;;  %v6010_v8 = vmax.f32 %v6819_v21, 0.0  ;;  %v10460_v9 = vpop.permute.xlu0 %4415 }
 0x608   : > { %v6011_v59 = vmax.f32 %v6820_v31, 0.0  ;;  %5959 = vmatmul.mubr.bf16.gmra.mrb[108].mxu1 %v7687_v40 }
 0x609   : > { %v6012_v45 = vmax.f32 %v6821_v55, 0.0  ;;  %5968 = vmatprep.mubr.bf16.mxu1 %v7688_v63 }
 0x60a   : > { %v6138_v62 = vpack.c.bf16 %v6011_v59, %v6009_v44 }
 0x60b   : > { %v6139_v10 = vpack.c.bf16 %v6012_v45, %v6010_v8  ;;  %v5700_v49 = vpop.f32.mrb[4].mxu1  ;;  %v10466_v45 = vpop.permute.xlu1 %4420 }
 0x60c   : > { %v6822_v46 = vadd.f32 %v5700_v49, %v10350_v18  ;;  %v5702_v30 = vpop.f32.mrb[5].mxu1  ;;  %v7697_v49 = vld [vmem:[%s10676_s5 + $0x3ec] ss:$16 sps:$4 sm:$0xff]  }
 0x60d   : > { %v6823_v36 = vadd.f32 %v5702_v30, %v10350_v18  ;;  %v5704_v51 = vpop.f32.mrb[6].mxu1  ;;  %6241 = vmatprep.subr.bf16.mxu1 %v6139_v10 }
 0x60e   : > { %v6824_v58 = vadd.f32 %v5704_v51, %v10355_v26  ;;  %v5706_v2 = vpop.f32.mrb[7].mxu1  ;;  %6242 = vmatpush1.bf16.msra.mxu1 %v6138_v62  ;;  %v6013_v4 = vmax.f32 %v6822_v46, 0.0 }
 0x60f   : > { %v6825_v25 = vadd.f32 %v5706_v2, %v10355_v26  ;;  %v6014_v18 = vmax.f32 %v6823_v36, 0.0  ;;  %v10476_v36 = vld.sshfl [vmem:[%s10678_s7] sm:$0x33 pattern:$0x75316420] }
 0x610   : > { %v6015_v33 = vmax.f32 %v6824_v58, 0.0  ;;  %5969 = vmatmul.mubr.bf16.gmra.mrb[112].mxu1 %v7690_v24  ;;  %v10479_v58 = vpop.permute.xlu0 %4575 }
 0x611   : > { %v6016_v56 = vmax.f32 %v6825_v25, 0.0  ;;  %5978 = vmatprep.mubr.bf16.mxu1 %v7691_v37 }
 0x612   : > { %v6140_v42 = vpack.c.bf16 %v6015_v33, %v6013_v4  ;;  %v6220_v4 = vcombine.high %v10476_v36, %v10476_v36  ;;  %v10703_v33 = vld [vmem:[#allocation6_spill] sm:$0xff] }
 0x613   : > { %v6141_v43 = vpack.c.bf16 %v6016_v56, %v6014_v18  ;;  %v5710_v22 = vpop.f32.mrb[8].mxu1 }
 0x614   : > { %v6826_v53 = vadd.f32 %v5710_v22, %v10370_v48  ;;  %v5712_v17 = vpop.f32.mrb[9].mxu1 }
 0x615   : > { %v6827_v26 = vadd.f32 %v5712_v17, %v10370_v48  ;;  %v5714_v60 = vpop.f32.mrb[10].mxu1  ;;  %6243 = vmatprep.subr.bf16.mxu1 %v6141_v43  ;;  %v7782_v48 = vmov 1966171168   ;;  %v7699_v17 = vld [vmem:[%s10676_s5 + $0x3e8] ss:$16 sps:$4 sm:$0xff]  }
 0x616   : > { %v6828_v7 = vadd.f32 %v5714_v60, %v10372_v54  ;;  %v5716_v28 = vpop.f32.mrb[11].mxu1  ;;  %6244 = vmatpush1.bf16.msra.mxu1 %v6140_v42  ;;  %v6017_v3 = vmax.f32 %v6826_v53, 0.0  ;;  %v6222_v63 = vunpack.c.l.s4 %v7782_v48  ;;  %v10486_v42 = vpop.permute.xlu1 %4580 }
 0x617   : > { %v6829_v13 = vadd.f32 %v5716_v28, %v10372_v54  ;;  %v6018_v21 = vmax.f32 %v6827_v26, 0.0  ;;  %v7696_v54 = vld [vmem:[%s10676_s5 + $0x3c8] ss:$16 sps:$4 sm:$0xff]   ;;  %v10497_v28 = vpop.permute.xlu0 %4425 }
 0x618   : > { %v6019_v40 = vmax.f32 %v6828_v7, 0.0  ;;  %5979 = vmatmul.mubr.bf16.gmra.mrb[116].mxu1 %v7693_v27  ;;  %v6223_v46 = vunpack.c.0.s8 %v6222_v63 }
 0x619   : > { %v6020_v47 = vmax.f32 %v6829_v13, 0.0  ;;  %5988 = vmatprep.mubr.bf16.mxu1 %v7694_v1 }
 0x61a   : > { %v6142_v31 = vpack.c.bf16 %v6019_v40, %v6017_v3  ;;  %v10484_v18 = vsub.s32 %v6223_v46, %v10703_v33 }
 0x61b   : > { %v6143_v55 = vpack.c.bf16 %v6020_v47, %v6018_v21  ;;  %v5720_v44 = vpop.f32.mrb[12].mxu1  ;;  %v10500_v21 = vpop.permute.xlu1 %4430 }
 0x61c   : > { %v6830_v59 = vadd.f32 %v5720_v44, %v10384_v57  ;;  %v5722_v8 = vpop.f32.mrb[13].mxu1  ;;  %v10494_v60 = vrot.slane %v6220_v4, %v10484_v18 }
 0x61d   : > { %v6831_v62 = vadd.f32 %v5722_v8, %v10384_v57  ;;  %v5724_v10 = vpop.f32.mrb[14].mxu1  ;;  %6245 = vmatprep.subr.bf16.mxu1 %v6143_v55 }
 0x61e   : > { %v6832_v30 = vadd.f32 %v5724_v10, %v10389_v34  ;;  %v5726_v24 = vpop.f32.mrb[15].mxu1  ;;  %6246 = vmatpush1.bf16.msra.mxu1 %v6142_v31  ;;  %v6021_v37 = vmax.f32 %v6830_v59, 0.0  ;;  %v10504_v59 = vpop.permute.xlu0 %4585 }
 0x61f   : > { %v6833_v51 = vadd.f32 %v5726_v24, %v10389_v34  ;;  %v6022_v2 = vmax.f32 %v6831_v62, 0.0  ;;  %v10508_v10 = vpop.permute.xlu1 %4590 }
 0x620   : > { %v6023_v57 = vmax.f32 %v6832_v30, 0.0  ;;  %5989 = vmatmul.mubr.bf16.gmra.mrb[120].mxu1 %v7696_v54 }
 0x621   : > { %v6024_v25 = vmax.f32 %v6833_v51, 0.0  ;;  %5998 = vmatprep.mubr.bf16.mxu1 %v7697_v49 }
 0x622   : > { %v6144_v56 = vpack.c.bf16 %v6023_v57, %v6021_v37  ;;  %v4436_v57 = vpop.permute.xlu0 %4435 }
 0x623   : > { %v6145_v43 = vpack.c.bf16 %v6024_v25, %v6022_v2  ;;  %v5730_v22 = vpop.f32.mrb[16].mxu1  ;;  %v10512_v33 = vpop.permute.xlu1 %4440 }
 0x624   : > { %v6834_v34 = vadd.f32 %v5730_v22, %v10404_v11  ;;  %v5732_v53 = vpop.f32.mrb[17].mxu1 }
 0x625   : > { %v6835_v27 = vadd.f32 %v5732_v53, %v10404_v11  ;;  %v5734_v26 = vpop.f32.mrb[18].mxu1  ;;  %6247 = vmatprep.subr.bf16.mxu1 %v6145_v43 }
 0x626   : > { %v6836_v1 = vadd.f32 %v5734_v26, %v10406_v15  ;;  %v5736_v7 = vpop.f32.mrb[19].mxu1  ;;  %6248 = vmatpush1.bf16.msra.mxu1 %v6144_v56  ;;  %v6025_v3 = vmax.f32 %v6834_v34, 0.0 }
 0x627   : > { %v6837_v13 = vadd.f32 %v5736_v7, %v10406_v15  ;;  %v6026_v47 = vmax.f32 %v6835_v27, 0.0  ;;  %v10517_v27 = vpop.permute.xlu0 %4595 }
 0x628   : > { %v6027_v40 = vmax.f32 %v6836_v1, 0.0  ;;  %5999 = vmatmul.mubr.bf16.gmra.mrb[124].mxu1 %v7699_v17 }
 0x629   : > { %v6028_v11 = vmax.f32 %v6837_v13, 0.0  ;;  %6273 = vmatprep.mubr.bf16.mxu1 %v10494_v60  ;;  %v10519_v13 = vpop.permute.xlu1 %4600 }
 0x62a   : > { %v6146_v48 = vpack.c.bf16 %v6027_v40, %v6025_v3 }
 0x62b   : > { %v6147_v63 = vpack.c.bf16 %v6028_v11, %v6026_v47  ;;  %v5740_v31 = vpop.f32.mrb[20].mxu1 }
 0x62c   : > { %v6838_v55 = vadd.f32 %v5740_v31, %v10418_v23  ;;  %v5742_v44 = vpop.f32.mrb[21].mxu1  ;;  %v4446_v31 = vpop.permute.xlu0 %4445 }
 0x62d   : > { %v6839_v8 = vadd.f32 %v5742_v44, %v10418_v23  ;;  %v5744_v15 = vpop.f32.mrb[22].mxu1  ;;  %6249 = vmatprep.subr.bf16.mxu1 %v6147_v63 }
 0x62e   : > { %v6840_v54 = vadd.f32 %v5744_v15, %v10423_v0  ;;  %v5746_v62 = vpop.f32.mrb[23].mxu1  ;;  %6250 = vmatpush1.bf16.msra.mxu1 %v6146_v48  ;;  %v6029_v46 = vmax.f32 %v6838_v55, 0.0  ;;  %v4451_v15 = vpop.permute.xlu1 %4450 }
 0x62f   : > { %v6841_v49 = vadd.f32 %v5746_v62, %v10423_v0  ;;  %v6030_v24 = vmax.f32 %v6839_v8, 0.0 }
 0x630   : > { %v6031_v30 = vmax.f32 %v6840_v54, 0.0 }
 0x631   : > { %v6032_v51 = vmax.f32 %v6841_v49, 0.0 }
 0x632   : > { %v6148_v37 = vpack.c.bf16 %v6031_v30, %v6029_v46 }
 0x633   : > { %v6149_v2 = vpack.c.bf16 %v6032_v51, %v6030_v24  ;;  %v5750_v25 = vpop.f32.mrb[24].mxu1  ;;  %v10526_v51 = vpop.permute.xlu0 %4605 }
 0x634   : > { %v6842_v23 = vadd.f32 %v5750_v25, %v10441_v12  ;;  %v5752_v4 = vpop.f32.mrb[25].mxu1 }
 0x635   : > { %v6843_v56 = vadd.f32 %v5752_v4, %v10441_v12  ;;  %v5754_v43 = vpop.f32.mrb[26].mxu1  ;;  %6251 = vmatprep.subr.bf16.mxu1 %v6149_v2 }
 0x636   : > { %v6844_v22 = vadd.f32 %v5754_v43, %v10444_v61  ;;  %v5756_v0 = vpop.f32.mrb[27].mxu1  ;;  %6252 = vmatpush1.bf16.msra.mxu1 %v6148_v37  ;;  %v6033_v53 = vmax.f32 %v6842_v23, 0.0  ;;  %v10530_v23 = vpop.permute.xlu1 %4610 }
 0x637   : > { %v6845_v34 = vadd.f32 %v5756_v0, %v10444_v61  ;;  %v6034_v26 = vmax.f32 %v6843_v56, 0.0 }
 0x638   : > { %v6035_v17 = vmax.f32 %v6844_v22, 0.0 }
 0x639   : > { %v6036_v1 = vmax.f32 %v6845_v34, 0.0 }
 0x63a   : > { %v6150_v7 = vpack.c.bf16 %v6035_v17, %v6033_v53  ;;  %v4456_v53 = vpop.permute.xlu0 %4455 }
 0x63b   : > { %v6151_v3 = vpack.c.bf16 %v6036_v1, %v6034_v26  ;;  %v5760_v40 = vpop.f32.mrb[28].mxu1 }
 0x63c   : > { %v6846_v12 = vadd.f32 %v5760_v40, %v10460_v9  ;;  %v5762_v47 = vpop.f32.mrb[29].mxu1 }
 0x63d   : > { %v6847_v11 = vadd.f32 %v5762_v47, %v10460_v9  ;;  %v5764_v48 = vpop.f32.mrb[30].mxu1  ;;  %6253 = vmatprep.subr.bf16.mxu1 %v6151_v3 }
 0x63e   : > { %v6848_v61 = vadd.f32 %v5764_v48, %v10466_v45  ;;  %v5766_v63 = vpop.f32.mrb[31].mxu1  ;;  %6254 = vmatpush1.bf16.msra.mxu1 %v6150_v7  ;;  %v6037_v44 = vmax.f32 %v6846_v12, 0.0  ;;  %v4461_v7 = vpop.permute.xlu1 %4460 }
 0x63f   : > { %v6849_v55 = vadd.f32 %v5766_v63, %v10466_v45  ;;  %v6038_v54 = vmax.f32 %v6847_v11, 0.0 }
 0x640   : > { %v6039_v8 = vmax.f32 %v6848_v61, 0.0  ;;  %v10535_v61 = vpop.permute.xlu0 %4615 }
 0x641   : > { %v6040_v62 = vmax.f32 %v6849_v55, 0.0 }
 0x642   : > { %v6152_v49 = vpack.c.bf16 %v6039_v8, %v6037_v44  ;;  %v10537_v8 = vpop.permute.xlu1 %4620 }
 0x643   : > { %v6153_v46 = vpack.c.bf16 %v6040_v62, %v6038_v54  ;;  %v5770_v30 = vpop.f32.mrb[32].mxu1 }
 0x644   : > { %v6850_v24 = vadd.f32 %v5770_v30, %v10497_v28  ;;  %v5772_v9 = vpop.f32.mrb[33].mxu1 }
 0x645   : > { %v6851_v37 = vadd.f32 %v5772_v9, %v10497_v28  ;;  %v5774_v2 = vpop.f32.mrb[34].mxu1  ;;  %6255 = vmatprep.subr.bf16.mxu1 %v6153_v46 }
 0x646   : > { %v6852_v25 = vadd.f32 %v5774_v2, %v10500_v21  ;;  %v5776_v45 = vpop.f32.mrb[35].mxu1  ;;  %6256 = vmatpush1.bf16.msra.mxu1 %v6152_v49  ;;  %v6041_v56 = vmax.f32 %v6850_v24, 0.0 }
 0x647   : > { %v6853_v4 = vadd.f32 %v5776_v45, %v10500_v21  ;;  %v6042_v22 = vmax.f32 %v6851_v37, 0.0  ;;  %v4471_v45 = vpop.permute.xlu1 %4470 }
 0x648   : > { %v6043_v43 = vmax.f32 %v6852_v25, 0.0 }
 0x649   : > { %v6044_v0 = vmax.f32 %v6853_v4, 0.0 }
 0x64a   : > { %v6154_v34 = vpack.c.bf16 %v6043_v43, %v6041_v56 }
 0x64b   : > { %v6155_v17 = vpack.c.bf16 %v6044_v0, %v6042_v22  ;;  %v5780_v26 = vpop.f32.mrb[36].mxu1 }
 0x64c   : > { %v6854_v1 = vadd.f32 %v5780_v26, %v4436_v57  ;;  %v5782_v28 = vpop.f32.mrb[37].mxu1 }
 0x64d   : > { %v6855_v3 = vadd.f32 %v5782_v28, %v4436_v57  ;;  %v5784_v40 = vpop.f32.mrb[38].mxu1  ;;  %6257 = vmatprep.subr.bf16.mxu1 %v6155_v17 }
 0x64e   : > { %v6856_v12 = vadd.f32 %v5784_v40, %v10512_v33  ;;  %v5786_v47 = vpop.f32.mrb[39].mxu1  ;;  %6258 = vmatpush1.bf16.msra.mxu1 %v6154_v34  ;;  %v6045_v11 = vmax.f32 %v6854_v1, 0.0  ;;  %v10541_v40 = vpop.permute.xlu1 %4630 }
 0x64f   : > { %v6857_v21 = vadd.f32 %v5786_v47, %v10512_v33  ;;  %v6046_v63 = vmax.f32 %v6855_v3, 0.0  ;;  %v4466_v33 = vpop.permute.xlu0 %4465 }
 0x650   : > { %v6047_v48 = vmax.f32 %v6856_v12, 0.0 }
 0x651   : > { %v6048_v55 = vmax.f32 %v6857_v21, 0.0 }
 0x652   : > { %v6156_v44 = vpack.c.bf16 %v6047_v48, %v6045_v11 }
 0x653   : > { %v6157_v54 = vpack.c.bf16 %v6048_v55, %v6046_v63  ;;  %v5790_v62 = vpop.f32.mrb[40].mxu1  ;;  %v10539_v26 = vpop.permute.xlu0 %4625 }
 0x654   : > { %v6858_v57 = vadd.f32 %v5790_v62, %v4446_v31  ;;  %v5792_v49 = vpop.f32.mrb[41].mxu1 }
 0x655   : > { %v6859_v46 = vadd.f32 %v5792_v49, %v4446_v31  ;;  %v5794_v30 = vpop.f32.mrb[42].mxu1  ;;  %6259 = vmatprep.subr.bf16.mxu1 %v6157_v54 }
 0x656   : > { %v6860_v24 = vadd.f32 %v5794_v30, %v4451_v15  ;;  %v5796_v9 = vpop.f32.mrb[43].mxu1  ;;  %6260 = vmatpush1.bf16.msra.mxu1 %v6156_v44  ;;  %v6049_v2 = vmax.f32 %v6858_v57, 0.0  ;;  %v4481_v57 = vpop.permute.xlu1 %4480 }
 0x657   : > { %v6861_v37 = vadd.f32 %v5796_v9, %v4451_v15  ;;  %v6050_v4 = vmax.f32 %v6859_v46, 0.0  ;;  %v4476_v63 = vpop.permute.xlu0 %4475 }
 0x658   : > { %v6051_v25 = vmax.f32 %v6860_v24, 0.0 }
 0x659   : > { %v6052_v56 = vmax.f32 %v6861_v37, 0.0 }
 0x65a   : > { %v6158_v43 = vpack.c.bf16 %v6051_v25, %v6049_v2 }
 0x65b   : > { %v6159_v22 = vpack.c.bf16 %v6052_v56, %v6050_v4  ;;  %v5800_v0 = vpop.f32.mrb[44].mxu1  ;;  %v10543_v37 = vpop.permute.xlu0 %4635 }
 0x65c   : > { %v6862_v34 = vadd.f32 %v5800_v0, %v4456_v53  ;;  %v5802_v17 = vpop.f32.mrb[45].mxu1  ;;  %v10545_v56 = vpop.permute.xlu1 %4640 }
 0x65d   : > { %v6863_v31 = vadd.f32 %v5802_v17, %v4456_v53  ;;  %v5804_v1 = vpop.f32.mrb[46].mxu1  ;;  %6261 = vmatprep.subr.bf16.mxu1 %v6159_v22 }
 0x65e   : > { %v6864_v28 = vadd.f32 %v5804_v1, %v4461_v7  ;;  %v5806_v3 = vpop.f32.mrb[47].mxu1  ;;  %6262 = vmatpush1.bf16.msra.mxu1 %v6158_v43  ;;  %v6053_v12 = vmax.f32 %v6862_v34, 0.0 }
 0x65f   : > { %v6865_v15 = vadd.f32 %v5806_v3, %v4461_v7  ;;  %v6054_v21 = vmax.f32 %v6863_v31, 0.0 }
 0x660   : > { %v6055_v47 = vmax.f32 %v6864_v28, 0.0 }
 0x661   : > { %v6056_v11 = vmax.f32 %v6865_v15, 0.0 }
 0x662   : > { %v6160_v48 = vpack.c.bf16 %v6055_v47, %v6053_v12  ;;  %v4491_v12 = vpop.permute.xlu1 %4490 }
 0x663   : > { %v6161_v55 = vpack.c.bf16 %v6056_v11, %v6054_v21  ;;  %v5810_v44 = vpop.f32.mrb[48].mxu1 }
 0x664   : > { %v6866_v54 = vadd.f32 %v5810_v44, %v4466_v33  ;;  %v5812_v62 = vpop.f32.mrb[49].mxu1 }
 0x665   : > { %v6867_v53 = vadd.f32 %v5812_v62, %v4466_v33  ;;  %v5814_v49 = vpop.f32.mrb[50].mxu1  ;;  %6263 = vmatprep.subr.bf16.mxu1 %v6161_v55 }
 0x666   : > { %v6868_v46 = vadd.f32 %v5814_v49, %v4471_v45  ;;  %v5816_v30 = vpop.f32.mrb[51].mxu1  ;;  %6264 = vmatpush1.bf16.msra.mxu1 %v6160_v48  ;;  %v6057_v9 = vmax.f32 %v6866_v54, 0.0 }
 0x667   : > { %v6869_v24 = vadd.f32 %v5816_v30, %v4471_v45  ;;  %v6058_v2 = vmax.f32 %v6867_v53, 0.0  ;;  %v4486_v45 = vpop.permute.xlu0 %4485  ;;  %v10549_v30 = vpop.permute.xlu1 %4650 }
 0x668   : > { %v6059_v7 = vmax.f32 %v6868_v46, 0.0 }
 0x669   : > { %v6060_v25 = vmax.f32 %v6869_v24, 0.0 }
 0x66a   : > { %v6162_v4 = vpack.c.bf16 %v6059_v7, %v6057_v9 }
 0x66b   : > { %v6163_v43 = vpack.c.bf16 %v6060_v25, %v6058_v2  ;;  %v5820_v22 = vpop.f32.mrb[52].mxu1  ;;  %v10547_v62 = vpop.permute.xlu0 %4645 }
 0x66c   : > { %v6870_v0 = vadd.f32 %v5820_v22, %v4476_v63  ;;  %v5822_v34 = vpop.f32.mrb[53].mxu1 }
 0x66d   : > { %v6871_v33 = vadd.f32 %v5822_v34, %v4476_v63  ;;  %v5824_v17 = vpop.f32.mrb[54].mxu1  ;;  %6265 = vmatprep.subr.bf16.mxu1 %v6163_v43 }
 0x66e   : > { %v6872_v31 = vadd.f32 %v5824_v17, %v4481_v57  ;;  %v5826_v1 = vpop.f32.mrb[55].mxu1  ;;  %6266 = vmatpush1.bf16.msra.mxu1 %v6162_v4  ;;  %v6061_v3 = vmax.f32 %v6870_v0, 0.0 }
 0x66f   : > { %v6873_v28 = vadd.f32 %v5826_v1, %v4481_v57  ;;  %v6062_v47 = vmax.f32 %v6871_v33, 0.0  ;;  %v4496_v4 = vpop.permute.xlu0 %4495  ;;  %v4501_v33 = vpop.permute.xlu1 %4500 }
 0x670   : > { %v6063_v15 = vmax.f32 %v6872_v31, 0.0 }
 0x671   : > { %v6064_v21 = vmax.f32 %v6873_v28, 0.0 }
 0x672   : > { %v6164_v11 = vpack.c.bf16 %v6063_v15, %v6061_v3 }
 0x673   : > { %v6165_v48 = vpack.c.bf16 %v6064_v21, %v6062_v47  ;;  %v5830_v55 = vpop.f32.mrb[56].mxu1 }
 0x674   : > { %v6874_v44 = vadd.f32 %v5830_v55, %v4486_v45  ;;  %v5832_v54 = vpop.f32.mrb[57].mxu1 }
 0x675   : > { %v6875_v63 = vadd.f32 %v5832_v54, %v4486_v45  ;;  %v5834_v53 = vpop.f32.mrb[58].mxu1  ;;  %6267 = vmatprep.subr.bf16.mxu1 %v6165_v48 }
 0x676   : > { %v6876_v49 = vadd.f32 %v5834_v53, %v4491_v12  ;;  %v5836_v46 = vpop.f32.mrb[59].mxu1  ;;  %6268 = vmatpush1.bf16.msra.mxu1 %v6164_v11  ;;  %v6065_v24 = vmax.f32 %v6874_v44, 0.0  ;;  %v10555_v53 = vrot.slane %v10476_v36, %v10484_v18 }
 0x677   : > { %v6877_v57 = vadd.f32 %v5836_v46, %v4491_v12  ;;  %v6066_v7 = vmax.f32 %v6875_v63, 0.0 }
 0x678   : > { %v6067_v9 = vmax.f32 %v6876_v49, 0.0 }
 0x679   : > { %v6068_v2 = vmax.f32 %v6877_v57, 0.0  ;;  %v6236_v57 = vcombine.high %v10494_v60, %v10494_v60 }
 0x67a   : > { %v6166_v25 = vpack.c.bf16 %v6067_v9, %v6065_v24 }
 0x67b   : > { %v6167_v43 = vpack.c.bf16 %v6068_v2, %v6066_v7  ;;  %v5840_v22 = vpop.f32.mrb[60].mxu1  ;;  %6314 = vmatprep.mubr.bf16.mxu0 %v6236_v57 }
 0x67c   : > { %v6878_v0 = vadd.f32 %v5840_v22, %v4496_v4  ;;  %v5842_v34 = vpop.f32.mrb[61].mxu1 }
 0x67d   : > { %v6879_v17 = vadd.f32 %v5842_v34, %v4496_v4  ;;  %v5844_v31 = vpop.f32.mrb[62].mxu1  ;;  %6269 = vmatprep.subr.bf16.mxu1 %v6167_v43 }
 0x67e   : > { %v6880_v1 = vadd.f32 %v5844_v31, %v4501_v33  ;;  %v5846_v45 = vpop.f32.mrb[63].mxu1  ;;  %6270 = vmatpush1.bf16.msra.mxu1 %v6166_v25  ;;  %v6069_v3 = vmax.f32 %v6878_v0, 0.0 }
 0x67f   : > { %v6881_v28 = vadd.f32 %v5846_v45, %v4501_v33  ;;  %v6070_v12 = vmax.f32 %v6879_v17, 0.0 }
 0x680   : > { %v6071_v15 = vmax.f32 %v6880_v1, 0.0 }
 0x681   : > { %v6072_v47 = vmax.f32 %v6881_v28, 0.0 }
 0x682   : > { %v6168_v21 = vpack.c.bf16 %v6071_v15, %v6069_v3 }
 0x683   : > { %v6169_v11 = vpack.c.bf16 %v6072_v47, %v6070_v12  ;;  %v5850_v48 = vpop.f32.mrb[64].mxu1 }
 0x684   : > { %v6882_v55 = vadd.f32 %v5850_v48, %v10343_v6  ;;  %v5852_v44 = vpop.f32.mrb[65].mxu1 }
 0x685   : > { %v6883_v54 = vadd.f32 %v5852_v44, %v10343_v6  ;;  %v5854_v63 = vpop.f32.mrb[66].mxu1  ;;  %6271 = vmatprep.subr.bf16.mxu1 %v6169_v11 }
 0x686   : > { %v6884_v49 = vadd.f32 %v5854_v63, %v10348_v32  ;;  %v5856_v46 = vpop.f32.mrb[67].mxu1  ;;  %6272 = vmatpush1.bf16.msra.mxu1 %v6168_v21  ;;  %v6073_v9 = vmax.f32 %v6882_v55, 0.0 }
 0x687   : > { %v6885_v24 = vadd.f32 %v5856_v46, %v10348_v32  ;;  %v6074_v2 = vmax.f32 %v6883_v54, 0.0 }
 0x688   : > { %v6075_v7 = vmax.f32 %v6884_v49, 0.0 }
 0x689   : > { %v6076_v6 = vmax.f32 %v6885_v24, 0.0  ;;  %6274 = vmatmul.mubr.bf16.vlgmr.msra.gmra.mrb[128].mxu1 %v10555_v53 }
 0x68a   : > { %v6170_v25 = vpack.c.bf16 %v6075_v7, %v6073_v9 }
 0x68b   : > { %v6171_v4 = vpack.c.bf16 %v6076_v6, %v6074_v2  ;;  %v5860_v36 = vpop.f32.mrb[68].mxu1 }
 0x68c   : > { %v6886_v43 = vadd.f32 %v5860_v36, %v10360_v19  ;;  %v5862_v22 = vpop.f32.mrb[69].mxu1 }
 0x68d   : > { %v6887_v0 = vadd.f32 %v5862_v22, %v10360_v19  ;;  %v5864_v34 = vpop.f32.mrb[70].mxu1  ;;  %6282 = vmatprep.subr.bf16.mxu0 %v6171_v4 }
 0x68e   : > { %v6888_v60 = vadd.f32 %v5864_v34, %v10362_v5  ;;  %v5866_v32 = vpop.f32.mrb[71].mxu1  ;;  %6283 = vmatpush1.bf16.msra.mxu0 %v6170_v25  ;;  %v6077_v17 = vmax.f32 %v6886_v43, 0.0 }
 0x68f   : > { %v6889_v33 = vadd.f32 %v5866_v32, %v10362_v5  ;;  %v6078_v1 = vmax.f32 %v6887_v0, 0.0 }
 0x690   : > { %v6079_v31 = vmax.f32 %v6888_v60, 0.0 }
 0x691   : > { %v6080_v45 = vmax.f32 %v6889_v33, 0.0 }
 0x692   : > { %v6172_v28 = vpack.c.bf16 %v6079_v31, %v6077_v17 }
 0x693   : > { %v6173_v3 = vpack.c.bf16 %v6080_v45, %v6078_v1  ;;  %v5870_v15 = vpop.f32.mrb[72].mxu1 }
 0x694   : > { %v6890_v12 = vadd.f32 %v5870_v15, %v10377_v14  ;;  %v5872_v47 = vpop.f32.mrb[73].mxu1 }
 0x695   : > { %v6891_v19 = vadd.f32 %v5872_v47, %v10377_v14  ;;  %v5874_v21 = vpop.f32.mrb[74].mxu1  ;;  %6284 = vmatprep.subr.bf16.mxu0 %v6173_v3 }
 0x696   : > { %v6892_v11 = vadd.f32 %v5874_v21, %v10382_v52  ;;  %v5876_v48 = vpop.f32.mrb[75].mxu1  ;;  %6285 = vmatpush1.bf16.msra.mxu0 %v6172_v28  ;;  %v6081_v55 = vmax.f32 %v6890_v12, 0.0 }
 0x697   : > { %v6893_v5 = vadd.f32 %v5876_v48, %v10382_v52  ;;  %v6082_v54 = vmax.f32 %v6891_v19, 0.0 }
 0x698   : > { %v6083_v44 = vmax.f32 %v6892_v11, 0.0 }
 0x699   : > { %v6084_v63 = vmax.f32 %v6893_v5, 0.0 }
 0x69a   : > { %v6174_v49 = vpack.c.bf16 %v6083_v44, %v6081_v55 }
 0x69b   : > { %v6175_v46 = vpack.c.bf16 %v6084_v63, %v6082_v54  ;;  %v5880_v57 = vpop.f32.mrb[76].mxu1 }
 0x69c   : > { %v6894_v24 = vadd.f32 %v5880_v57, %v10394_v50  ;;  %v5882_v9 = vpop.f32.mrb[77].mxu1 }
 0x69d   : > { %v6895_v14 = vadd.f32 %v5882_v9, %v10394_v50  ;;  %v5884_v7 = vpop.f32.mrb[78].mxu1  ;;  %6286 = vmatprep.subr.bf16.mxu0 %v6175_v46 }
 0x69e   : > { %v6896_v2 = vadd.f32 %v5884_v7, %v10396_v16  ;;  %v5886_v6 = vpop.f32.mrb[79].mxu1  ;;  %6287 = vmatpush1.bf16.msra.mxu0 %v6174_v49  ;;  %v6085_v25 = vmax.f32 %v6894_v24, 0.0 }
 0x69f   : > { %v6897_v52 = vadd.f32 %v5886_v6, %v10396_v16  ;;  %v6086_v36 = vmax.f32 %v6895_v14, 0.0 }
 0x6a0   : > { %v6087_v4 = vmax.f32 %v6896_v2, 0.0 }
 0x6a1   : > { %v6088_v43 = vmax.f32 %v6897_v52, 0.0 }
 0x6a2   : > { %v6176_v22 = vpack.c.bf16 %v6087_v4, %v6085_v25 }
 0x6a3   : > { %v6177_v0 = vpack.c.bf16 %v6088_v43, %v6086_v36  ;;  %v5890_v34 = vpop.f32.mrb[80].mxu1 }
 0x6a4   : > { %v6898_v60 = vadd.f32 %v5890_v34, %v10411_v20  ;;  %v5892_v32 = vpop.f32.mrb[81].mxu1 }
 0x6a5   : > { %v6899_v50 = vadd.f32 %v5892_v32, %v10411_v20  ;;  %v5894_v33 = vpop.f32.mrb[82].mxu1  ;;  %6288 = vmatprep.subr.bf16.mxu0 %v6177_v0 }
 0x6a6   : > { %v6900_v17 = vadd.f32 %v5894_v33, %v10416_v38  ;;  %v5896_v31 = vpop.f32.mrb[83].mxu1  ;;  %6289 = vmatpush1.bf16.msra.mxu0 %v6176_v22  ;;  %v6089_v1 = vmax.f32 %v6898_v60, 0.0 }
 0x6a7   : > { %v6901_v16 = vadd.f32 %v5896_v31, %v10416_v38  ;;  %v6090_v28 = vmax.f32 %v6899_v50, 0.0 }
 0x6a8   : > { %v6091_v45 = vmax.f32 %v6900_v17, 0.0 }
 0x6a9   : > { %v6092_v3 = vmax.f32 %v6901_v16, 0.0 }
 0x6aa   : > { %v6178_v15 = vpack.c.bf16 %v6091_v45, %v6089_v1 }
 0x6ab   : > { %v6179_v12 = vpack.c.bf16 %v6092_v3, %v6090_v28  ;;  %v5900_v47 = vpop.f32.mrb[84].mxu1 }
 0x6ac   : > { %v6902_v19 = vadd.f32 %v5900_v47, %v10428_v41  ;;  %v5902_v21 = vpop.f32.mrb[85].mxu1 }
 0x6ad   : > { %v6903_v20 = vadd.f32 %v5902_v21, %v10428_v41  ;;  %v5904_v11 = vpop.f32.mrb[86].mxu1  ;;  %6290 = vmatprep.subr.bf16.mxu0 %v6179_v12 }
 0x6ae   : > { %v6904_v48 = vadd.f32 %v5904_v11, %v10430_v35  ;;  %v5906_v5 = vpop.f32.mrb[87].mxu1  ;;  %6291 = vmatpush1.bf16.msra.mxu0 %v6178_v15  ;;  %v6093_v55 = vmax.f32 %v6902_v19, 0.0 }
 0x6af   : > { %v6905_v38 = vadd.f32 %v5906_v5, %v10430_v35  ;;  %v6094_v54 = vmax.f32 %v6903_v20, 0.0 }
 0x6b0   : > { %v6095_v44 = vmax.f32 %v6904_v48, 0.0 }
 0x6b1   : > { %v6096_v63 = vmax.f32 %v6905_v38, 0.0 }
 0x6b2   : > { %v6180_v49 = vpack.c.bf16 %v6095_v44, %v6093_v55 }
 0x6b3   : > { %v6181_v46 = vpack.c.bf16 %v6096_v63, %v6094_v54  ;;  %v5910_v57 = vpop.f32.mrb[88].mxu1 }
 0x6b4   : > { %v6906_v24 = vadd.f32 %v5910_v57, %v10450_v29  ;;  %v5912_v9 = vpop.f32.mrb[89].mxu1 }
 0x6b5   : > { %v6907_v41 = vadd.f32 %v5912_v9, %v10450_v29  ;;  %v5914_v14 = vpop.f32.mrb[90].mxu1  ;;  %6292 = vmatprep.subr.bf16.mxu0 %v6181_v46 }
 0x6b6   : > { %v6908_v7 = vadd.f32 %v5914_v14, %v10457_v39  ;;  %v5916_v2 = vpop.f32.mrb[91].mxu1  ;;  %6293 = vmatpush1.bf16.msra.mxu0 %v6180_v49  ;;  %v6097_v6 = vmax.f32 %v6906_v24, 0.0 }
 0x6b7   : > { %v6909_v35 = vadd.f32 %v5916_v2, %v10457_v39  ;;  %v6098_v25 = vmax.f32 %v6907_v41, 0.0 }
 0x6b8   : > { %v6099_v52 = vmax.f32 %v6908_v7, 0.0 }
 0x6b9   : > { %v6100_v4 = vmax.f32 %v6909_v35, 0.0 }
 0x6ba   : > { %v6182_v36 = vpack.c.bf16 %v6099_v52, %v6097_v6 }
 0x6bb   : > { %v6183_v43 = vpack.c.bf16 %v6100_v4, %v6098_v25  ;;  %v5920_v22 = vpop.f32.mrb[92].mxu1 }
 0x6bc   : > { %v6910_v0 = vadd.f32 %v5920_v22, %v10479_v58  ;;  %v5922_v34 = vpop.f32.mrb[93].mxu1 }
 0x6bd   : > { %v6911_v29 = vadd.f32 %v5922_v34, %v10479_v58  ;;  %v5924_v60 = vpop.f32.mrb[94].mxu1  ;;  %6294 = vmatprep.subr.bf16.mxu0 %v6183_v43 }
 0x6be   : > { %v6912_v32 = vadd.f32 %v5924_v60, %v10486_v42  ;;  %v5926_v50 = vpop.f32.mrb[95].mxu1  ;;  %6295 = vmatpush1.bf16.msra.mxu0 %v6182_v36  ;;  %v6101_v33 = vmax.f32 %v6910_v0, 0.0 }
 0x6bf   : > { %v6913_v39 = vadd.f32 %v5926_v50, %v10486_v42  ;;  %v6102_v31 = vmax.f32 %v6911_v29, 0.0 }
 0x6c0   : > { %v6103_v17 = vmax.f32 %v6912_v32, 0.0 }
 0x6c1   : > { %v6104_v16 = vmax.f32 %v6913_v39, 0.0 }
 0x6c2   : > { %v6184_v1 = vpack.c.bf16 %v6103_v17, %v6101_v33 }
 0x6c3   : > { %v6185_v45 = vpack.c.bf16 %v6104_v16, %v6102_v31  ;;  %v5930_v28 = vpop.f32.mrb[96].mxu1 }
 0x6c4   : > { %v6914_v3 = vadd.f32 %v5930_v28, %v10504_v59  ;;  %v5932_v15 = vpop.f32.mrb[97].mxu1 }
 0x6c5   : > { %v6915_v58 = vadd.f32 %v5932_v15, %v10504_v59  ;;  %v5934_v12 = vpop.f32.mrb[98].mxu1  ;;  %6296 = vmatprep.subr.bf16.mxu0 %v6185_v45 }
 0x6c6   : > { %v6916_v47 = vadd.f32 %v5934_v12, %v10508_v10  ;;  %v5936_v19 = vpop.f32.mrb[99].mxu1  ;;  %6297 = vmatpush1.bf16.msra.mxu0 %v6184_v1  ;;  %v6105_v21 = vmax.f32 %v6914_v3, 0.0 }
 0x6c7   : > { %v6917_v42 = vadd.f32 %v5936_v19, %v10508_v10  ;;  %v6106_v11 = vmax.f32 %v6915_v58, 0.0 }
 0x6c8   : > { %v6107_v20 = vmax.f32 %v6916_v47, 0.0 }
 0x6c9   : > { %v6108_v48 = vmax.f32 %v6917_v42, 0.0 }
 0x6ca   : > { %v6186_v5 = vpack.c.bf16 %v6107_v20, %v6105_v21 }
 0x6cb   : > { %v6187_v38 = vpack.c.bf16 %v6108_v48, %v6106_v11  ;;  %v5940_v55 = vpop.f32.mrb[100].mxu1 }
 0x6cc   : > { %v6918_v44 = vadd.f32 %v5940_v55, %v10517_v27  ;;  %v5942_v54 = vpop.f32.mrb[101].mxu1 }
 0x6cd   : > { %v6919_v59 = vadd.f32 %v5942_v54, %v10517_v27  ;;  %v5944_v63 = vpop.f32.mrb[102].mxu1  ;;  %6298 = vmatprep.subr.bf16.mxu0 %v6187_v38 }
 0x6ce   : > { %v6920_v49 = vadd.f32 %v5944_v63, %v10519_v13  ;;  %v5946_v46 = vpop.f32.mrb[103].mxu1  ;;  %6299 = vmatpush1.bf16.msra.mxu0 %v6186_v5  ;;  %v6109_v57 = vmax.f32 %v6918_v44, 0.0 }
 0x6cf   : > { %v6921_v10 = vadd.f32 %v5946_v46, %v10519_v13  ;;  %v6110_v9 = vmax.f32 %v6919_v59, 0.0 }
 0x6d0   : > { %v6111_v24 = vmax.f32 %v6920_v49, 0.0 }
 0x6d1   : > { %v6112_v41 = vmax.f32 %v6921_v10, 0.0 }
 0x6d2   : > { %v6188_v14 = vpack.c.bf16 %v6111_v24, %v6109_v57 }
 0x6d3   : > { %v6189_v7 = vpack.c.bf16 %v6112_v41, %v6110_v9  ;;  %v5950_v2 = vpop.f32.mrb[104].mxu1 }
 0x6d4   : > { %v6922_v35 = vadd.f32 %v5950_v2, %v10526_v51  ;;  %v5952_v6 = vpop.f32.mrb[105].mxu1 }
 0x6d5   : > { %v6923_v27 = vadd.f32 %v5952_v6, %v10526_v51  ;;  %v5954_v52 = vpop.f32.mrb[106].mxu1  ;;  %6300 = vmatprep.subr.bf16.mxu0 %v6189_v7 }
 0x6d6   : > { %v6924_v25 = vadd.f32 %v5954_v52, %v10530_v23  ;;  %v5956_v4 = vpop.f32.mrb[107].mxu1  ;;  %6301 = vmatpush1.bf16.msra.mxu0 %v6188_v14  ;;  %v6113_v36 = vmax.f32 %v6922_v35, 0.0 }
 0x6d7   : > { %v6925_v13 = vadd.f32 %v5956_v4, %v10530_v23  ;;  %v6114_v22 = vmax.f32 %v6923_v27, 0.0 }
 0x6d8   : > { %v6115_v43 = vmax.f32 %v6924_v25, 0.0 }
 0x6d9   : > { %v6116_v0 = vmax.f32 %v6925_v13, 0.0 }
 0x6da   : > { %v6190_v34 = vpack.c.bf16 %v6115_v43, %v6113_v36  ;;  %v4656_v43 = vpop.permute.xlu0 %4655 }
 0x6db   : > { %v6191_v29 = vpack.c.bf16 %v6116_v0, %v6114_v22  ;;  %v5960_v60 = vpop.f32.mrb[108].mxu1 }
 0x6dc   : > { %v6926_v32 = vadd.f32 %v5960_v60, %v10535_v61  ;;  %v5962_v50 = vpop.f32.mrb[109].mxu1  ;;  %v4661_v60 = vpop.permute.xlu1 %4660 }
 0x6dd   : > { %v6927_v51 = vadd.f32 %v5962_v50, %v10535_v61  ;;  %v5964_v39 = vpop.f32.mrb[110].mxu1  ;;  %6302 = vmatprep.subr.bf16.mxu0 %v6191_v29 }
 0x6de   : > { %v6928_v33 = vadd.f32 %v5964_v39, %v10537_v8  ;;  %v5966_v17 = vpop.f32.mrb[111].mxu1  ;;  %6303 = vmatpush1.bf16.msra.mxu0 %v6190_v34  ;;  %v6117_v31 = vmax.f32 %v6926_v32, 0.0 }
 0x6df   : > { %v6929_v23 = vadd.f32 %v5966_v17, %v10537_v8  ;;  %v6118_v1 = vmax.f32 %v6927_v51, 0.0 }
 0x6e0   : > { %v6119_v16 = vmax.f32 %v6928_v33, 0.0 }
 0x6e1   : > { %v6120_v45 = vmax.f32 %v6929_v23, 0.0 }
 0x6e2   : > { %v6192_v28 = vpack.c.bf16 %v6119_v16, %v6117_v31 }
 0x6e3   : > { %v6193_v3 = vpack.c.bf16 %v6120_v45, %v6118_v1  ;;  %v5970_v15 = vpop.f32.mrb[112].mxu1  ;;  %v6235_v1 = vcombine.high %v10555_v53, %v10555_v53 }
 0x6e4   : > { %v6930_v58 = vadd.f32 %v5970_v15, %v10539_v26  ;;  %v5972_v12 = vpop.f32.mrb[113].mxu1 }
 0x6e5   : > { %v6931_v61 = vadd.f32 %v5972_v12, %v10539_v26  ;;  %v5974_v47 = vpop.f32.mrb[114].mxu1  ;;  %6304 = vmatprep.subr.bf16.mxu0 %v6193_v3  ;;  %v10704_v12 = vld [vmem:[#allocation8_spill] sm:$0xff] }
 0x6e6   : > { %v6932_v19 = vadd.f32 %v5974_v47, %v10541_v40  ;;  %v5976_v42 = vpop.f32.mrb[115].mxu1  ;;  %6305 = vmatpush1.bf16.msra.mxu0 %v6192_v28  ;;  %v6121_v21 = vmax.f32 %v6930_v58, 0.0  ;;  %v6206_v58 = vpop.permute.xlu0 %6205 }
 0x6e7   : > { %v6933_v8 = vadd.f32 %v5976_v42, %v10541_v40  ;;  %v6122_v11 = vmax.f32 %v6931_v61, 0.0  ;;  %v6211_v61 = vrot.slane %v6206_v58, %v10704_v12 }
 0x6e8   : > { %v6123_v20 = vmax.f32 %v6932_v19, 0.0 }
 0x6e9   : > { %v6124_v48 = vmax.f32 %v6933_v8, 0.0 }
 0x6ea   : > { %v6194_v5 = vpack.c.bf16 %v6123_v20, %v6121_v21 }
 0x6eb   : > { %v6195_v38 = vpack.c.bf16 %v6124_v48, %v6122_v11  ;;  %v5980_v55 = vpop.f32.mrb[116].mxu1 }
 0x6ec   : > { %v6934_v44 = vadd.f32 %v5980_v55, %v10543_v37  ;;  %v5982_v54 = vpop.f32.mrb[117].mxu1 }
 0x6ed   : > { %v6935_v26 = vadd.f32 %v5982_v54, %v10543_v37  ;;  %v5984_v59 = vpop.f32.mrb[118].mxu1  ;;  %6306 = vmatprep.subr.bf16.mxu0 %v6195_v38  ;;  %v10705_v38 = vlaneseq }
 0x6ee   : > { %v6936_v63 = vadd.f32 %v5984_v59, %v10545_v56  ;;  %v5986_v49 = vpop.f32.mrb[119].mxu1  ;;  %6307 = vmatpush1.bf16.msra.mxu0 %v6194_v5  ;;  %v6125_v46 = vmax.f32 %v6934_v44, 0.0 }
 0x6ef   : > { %v6937_v40 = vadd.f32 %v5986_v49, %v10545_v56  ;;  %v6126_v57 = vmax.f32 %v6935_v26, 0.0  ;;  %vm6343_vm0 = vcmp.lt.s32.totalorder %v10705_v38, 256 }
 0x6f0   : > { %v6127_v10 = vmax.f32 %v6936_v63, 0.0 }
 0x6f1   : > { %v6128_v24 = vmax.f32 %v6937_v40, 0.0 }
 0x6f2   : > { %v6196_v9 = vpack.c.bf16 %v6127_v10, %v6125_v46 }
 0x6f3   : > { %v6197_v41 = vpack.c.bf16 %v6128_v24, %v6126_v57  ;;  %v5990_v14 = vpop.f32.mrb[120].mxu1 }
 0x6f4   : > { %v6938_v7 = vadd.f32 %v5990_v14, %v10547_v62  ;;  %v5992_v2 = vpop.f32.mrb[121].mxu1 }
 0x6f5   : > { %v6939_v37 = vadd.f32 %v5992_v2, %v10547_v62  ;;  %v5994_v35 = vpop.f32.mrb[122].mxu1  ;;  %6308 = vmatprep.subr.bf16.mxu0 %v6197_v41 }
 0x6f6   : > { %v6940_v6 = vadd.f32 %v5994_v35, %v10549_v30  ;;  %v5996_v27 = vpop.f32.mrb[123].mxu1  ;;  %6309 = vmatpush1.bf16.msra.mxu0 %v6196_v9  ;;  %v6129_v52 = vmax.f32 %v6938_v7, 0.0 }
 0x6f7   : > { %v6941_v56 = vadd.f32 %v5996_v27, %v10549_v30  ;;  %v6130_v4 = vmax.f32 %v6939_v37, 0.0 }
 0x6f8   : > { %v6131_v25 = vmax.f32 %v6940_v6, 0.0 }
 0x6f9   : > { %v6132_v13 = vmax.f32 %v6941_v56, 0.0 }
 0x6fa   : > { %v6198_v36 = vpack.c.bf16 %v6131_v25, %v6129_v52 }
 0x6fb   : > { %v6199_v22 = vpack.c.bf16 %v6132_v13, %v6130_v4  ;;  %v6000_v0 = vpop.f32.mrb[124].mxu1 }
 0x6fc   : > { %v6942_v34 = vadd.f32 %v6000_v0, %v4656_v43  ;;  %v6002_v29 = vpop.f32.mrb[125].mxu1 }
 0x6fd   : > { %v6943_v62 = vadd.f32 %v6002_v29, %v4656_v43  ;;  %v6004_v32 = vpop.f32.mrb[126].mxu1  ;;  %6310 = vmatprep.subr.bf16.mxu0 %v6199_v22 }
 0x6fe   : > { %v6944_v50 = vadd.f32 %v6004_v32, %v4661_v60  ;;  %v6006_v51 = vpop.f32.mrb[127].mxu1  ;;  %6311 = vmatpush1.bf16.msra.mxu0 %v6198_v36  ;;  %v6133_v30 = vmax.f32 %v6942_v34, 0.0 }
 0x6ff   : > { %v6945_v39 = vadd.f32 %v6006_v51, %v4661_v60  ;;  %v6134_v17 = vmax.f32 %v6943_v62, 0.0 }
 0x700   : > { %v6135_v33 = vmax.f32 %v6944_v50, 0.0 }
 0x701   : > { %v6136_v23 = vmax.f32 %v6945_v39, 0.0 }
 0x702   : > { %v6200_v31 = vpack.c.bf16 %v6135_v33, %v6133_v30 }
 0x703   : > { %v6201_v16 = vpack.c.bf16 %v6136_v23, %v6134_v17 }
 0x705   : > { %6312 = vmatprep.subr.bf16.mxu0 %v6201_v16 }
 0x706   : > { %6313 = vmatpush1.bf16.msra.mxu0 %v6200_v31 }
 0x709   : > { %6315 = vmatmul.mubr.bf16.vlgmr.msra.gmra.mrb[128].mxu0 %v6235_v1 }
 0x75c   : > { %v6275_v45 = vpop.f32.mrb[128].mxu1 }
 0x75d   : > { %v6277_v28 = vpop.f32.mrb[129].mxu1  ;;  %v6276_v47 = vadd.f32 %v6275_v45, %v6211_v61 }
 0x75e   : > { %v6279_v3 = vpop.f32.mrb[130].mxu1  ;;  %v6278_v19 = vadd.f32 %v6277_v28, %v6211_v61 }
 0x75f   : > { %v6280_v15 = vpop.f32.mrb[131].mxu1 }
 0x7dc   : > { %v6316_v42 = vpop.f32.mrb[128].mxu0 }
 0x7dd   : > { %v6317_v8 = vadd.f32 %v6316_v42, %v6276_v47  ;;  %v6318_v21 = vpop.f32.mrb[129].mxu0 }
 0x7de   : > { %v6319_v20 = vadd.f32 %v6318_v21, %v6278_v19  ;;  %v6320_v53 = vpop.f32.mrb[130].mxu0 }
 0x7df   : > { %v6321_v11 = vpop.f32.mrb[131].mxu0 }
 0x7e0   : > { %v6325_v48 = vcombine.low %v6317_v8, %v6319_v20 }
 0x7e2   : > { %v6332_v5 = vrot.slane %v6325_v48, %v10484_v18 }
 0x7e4   : > { %v6339_v55 = vrot.slane %v6332_v5, %v10484_v18 }
 0x7e6   : > { %6345 = vst.msk [vmem:[%s328_s23] sm:$0x3] %vm6343_vm0, %v6339_v55 }
 0x7e7   : > { %7729 = shalt.err (!%p7726_p3)
}
 0x7e8   : > { %s7730_s10 = scalar_lea.hbm %s10629_s26, 32  ;;  %s7734_s22 = scalar_lea.hbm %s10680_s9, 64 }
 0x7e9   : > { %p7731_p4 = scmp.ne.s32.totalorder %s10629_s26, %s7730_s10  ;;  %p7735_p9 = scmp.lt.u32.totalorder %s10629_s26, %s10680_s9 }
 0x7ea   : > { %p7736_p10 = scmp.lt.u32.totalorder %s7734_s22, %s7730_s10  ;;  %p7738_p12 = scmp.lt.u32.totalorder %s7730_s10, %s10629_s26 }
 0x7eb   : > { %p7732_p7 = pnand %p7731_p4, %p7875_p5 }
 0x7ec   : > { %p7737_p11 = por %p7736_p10, %p7735_p9 }
 0x7ed   : > { %p7733_p8 = pneg %p7732_p7 }
 0x7ee   : > { %p7739_p13 = por %p7738_p12, %p7737_p11 }
 0x7f0   : > { %p7740_p0 = pnand %p7739_p13, %p7733_p8 }
 0x7f2   : > { %7743 = shalt.err (!%p7740_p0)
}
 0x7f3   : > { %7206 = dma.vmem_to_hbm [thread:$0]  (%p7875_p5), %s10631_s18, 32, %s10629_s26, %s6347_s8  }
 0x7f4 PF: > { %p7212_p1 = scmp.ge.s32.totalorder %s7778_s14, 2  ;;  %s6373_s25 = sand.u32 1, %s7766_s11  }
 0x7f5   : > { %s6374_s27 = scalar_lea.sflag [#allocation4], %s6373_s25 }
 0x7f6   : > { %p7209_p2 = pnand %p7212_p1, %p7879_p6 }
 0x7f8   : > { %7761 = dma.done.wait (!%p7209_p2), %s6374_s27, 32  }
 0x7f9   : > { %7763 = vsyncadd (!%p7209_p2), %s6374_s27, 4294967264  ;;  %p21_p3 = scmp.ge.s32.totalorder %s7862_s16, 4   ;;  %s10706_s11 = smov %s7770_s12 }
 0x7fa   : > { %s10707_s12 = smov %s7774_s13  ;;  %s10708_s13 = smov %s7873_s19 }
 0x7fb   : > { %s10709_s14 = smov %s7862_s16  ;;  %23 = sbr.rel (!%p21_p3) target bundleno = 6 (0x6), region = 91 }
 0x802   :  { %6379 = vsyncpa [#allocation4], 1 }
 0x803   :  { %6381 = vsyncpa [#allocation4 + $0x1], 1 }

</bundles_post_ra>
